<compile_context>
chip_gen: v7x
topology: tpu7x:2x2x1
jax: 0.10.0
libtpu: 0.0.40
codegen_flags: <defaults>
</compile_context>

<pallas_src>
import functools

import jax
import jax.numpy as jnp
from jax.experimental import pallas as pl
from jax.experimental.pallas import tpu as pltpu


_BN_EPS = 1e-5


# ----------------------------------------------------------------------------
# In-kernel helpers (traced inside the fused kernel body)
# ----------------------------------------------------------------------------
def _tap(src_ref, dy, dx, ho, wo, stride):
    """Load one 3x3 tap window from a zero-padded NHWC scratch ref."""
    if stride == 1:
        return src_ref[:, dy:dy + ho, dx:dx + wo, :]
    return src_ref[:, pl.ds(dy, ho, stride), pl.ds(dx, wo, stride), :]


def _conv3x3(src_ref, hi, wi, cin, cout, w_ref, b_ref, *, batch, stride=1,
             relu=True):
    """3x3 conv (pad=1, stride s) + folded-BN bias + optional ReLU.

    src_ref holds the zero-padded (batch, hi+2, wi+2, cin) activation in VMEM.
    w_ref is the bf16 im2col weight (9*cin, cout) with the BN scale folded in.
    One im2col concat + ONE bf16 MXU matmul per layer.
    """
    ho, wo = hi // stride, wi // stride
    n = batch * ho * wo
    taps = [_tap(src_ref, t // 3, t % 3, ho, wo, stride) for t in range(9)]
    patches = jnp.concatenate(taps, axis=-1)                 # (B, ho, wo, 9*cin)
    patches = patches.reshape(n, 9 * cin).astype(jnp.bfloat16)
    acc = jnp.dot(patches, w_ref[...], preferred_element_type=jnp.float32)
    y = acc + b_ref[...]
    if relu:
        y = jnp.maximum(y, 0.0)
    return y.reshape(batch, ho, wo, cout)


def _fused_kernel(*refs, batch):
    (pat_ref,
     w1, b1, w2, b2, w23, b23, w3, b3, w34, b34, w4, b4,
     w45, b45, w5, b5, w6s, b6s, wdw, bdw,
     wh, bh,
     wf1, bf1, wf2, bf2, wf3, bf3,
     cls_ref, ft_ref,
     s8, s4a, s4b, s4c, s2, sft1, sft2) = refs
    B = batch

    # Zero ONLY the 1-pixel halos, ONLY on the first grid step.  Interiors are
    # fully rewritten every step, so halos stay zero across grid iterations.
    @pl.when(pl.program_id(0) == 0)
    def _zero_halos():
        for s in (s8, s4a, s4b, s4c, s2, sft1, sft2):
            _, hp, wp, c = s.shape
            z_row = jnp.zeros((B, 1, wp, c), jnp.float32)
            z_col = jnp.zeros((B, hp, 1, c), jnp.float32)
            s[:, 0:1, :, :] = z_row
            s[:, hp - 1:hp, :, :] = z_row
            s[:, :, 0:1, :] = z_col
            s[:, :, wp - 1:wp, :] = z_col

    conv = functools.partial(_conv3x3, batch=B)

    # ---- synthetic MiniFASNetV2 backbone ------------------------------------
    # conv1 (3->16, stride 2): im2col patches built wrapper-side -> single dot.
    p1 = pat_ref[...].reshape(B * 64, 27).astype(jnp.bfloat16)
    y = jnp.dot(p1, w1[...], preferred_element_type=jnp.float32) + b1[...]
    y = jnp.maximum(y, 0.0).reshape(B, 8, 8, 16)
    s8[:, 1:9, 1:9, :] = y

    y = conv(s8, 8, 8, 16, 16, w2, b2)                       # (B, 8, 8, 16)
    s8[:, 1:9, 1:9, :] = y
    y = conv(s8, 8, 8, 16, 32, w23, b23, stride=2)           # (B, 4, 4, 32)
    s4a[:, 1:5, 1:5, :] = y
    y = conv(s4a, 4, 4, 32, 32, w3, b3)                      # (B, 4, 4, 32)
    s4a[:, 1:5, 1:5, :] = y
    y = conv(s4a, 4, 4, 32, 64, w34, b34)                    # (B, 4, 4, 64)
    s4b[:, 1:5, 1:5, :] = y
    y = conv(s4b, 4, 4, 64, 128, w4, b4)                     # (B, 4, 4, 128) = x
    s4c[:, 1:5, 1:5, :] = y

    # ---- classification branch ----------------------------------------------
    y = conv(s4c, 4, 4, 128, 128, w45, b45, stride=2)        # (B, 2, 2, 128)
    s2[:, 1:3, 1:3, :] = y
    y = conv(s2, 2, 2, 128, 128, w5, b5)                     # (B, 2, 2, 128)
    s2[:, 1:3, 1:3, :] = y
    y = conv(s2, 2, 2, 128, 128, w6s, b6s)                   # (B, 2, 2, 128)
    # conv_6_dw: full-spatial (2x2) depthwise conv + BN (no ReLU); BN scale is
    # folded into the (4, 128) depthwise weight.  Flatten is implicit.
    ydw = jnp.sum(y.reshape(B, 4, 128) * wdw[...], axis=1) + bdw[...]  # (B,128)
    # linear -> BatchNorm1d -> dropout(id) -> prob, all pre-folded into (128,2).
    cls_ref[...] = (jnp.dot(ydw.astype(jnp.bfloat16), wh[...],
                            preferred_element_type=jnp.float32) + bh[...])

    # ---- FTGenerator branch (own scratch; reads x resident in s4c) ----------
    y = conv(s4c, 4, 4, 128, 128, wf1, bf1)                  # (B, 4, 4, 128)
    sft1[:, 1:5, 1:5, :] = y
    y = conv(sft1, 4, 4, 128, 64, wf2, bf2)                  # (B, 4, 4, 64)
    sft2[:, 1:5, 1:5, :] = y
    # ft3 (64 -> 1): an N=1 matmul wastes the MXU, so do a VPU multiply plus a
    # lane reduction over the 9*64 im2col columns instead.
    taps = [_tap(sft2, t // 3, t % 3, 4, 4, 1) for t in range(9)]
    p = jnp.concatenate(taps, axis=-1)                       # (B, 4, 4, 576)
    ft = jnp.sum(p * wf3[...], axis=-1, keepdims=True) + bf3[...]    # (B,4,4,1)
    ft_ref[...] = jnp.maximum(ft, 0.0)


# ----------------------------------------------------------------------------
# Wrapper: single pallas_call with a parallel batch grid
# ----------------------------------------------------------------------------
def _pick_batch_block(B):
    # Block must be full-B or a multiple of 8 (second-minor tiling rule on the
    # (B, 2) / (B, 64, 27) blocks).
    if B <= 8:
        return B
    if B % 8 == 0:
        return 8
    return B


def multiftnet_forward(x_nchw, params):
    x = x_nchw.astype(jnp.float32)                           # (B, 3, 16, 16)
    B = x.shape[0]

    # conv1 im2col patches built wrapper-side (layout plumbing, not compute):
    # 3x3 / stride 2 / pad 1 over a 16x16 input -> (B, 8*8, 9*3).
    xp = jnp.pad(x, ((0, 0), (0, 0), (1, 1), (1, 1)))
    taps = [xp[:, :, dy:dy + 16:2, dx:dx + 16:2]
            for dy in range(3) for dx in range(3)]           # 9 x (B, 3, 8, 8)
    pat = jnp.stack(taps, axis=1)                            # (B, 9, 3, 8, 8)
    pat = pat.transpose(0, 3, 4, 1, 2).reshape(B, 64, 27)    # rows=(oy,ox), K=(t,c)

    bB = _pick_batch_block(B)
    nsteps = B // bB

    args = [pat]
    for name in ('conv1', 'conv2_dw', 'conv_23', 'conv_3', 'conv_34', 'conv_4',
                 'conv_45', 'conv_5', 'conv_6_sep', 'conv_6_dw'):
        args += [params[name][0], params[name][1]]
    args += [params['head_w'], params['head_b']]
    for name in ('ft1', 'ft2', 'ft3'):
        args += [params[name][0], params[name][1]]

    in_specs = [pl.BlockSpec((bB, 64, 27), lambda i: (i, 0, 0))]
    for a in args[1:]:
        in_specs.append(pl.BlockSpec(a.shape, lambda i, _nd=a.ndim: (0,) * _nd))

    flops_per_elem = 2 * (64 * 27 * 16 + 64 * 144 * 16 + 16 * 144 * 32
                          + 16 * 288 * 32 + 16 * 288 * 64 + 16 * 576 * 128
                          + 3 * 4 * 1152 * 128 + 4 * 128 + 128 * 2
                          + 16 * 1152 * 128 + 16 * 1152 * 64 + 16 * 576)
    bytes_accessed = (sum(int(a.size) * a.dtype.itemsize for a in args)
                      + B * (2 + 16) * 4)

    cls, ft_nhwc = pl.pallas_call(
        functools.partial(_fused_kernel, batch=bB),
        out_shape=(jax.ShapeDtypeStruct((B, 2), jnp.float32),
                   jax.ShapeDtypeStruct((B, 4, 4, 1), jnp.float32)),
        grid=(nsteps,),
        in_specs=in_specs,
        out_specs=(pl.BlockSpec((bB, 2), lambda i: (i, 0)),
                   pl.BlockSpec((bB, 4, 4, 1), lambda i: (i, 0, 0, 0))),
        scratch_shapes=[
            pltpu.VMEM((bB, 10, 10, 16), jnp.float32),   # padded 8x8x16
            pltpu.VMEM((bB, 6, 6, 32), jnp.float32),     # padded 4x4x32
            pltpu.VMEM((bB, 6, 6, 64), jnp.float32),     # padded 4x4x64
            pltpu.VMEM((bB, 6, 6, 128), jnp.float32),    # padded 4x4x128 (= x)
            pltpu.VMEM((bB, 4, 4, 128), jnp.float32),    # padded 2x2x128
            pltpu.VMEM((bB, 6, 6, 128), jnp.float32),    # FT branch: ft1 out
            pltpu.VMEM((bB, 6, 6, 64), jnp.float32),     # FT branch: ft2 out
        ],
        compiler_params=pltpu.CompilerParams(
            dimension_semantics=("parallel",),
            vmem_limit_bytes=32 * 1024 * 1024),
        cost_estimate=pl.CostEstimate(flops=int(flops_per_elem * B),
                                      transcendentals=0,
                                      bytes_accessed=int(bytes_accessed)),
    )(*args)

    ft = ft_nhwc.reshape(B, 1, 4, 4)     # C == 1, so NHWC -> NCHW is a reshape
    return cls, ft


# ----------------------------------------------------------------------------
# Deterministic parameter initialization (mirrors _initialize_weights),
# pre-folded into kernel-ready bf16 operands.
# ----------------------------------------------------------------------------
def _bn_fold(c):
    # gamma=1, beta=0, running_mean=0, running_var=1 (fresh init), folded.
    scale = jnp.full((c,), 1.0 / (1.0 + _BN_EPS) ** 0.5, jnp.float32)
    bias = jnp.zeros((c,), jnp.float32)
    return scale, bias


def init_params(key):
    keys = iter(jax.random.split(key, 32))

    def conv_block(cin, cout):
        # kaiming_normal_(mode='fan_out') conv weight with the BN scale folded
        # in, stored as the bf16 (9*cin, cout) im2col operand.
        fan_out = 9 * cout
        w = jax.random.normal(next(keys), (3, 3, cin, cout),
                              jnp.float32) * (2.0 / fan_out) ** 0.5
        s, b = _bn_fold(cout)
        wf = (w * s).reshape(9 * cin, cout).astype(jnp.bfloat16)
        return wf, b.reshape(1, cout)

    p = {}
    # synthetic MiniFASNetV2 backbone stages
    p['conv1'] = conv_block(3, 16)        # stride 2: 16 -> 8 (wrapper im2col)
    p['conv2_dw'] = conv_block(16, 16)
    p['conv_23'] = conv_block(16, 32)     # stride 2: 8 -> 4
    p['conv_3'] = conv_block(32, 32)
    p['conv_34'] = conv_block(32, 64)
    p['conv_4'] = conv_block(64, 128)     # x fed to FTGenerator: (B,4,4,128)
    p['conv_45'] = conv_block(128, 128)   # stride 2: 4 -> 2
    p['conv_5'] = conv_block(128, 128)
    p['conv_6_sep'] = conv_block(128, 128)

    # conv_6_dw: full-spatial (2x2) depthwise conv + BN, scale folded (VPU op).
    w6 = jax.random.normal(next(keys), (2, 2, 128), jnp.float32) * (2.0 / 4.0) ** 0.5
    s6, b6 = _bn_fold(128)
    p['conv_6_dw'] = ((w6 * s6).reshape(4, 128), b6.reshape(1, 128))

    # head: linear(128->128, std=0.001, bias 0) -> BatchNorm1d -> dropout(id)
    # -> prob(128->2, bias=False), folded offline into ONE (128,2) matmul+bias.
    lw = jax.random.normal(next(keys), (128, 128), jnp.float32) * 0.001
    lb = jnp.zeros((128,), jnp.float32)
    sbn, bbn = _bn_fold(128)
    pw = jax.random.normal(next(keys), (128, 2), jnp.float32) * 0.001
    p['head_w'] = ((lw * sbn) @ pw).astype(jnp.bfloat16)
    p['head_b'] = ((lb * sbn + bbn) @ pw).reshape(1, 2)

    # FTGenerator: 128 -> 128 -> 64 -> 1 (conv3x3 + BN + ReLU each).
    p['ft1'] = conv_block(128, 128)
    p['ft2'] = conv_block(128, 64)
    w3 = jax.random.normal(next(keys), (3, 3, 64, 1), jnp.float32) * (2.0 / 9.0) ** 0.5
    s3, b3 = _bn_fold(1)
    p['ft3'] = ((w3 * s3).reshape(1, 9 * 64), b3.reshape(1, 1))
    return p


if __name__ == "__main__":
    root = jax.random.PRNGKey(0)
    k_x, k_p = jax.random.split(root)
    x = jax.random.normal(k_x, (2, 3, 16, 16), jnp.float32)   # NCHW input
    params = init_params(k_p)

    fwd = jax.jit(lambda inp: multiftnet_forward(inp, params))
    cls, ft = fwd(x)
    jax.block_until_ready(cls)
    jax.block_until_ready(ft)

    assert cls.shape == (2, 2), cls.shape
    assert ft.shape == (2, 1, 4, 4), ft.shape
    print("KERNEL_OK")
</pallas_src>

<mosaic_0001>
module attributes {stable_mosaic.version = 11 : i64} {
  func.func @_fused_kernel(%arg0: i32, %arg1: memref<2x64x27xf32, #tpu.memory_space<vmem>>, %arg2: memref<27x16xbf16, #tpu.memory_space<vmem>>, %arg3: memref<1x16xf32, #tpu.memory_space<vmem>>, %arg4: memref<144x16xbf16, #tpu.memory_space<vmem>>, %arg5: memref<1x16xf32, #tpu.memory_space<vmem>>, %arg6: memref<144x32xbf16, #tpu.memory_space<vmem>>, %arg7: memref<1x32xf32, #tpu.memory_space<vmem>>, %arg8: memref<288x32xbf16, #tpu.memory_space<vmem>>, %arg9: memref<1x32xf32, #tpu.memory_space<vmem>>, %arg10: memref<288x64xbf16, #tpu.memory_space<vmem>>, %arg11: memref<1x64xf32, #tpu.memory_space<vmem>>, %arg12: memref<576x128xbf16, #tpu.memory_space<vmem>>, %arg13: memref<1x128xf32, #tpu.memory_space<vmem>>, %arg14: memref<1152x128xbf16, #tpu.memory_space<vmem>>, %arg15: memref<1x128xf32, #tpu.memory_space<vmem>>, %arg16: memref<1152x128xbf16, #tpu.memory_space<vmem>>, %arg17: memref<1x128xf32, #tpu.memory_space<vmem>>, %arg18: memref<1152x128xbf16, #tpu.memory_space<vmem>>, %arg19: memref<1x128xf32, #tpu.memory_space<vmem>>, %arg20: memref<4x128xf32, #tpu.memory_space<vmem>>, %arg21: memref<1x128xf32, #tpu.memory_space<vmem>>, %arg22: memref<128x2xbf16, #tpu.memory_space<vmem>>, %arg23: memref<1x2xf32, #tpu.memory_space<vmem>>, %arg24: memref<1152x128xbf16, #tpu.memory_space<vmem>>, %arg25: memref<1x128xf32, #tpu.memory_space<vmem>>, %arg26: memref<1152x64xbf16, #tpu.memory_space<vmem>>, %arg27: memref<1x64xf32, #tpu.memory_space<vmem>>, %arg28: memref<1x576xf32, #tpu.memory_space<vmem>>, %arg29: memref<1x1xf32, #tpu.memory_space<vmem>>, %arg30: memref<2x2xf32, #tpu.memory_space<vmem>>, %arg31: memref<2x4x4x1xf32, #tpu.memory_space<vmem>>, %arg32: memref<2x10x10x16xf32, #tpu.memory_space<vmem>>, %arg33: memref<2x6x6x32xf32, #tpu.memory_space<vmem>>, %arg34: memref<2x6x6x64xf32, #tpu.memory_space<vmem>>, %arg35: memref<2x6x6x128xf32, #tpu.memory_space<vmem>>, %arg36: memref<2x4x4x128xf32, #tpu.memory_space<vmem>>, %arg37: memref<2x6x6x128xf32, #tpu.memory_space<vmem>>, %arg38: memref<2x6x6x64xf32, #tpu.memory_space<vmem>>) attributes {dimension_semantics = [#tpu.dimension_semantics<parallel>], iteration_bounds = array<i64: 1>, scalar_prefetch = 0 : i64, scratch_operands = 7 : i64, tpu.core_type = #tpu.core_type<tc>, window_params = [{transform_indices = @transform_0, window_bounds = array<i64: 2, 64, 27>}, {pipeline_mode = #tpu.pipeline_mode<synchronous>, transform_indices = @transform_1, window_bounds = array<i64: 27, 16>}, {pipeline_mode = #tpu.pipeline_mode<synchronous>, transform_indices = @transform_2, window_bounds = array<i64: 1, 16>}, {pipeline_mode = #tpu.pipeline_mode<synchronous>, transform_indices = @transform_3, window_bounds = array<i64: 144, 16>}, {pipeline_mode = #tpu.pipeline_mode<synchronous>, transform_indices = @transform_4, window_bounds = array<i64: 1, 16>}, {pipeline_mode = #tpu.pipeline_mode<synchronous>, transform_indices = @transform_5, window_bounds = array<i64: 144, 32>}, {pipeline_mode = #tpu.pipeline_mode<synchronous>, transform_indices = @transform_6, window_bounds = array<i64: 1, 32>}, {pipeline_mode = #tpu.pipeline_mode<synchronous>, transform_indices = @transform_7, window_bounds = array<i64: 288, 32>}, {pipeline_mode = #tpu.pipeline_mode<synchronous>, transform_indices = @transform_8, window_bounds = array<i64: 1, 32>}, {pipeline_mode = #tpu.pipeline_mode<synchronous>, transform_indices = @transform_9, window_bounds = array<i64: 288, 64>}, {pipeline_mode = #tpu.pipeline_mode<synchronous>, transform_indices = @transform_10, window_bounds = array<i64: 1, 64>}, {pipeline_mode = #tpu.pipeline_mode<synchronous>, transform_indices = @transform_11, window_bounds = array<i64: 576, 128>}, {pipeline_mode = #tpu.pipeline_mode<synchronous>, transform_indices = @transform_12, window_bounds = array<i64: 1, 128>}, {pipeline_mode = #tpu.pipeline_mode<synchronous>, transform_indices = @transform_13, window_bounds = array<i64: 1152, 128>}, {pipeline_mode = #tpu.pipeline_mode<synchronous>, transform_indices = @transform_14, window_bounds = array<i64: 1, 128>}, {pipeline_mode = #tpu.pipeline_mode<synchronous>, transform_indices = @transform_15, window_bounds = array<i64: 1152, 128>}, {pipeline_mode = #tpu.pipeline_mode<synchronous>, transform_indices = @transform_16, window_bounds = array<i64: 1, 128>}, {pipeline_mode = #tpu.pipeline_mode<synchronous>, transform_indices = @transform_17, window_bounds = array<i64: 1152, 128>}, {pipeline_mode = #tpu.pipeline_mode<synchronous>, transform_indices = @transform_18, window_bounds = array<i64: 1, 128>}, {pipeline_mode = #tpu.pipeline_mode<synchronous>, transform_indices = @transform_19, window_bounds = array<i64: 4, 128>}, {pipeline_mode = #tpu.pipeline_mode<synchronous>, transform_indices = @transform_20, window_bounds = array<i64: 1, 128>}, {pipeline_mode = #tpu.pipeline_mode<synchronous>, transform_indices = @transform_21, window_bounds = array<i64: 128, 2>}, {pipeline_mode = #tpu.pipeline_mode<synchronous>, transform_indices = @transform_22, window_bounds = array<i64: 1, 2>}, {pipeline_mode = #tpu.pipeline_mode<synchronous>, transform_indices = @transform_23, window_bounds = array<i64: 1152, 128>}, {pipeline_mode = #tpu.pipeline_mode<synchronous>, transform_indices = @transform_24, window_bounds = array<i64: 1, 128>}, {pipeline_mode = #tpu.pipeline_mode<synchronous>, transform_indices = @transform_25, window_bounds = array<i64: 1152, 64>}, {pipeline_mode = #tpu.pipeline_mode<synchronous>, transform_indices = @transform_26, window_bounds = array<i64: 1, 64>}, {pipeline_mode = #tpu.pipeline_mode<synchronous>, transform_indices = @transform_27, window_bounds = array<i64: 1, 576>}, {pipeline_mode = #tpu.pipeline_mode<synchronous>, transform_indices = @transform_28, window_bounds = array<i64: 1, 1>}, {transform_indices = @transform_29, window_bounds = array<i64: 2, 2>}, {transform_indices = @transform_30, window_bounds = array<i64: 2, 4, 4, 1>}]} {
    %c0_i32 = arith.constant 0 : i32
    %0 = arith.cmpi eq, %arg0, %c0_i32 : i32
    %1 = arith.extui %0 : i1 to i32
    %c0_i32_0 = arith.constant 0 : i32
    %2 = arith.cmpi ne, %1, %c0_i32_0 : i32
    scf.if %2 {
      %cst_524 = arith.constant 0.000000e+00 : f32
      %263 = vector.broadcast %cst_524 : f32 to vector<2x1x10x16xf32>
      %cst_525 = arith.constant 0.000000e+00 : f32
      %264 = vector.broadcast %cst_525 : f32 to vector<2x10x1x16xf32>
      %c0_526 = arith.constant 0 : index
      %c0_527 = arith.constant 0 : index
      %c0_528 = arith.constant 0 : index
      %c0_529 = arith.constant 0 : index
      %265 = vector.load %arg32[%c0_526, %c0_527, %c0_528, %c0_529] : memref<2x10x10x16xf32, #tpu.memory_space<vmem>>, vector<2x1x10x16xf32>
      tpu.vector_store %arg32[%c0_526, %c0_527, %c0_528, %c0_529], %263 {strides = array<i32>} : memref<2x10x10x16xf32, #tpu.memory_space<vmem>>, vector<2x1x10x16xf32>,
      %c0_530 = arith.constant 0 : index
      %c9 = arith.constant 9 : index
      %c0_531 = arith.constant 0 : index
      %c0_532 = arith.constant 0 : index
      %266 = vector.load %arg32[%c0_530, %c9, %c0_531, %c0_532] : memref<2x10x10x16xf32, #tpu.memory_space<vmem>>, vector<2x1x10x16xf32>
      tpu.vector_store %arg32[%c0_530, %c9, %c0_531, %c0_532], %263 {strides = array<i32>} : memref<2x10x10x16xf32, #tpu.memory_space<vmem>>, vector<2x1x10x16xf32>,
      %c0_533 = arith.constant 0 : index
      %c0_534 = arith.constant 0 : index
      %c0_535 = arith.constant 0 : index
      %c0_536 = arith.constant 0 : index
      %267 = vector.load %arg32[%c0_533, %c0_534, %c0_535, %c0_536] : memref<2x10x10x16xf32, #tpu.memory_space<vmem>>, vector<2x10x1x16xf32>
      tpu.vector_store %arg32[%c0_533, %c0_534, %c0_535, %c0_536], %264 {strides = array<i32>} : memref<2x10x10x16xf32, #tpu.memory_space<vmem>>, vector<2x10x1x16xf32>,
      %c0_537 = arith.constant 0 : index
      %c0_538 = arith.constant 0 : index
      %c9_539 = arith.constant 9 : index
      %c0_540 = arith.constant 0 : index
      %268 = vector.load %arg32[%c0_537, %c0_538, %c9_539, %c0_540] : memref<2x10x10x16xf32, #tpu.memory_space<vmem>>, vector<2x10x1x16xf32>
      tpu.vector_store %arg32[%c0_537, %c0_538, %c9_539, %c0_540], %264 {strides = array<i32>} : memref<2x10x10x16xf32, #tpu.memory_space<vmem>>, vector<2x10x1x16xf32>,
      %cst_541 = arith.constant 0.000000e+00 : f32
      %269 = vector.broadcast %cst_541 : f32 to vector<2x1x6x32xf32>
      %cst_542 = arith.constant 0.000000e+00 : f32
      %270 = vector.broadcast %cst_542 : f32 to vector<2x6x1x32xf32>
      %c0_543 = arith.constant 0 : index
      %c0_544 = arith.constant 0 : index
      %c0_545 = arith.constant 0 : index
      %c0_546 = arith.constant 0 : index
      %271 = vector.load %arg33[%c0_543, %c0_544, %c0_545, %c0_546] : memref<2x6x6x32xf32, #tpu.memory_space<vmem>>, vector<2x1x6x32xf32>
      tpu.vector_store %arg33[%c0_543, %c0_544, %c0_545, %c0_546], %269 {strides = array<i32>} : memref<2x6x6x32xf32, #tpu.memory_space<vmem>>, vector<2x1x6x32xf32>,
      %c0_547 = arith.constant 0 : index
      %c5 = arith.constant 5 : index
      %c0_548 = arith.constant 0 : index
      %c0_549 = arith.constant 0 : index
      %272 = vector.load %arg33[%c0_547, %c5, %c0_548, %c0_549] : memref<2x6x6x32xf32, #tpu.memory_space<vmem>>, vector<2x1x6x32xf32>
      tpu.vector_store %arg33[%c0_547, %c5, %c0_548, %c0_549], %269 {strides = array<i32>} : memref<2x6x6x32xf32, #tpu.memory_space<vmem>>, vector<2x1x6x32xf32>,
      %c0_550 = arith.constant 0 : index
      %c0_551 = arith.constant 0 : index
      %c0_552 = arith.constant 0 : index
      %c0_553 = arith.constant 0 : index
      %273 = vector.load %arg33[%c0_550, %c0_551, %c0_552, %c0_553] : memref<2x6x6x32xf32, #tpu.memory_space<vmem>>, vector<2x6x1x32xf32>
      tpu.vector_store %arg33[%c0_550, %c0_551, %c0_552, %c0_553], %270 {strides = array<i32>} : memref<2x6x6x32xf32, #tpu.memory_space<vmem>>, vector<2x6x1x32xf32>,
      %c0_554 = arith.constant 0 : index
      %c0_555 = arith.constant 0 : index
      %c5_556 = arith.constant 5 : index
      %c0_557 = arith.constant 0 : index
      %274 = vector.load %arg33[%c0_554, %c0_555, %c5_556, %c0_557] : memref<2x6x6x32xf32, #tpu.memory_space<vmem>>, vector<2x6x1x32xf32>
      tpu.vector_store %arg33[%c0_554, %c0_555, %c5_556, %c0_557], %270 {strides = array<i32>} : memref<2x6x6x32xf32, #tpu.memory_space<vmem>>, vector<2x6x1x32xf32>,
      %cst_558 = arith.constant 0.000000e+00 : f32
      %275 = vector.broadcast %cst_558 : f32 to vector<2x1x6x64xf32>
      %cst_559 = arith.constant 0.000000e+00 : f32
      %276 = vector.broadcast %cst_559 : f32 to vector<2x6x1x64xf32>
      %c0_560 = arith.constant 0 : index
      %c0_561 = arith.constant 0 : index
      %c0_562 = arith.constant 0 : index
      %c0_563 = arith.constant 0 : index
      %277 = vector.load %arg34[%c0_560, %c0_561, %c0_562, %c0_563] : memref<2x6x6x64xf32, #tpu.memory_space<vmem>>, vector<2x1x6x64xf32>
      tpu.vector_store %arg34[%c0_560, %c0_561, %c0_562, %c0_563], %275 {strides = array<i32>} : memref<2x6x6x64xf32, #tpu.memory_space<vmem>>, vector<2x1x6x64xf32>,
      %c0_564 = arith.constant 0 : index
      %c5_565 = arith.constant 5 : index
      %c0_566 = arith.constant 0 : index
      %c0_567 = arith.constant 0 : index
      %278 = vector.load %arg34[%c0_564, %c5_565, %c0_566, %c0_567] : memref<2x6x6x64xf32, #tpu.memory_space<vmem>>, vector<2x1x6x64xf32>
      tpu.vector_store %arg34[%c0_564, %c5_565, %c0_566, %c0_567], %275 {strides = array<i32>} : memref<2x6x6x64xf32, #tpu.memory_space<vmem>>, vector<2x1x6x64xf32>,
      %c0_568 = arith.constant 0 : index
      %c0_569 = arith.constant 0 : index
      %c0_570 = arith.constant 0 : index
      %c0_571 = arith.constant 0 : index
      %279 = vector.load %arg34[%c0_568, %c0_569, %c0_570, %c0_571] : memref<2x6x6x64xf32, #tpu.memory_space<vmem>>, vector<2x6x1x64xf32>
      tpu.vector_store %arg34[%c0_568, %c0_569, %c0_570, %c0_571], %276 {strides = array<i32>} : memref<2x6x6x64xf32, #tpu.memory_space<vmem>>, vector<2x6x1x64xf32>,
      %c0_572 = arith.constant 0 : index
      %c0_573 = arith.constant 0 : index
      %c5_574 = arith.constant 5 : index
      %c0_575 = arith.constant 0 : index
      %280 = vector.load %arg34[%c0_572, %c0_573, %c5_574, %c0_575] : memref<2x6x6x64xf32, #tpu.memory_space<vmem>>, vector<2x6x1x64xf32>
      tpu.vector_store %arg34[%c0_572, %c0_573, %c5_574, %c0_575], %276 {strides = array<i32>} : memref<2x6x6x64xf32, #tpu.memory_space<vmem>>, vector<2x6x1x64xf32>,
      %cst_576 = arith.constant 0.000000e+00 : f32
      %281 = vector.broadcast %cst_576 : f32 to vector<2x1x6x128xf32>
      %cst_577 = arith.constant 0.000000e+00 : f32
      %282 = vector.broadcast %cst_577 : f32 to vector<2x6x1x128xf32>
      %c0_578 = arith.constant 0 : index
      %c0_579 = arith.constant 0 : index
      %c0_580 = arith.constant 0 : index
      %c0_581 = arith.constant 0 : index
      %283 = vector.load %arg35[%c0_578, %c0_579, %c0_580, %c0_581] : memref<2x6x6x128xf32, #tpu.memory_space<vmem>>, vector<2x1x6x128xf32>
      tpu.vector_store %arg35[%c0_578, %c0_579, %c0_580, %c0_581], %281 {strides = array<i32>} : memref<2x6x6x128xf32, #tpu.memory_space<vmem>>, vector<2x1x6x128xf32>,
      %c0_582 = arith.constant 0 : index
      %c5_583 = arith.constant 5 : index
      %c0_584 = arith.constant 0 : index
      %c0_585 = arith.constant 0 : index
      %284 = vector.load %arg35[%c0_582, %c5_583, %c0_584, %c0_585] : memref<2x6x6x128xf32, #tpu.memory_space<vmem>>, vector<2x1x6x128xf32>
      tpu.vector_store %arg35[%c0_582, %c5_583, %c0_584, %c0_585], %281 {strides = array<i32>} : memref<2x6x6x128xf32, #tpu.memory_space<vmem>>, vector<2x1x6x128xf32>,
      %c0_586 = arith.constant 0 : index
      %c0_587 = arith.constant 0 : index
      %c0_588 = arith.constant 0 : index
      %c0_589 = arith.constant 0 : index
      %285 = vector.load %arg35[%c0_586, %c0_587, %c0_588, %c0_589] : memref<2x6x6x128xf32, #tpu.memory_space<vmem>>, vector<2x6x1x128xf32>
      tpu.vector_store %arg35[%c0_586, %c0_587, %c0_588, %c0_589], %282 {strides = array<i32>} : memref<2x6x6x128xf32, #tpu.memory_space<vmem>>, vector<2x6x1x128xf32>,
      %c0_590 = arith.constant 0 : index
      %c0_591 = arith.constant 0 : index
      %c5_592 = arith.constant 5 : index
      %c0_593 = arith.constant 0 : index
      %286 = vector.load %arg35[%c0_590, %c0_591, %c5_592, %c0_593] : memref<2x6x6x128xf32, #tpu.memory_space<vmem>>, vector<2x6x1x128xf32>
      tpu.vector_store %arg35[%c0_590, %c0_591, %c5_592, %c0_593], %282 {strides = array<i32>} : memref<2x6x6x128xf32, #tpu.memory_space<vmem>>, vector<2x6x1x128xf32>,
      %cst_594 = arith.constant 0.000000e+00 : f32
      %287 = vector.broadcast %cst_594 : f32 to vector<2x1x4x128xf32>
      %cst_595 = arith.constant 0.000000e+00 : f32
      %288 = vector.broadcast %cst_595 : f32 to vector<2x4x1x128xf32>
      %c0_596 = arith.constant 0 : index
      %c0_597 = arith.constant 0 : index
      %c0_598 = arith.constant 0 : index
      %c0_599 = arith.constant 0 : index
      %289 = vector.load %arg36[%c0_596, %c0_597, %c0_598, %c0_599] : memref<2x4x4x128xf32, #tpu.memory_space<vmem>>, vector<2x1x4x128xf32>
      tpu.vector_store %arg36[%c0_596, %c0_597, %c0_598, %c0_599], %287 {strides = array<i32>} : memref<2x4x4x128xf32, #tpu.memory_space<vmem>>, vector<2x1x4x128xf32>,
      %c0_600 = arith.constant 0 : index
      %c3 = arith.constant 3 : index
      %c0_601 = arith.constant 0 : index
      %c0_602 = arith.constant 0 : index
      %290 = vector.load %arg36[%c0_600, %c3, %c0_601, %c0_602] : memref<2x4x4x128xf32, #tpu.memory_space<vmem>>, vector<2x1x4x128xf32>
      tpu.vector_store %arg36[%c0_600, %c3, %c0_601, %c0_602], %287 {strides = array<i32>} : memref<2x4x4x128xf32, #tpu.memory_space<vmem>>, vector<2x1x4x128xf32>,
      %c0_603 = arith.constant 0 : index
      %c0_604 = arith.constant 0 : index
      %c0_605 = arith.constant 0 : index
      %c0_606 = arith.constant 0 : index
      %291 = vector.load %arg36[%c0_603, %c0_604, %c0_605, %c0_606] : memref<2x4x4x128xf32, #tpu.memory_space<vmem>>, vector<2x4x1x128xf32>
      tpu.vector_store %arg36[%c0_603, %c0_604, %c0_605, %c0_606], %288 {strides = array<i32>} : memref<2x4x4x128xf32, #tpu.memory_space<vmem>>, vector<2x4x1x128xf32>,
      %c0_607 = arith.constant 0 : index
      %c0_608 = arith.constant 0 : index
      %c3_609 = arith.constant 3 : index
      %c0_610 = arith.constant 0 : index
      %292 = vector.load %arg36[%c0_607, %c0_608, %c3_609, %c0_610] : memref<2x4x4x128xf32, #tpu.memory_space<vmem>>, vector<2x4x1x128xf32>
      tpu.vector_store %arg36[%c0_607, %c0_608, %c3_609, %c0_610], %288 {strides = array<i32>} : memref<2x4x4x128xf32, #tpu.memory_space<vmem>>, vector<2x4x1x128xf32>,
      %cst_611 = arith.constant 0.000000e+00 : f32
      %293 = vector.broadcast %cst_611 : f32 to vector<2x1x6x128xf32>
      %cst_612 = arith.constant 0.000000e+00 : f32
      %294 = vector.broadcast %cst_612 : f32 to vector<2x6x1x128xf32>
      %c0_613 = arith.constant 0 : index
      %c0_614 = arith.constant 0 : index
      %c0_615 = arith.constant 0 : index
      %c0_616 = arith.constant 0 : index
      %295 = vector.load %arg37[%c0_613, %c0_614, %c0_615, %c0_616] : memref<2x6x6x128xf32, #tpu.memory_space<vmem>>, vector<2x1x6x128xf32>
      tpu.vector_store %arg37[%c0_613, %c0_614, %c0_615, %c0_616], %293 {strides = array<i32>} : memref<2x6x6x128xf32, #tpu.memory_space<vmem>>, vector<2x1x6x128xf32>,
      %c0_617 = arith.constant 0 : index
      %c5_618 = arith.constant 5 : index
      %c0_619 = arith.constant 0 : index
      %c0_620 = arith.constant 0 : index
      %296 = vector.load %arg37[%c0_617, %c5_618, %c0_619, %c0_620] : memref<2x6x6x128xf32, #tpu.memory_space<vmem>>, vector<2x1x6x128xf32>
      tpu.vector_store %arg37[%c0_617, %c5_618, %c0_619, %c0_620], %293 {strides = array<i32>} : memref<2x6x6x128xf32, #tpu.memory_space<vmem>>, vector<2x1x6x128xf32>,
      %c0_621 = arith.constant 0 : index
      %c0_622 = arith.constant 0 : index
      %c0_623 = arith.constant 0 : index
      %c0_624 = arith.constant 0 : index
      %297 = vector.load %arg37[%c0_621, %c0_622, %c0_623, %c0_624] : memref<2x6x6x128xf32, #tpu.memory_space<vmem>>, vector<2x6x1x128xf32>
      tpu.vector_store %arg37[%c0_621, %c0_622, %c0_623, %c0_624], %294 {strides = array<i32>} : memref<2x6x6x128xf32, #tpu.memory_space<vmem>>, vector<2x6x1x128xf32>,
      %c0_625 = arith.constant 0 : index
      %c0_626 = arith.constant 0 : index
      %c5_627 = arith.constant 5 : index
      %c0_628 = arith.constant 0 : index
      %298 = vector.load %arg37[%c0_625, %c0_626, %c5_627, %c0_628] : memref<2x6x6x128xf32, #tpu.memory_space<vmem>>, vector<2x6x1x128xf32>
      tpu.vector_store %arg37[%c0_625, %c0_626, %c5_627, %c0_628], %294 {strides = array<i32>} : memref<2x6x6x128xf32, #tpu.memory_space<vmem>>, vector<2x6x1x128xf32>,
      %cst_629 = arith.constant 0.000000e+00 : f32
      %299 = vector.broadcast %cst_629 : f32 to vector<2x1x6x64xf32>
      %cst_630 = arith.constant 0.000000e+00 : f32
      %300 = vector.broadcast %cst_630 : f32 to vector<2x6x1x64xf32>
      %c0_631 = arith.constant 0 : index
      %c0_632 = arith.constant 0 : index
      %c0_633 = arith.constant 0 : index
      %c0_634 = arith.constant 0 : index
      %301 = vector.load %arg38[%c0_631, %c0_632, %c0_633, %c0_634] : memref<2x6x6x64xf32, #tpu.memory_space<vmem>>, vector<2x1x6x64xf32>
      tpu.vector_store %arg38[%c0_631, %c0_632, %c0_633, %c0_634], %299 {strides = array<i32>} : memref<2x6x6x64xf32, #tpu.memory_space<vmem>>, vector<2x1x6x64xf32>,
      %c0_635 = arith.constant 0 : index
      %c5_636 = arith.constant 5 : index
      %c0_637 = arith.constant 0 : index
      %c0_638 = arith.constant 0 : index
      %302 = vector.load %arg38[%c0_635, %c5_636, %c0_637, %c0_638] : memref<2x6x6x64xf32, #tpu.memory_space<vmem>>, vector<2x1x6x64xf32>
      tpu.vector_store %arg38[%c0_635, %c5_636, %c0_637, %c0_638], %299 {strides = array<i32>} : memref<2x6x6x64xf32, #tpu.memory_space<vmem>>, vector<2x1x6x64xf32>,
      %c0_639 = arith.constant 0 : index
      %c0_640 = arith.constant 0 : index
      %c0_641 = arith.constant 0 : index
      %c0_642 = arith.constant 0 : index
      %303 = vector.load %arg38[%c0_639, %c0_640, %c0_641, %c0_642] : memref<2x6x6x64xf32, #tpu.memory_space<vmem>>, vector<2x6x1x64xf32>
      tpu.vector_store %arg38[%c0_639, %c0_640, %c0_641, %c0_642], %300 {strides = array<i32>} : memref<2x6x6x64xf32, #tpu.memory_space<vmem>>, vector<2x6x1x64xf32>,
      %c0_643 = arith.constant 0 : index
      %c0_644 = arith.constant 0 : index
      %c5_645 = arith.constant 5 : index
      %c0_646 = arith.constant 0 : index
      %304 = vector.load %arg38[%c0_643, %c0_644, %c5_645, %c0_646] : memref<2x6x6x64xf32, #tpu.memory_space<vmem>>, vector<2x6x1x64xf32>
      tpu.vector_store %arg38[%c0_643, %c0_644, %c5_645, %c0_646], %300 {strides = array<i32>} : memref<2x6x6x64xf32, #tpu.memory_space<vmem>>, vector<2x6x1x64xf32>,
    } else {
    }
    %c0 = arith.constant 0 : index
    %c0_1 = arith.constant 0 : index
    %c0_2 = arith.constant 0 : index
    %3 = vector.load %arg1[%c0, %c0_1, %c0_2] : memref<2x64x27xf32, #tpu.memory_space<vmem>>, vector<2x64x27xf32>
    %4 = vector.shape_cast %3 : vector<2x64x27xf32> to vector<128x27xf32>
    %5 = arith.truncf %4 : vector<128x27xf32> to vector<128x27xbf16>
    %c0_3 = arith.constant 0 : index
    %c0_4 = arith.constant 0 : index
    %6 = vector.load %arg2[%c0_3, %c0_4] : memref<27x16xbf16, #tpu.memory_space<vmem>>, vector<27x16xbf16>
    %cst = arith.constant dense<0.000000e+00> : vector<128x16xf32>
    %7 = tpu.matmul %5, %6, %cst {dimension_numbers = #tpu.dot_dimension_numbers<[1], [0], [0], [1], [0, 0, 1, 1], [], []>} : vector<128x27xbf16>, vector<27x16xbf16>, vector<128x16xf32> -> vector<128x16xf32>
    %c0_5 = arith.constant 0 : index
    %c0_6 = arith.constant 0 : index
    %8 = vector.load %arg3[%c0_5, %c0_6] : memref<1x16xf32, #tpu.memory_space<vmem>>, vector<1x16xf32>
    %9 = vector.broadcast %8 : vector<1x16xf32> to vector<128x16xf32>
    %10 = arith.addf %7, %9 : vector<128x16xf32>
    %cst_7 = arith.constant 0.000000e+00 : f32
    %11 = vector.broadcast %cst_7 : f32 to vector<128x16xf32>
    %12 = arith.maximumf %10, %11 : vector<128x16xf32>
    %13 = vector.shape_cast %12 : vector<128x16xf32> to vector<2x8x8x16xf32>
    %c0_8 = arith.constant 0 : index
    %c1 = arith.constant 1 : index
    %c1_9 = arith.constant 1 : index
    %c0_10 = arith.constant 0 : index
    %14 = vector.load %arg32[%c0_8, %c1, %c1_9, %c0_10] : memref<2x10x10x16xf32, #tpu.memory_space<vmem>>, vector<2x8x8x16xf32>
    tpu.vector_store %arg32[%c0_8, %c1, %c1_9, %c0_10], %13 {strides = array<i32>} : memref<2x10x10x16xf32, #tpu.memory_space<vmem>>, vector<2x8x8x16xf32>,
    %c0_11 = arith.constant 0 : index
    %c0_12 = arith.constant 0 : index
    %c0_13 = arith.constant 0 : index
    %c0_14 = arith.constant 0 : index
    %15 = vector.load %arg32[%c0_11, %c0_12, %c0_13, %c0_14] : memref<2x10x10x16xf32, #tpu.memory_space<vmem>>, vector<2x8x8x16xf32>
    %c0_15 = arith.constant 0 : index
    %c0_16 = arith.constant 0 : index
    %c1_17 = arith.constant 1 : index
    %c0_18 = arith.constant 0 : index
    %16 = vector.load %arg32[%c0_15, %c0_16, %c1_17, %c0_18] : memref<2x10x10x16xf32, #tpu.memory_space<vmem>>, vector<2x8x8x16xf32>
    %c0_19 = arith.constant 0 : index
    %c0_20 = arith.constant 0 : index
    %c2 = arith.constant 2 : index
    %c0_21 = arith.constant 0 : index
    %17 = vector.load %arg32[%c0_19, %c0_20, %c2, %c0_21] : memref<2x10x10x16xf32, #tpu.memory_space<vmem>>, vector<2x8x8x16xf32>
    %c0_22 = arith.constant 0 : index
    %c1_23 = arith.constant 1 : index
    %c0_24 = arith.constant 0 : index
    %c0_25 = arith.constant 0 : index
    %18 = vector.load %arg32[%c0_22, %c1_23, %c0_24, %c0_25] : memref<2x10x10x16xf32, #tpu.memory_space<vmem>>, vector<2x8x8x16xf32>
    %c0_26 = arith.constant 0 : index
    %c1_27 = arith.constant 1 : index
    %c1_28 = arith.constant 1 : index
    %c0_29 = arith.constant 0 : index
    %19 = vector.load %arg32[%c0_26, %c1_27, %c1_28, %c0_29] : memref<2x10x10x16xf32, #tpu.memory_space<vmem>>, vector<2x8x8x16xf32>
    %c0_30 = arith.constant 0 : index
    %c1_31 = arith.constant 1 : index
    %c2_32 = arith.constant 2 : index
    %c0_33 = arith.constant 0 : index
    %20 = vector.load %arg32[%c0_30, %c1_31, %c2_32, %c0_33] : memref<2x10x10x16xf32, #tpu.memory_space<vmem>>, vector<2x8x8x16xf32>
    %c0_34 = arith.constant 0 : index
    %c2_35 = arith.constant 2 : index
    %c0_36 = arith.constant 0 : index
    %c0_37 = arith.constant 0 : index
    %21 = vector.load %arg32[%c0_34, %c2_35, %c0_36, %c0_37] : memref<2x10x10x16xf32, #tpu.memory_space<vmem>>, vector<2x8x8x16xf32>
    %c0_38 = arith.constant 0 : index
    %c2_39 = arith.constant 2 : index
    %c1_40 = arith.constant 1 : index
    %c0_41 = arith.constant 0 : index
    %22 = vector.load %arg32[%c0_38, %c2_39, %c1_40, %c0_41] : memref<2x10x10x16xf32, #tpu.memory_space<vmem>>, vector<2x8x8x16xf32>
    %c0_42 = arith.constant 0 : index
    %c2_43 = arith.constant 2 : index
    %c2_44 = arith.constant 2 : index
    %c0_45 = arith.constant 0 : index
    %23 = vector.load %arg32[%c0_42, %c2_43, %c2_44, %c0_45] : memref<2x10x10x16xf32, #tpu.memory_space<vmem>>, vector<2x8x8x16xf32>
    %24 = tpu.concatenate %15, %16, %17, %18, %19, %20, %21, %22, %23 in 3 : vector<2x8x8x16xf32>, vector<2x8x8x16xf32>, vector<2x8x8x16xf32>, vector<2x8x8x16xf32>, vector<2x8x8x16xf32>, vector<2x8x8x16xf32>, vector<2x8x8x16xf32>, vector<2x8x8x16xf32>, vector<2x8x8x16xf32> -> vector<2x8x8x144xf32>
    %25 = vector.shape_cast %24 : vector<2x8x8x144xf32> to vector<128x144xf32>
    %26 = arith.truncf %25 : vector<128x144xf32> to vector<128x144xbf16>
    %c0_46 = arith.constant 0 : index
    %c0_47 = arith.constant 0 : index
    %27 = vector.load %arg4[%c0_46, %c0_47] : memref<144x16xbf16, #tpu.memory_space<vmem>>, vector<144x16xbf16>
    %cst_48 = arith.constant dense<0.000000e+00> : vector<128x16xf32>
    %28 = tpu.matmul %26, %27, %cst_48 {dimension_numbers = #tpu.dot_dimension_numbers<[1], [0], [0], [1], [0, 0, 1, 1], [], []>} : vector<128x144xbf16>, vector<144x16xbf16>, vector<128x16xf32> -> vector<128x16xf32>
    %c0_49 = arith.constant 0 : index
    %c0_50 = arith.constant 0 : index
    %29 = vector.load %arg5[%c0_49, %c0_50] : memref<1x16xf32, #tpu.memory_space<vmem>>, vector<1x16xf32>
    %30 = vector.broadcast %29 : vector<1x16xf32> to vector<128x16xf32>
    %31 = arith.addf %28, %30 : vector<128x16xf32>
    %cst_51 = arith.constant 0.000000e+00 : f32
    %32 = vector.broadcast %cst_51 : f32 to vector<128x16xf32>
    %33 = arith.maximumf %31, %32 : vector<128x16xf32>
    %34 = vector.shape_cast %33 : vector<128x16xf32> to vector<2x8x8x16xf32>
    %c0_52 = arith.constant 0 : index
    %c1_53 = arith.constant 1 : index
    %c1_54 = arith.constant 1 : index
    %c0_55 = arith.constant 0 : index
    %35 = vector.load %arg32[%c0_52, %c1_53, %c1_54, %c0_55] : memref<2x10x10x16xf32, #tpu.memory_space<vmem>>, vector<2x8x8x16xf32>
    tpu.vector_store %arg32[%c0_52, %c1_53, %c1_54, %c0_55], %34 {strides = array<i32>} : memref<2x10x10x16xf32, #tpu.memory_space<vmem>>, vector<2x8x8x16xf32>,
    %c0_56 = arith.constant 0 : index
    %c0_57 = arith.constant 0 : index
    %c0_58 = arith.constant 0 : index
    %c0_59 = arith.constant 0 : index
    %36 = tpu.strided_load %arg32[%c0_56, %c0_57, %c0_58, %c0_59] {strides = array<i32: 1, 2, 2, 1>} : memref<2x10x10x16xf32, #tpu.memory_space<vmem>>, vector<2x4x4x16xf32>
    %c0_60 = arith.constant 0 : index
    %c0_61 = arith.constant 0 : index
    %c1_62 = arith.constant 1 : index
    %c0_63 = arith.constant 0 : index
    %37 = tpu.strided_load %arg32[%c0_60, %c0_61, %c1_62, %c0_63] {strides = array<i32: 1, 2, 2, 1>} : memref<2x10x10x16xf32, #tpu.memory_space<vmem>>, vector<2x4x4x16xf32>
    %c0_64 = arith.constant 0 : index
    %c0_65 = arith.constant 0 : index
    %c2_66 = arith.constant 2 : index
    %c0_67 = arith.constant 0 : index
    %38 = tpu.strided_load %arg32[%c0_64, %c0_65, %c2_66, %c0_67] {strides = array<i32: 1, 2, 2, 1>} : memref<2x10x10x16xf32, #tpu.memory_space<vmem>>, vector<2x4x4x16xf32>
    %c0_68 = arith.constant 0 : index
    %c1_69 = arith.constant 1 : index
    %c0_70 = arith.constant 0 : index
    %c0_71 = arith.constant 0 : index
    %39 = tpu.strided_load %arg32[%c0_68, %c1_69, %c0_70, %c0_71] {strides = array<i32: 1, 2, 2, 1>} : memref<2x10x10x16xf32, #tpu.memory_space<vmem>>, vector<2x4x4x16xf32>
    %c0_72 = arith.constant 0 : index
    %c1_73 = arith.constant 1 : index
    %c1_74 = arith.constant 1 : index
    %c0_75 = arith.constant 0 : index
    %40 = tpu.strided_load %arg32[%c0_72, %c1_73, %c1_74, %c0_75] {strides = array<i32: 1, 2, 2, 1>} : memref<2x10x10x16xf32, #tpu.memory_space<vmem>>, vector<2x4x4x16xf32>
    %c0_76 = arith.constant 0 : index
    %c1_77 = arith.constant 1 : index
    %c2_78 = arith.constant 2 : index
    %c0_79 = arith.constant 0 : index
    %41 = tpu.strided_load %arg32[%c0_76, %c1_77, %c2_78, %c0_79] {strides = array<i32: 1, 2, 2, 1>} : memref<2x10x10x16xf32, #tpu.memory_space<vmem>>, vector<2x4x4x16xf32>
    %c0_80 = arith.constant 0 : index
    %c2_81 = arith.constant 2 : index
    %c0_82 = arith.constant 0 : index
    %c0_83 = arith.constant 0 : index
    %42 = tpu.strided_load %arg32[%c0_80, %c2_81, %c0_82, %c0_83] {strides = array<i32: 1, 2, 2, 1>} : memref<2x10x10x16xf32, #tpu.memory_space<vmem>>, vector<2x4x4x16xf32>
    %c0_84 = arith.constant 0 : index
    %c2_85 = arith.constant 2 : index
    %c1_86 = arith.constant 1 : index
    %c0_87 = arith.constant 0 : index
    %43 = tpu.strided_load %arg32[%c0_84, %c2_85, %c1_86, %c0_87] {strides = array<i32: 1, 2, 2, 1>} : memref<2x10x10x16xf32, #tpu.memory_space<vmem>>, vector<2x4x4x16xf32>
    %c0_88 = arith.constant 0 : index
    %c2_89 = arith.constant 2 : index
    %c2_90 = arith.constant 2 : index
    %c0_91 = arith.constant 0 : index
    %44 = tpu.strided_load %arg32[%c0_88, %c2_89, %c2_90, %c0_91] {strides = array<i32: 1, 2, 2, 1>} : memref<2x10x10x16xf32, #tpu.memory_space<vmem>>, vector<2x4x4x16xf32>
    %45 = tpu.concatenate %36, %37, %38, %39, %40, %41, %42, %43, %44 in 3 : vector<2x4x4x16xf32>, vector<2x4x4x16xf32>, vector<2x4x4x16xf32>, vector<2x4x4x16xf32>, vector<2x4x4x16xf32>, vector<2x4x4x16xf32>, vector<2x4x4x16xf32>, vector<2x4x4x16xf32>, vector<2x4x4x16xf32> -> vector<2x4x4x144xf32>
    %46 = vector.shape_cast %45 : vector<2x4x4x144xf32> to vector<32x144xf32>
    %47 = arith.truncf %46 : vector<32x144xf32> to vector<32x144xbf16>
    %c0_92 = arith.constant 0 : index
    %c0_93 = arith.constant 0 : index
    %48 = vector.load %arg6[%c0_92, %c0_93] : memref<144x32xbf16, #tpu.memory_space<vmem>>, vector<144x32xbf16>
    %cst_94 = arith.constant dense<0.000000e+00> : vector<32x32xf32>
    %49 = tpu.matmul %47, %48, %cst_94 {dimension_numbers = #tpu.dot_dimension_numbers<[1], [0], [0], [1], [0, 0, 1, 1], [], []>} : vector<32x144xbf16>, vector<144x32xbf16>, vector<32x32xf32> -> vector<32x32xf32>
    %c0_95 = arith.constant 0 : index
    %c0_96 = arith.constant 0 : index
    %50 = vector.load %arg7[%c0_95, %c0_96] : memref<1x32xf32, #tpu.memory_space<vmem>>, vector<1x32xf32>
    %51 = vector.broadcast %50 : vector<1x32xf32> to vector<32x32xf32>
    %52 = arith.addf %49, %51 : vector<32x32xf32>
    %cst_97 = arith.constant 0.000000e+00 : f32
    %53 = vector.broadcast %cst_97 : f32 to vector<32x32xf32>
    %54 = arith.maximumf %52, %53 : vector<32x32xf32>
    %55 = vector.shape_cast %54 : vector<32x32xf32> to vector<2x4x4x32xf32>
    %c0_98 = arith.constant 0 : index
    %c1_99 = arith.constant 1 : index
    %c1_100 = arith.constant 1 : index
    %c0_101 = arith.constant 0 : index
    %56 = vector.load %arg33[%c0_98, %c1_99, %c1_100, %c0_101] : memref<2x6x6x32xf32, #tpu.memory_space<vmem>>, vector<2x4x4x32xf32>
    tpu.vector_store %arg33[%c0_98, %c1_99, %c1_100, %c0_101], %55 {strides = array<i32>} : memref<2x6x6x32xf32, #tpu.memory_space<vmem>>, vector<2x4x4x32xf32>,
    %c0_102 = arith.constant 0 : index
    %c0_103 = arith.constant 0 : index
    %c0_104 = arith.constant 0 : index
    %c0_105 = arith.constant 0 : index
    %57 = vector.load %arg33[%c0_102, %c0_103, %c0_104, %c0_105] : memref<2x6x6x32xf32, #tpu.memory_space<vmem>>, vector<2x4x4x32xf32>
    %c0_106 = arith.constant 0 : index
    %c0_107 = arith.constant 0 : index
    %c1_108 = arith.constant 1 : index
    %c0_109 = arith.constant 0 : index
    %58 = vector.load %arg33[%c0_106, %c0_107, %c1_108, %c0_109] : memref<2x6x6x32xf32, #tpu.memory_space<vmem>>, vector<2x4x4x32xf32>
    %c0_110 = arith.constant 0 : index
    %c0_111 = arith.constant 0 : index
    %c2_112 = arith.constant 2 : index
    %c0_113 = arith.constant 0 : index
    %59 = vector.load %arg33[%c0_110, %c0_111, %c2_112, %c0_113] : memref<2x6x6x32xf32, #tpu.memory_space<vmem>>, vector<2x4x4x32xf32>
    %c0_114 = arith.constant 0 : index
    %c1_115 = arith.constant 1 : index
    %c0_116 = arith.constant 0 : index
    %c0_117 = arith.constant 0 : index
    %60 = vector.load %arg33[%c0_114, %c1_115, %c0_116, %c0_117] : memref<2x6x6x32xf32, #tpu.memory_space<vmem>>, vector<2x4x4x32xf32>
    %c0_118 = arith.constant 0 : index
    %c1_119 = arith.constant 1 : index
    %c1_120 = arith.constant 1 : index
    %c0_121 = arith.constant 0 : index
    %61 = vector.load %arg33[%c0_118, %c1_119, %c1_120, %c0_121] : memref<2x6x6x32xf32, #tpu.memory_space<vmem>>, vector<2x4x4x32xf32>
    %c0_122 = arith.constant 0 : index
    %c1_123 = arith.constant 1 : index
    %c2_124 = arith.constant 2 : index
    %c0_125 = arith.constant 0 : index
    %62 = vector.load %arg33[%c0_122, %c1_123, %c2_124, %c0_125] : memref<2x6x6x32xf32, #tpu.memory_space<vmem>>, vector<2x4x4x32xf32>
    %c0_126 = arith.constant 0 : index
    %c2_127 = arith.constant 2 : index
    %c0_128 = arith.constant 0 : index
    %c0_129 = arith.constant 0 : index
    %63 = vector.load %arg33[%c0_126, %c2_127, %c0_128, %c0_129] : memref<2x6x6x32xf32, #tpu.memory_space<vmem>>, vector<2x4x4x32xf32>
    %c0_130 = arith.constant 0 : index
    %c2_131 = arith.constant 2 : index
    %c1_132 = arith.constant 1 : index
    %c0_133 = arith.constant 0 : index
    %64 = vector.load %arg33[%c0_130, %c2_131, %c1_132, %c0_133] : memref<2x6x6x32xf32, #tpu.memory_space<vmem>>, vector<2x4x4x32xf32>
    %c0_134 = arith.constant 0 : index
    %c2_135 = arith.constant 2 : index
    %c2_136 = arith.constant 2 : index
    %c0_137 = arith.constant 0 : index
    %65 = vector.load %arg33[%c0_134, %c2_135, %c2_136, %c0_137] : memref<2x6x6x32xf32, #tpu.memory_space<vmem>>, vector<2x4x4x32xf32>
    %66 = tpu.concatenate %57, %58, %59, %60, %61, %62, %63, %64, %65 in 3 : vector<2x4x4x32xf32>, vector<2x4x4x32xf32>, vector<2x4x4x32xf32>, vector<2x4x4x32xf32>, vector<2x4x4x32xf32>, vector<2x4x4x32xf32>, vector<2x4x4x32xf32>, vector<2x4x4x32xf32>, vector<2x4x4x32xf32> -> vector<2x4x4x288xf32>
    %67 = vector.shape_cast %66 : vector<2x4x4x288xf32> to vector<32x288xf32>
    %68 = arith.truncf %67 : vector<32x288xf32> to vector<32x288xbf16>
    %c0_138 = arith.constant 0 : index
    %c0_139 = arith.constant 0 : index
    %69 = vector.load %arg8[%c0_138, %c0_139] : memref<288x32xbf16, #tpu.memory_space<vmem>>, vector<288x32xbf16>
    %cst_140 = arith.constant dense<0.000000e+00> : vector<32x32xf32>
    %70 = tpu.matmul %68, %69, %cst_140 {dimension_numbers = #tpu.dot_dimension_numbers<[1], [0], [0], [1], [0, 0, 1, 1], [], []>} : vector<32x288xbf16>, vector<288x32xbf16>, vector<32x32xf32> -> vector<32x32xf32>
    %c0_141 = arith.constant 0 : index
    %c0_142 = arith.constant 0 : index
    %71 = vector.load %arg9[%c0_141, %c0_142] : memref<1x32xf32, #tpu.memory_space<vmem>>, vector<1x32xf32>
    %72 = vector.broadcast %71 : vector<1x32xf32> to vector<32x32xf32>
    %73 = arith.addf %70, %72 : vector<32x32xf32>
    %cst_143 = arith.constant 0.000000e+00 : f32
    %74 = vector.broadcast %cst_143 : f32 to vector<32x32xf32>
    %75 = arith.maximumf %73, %74 : vector<32x32xf32>
    %76 = vector.shape_cast %75 : vector<32x32xf32> to vector<2x4x4x32xf32>
    %c0_144 = arith.constant 0 : index
    %c1_145 = arith.constant 1 : index
    %c1_146 = arith.constant 1 : index
    %c0_147 = arith.constant 0 : index
    %77 = vector.load %arg33[%c0_144, %c1_145, %c1_146, %c0_147] : memref<2x6x6x32xf32, #tpu.memory_space<vmem>>, vector<2x4x4x32xf32>
    tpu.vector_store %arg33[%c0_144, %c1_145, %c1_146, %c0_147], %76 {strides = array<i32>} : memref<2x6x6x32xf32, #tpu.memory_space<vmem>>, vector<2x4x4x32xf32>,
    %c0_148 = arith.constant 0 : index
    %c0_149 = arith.constant 0 : index
    %c0_150 = arith.constant 0 : index
    %c0_151 = arith.constant 0 : index
    %78 = vector.load %arg33[%c0_148, %c0_149, %c0_150, %c0_151] : memref<2x6x6x32xf32, #tpu.memory_space<vmem>>, vector<2x4x4x32xf32>
    %c0_152 = arith.constant 0 : index
    %c0_153 = arith.constant 0 : index
    %c1_154 = arith.constant 1 : index
    %c0_155 = arith.constant 0 : index
    %79 = vector.load %arg33[%c0_152, %c0_153, %c1_154, %c0_155] : memref<2x6x6x32xf32, #tpu.memory_space<vmem>>, vector<2x4x4x32xf32>
    %c0_156 = arith.constant 0 : index
    %c0_157 = arith.constant 0 : index
    %c2_158 = arith.constant 2 : index
    %c0_159 = arith.constant 0 : index
    %80 = vector.load %arg33[%c0_156, %c0_157, %c2_158, %c0_159] : memref<2x6x6x32xf32, #tpu.memory_space<vmem>>, vector<2x4x4x32xf32>
    %c0_160 = arith.constant 0 : index
    %c1_161 = arith.constant 1 : index
    %c0_162 = arith.constant 0 : index
    %c0_163 = arith.constant 0 : index
    %81 = vector.load %arg33[%c0_160, %c1_161, %c0_162, %c0_163] : memref<2x6x6x32xf32, #tpu.memory_space<vmem>>, vector<2x4x4x32xf32>
    %c0_164 = arith.constant 0 : index
    %c1_165 = arith.constant 1 : index
    %c1_166 = arith.constant 1 : index
    %c0_167 = arith.constant 0 : index
    %82 = vector.load %arg33[%c0_164, %c1_165, %c1_166, %c0_167] : memref<2x6x6x32xf32, #tpu.memory_space<vmem>>, vector<2x4x4x32xf32>
    %c0_168 = arith.constant 0 : index
    %c1_169 = arith.constant 1 : index
    %c2_170 = arith.constant 2 : index
    %c0_171 = arith.constant 0 : index
    %83 = vector.load %arg33[%c0_168, %c1_169, %c2_170, %c0_171] : memref<2x6x6x32xf32, #tpu.memory_space<vmem>>, vector<2x4x4x32xf32>
    %c0_172 = arith.constant 0 : index
    %c2_173 = arith.constant 2 : index
    %c0_174 = arith.constant 0 : index
    %c0_175 = arith.constant 0 : index
    %84 = vector.load %arg33[%c0_172, %c2_173, %c0_174, %c0_175] : memref<2x6x6x32xf32, #tpu.memory_space<vmem>>, vector<2x4x4x32xf32>
    %c0_176 = arith.constant 0 : index
    %c2_177 = arith.constant 2 : index
    %c1_178 = arith.constant 1 : index
    %c0_179 = arith.constant 0 : index
    %85 = vector.load %arg33[%c0_176, %c2_177, %c1_178, %c0_179] : memref<2x6x6x32xf32, #tpu.memory_space<vmem>>, vector<2x4x4x32xf32>
    %c0_180 = arith.constant 0 : index
    %c2_181 = arith.constant 2 : index
    %c2_182 = arith.constant 2 : index
    %c0_183 = arith.constant 0 : index
    %86 = vector.load %arg33[%c0_180, %c2_181, %c2_182, %c0_183] : memref<2x6x6x32xf32, #tpu.memory_space<vmem>>, vector<2x4x4x32xf32>
    %87 = tpu.concatenate %78, %79, %80, %81, %82, %83, %84, %85, %86 in 3 : vector<2x4x4x32xf32>, vector<2x4x4x32xf32>, vector<2x4x4x32xf32>, vector<2x4x4x32xf32>, vector<2x4x4x32xf32>, vector<2x4x4x32xf32>, vector<2x4x4x32xf32>, vector<2x4x4x32xf32>, vector<2x4x4x32xf32> -> vector<2x4x4x288xf32>
    %88 = vector.shape_cast %87 : vector<2x4x4x288xf32> to vector<32x288xf32>
    %89 = arith.truncf %88 : vector<32x288xf32> to vector<32x288xbf16>
    %c0_184 = arith.constant 0 : index
    %c0_185 = arith.constant 0 : index
    %90 = vector.load %arg10[%c0_184, %c0_185] : memref<288x64xbf16, #tpu.memory_space<vmem>>, vector<288x64xbf16>
    %cst_186 = arith.constant dense<0.000000e+00> : vector<32x64xf32>
    %91 = tpu.matmul %89, %90, %cst_186 {dimension_numbers = #tpu.dot_dimension_numbers<[1], [0], [0], [1], [0, 0, 1, 1], [], []>} : vector<32x288xbf16>, vector<288x64xbf16>, vector<32x64xf32> -> vector<32x64xf32>
    %c0_187 = arith.constant 0 : index
    %c0_188 = arith.constant 0 : index
    %92 = vector.load %arg11[%c0_187, %c0_188] : memref<1x64xf32, #tpu.memory_space<vmem>>, vector<1x64xf32>
    %93 = vector.broadcast %92 : vector<1x64xf32> to vector<32x64xf32>
    %94 = arith.addf %91, %93 : vector<32x64xf32>
    %cst_189 = arith.constant 0.000000e+00 : f32
    %95 = vector.broadcast %cst_189 : f32 to vector<32x64xf32>
    %96 = arith.maximumf %94, %95 : vector<32x64xf32>
    %97 = vector.shape_cast %96 : vector<32x64xf32> to vector<2x4x4x64xf32>
    %c0_190 = arith.constant 0 : index
    %c1_191 = arith.constant 1 : index
    %c1_192 = arith.constant 1 : index
    %c0_193 = arith.constant 0 : index
    %98 = vector.load %arg34[%c0_190, %c1_191, %c1_192, %c0_193] : memref<2x6x6x64xf32, #tpu.memory_space<vmem>>, vector<2x4x4x64xf32>
    tpu.vector_store %arg34[%c0_190, %c1_191, %c1_192, %c0_193], %97 {strides = array<i32>} : memref<2x6x6x64xf32, #tpu.memory_space<vmem>>, vector<2x4x4x64xf32>,
    %c0_194 = arith.constant 0 : index
    %c0_195 = arith.constant 0 : index
    %c0_196 = arith.constant 0 : index
    %c0_197 = arith.constant 0 : index
    %99 = vector.load %arg34[%c0_194, %c0_195, %c0_196, %c0_197] : memref<2x6x6x64xf32, #tpu.memory_space<vmem>>, vector<2x4x4x64xf32>
    %c0_198 = arith.constant 0 : index
    %c0_199 = arith.constant 0 : index
    %c1_200 = arith.constant 1 : index
    %c0_201 = arith.constant 0 : index
    %100 = vector.load %arg34[%c0_198, %c0_199, %c1_200, %c0_201] : memref<2x6x6x64xf32, #tpu.memory_space<vmem>>, vector<2x4x4x64xf32>
    %c0_202 = arith.constant 0 : index
    %c0_203 = arith.constant 0 : index
    %c2_204 = arith.constant 2 : index
    %c0_205 = arith.constant 0 : index
    %101 = vector.load %arg34[%c0_202, %c0_203, %c2_204, %c0_205] : memref<2x6x6x64xf32, #tpu.memory_space<vmem>>, vector<2x4x4x64xf32>
    %c0_206 = arith.constant 0 : index
    %c1_207 = arith.constant 1 : index
    %c0_208 = arith.constant 0 : index
    %c0_209 = arith.constant 0 : index
    %102 = vector.load %arg34[%c0_206, %c1_207, %c0_208, %c0_209] : memref<2x6x6x64xf32, #tpu.memory_space<vmem>>, vector<2x4x4x64xf32>
    %c0_210 = arith.constant 0 : index
    %c1_211 = arith.constant 1 : index
    %c1_212 = arith.constant 1 : index
    %c0_213 = arith.constant 0 : index
    %103 = vector.load %arg34[%c0_210, %c1_211, %c1_212, %c0_213] : memref<2x6x6x64xf32, #tpu.memory_space<vmem>>, vector<2x4x4x64xf32>
    %c0_214 = arith.constant 0 : index
    %c1_215 = arith.constant 1 : index
    %c2_216 = arith.constant 2 : index
    %c0_217 = arith.constant 0 : index
    %104 = vector.load %arg34[%c0_214, %c1_215, %c2_216, %c0_217] : memref<2x6x6x64xf32, #tpu.memory_space<vmem>>, vector<2x4x4x64xf32>
    %c0_218 = arith.constant 0 : index
    %c2_219 = arith.constant 2 : index
    %c0_220 = arith.constant 0 : index
    %c0_221 = arith.constant 0 : index
    %105 = vector.load %arg34[%c0_218, %c2_219, %c0_220, %c0_221] : memref<2x6x6x64xf32, #tpu.memory_space<vmem>>, vector<2x4x4x64xf32>
    %c0_222 = arith.constant 0 : index
    %c2_223 = arith.constant 2 : index
    %c1_224 = arith.constant 1 : index
    %c0_225 = arith.constant 0 : index
    %106 = vector.load %arg34[%c0_222, %c2_223, %c1_224, %c0_225] : memref<2x6x6x64xf32, #tpu.memory_space<vmem>>, vector<2x4x4x64xf32>
    %c0_226 = arith.constant 0 : index
    %c2_227 = arith.constant 2 : index
    %c2_228 = arith.constant 2 : index
    %c0_229 = arith.constant 0 : index
    %107 = vector.load %arg34[%c0_226, %c2_227, %c2_228, %c0_229] : memref<2x6x6x64xf32, #tpu.memory_space<vmem>>, vector<2x4x4x64xf32>
    %108 = tpu.concatenate %99, %100, %101, %102, %103, %104, %105, %106, %107 in 3 : vector<2x4x4x64xf32>, vector<2x4x4x64xf32>, vector<2x4x4x64xf32>, vector<2x4x4x64xf32>, vector<2x4x4x64xf32>, vector<2x4x4x64xf32>, vector<2x4x4x64xf32>, vector<2x4x4x64xf32>, vector<2x4x4x64xf32> -> vector<2x4x4x576xf32>
    %109 = vector.shape_cast %108 : vector<2x4x4x576xf32> to vector<32x576xf32>
    %110 = arith.truncf %109 : vector<32x576xf32> to vector<32x576xbf16>
    %c0_230 = arith.constant 0 : index
    %c0_231 = arith.constant 0 : index
    %111 = vector.load %arg12[%c0_230, %c0_231] : memref<576x128xbf16, #tpu.memory_space<vmem>>, vector<576x128xbf16>
    %cst_232 = arith.constant dense<0.000000e+00> : vector<32x128xf32>
    %112 = tpu.matmul %110, %111, %cst_232 {dimension_numbers = #tpu.dot_dimension_numbers<[1], [0], [0], [1], [0, 0, 1, 1], [], []>} : vector<32x576xbf16>, vector<576x128xbf16>, vector<32x128xf32> -> vector<32x128xf32>
    %c0_233 = arith.constant 0 : index
    %c0_234 = arith.constant 0 : index
    %113 = vector.load %arg13[%c0_233, %c0_234] : memref<1x128xf32, #tpu.memory_space<vmem>>, vector<1x128xf32>
    %114 = vector.broadcast %113 : vector<1x128xf32> to vector<32x128xf32>
    %115 = arith.addf %112, %114 : vector<32x128xf32>
    %cst_235 = arith.constant 0.000000e+00 : f32
    %116 = vector.broadcast %cst_235 : f32 to vector<32x128xf32>
    %117 = arith.maximumf %115, %116 : vector<32x128xf32>
    %118 = vector.shape_cast %117 : vector<32x128xf32> to vector<2x4x4x128xf32>
    %c0_236 = arith.constant 0 : index
    %c1_237 = arith.constant 1 : index
    %c1_238 = arith.constant 1 : index
    %c0_239 = arith.constant 0 : index
    %119 = vector.load %arg35[%c0_236, %c1_237, %c1_238, %c0_239] : memref<2x6x6x128xf32, #tpu.memory_space<vmem>>, vector<2x4x4x128xf32>
    tpu.vector_store %arg35[%c0_236, %c1_237, %c1_238, %c0_239], %118 {strides = array<i32>} : memref<2x6x6x128xf32, #tpu.memory_space<vmem>>, vector<2x4x4x128xf32>,
    %c0_240 = arith.constant 0 : index
    %c0_241 = arith.constant 0 : index
    %c0_242 = arith.constant 0 : index
    %c0_243 = arith.constant 0 : index
    %120 = tpu.strided_load %arg35[%c0_240, %c0_241, %c0_242, %c0_243] {strides = array<i32: 1, 2, 2, 1>} : memref<2x6x6x128xf32, #tpu.memory_space<vmem>>, vector<2x2x2x128xf32>
    %c0_244 = arith.constant 0 : index
    %c0_245 = arith.constant 0 : index
    %c1_246 = arith.constant 1 : index
    %c0_247 = arith.constant 0 : index
    %121 = tpu.strided_load %arg35[%c0_244, %c0_245, %c1_246, %c0_247] {strides = array<i32: 1, 2, 2, 1>} : memref<2x6x6x128xf32, #tpu.memory_space<vmem>>, vector<2x2x2x128xf32>
    %c0_248 = arith.constant 0 : index
    %c0_249 = arith.constant 0 : index
    %c2_250 = arith.constant 2 : index
    %c0_251 = arith.constant 0 : index
    %122 = tpu.strided_load %arg35[%c0_248, %c0_249, %c2_250, %c0_251] {strides = array<i32: 1, 2, 2, 1>} : memref<2x6x6x128xf32, #tpu.memory_space<vmem>>, vector<2x2x2x128xf32>
    %c0_252 = arith.constant 0 : index
    %c1_253 = arith.constant 1 : index
    %c0_254 = arith.constant 0 : index
    %c0_255 = arith.constant 0 : index
    %123 = tpu.strided_load %arg35[%c0_252, %c1_253, %c0_254, %c0_255] {strides = array<i32: 1, 2, 2, 1>} : memref<2x6x6x128xf32, #tpu.memory_space<vmem>>, vector<2x2x2x128xf32>
    %c0_256 = arith.constant 0 : index
    %c1_257 = arith.constant 1 : index
    %c1_258 = arith.constant 1 : index
    %c0_259 = arith.constant 0 : index
    %124 = tpu.strided_load %arg35[%c0_256, %c1_257, %c1_258, %c0_259] {strides = array<i32: 1, 2, 2, 1>} : memref<2x6x6x128xf32, #tpu.memory_space<vmem>>, vector<2x2x2x128xf32>
    %c0_260 = arith.constant 0 : index
    %c1_261 = arith.constant 1 : index
    %c2_262 = arith.constant 2 : index
    %c0_263 = arith.constant 0 : index
    %125 = tpu.strided_load %arg35[%c0_260, %c1_261, %c2_262, %c0_263] {strides = array<i32: 1, 2, 2, 1>} : memref<2x6x6x128xf32, #tpu.memory_space<vmem>>, vector<2x2x2x128xf32>
    %c0_264 = arith.constant 0 : index
    %c2_265 = arith.constant 2 : index
    %c0_266 = arith.constant 0 : index
    %c0_267 = arith.constant 0 : index
    %126 = tpu.strided_load %arg35[%c0_264, %c2_265, %c0_266, %c0_267] {strides = array<i32: 1, 2, 2, 1>} : memref<2x6x6x128xf32, #tpu.memory_space<vmem>>, vector<2x2x2x128xf32>
    %c0_268 = arith.constant 0 : index
    %c2_269 = arith.constant 2 : index
    %c1_270 = arith.constant 1 : index
    %c0_271 = arith.constant 0 : index
    %127 = tpu.strided_load %arg35[%c0_268, %c2_269, %c1_270, %c0_271] {strides = array<i32: 1, 2, 2, 1>} : memref<2x6x6x128xf32, #tpu.memory_space<vmem>>, vector<2x2x2x128xf32>
    %c0_272 = arith.constant 0 : index
    %c2_273 = arith.constant 2 : index
    %c2_274 = arith.constant 2 : index
    %c0_275 = arith.constant 0 : index
    %128 = tpu.strided_load %arg35[%c0_272, %c2_273, %c2_274, %c0_275] {strides = array<i32: 1, 2, 2, 1>} : memref<2x6x6x128xf32, #tpu.memory_space<vmem>>, vector<2x2x2x128xf32>
    %129 = tpu.concatenate %120, %121, %122, %123, %124, %125, %126, %127, %128 in 3 : vector<2x2x2x128xf32>, vector<2x2x2x128xf32>, vector<2x2x2x128xf32>, vector<2x2x2x128xf32>, vector<2x2x2x128xf32>, vector<2x2x2x128xf32>, vector<2x2x2x128xf32>, vector<2x2x2x128xf32>, vector<2x2x2x128xf32> -> vector<2x2x2x1152xf32>
    %130 = vector.shape_cast %129 : vector<2x2x2x1152xf32> to vector<8x1152xf32>
    %131 = arith.truncf %130 : vector<8x1152xf32> to vector<8x1152xbf16>
    %c0_276 = arith.constant 0 : index
    %c0_277 = arith.constant 0 : index
    %132 = vector.load %arg14[%c0_276, %c0_277] : memref<1152x128xbf16, #tpu.memory_space<vmem>>, vector<1152x128xbf16>
    %cst_278 = arith.constant dense<0.000000e+00> : vector<8x128xf32>
    %133 = tpu.matmul %131, %132, %cst_278 {dimension_numbers = #tpu.dot_dimension_numbers<[1], [0], [0], [1], [0, 0, 1, 1], [], []>} : vector<8x1152xbf16>, vector<1152x128xbf16>, vector<8x128xf32> -> vector<8x128xf32>
    %c0_279 = arith.constant 0 : index
    %c0_280 = arith.constant 0 : index
    %134 = vector.load %arg15[%c0_279, %c0_280] : memref<1x128xf32, #tpu.memory_space<vmem>>, vector<1x128xf32>
    %135 = vector.broadcast %134 : vector<1x128xf32> to vector<8x128xf32>
    %136 = arith.addf %133, %135 : vector<8x128xf32>
    %cst_281 = arith.constant 0.000000e+00 : f32
    %137 = vector.broadcast %cst_281 : f32 to vector<8x128xf32>
    %138 = arith.maximumf %136, %137 : vector<8x128xf32>
    %139 = vector.shape_cast %138 : vector<8x128xf32> to vector<2x2x2x128xf32>
    %c0_282 = arith.constant 0 : index
    %c1_283 = arith.constant 1 : index
    %c1_284 = arith.constant 1 : index
    %c0_285 = arith.constant 0 : index
    %140 = vector.load %arg36[%c0_282, %c1_283, %c1_284, %c0_285] : memref<2x4x4x128xf32, #tpu.memory_space<vmem>>, vector<2x2x2x128xf32>
    tpu.vector_store %arg36[%c0_282, %c1_283, %c1_284, %c0_285], %139 {strides = array<i32>} : memref<2x4x4x128xf32, #tpu.memory_space<vmem>>, vector<2x2x2x128xf32>,
    %c0_286 = arith.constant 0 : index
    %c0_287 = arith.constant 0 : index
    %c0_288 = arith.constant 0 : index
    %c0_289 = arith.constant 0 : index
    %141 = vector.load %arg36[%c0_286, %c0_287, %c0_288, %c0_289] : memref<2x4x4x128xf32, #tpu.memory_space<vmem>>, vector<2x2x2x128xf32>
    %c0_290 = arith.constant 0 : index
    %c0_291 = arith.constant 0 : index
    %c1_292 = arith.constant 1 : index
    %c0_293 = arith.constant 0 : index
    %142 = vector.load %arg36[%c0_290, %c0_291, %c1_292, %c0_293] : memref<2x4x4x128xf32, #tpu.memory_space<vmem>>, vector<2x2x2x128xf32>
    %c0_294 = arith.constant 0 : index
    %c0_295 = arith.constant 0 : index
    %c2_296 = arith.constant 2 : index
    %c0_297 = arith.constant 0 : index
    %143 = vector.load %arg36[%c0_294, %c0_295, %c2_296, %c0_297] : memref<2x4x4x128xf32, #tpu.memory_space<vmem>>, vector<2x2x2x128xf32>
    %c0_298 = arith.constant 0 : index
    %c1_299 = arith.constant 1 : index
    %c0_300 = arith.constant 0 : index
    %c0_301 = arith.constant 0 : index
    %144 = vector.load %arg36[%c0_298, %c1_299, %c0_300, %c0_301] : memref<2x4x4x128xf32, #tpu.memory_space<vmem>>, vector<2x2x2x128xf32>
    %c0_302 = arith.constant 0 : index
    %c1_303 = arith.constant 1 : index
    %c1_304 = arith.constant 1 : index
    %c0_305 = arith.constant 0 : index
    %145 = vector.load %arg36[%c0_302, %c1_303, %c1_304, %c0_305] : memref<2x4x4x128xf32, #tpu.memory_space<vmem>>, vector<2x2x2x128xf32>
    %c0_306 = arith.constant 0 : index
    %c1_307 = arith.constant 1 : index
    %c2_308 = arith.constant 2 : index
    %c0_309 = arith.constant 0 : index
    %146 = vector.load %arg36[%c0_306, %c1_307, %c2_308, %c0_309] : memref<2x4x4x128xf32, #tpu.memory_space<vmem>>, vector<2x2x2x128xf32>
    %c0_310 = arith.constant 0 : index
    %c2_311 = arith.constant 2 : index
    %c0_312 = arith.constant 0 : index
    %c0_313 = arith.constant 0 : index
    %147 = vector.load %arg36[%c0_310, %c2_311, %c0_312, %c0_313] : memref<2x4x4x128xf32, #tpu.memory_space<vmem>>, vector<2x2x2x128xf32>
    %c0_314 = arith.constant 0 : index
    %c2_315 = arith.constant 2 : index
    %c1_316 = arith.constant 1 : index
    %c0_317 = arith.constant 0 : index
    %148 = vector.load %arg36[%c0_314, %c2_315, %c1_316, %c0_317] : memref<2x4x4x128xf32, #tpu.memory_space<vmem>>, vector<2x2x2x128xf32>
    %c0_318 = arith.constant 0 : index
    %c2_319 = arith.constant 2 : index
    %c2_320 = arith.constant 2 : index
    %c0_321 = arith.constant 0 : index
    %149 = vector.load %arg36[%c0_318, %c2_319, %c2_320, %c0_321] : memref<2x4x4x128xf32, #tpu.memory_space<vmem>>, vector<2x2x2x128xf32>
    %150 = tpu.concatenate %141, %142, %143, %144, %145, %146, %147, %148, %149 in 3 : vector<2x2x2x128xf32>, vector<2x2x2x128xf32>, vector<2x2x2x128xf32>, vector<2x2x2x128xf32>, vector<2x2x2x128xf32>, vector<2x2x2x128xf32>, vector<2x2x2x128xf32>, vector<2x2x2x128xf32>, vector<2x2x2x128xf32> -> vector<2x2x2x1152xf32>
    %151 = vector.shape_cast %150 : vector<2x2x2x1152xf32> to vector<8x1152xf32>
    %152 = arith.truncf %151 : vector<8x1152xf32> to vector<8x1152xbf16>
    %c0_322 = arith.constant 0 : index
    %c0_323 = arith.constant 0 : index
    %153 = vector.load %arg16[%c0_322, %c0_323] : memref<1152x128xbf16, #tpu.memory_space<vmem>>, vector<1152x128xbf16>
    %cst_324 = arith.constant dense<0.000000e+00> : vector<8x128xf32>
    %154 = tpu.matmul %152, %153, %cst_324 {dimension_numbers = #tpu.dot_dimension_numbers<[1], [0], [0], [1], [0, 0, 1, 1], [], []>} : vector<8x1152xbf16>, vector<1152x128xbf16>, vector<8x128xf32> -> vector<8x128xf32>
    %c0_325 = arith.constant 0 : index
    %c0_326 = arith.constant 0 : index
    %155 = vector.load %arg17[%c0_325, %c0_326] : memref<1x128xf32, #tpu.memory_space<vmem>>, vector<1x128xf32>
    %156 = vector.broadcast %155 : vector<1x128xf32> to vector<8x128xf32>
    %157 = arith.addf %154, %156 : vector<8x128xf32>
    %cst_327 = arith.constant 0.000000e+00 : f32
    %158 = vector.broadcast %cst_327 : f32 to vector<8x128xf32>
    %159 = arith.maximumf %157, %158 : vector<8x128xf32>
    %160 = vector.shape_cast %159 : vector<8x128xf32> to vector<2x2x2x128xf32>
    %c0_328 = arith.constant 0 : index
    %c1_329 = arith.constant 1 : index
    %c1_330 = arith.constant 1 : index
    %c0_331 = arith.constant 0 : index
    %161 = vector.load %arg36[%c0_328, %c1_329, %c1_330, %c0_331] : memref<2x4x4x128xf32, #tpu.memory_space<vmem>>, vector<2x2x2x128xf32>
    tpu.vector_store %arg36[%c0_328, %c1_329, %c1_330, %c0_331], %160 {strides = array<i32>} : memref<2x4x4x128xf32, #tpu.memory_space<vmem>>, vector<2x2x2x128xf32>,
    %c0_332 = arith.constant 0 : index
    %c0_333 = arith.constant 0 : index
    %c0_334 = arith.constant 0 : index
    %c0_335 = arith.constant 0 : index
    %162 = vector.load %arg36[%c0_332, %c0_333, %c0_334, %c0_335] : memref<2x4x4x128xf32, #tpu.memory_space<vmem>>, vector<2x2x2x128xf32>
    %c0_336 = arith.constant 0 : index
    %c0_337 = arith.constant 0 : index
    %c1_338 = arith.constant 1 : index
    %c0_339 = arith.constant 0 : index
    %163 = vector.load %arg36[%c0_336, %c0_337, %c1_338, %c0_339] : memref<2x4x4x128xf32, #tpu.memory_space<vmem>>, vector<2x2x2x128xf32>
    %c0_340 = arith.constant 0 : index
    %c0_341 = arith.constant 0 : index
    %c2_342 = arith.constant 2 : index
    %c0_343 = arith.constant 0 : index
    %164 = vector.load %arg36[%c0_340, %c0_341, %c2_342, %c0_343] : memref<2x4x4x128xf32, #tpu.memory_space<vmem>>, vector<2x2x2x128xf32>
    %c0_344 = arith.constant 0 : index
    %c1_345 = arith.constant 1 : index
    %c0_346 = arith.constant 0 : index
    %c0_347 = arith.constant 0 : index
    %165 = vector.load %arg36[%c0_344, %c1_345, %c0_346, %c0_347] : memref<2x4x4x128xf32, #tpu.memory_space<vmem>>, vector<2x2x2x128xf32>
    %c0_348 = arith.constant 0 : index
    %c1_349 = arith.constant 1 : index
    %c1_350 = arith.constant 1 : index
    %c0_351 = arith.constant 0 : index
    %166 = vector.load %arg36[%c0_348, %c1_349, %c1_350, %c0_351] : memref<2x4x4x128xf32, #tpu.memory_space<vmem>>, vector<2x2x2x128xf32>
    %c0_352 = arith.constant 0 : index
    %c1_353 = arith.constant 1 : index
    %c2_354 = arith.constant 2 : index
    %c0_355 = arith.constant 0 : index
    %167 = vector.load %arg36[%c0_352, %c1_353, %c2_354, %c0_355] : memref<2x4x4x128xf32, #tpu.memory_space<vmem>>, vector<2x2x2x128xf32>
    %c0_356 = arith.constant 0 : index
    %c2_357 = arith.constant 2 : index
    %c0_358 = arith.constant 0 : index
    %c0_359 = arith.constant 0 : index
    %168 = vector.load %arg36[%c0_356, %c2_357, %c0_358, %c0_359] : memref<2x4x4x128xf32, #tpu.memory_space<vmem>>, vector<2x2x2x128xf32>
    %c0_360 = arith.constant 0 : index
    %c2_361 = arith.constant 2 : index
    %c1_362 = arith.constant 1 : index
    %c0_363 = arith.constant 0 : index
    %169 = vector.load %arg36[%c0_360, %c2_361, %c1_362, %c0_363] : memref<2x4x4x128xf32, #tpu.memory_space<vmem>>, vector<2x2x2x128xf32>
    %c0_364 = arith.constant 0 : index
    %c2_365 = arith.constant 2 : index
    %c2_366 = arith.constant 2 : index
    %c0_367 = arith.constant 0 : index
    %170 = vector.load %arg36[%c0_364, %c2_365, %c2_366, %c0_367] : memref<2x4x4x128xf32, #tpu.memory_space<vmem>>, vector<2x2x2x128xf32>
    %171 = tpu.concatenate %162, %163, %164, %165, %166, %167, %168, %169, %170 in 3 : vector<2x2x2x128xf32>, vector<2x2x2x128xf32>, vector<2x2x2x128xf32>, vector<2x2x2x128xf32>, vector<2x2x2x128xf32>, vector<2x2x2x128xf32>, vector<2x2x2x128xf32>, vector<2x2x2x128xf32>, vector<2x2x2x128xf32> -> vector<2x2x2x1152xf32>
    %172 = vector.shape_cast %171 : vector<2x2x2x1152xf32> to vector<8x1152xf32>
    %173 = arith.truncf %172 : vector<8x1152xf32> to vector<8x1152xbf16>
    %c0_368 = arith.constant 0 : index
    %c0_369 = arith.constant 0 : index
    %174 = vector.load %arg18[%c0_368, %c0_369] : memref<1152x128xbf16, #tpu.memory_space<vmem>>, vector<1152x128xbf16>
    %cst_370 = arith.constant dense<0.000000e+00> : vector<8x128xf32>
    %175 = tpu.matmul %173, %174, %cst_370 {dimension_numbers = #tpu.dot_dimension_numbers<[1], [0], [0], [1], [0, 0, 1, 1], [], []>} : vector<8x1152xbf16>, vector<1152x128xbf16>, vector<8x128xf32> -> vector<8x128xf32>
    %c0_371 = arith.constant 0 : index
    %c0_372 = arith.constant 0 : index
    %176 = vector.load %arg19[%c0_371, %c0_372] : memref<1x128xf32, #tpu.memory_space<vmem>>, vector<1x128xf32>
    %177 = vector.broadcast %176 : vector<1x128xf32> to vector<8x128xf32>
    %178 = arith.addf %175, %177 : vector<8x128xf32>
    %cst_373 = arith.constant 0.000000e+00 : f32
    %179 = vector.broadcast %cst_373 : f32 to vector<8x128xf32>
    %180 = arith.maximumf %178, %179 : vector<8x128xf32>
    %181 = vector.shape_cast %180 : vector<8x128xf32> to vector<2x2x2x128xf32>
    %182 = vector.shape_cast %181 : vector<2x2x2x128xf32> to vector<2x4x128xf32>
    %c0_374 = arith.constant 0 : index
    %c0_375 = arith.constant 0 : index
    %183 = vector.load %arg20[%c0_374, %c0_375] : memref<4x128xf32, #tpu.memory_space<vmem>>, vector<4x128xf32>
    %184 = vector.shape_cast %183 : vector<4x128xf32> to vector<1x4x128xf32>
    %185 = vector.broadcast %184 : vector<1x4x128xf32> to vector<2x4x128xf32>
    %186 = arith.mulf %182, %185 : vector<2x4x128xf32>
    %cst_376 = arith.constant dense<0.000000e+00> : vector<2x128xf32>
    %187 = vector.multi_reduction <add>, %186, %cst_376 [1] : vector<2x4x128xf32> to vector<2x128xf32>
    %c0_377 = arith.constant 0 : index
    %c0_378 = arith.constant 0 : index
    %188 = vector.load %arg21[%c0_377, %c0_378] : memref<1x128xf32, #tpu.memory_space<vmem>>, vector<1x128xf32>
    %189 = vector.broadcast %188 : vector<1x128xf32> to vector<2x128xf32>
    %190 = arith.addf %187, %189 : vector<2x128xf32>
    %191 = arith.truncf %190 : vector<2x128xf32> to vector<2x128xbf16>
    %c0_379 = arith.constant 0 : index
    %c0_380 = arith.constant 0 : index
    %192 = vector.load %arg22[%c0_379, %c0_380] : memref<128x2xbf16, #tpu.memory_space<vmem>>, vector<128x2xbf16>
    %cst_381 = arith.constant dense<0.000000e+00> : vector<2x2xf32>
    %193 = tpu.matmul %191, %192, %cst_381 {dimension_numbers = #tpu.dot_dimension_numbers<[1], [0], [0], [1], [0, 0, 1, 1], [], []>} : vector<2x128xbf16>, vector<128x2xbf16>, vector<2x2xf32> -> vector<2x2xf32>
    %c0_382 = arith.constant 0 : index
    %c0_383 = arith.constant 0 : index
    %194 = vector.load %arg23[%c0_382, %c0_383] : memref<1x2xf32, #tpu.memory_space<vmem>>, vector<1x2xf32>
    %195 = vector.broadcast %194 : vector<1x2xf32> to vector<2x2xf32>
    %196 = arith.addf %193, %195 : vector<2x2xf32>
    %c0_384 = arith.constant 0 : index
    %c0_385 = arith.constant 0 : index
    %197 = vector.load %arg30[%c0_384, %c0_385] : memref<2x2xf32, #tpu.memory_space<vmem>>, vector<2x2xf32>
    tpu.vector_store %arg30[%c0_384, %c0_385], %196 {strides = array<i32>} : memref<2x2xf32, #tpu.memory_space<vmem>>, vector<2x2xf32>,
    %c0_386 = arith.constant 0 : index
    %c0_387 = arith.constant 0 : index
    %c0_388 = arith.constant 0 : index
    %c0_389 = arith.constant 0 : index
    %198 = vector.load %arg35[%c0_386, %c0_387, %c0_388, %c0_389] : memref<2x6x6x128xf32, #tpu.memory_space<vmem>>, vector<2x4x4x128xf32>
    %c0_390 = arith.constant 0 : index
    %c0_391 = arith.constant 0 : index
    %c1_392 = arith.constant 1 : index
    %c0_393 = arith.constant 0 : index
    %199 = vector.load %arg35[%c0_390, %c0_391, %c1_392, %c0_393] : memref<2x6x6x128xf32, #tpu.memory_space<vmem>>, vector<2x4x4x128xf32>
    %c0_394 = arith.constant 0 : index
    %c0_395 = arith.constant 0 : index
    %c2_396 = arith.constant 2 : index
    %c0_397 = arith.constant 0 : index
    %200 = vector.load %arg35[%c0_394, %c0_395, %c2_396, %c0_397] : memref<2x6x6x128xf32, #tpu.memory_space<vmem>>, vector<2x4x4x128xf32>
    %c0_398 = arith.constant 0 : index
    %c1_399 = arith.constant 1 : index
    %c0_400 = arith.constant 0 : index
    %c0_401 = arith.constant 0 : index
    %201 = vector.load %arg35[%c0_398, %c1_399, %c0_400, %c0_401] : memref<2x6x6x128xf32, #tpu.memory_space<vmem>>, vector<2x4x4x128xf32>
    %c0_402 = arith.constant 0 : index
    %c1_403 = arith.constant 1 : index
    %c1_404 = arith.constant 1 : index
    %c0_405 = arith.constant 0 : index
    %202 = vector.load %arg35[%c0_402, %c1_403, %c1_404, %c0_405] : memref<2x6x6x128xf32, #tpu.memory_space<vmem>>, vector<2x4x4x128xf32>
    %c0_406 = arith.constant 0 : index
    %c1_407 = arith.constant 1 : index
    %c2_408 = arith.constant 2 : index
    %c0_409 = arith.constant 0 : index
    %203 = vector.load %arg35[%c0_406, %c1_407, %c2_408, %c0_409] : memref<2x6x6x128xf32, #tpu.memory_space<vmem>>, vector<2x4x4x128xf32>
    %c0_410 = arith.constant 0 : index
    %c2_411 = arith.constant 2 : index
    %c0_412 = arith.constant 0 : index
    %c0_413 = arith.constant 0 : index
    %204 = vector.load %arg35[%c0_410, %c2_411, %c0_412, %c0_413] : memref<2x6x6x128xf32, #tpu.memory_space<vmem>>, vector<2x4x4x128xf32>
    %c0_414 = arith.constant 0 : index
    %c2_415 = arith.constant 2 : index
    %c1_416 = arith.constant 1 : index
    %c0_417 = arith.constant 0 : index
    %205 = vector.load %arg35[%c0_414, %c2_415, %c1_416, %c0_417] : memref<2x6x6x128xf32, #tpu.memory_space<vmem>>, vector<2x4x4x128xf32>
    %c0_418 = arith.constant 0 : index
    %c2_419 = arith.constant 2 : index
    %c2_420 = arith.constant 2 : index
    %c0_421 = arith.constant 0 : index
    %206 = vector.load %arg35[%c0_418, %c2_419, %c2_420, %c0_421] : memref<2x6x6x128xf32, #tpu.memory_space<vmem>>, vector<2x4x4x128xf32>
    %207 = tpu.concatenate %198, %199, %200, %201, %202, %203, %204, %205, %206 in 3 : vector<2x4x4x128xf32>, vector<2x4x4x128xf32>, vector<2x4x4x128xf32>, vector<2x4x4x128xf32>, vector<2x4x4x128xf32>, vector<2x4x4x128xf32>, vector<2x4x4x128xf32>, vector<2x4x4x128xf32>, vector<2x4x4x128xf32> -> vector<2x4x4x1152xf32>
    %208 = vector.shape_cast %207 : vector<2x4x4x1152xf32> to vector<32x1152xf32>
    %209 = arith.truncf %208 : vector<32x1152xf32> to vector<32x1152xbf16>
    %c0_422 = arith.constant 0 : index
    %c0_423 = arith.constant 0 : index
    %210 = vector.load %arg24[%c0_422, %c0_423] : memref<1152x128xbf16, #tpu.memory_space<vmem>>, vector<1152x128xbf16>
    %cst_424 = arith.constant dense<0.000000e+00> : vector<32x128xf32>
    %211 = tpu.matmul %209, %210, %cst_424 {dimension_numbers = #tpu.dot_dimension_numbers<[1], [0], [0], [1], [0, 0, 1, 1], [], []>} : vector<32x1152xbf16>, vector<1152x128xbf16>, vector<32x128xf32> -> vector<32x128xf32>
    %c0_425 = arith.constant 0 : index
    %c0_426 = arith.constant 0 : index
    %212 = vector.load %arg25[%c0_425, %c0_426] : memref<1x128xf32, #tpu.memory_space<vmem>>, vector<1x128xf32>
    %213 = vector.broadcast %212 : vector<1x128xf32> to vector<32x128xf32>
    %214 = arith.addf %211, %213 : vector<32x128xf32>
    %cst_427 = arith.constant 0.000000e+00 : f32
    %215 = vector.broadcast %cst_427 : f32 to vector<32x128xf32>
    %216 = arith.maximumf %214, %215 : vector<32x128xf32>
    %217 = vector.shape_cast %216 : vector<32x128xf32> to vector<2x4x4x128xf32>
    %c0_428 = arith.constant 0 : index
    %c1_429 = arith.constant 1 : index
    %c1_430 = arith.constant 1 : index
    %c0_431 = arith.constant 0 : index
    %218 = vector.load %arg37[%c0_428, %c1_429, %c1_430, %c0_431] : memref<2x6x6x128xf32, #tpu.memory_space<vmem>>, vector<2x4x4x128xf32>
    tpu.vector_store %arg37[%c0_428, %c1_429, %c1_430, %c0_431], %217 {strides = array<i32>} : memref<2x6x6x128xf32, #tpu.memory_space<vmem>>, vector<2x4x4x128xf32>,
    %c0_432 = arith.constant 0 : index
    %c0_433 = arith.constant 0 : index
    %c0_434 = arith.constant 0 : index
    %c0_435 = arith.constant 0 : index
    %219 = vector.load %arg37[%c0_432, %c0_433, %c0_434, %c0_435] : memref<2x6x6x128xf32, #tpu.memory_space<vmem>>, vector<2x4x4x128xf32>
    %c0_436 = arith.constant 0 : index
    %c0_437 = arith.constant 0 : index
    %c1_438 = arith.constant 1 : index
    %c0_439 = arith.constant 0 : index
    %220 = vector.load %arg37[%c0_436, %c0_437, %c1_438, %c0_439] : memref<2x6x6x128xf32, #tpu.memory_space<vmem>>, vector<2x4x4x128xf32>
    %c0_440 = arith.constant 0 : index
    %c0_441 = arith.constant 0 : index
    %c2_442 = arith.constant 2 : index
    %c0_443 = arith.constant 0 : index
    %221 = vector.load %arg37[%c0_440, %c0_441, %c2_442, %c0_443] : memref<2x6x6x128xf32, #tpu.memory_space<vmem>>, vector<2x4x4x128xf32>
    %c0_444 = arith.constant 0 : index
    %c1_445 = arith.constant 1 : index
    %c0_446 = arith.constant 0 : index
    %c0_447 = arith.constant 0 : index
    %222 = vector.load %arg37[%c0_444, %c1_445, %c0_446, %c0_447] : memref<2x6x6x128xf32, #tpu.memory_space<vmem>>, vector<2x4x4x128xf32>
    %c0_448 = arith.constant 0 : index
    %c1_449 = arith.constant 1 : index
    %c1_450 = arith.constant 1 : index
    %c0_451 = arith.constant 0 : index
    %223 = vector.load %arg37[%c0_448, %c1_449, %c1_450, %c0_451] : memref<2x6x6x128xf32, #tpu.memory_space<vmem>>, vector<2x4x4x128xf32>
    %c0_452 = arith.constant 0 : index
    %c1_453 = arith.constant 1 : index
    %c2_454 = arith.constant 2 : index
    %c0_455 = arith.constant 0 : index
    %224 = vector.load %arg37[%c0_452, %c1_453, %c2_454, %c0_455] : memref<2x6x6x128xf32, #tpu.memory_space<vmem>>, vector<2x4x4x128xf32>
    %c0_456 = arith.constant 0 : index
    %c2_457 = arith.constant 2 : index
    %c0_458 = arith.constant 0 : index
    %c0_459 = arith.constant 0 : index
    %225 = vector.load %arg37[%c0_456, %c2_457, %c0_458, %c0_459] : memref<2x6x6x128xf32, #tpu.memory_space<vmem>>, vector<2x4x4x128xf32>
    %c0_460 = arith.constant 0 : index
    %c2_461 = arith.constant 2 : index
    %c1_462 = arith.constant 1 : index
    %c0_463 = arith.constant 0 : index
    %226 = vector.load %arg37[%c0_460, %c2_461, %c1_462, %c0_463] : memref<2x6x6x128xf32, #tpu.memory_space<vmem>>, vector<2x4x4x128xf32>
    %c0_464 = arith.constant 0 : index
    %c2_465 = arith.constant 2 : index
    %c2_466 = arith.constant 2 : index
    %c0_467 = arith.constant 0 : index
    %227 = vector.load %arg37[%c0_464, %c2_465, %c2_466, %c0_467] : memref<2x6x6x128xf32, #tpu.memory_space<vmem>>, vector<2x4x4x128xf32>
    %228 = tpu.concatenate %219, %220, %221, %222, %223, %224, %225, %226, %227 in 3 : vector<2x4x4x128xf32>, vector<2x4x4x128xf32>, vector<2x4x4x128xf32>, vector<2x4x4x128xf32>, vector<2x4x4x128xf32>, vector<2x4x4x128xf32>, vector<2x4x4x128xf32>, vector<2x4x4x128xf32>, vector<2x4x4x128xf32> -> vector<2x4x4x1152xf32>
    %229 = vector.shape_cast %228 : vector<2x4x4x1152xf32> to vector<32x1152xf32>
    %230 = arith.truncf %229 : vector<32x1152xf32> to vector<32x1152xbf16>
    %c0_468 = arith.constant 0 : index
    %c0_469 = arith.constant 0 : index
    %231 = vector.load %arg26[%c0_468, %c0_469] : memref<1152x64xbf16, #tpu.memory_space<vmem>>, vector<1152x64xbf16>
    %cst_470 = arith.constant dense<0.000000e+00> : vector<32x64xf32>
    %232 = tpu.matmul %230, %231, %cst_470 {dimension_numbers = #tpu.dot_dimension_numbers<[1], [0], [0], [1], [0, 0, 1, 1], [], []>} : vector<32x1152xbf16>, vector<1152x64xbf16>, vector<32x64xf32> -> vector<32x64xf32>
    %c0_471 = arith.constant 0 : index
    %c0_472 = arith.constant 0 : index
    %233 = vector.load %arg27[%c0_471, %c0_472] : memref<1x64xf32, #tpu.memory_space<vmem>>, vector<1x64xf32>
    %234 = vector.broadcast %233 : vector<1x64xf32> to vector<32x64xf32>
    %235 = arith.addf %232, %234 : vector<32x64xf32>
    %cst_473 = arith.constant 0.000000e+00 : f32
    %236 = vector.broadcast %cst_473 : f32 to vector<32x64xf32>
    %237 = arith.maximumf %235, %236 : vector<32x64xf32>
    %238 = vector.shape_cast %237 : vector<32x64xf32> to vector<2x4x4x64xf32>
    %c0_474 = arith.constant 0 : index
    %c1_475 = arith.constant 1 : index
    %c1_476 = arith.constant 1 : index
    %c0_477 = arith.constant 0 : index
    %239 = vector.load %arg38[%c0_474, %c1_475, %c1_476, %c0_477] : memref<2x6x6x64xf32, #tpu.memory_space<vmem>>, vector<2x4x4x64xf32>
    tpu.vector_store %arg38[%c0_474, %c1_475, %c1_476, %c0_477], %238 {strides = array<i32>} : memref<2x6x6x64xf32, #tpu.memory_space<vmem>>, vector<2x4x4x64xf32>,
    %c0_478 = arith.constant 0 : index
    %c0_479 = arith.constant 0 : index
    %c0_480 = arith.constant 0 : index
    %c0_481 = arith.constant 0 : index
    %240 = vector.load %arg38[%c0_478, %c0_479, %c0_480, %c0_481] : memref<2x6x6x64xf32, #tpu.memory_space<vmem>>, vector<2x4x4x64xf32>
    %c0_482 = arith.constant 0 : index
    %c0_483 = arith.constant 0 : index
    %c1_484 = arith.constant 1 : index
    %c0_485 = arith.constant 0 : index
    %241 = vector.load %arg38[%c0_482, %c0_483, %c1_484, %c0_485] : memref<2x6x6x64xf32, #tpu.memory_space<vmem>>, vector<2x4x4x64xf32>
    %c0_486 = arith.constant 0 : index
    %c0_487 = arith.constant 0 : index
    %c2_488 = arith.constant 2 : index
    %c0_489 = arith.constant 0 : index
    %242 = vector.load %arg38[%c0_486, %c0_487, %c2_488, %c0_489] : memref<2x6x6x64xf32, #tpu.memory_space<vmem>>, vector<2x4x4x64xf32>
    %c0_490 = arith.constant 0 : index
    %c1_491 = arith.constant 1 : index
    %c0_492 = arith.constant 0 : index
    %c0_493 = arith.constant 0 : index
    %243 = vector.load %arg38[%c0_490, %c1_491, %c0_492, %c0_493] : memref<2x6x6x64xf32, #tpu.memory_space<vmem>>, vector<2x4x4x64xf32>
    %c0_494 = arith.constant 0 : index
    %c1_495 = arith.constant 1 : index
    %c1_496 = arith.constant 1 : index
    %c0_497 = arith.constant 0 : index
    %244 = vector.load %arg38[%c0_494, %c1_495, %c1_496, %c0_497] : memref<2x6x6x64xf32, #tpu.memory_space<vmem>>, vector<2x4x4x64xf32>
    %c0_498 = arith.constant 0 : index
    %c1_499 = arith.constant 1 : index
    %c2_500 = arith.constant 2 : index
    %c0_501 = arith.constant 0 : index
    %245 = vector.load %arg38[%c0_498, %c1_499, %c2_500, %c0_501] : memref<2x6x6x64xf32, #tpu.memory_space<vmem>>, vector<2x4x4x64xf32>
    %c0_502 = arith.constant 0 : index
    %c2_503 = arith.constant 2 : index
    %c0_504 = arith.constant 0 : index
    %c0_505 = arith.constant 0 : index
    %246 = vector.load %arg38[%c0_502, %c2_503, %c0_504, %c0_505] : memref<2x6x6x64xf32, #tpu.memory_space<vmem>>, vector<2x4x4x64xf32>
    %c0_506 = arith.constant 0 : index
    %c2_507 = arith.constant 2 : index
    %c1_508 = arith.constant 1 : index
    %c0_509 = arith.constant 0 : index
    %247 = vector.load %arg38[%c0_506, %c2_507, %c1_508, %c0_509] : memref<2x6x6x64xf32, #tpu.memory_space<vmem>>, vector<2x4x4x64xf32>
    %c0_510 = arith.constant 0 : index
    %c2_511 = arith.constant 2 : index
    %c2_512 = arith.constant 2 : index
    %c0_513 = arith.constant 0 : index
    %248 = vector.load %arg38[%c0_510, %c2_511, %c2_512, %c0_513] : memref<2x6x6x64xf32, #tpu.memory_space<vmem>>, vector<2x4x4x64xf32>
    %249 = tpu.concatenate %240, %241, %242, %243, %244, %245, %246, %247, %248 in 3 : vector<2x4x4x64xf32>, vector<2x4x4x64xf32>, vector<2x4x4x64xf32>, vector<2x4x4x64xf32>, vector<2x4x4x64xf32>, vector<2x4x4x64xf32>, vector<2x4x4x64xf32>, vector<2x4x4x64xf32>, vector<2x4x4x64xf32> -> vector<2x4x4x576xf32>
    %c0_514 = arith.constant 0 : index
    %c0_515 = arith.constant 0 : index
    %250 = vector.load %arg28[%c0_514, %c0_515] : memref<1x576xf32, #tpu.memory_space<vmem>>, vector<1x576xf32>
    %251 = vector.shape_cast %250 : vector<1x576xf32> to vector<1x1x1x576xf32>
    %252 = vector.broadcast %251 : vector<1x1x1x576xf32> to vector<2x4x4x576xf32>
    %253 = arith.mulf %249, %252 : vector<2x4x4x576xf32>
    %cst_516 = arith.constant dense<0.000000e+00> : vector<2x4x4xf32>
    %254 = vector.multi_reduction <add>, %253, %cst_516 [3] : vector<2x4x4x576xf32> to vector<2x4x4xf32>
    %255 = vector.shape_cast %254 : vector<2x4x4xf32> to vector<2x4x4x1xf32>
    %c0_517 = arith.constant 0 : index
    %c0_518 = arith.constant 0 : index
    %256 = vector.load %arg29[%c0_517, %c0_518] : memref<1x1xf32, #tpu.memory_space<vmem>>, vector<1x1xf32>
    %257 = vector.shape_cast %256 : vector<1x1xf32> to vector<1x1x1x1xf32>
    %258 = vector.broadcast %257 : vector<1x1x1x1xf32> to vector<2x4x4x1xf32>
    %259 = arith.addf %255, %258 : vector<2x4x4x1xf32>
    %cst_519 = arith.constant 0.000000e+00 : f32
    %260 = vector.broadcast %cst_519 : f32 to vector<2x4x4x1xf32>
    %261 = arith.maximumf %259, %260 : vector<2x4x4x1xf32>
    %c0_520 = arith.constant 0 : index
    %c0_521 = arith.constant 0 : index
    %c0_522 = arith.constant 0 : index
    %c0_523 = arith.constant 0 : index
    %262 = vector.load %arg31[%c0_520, %c0_521, %c0_522, %c0_523] : memref<2x4x4x1xf32, #tpu.memory_space<vmem>>, vector<2x4x4x1xf32>
    tpu.vector_store %arg31[%c0_520, %c0_521, %c0_522, %c0_523], %261 {strides = array<i32>} : memref<2x4x4x1xf32, #tpu.memory_space<vmem>>, vector<2x4x4x1xf32>,
    return
  }
  func.func @transform_0(%arg0: i32) -> (i32, i32, i32) {
    %c0_i32 = arith.constant 0 : i32
    %c0_i32_0 = arith.constant 0 : i32
    %c0_i32_1 = arith.constant 0 : i32
    return %arg0, %c0_i32, %c0_i32_0 : i32, i32, i32
  }
  func.func @transform_1(%arg0: i32) -> (i32, i32) {
    %c0_i32 = arith.constant 0 : i32
    %c0_i32_0 = arith.constant 0 : i32
    %c0_i32_1 = arith.constant 0 : i32
    return %c0_i32, %c0_i32_0 : i32, i32
  }
  func.func @transform_2(%arg0: i32) -> (i32, i32) {
    %c0_i32 = arith.constant 0 : i32
    %c0_i32_0 = arith.constant 0 : i32
    %c0_i32_1 = arith.constant 0 : i32
    return %c0_i32, %c0_i32_0 : i32, i32
  }
  func.func @transform_3(%arg0: i32) -> (i32, i32) {
    %c0_i32 = arith.constant 0 : i32
    %c0_i32_0 = arith.constant 0 : i32
    %c0_i32_1 = arith.constant 0 : i32
    return %c0_i32, %c0_i32_0 : i32, i32
  }
  func.func @transform_4(%arg0: i32) -> (i32, i32) {
    %c0_i32 = arith.constant 0 : i32
    %c0_i32_0 = arith.constant 0 : i32
    %c0_i32_1 = arith.constant 0 : i32
    return %c0_i32, %c0_i32_0 : i32, i32
  }
  func.func @transform_5(%arg0: i32) -> (i32, i32) {
    %c0_i32 = arith.constant 0 : i32
    %c0_i32_0 = arith.constant 0 : i32
    %c0_i32_1 = arith.constant 0 : i32
    return %c0_i32, %c0_i32_0 : i32, i32
  }
  func.func @transform_6(%arg0: i32) -> (i32, i32) {
    %c0_i32 = arith.constant 0 : i32
    %c0_i32_0 = arith.constant 0 : i32
    %c0_i32_1 = arith.constant 0 : i32
    return %c0_i32, %c0_i32_0 : i32, i32
  }
  func.func @transform_7(%arg0: i32) -> (i32, i32) {
    %c0_i32 = arith.constant 0 : i32
    %c0_i32_0 = arith.constant 0 : i32
    %c0_i32_1 = arith.constant 0 : i32
    return %c0_i32, %c0_i32_0 : i32, i32
  }
  func.func @transform_8(%arg0: i32) -> (i32, i32) {
    %c0_i32 = arith.constant 0 : i32
    %c0_i32_0 = arith.constant 0 : i32
    %c0_i32_1 = arith.constant 0 : i32
    return %c0_i32, %c0_i32_0 : i32, i32
  }
  func.func @transform_9(%arg0: i32) -> (i32, i32) {
    %c0_i32 = arith.constant 0 : i32
    %c0_i32_0 = arith.constant 0 : i32
    %c0_i32_1 = arith.constant 0 : i32
    return %c0_i32, %c0_i32_0 : i32, i32
  }
  func.func @transform_10(%arg0: i32) -> (i32, i32) {
    %c0_i32 = arith.constant 0 : i32
    %c0_i32_0 = arith.constant 0 : i32
    %c0_i32_1 = arith.constant 0 : i32
    return %c0_i32, %c0_i32_0 : i32, i32
  }
  func.func @transform_11(%arg0: i32) -> (i32, i32) {
    %c0_i32 = arith.constant 0 : i32
    %c0_i32_0 = arith.constant 0 : i32
    %c0_i32_1 = arith.constant 0 : i32
    return %c0_i32, %c0_i32_0 : i32, i32
  }
  func.func @transform_12(%arg0: i32) -> (i32, i32) {
    %c0_i32 = arith.constant 0 : i32
    %c0_i32_0 = arith.constant 0 : i32
    %c0_i32_1 = arith.constant 0 : i32
    return %c0_i32, %c0_i32_0 : i32, i32
  }
  func.func @transform_13(%arg0: i32) -> (i32, i32) {
    %c0_i32 = arith.constant 0 : i32
    %c0_i32_0 = arith.constant 0 : i32
    %c0_i32_1 = arith.constant 0 : i32
    return %c0_i32, %c0_i32_0 : i32, i32
  }
  func.func @transform_14(%arg0: i32) -> (i32, i32) {
    %c0_i32 = arith.constant 0 : i32
    %c0_i32_0 = arith.constant 0 : i32
    %c0_i32_1 = arith.constant 0 : i32
    return %c0_i32, %c0_i32_0 : i32, i32
  }
  func.func @transform_15(%arg0: i32) -> (i32, i32) {
    %c0_i32 = arith.constant 0 : i32
    %c0_i32_0 = arith.constant 0 : i32
    %c0_i32_1 = arith.constant 0 : i32
    return %c0_i32, %c0_i32_0 : i32, i32
  }
  func.func @transform_16(%arg0: i32) -> (i32, i32) {
    %c0_i32 = arith.constant 0 : i32
    %c0_i32_0 = arith.constant 0 : i32
    %c0_i32_1 = arith.constant 0 : i32
    return %c0_i32, %c0_i32_0 : i32, i32
  }
  func.func @transform_17(%arg0: i32) -> (i32, i32) {
    %c0_i32 = arith.constant 0 : i32
    %c0_i32_0 = arith.constant 0 : i32
    %c0_i32_1 = arith.constant 0 : i32
    return %c0_i32, %c0_i32_0 : i32, i32
  }
  func.func @transform_18(%arg0: i32) -> (i32, i32) {
    %c0_i32 = arith.constant 0 : i32
    %c0_i32_0 = arith.constant 0 : i32
    %c0_i32_1 = arith.constant 0 : i32
    return %c0_i32, %c0_i32_0 : i32, i32
  }
  func.func @transform_19(%arg0: i32) -> (i32, i32) {
    %c0_i32 = arith.constant 0 : i32
    %c0_i32_0 = arith.constant 0 : i32
    %c0_i32_1 = arith.constant 0 : i32
    return %c0_i32, %c0_i32_0 : i32, i32
  }
  func.func @transform_20(%arg0: i32) -> (i32, i32) {
    %c0_i32 = arith.constant 0 : i32
    %c0_i32_0 = arith.constant 0 : i32
    %c0_i32_1 = arith.constant 0 : i32
    return %c0_i32, %c0_i32_0 : i32, i32
  }
  func.func @transform_21(%arg0: i32) -> (i32, i32) {
    %c0_i32 = arith.constant 0 : i32
    %c0_i32_0 = arith.constant 0 : i32
    %c0_i32_1 = arith.constant 0 : i32
    return %c0_i32, %c0_i32_0 : i32, i32
  }
  func.func @transform_22(%arg0: i32) -> (i32, i32) {
    %c0_i32 = arith.constant 0 : i32
    %c0_i32_0 = arith.constant 0 : i32
    %c0_i32_1 = arith.constant 0 : i32
    return %c0_i32, %c0_i32_0 : i32, i32
  }
  func.func @transform_23(%arg0: i32) -> (i32, i32) {
    %c0_i32 = arith.constant 0 : i32
    %c0_i32_0 = arith.constant 0 : i32
    %c0_i32_1 = arith.constant 0 : i32
    return %c0_i32, %c0_i32_0 : i32, i32
  }
  func.func @transform_24(%arg0: i32) -> (i32, i32) {
    %c0_i32 = arith.constant 0 : i32
    %c0_i32_0 = arith.constant 0 : i32
    %c0_i32_1 = arith.constant 0 : i32
    return %c0_i32, %c0_i32_0 : i32, i32
  }
  func.func @transform_25(%arg0: i32) -> (i32, i32) {
    %c0_i32 = arith.constant 0 : i32
    %c0_i32_0 = arith.constant 0 : i32
    %c0_i32_1 = arith.constant 0 : i32
    return %c0_i32, %c0_i32_0 : i32, i32
  }
  func.func @transform_26(%arg0: i32) -> (i32, i32) {
    %c0_i32 = arith.constant 0 : i32
    %c0_i32_0 = arith.constant 0 : i32
    %c0_i32_1 = arith.constant 0 : i32
    return %c0_i32, %c0_i32_0 : i32, i32
  }
  func.func @transform_27(%arg0: i32) -> (i32, i32) {
    %c0_i32 = arith.constant 0 : i32
    %c0_i32_0 = arith.constant 0 : i32
    %c0_i32_1 = arith.constant 0 : i32
    return %c0_i32, %c0_i32_0 : i32, i32
  }
  func.func @transform_28(%arg0: i32) -> (i32, i32) {
    %c0_i32 = arith.constant 0 : i32
    %c0_i32_0 = arith.constant 0 : i32
    %c0_i32_1 = arith.constant 0 : i32
    return %c0_i32, %c0_i32_0 : i32, i32
  }
  func.func @transform_29(%arg0: i32) -> (i32, i32) {
    %c0_i32 = arith.constant 0 : i32
    %c0_i32_0 = arith.constant 0 : i32
    return %arg0, %c0_i32 : i32, i32
  }
  func.func @transform_30(%arg0: i32) -> (i32, i32, i32, i32) {
    %c0_i32 = arith.constant 0 : i32
    %c0_i32_0 = arith.constant 0 : i32
    %c0_i32_1 = arith.constant 0 : i32
    %c0_i32_2 = arith.constant 0 : i32
    return %arg0, %c0_i32, %c0_i32_0, %c0_i32_1 : i32, i32, i32, i32
  }
}

</mosaic_0001>

<bundles_post_ra>
// kernel: _lambda_.1
= control target key start
LH: loop header
LB: loop body
LE: loop exit
PB: predicated region body
PF: predicated region fallthrough
CT: control target
= control target key end

     0   :  { %s13203_s6 = smov 1   ;;  %s13204_s10 = smov 2   ;;  %s15652_s0 = inlined_call_operand.smem [shape: u32[31], index: -1, kind: input, shape index: {}] }
   0x1   :  { %s13259_s5 = sld [smem:[%s15652_s0]]   ;;  %s13205_s14 = smov 3  }
   0x2   :  { %s13264_s9 = sld [smem:[%s15652_s0 + %s13203_s6]]   ;;  %s13206_s18 = smov 4  }
   0x3   :  { %s13269_s13 = sld [smem:[%s15652_s0 + %s13204_s10]]   ;;  %s13207_s22 = smov 5  }
   0x4   :  { %s13274_s17 = sld [smem:[%s15652_s0 + %s13205_s14]]   ;;  %s13208_s26 = smov 6  }
   0x5   :  { %s13279_s21 = sld [smem:[%s15652_s0 + %s13206_s18]]   ;;  %s13209_s30 = smov 7  }
   0x6   :  { %s13284_s25 = sld [smem:[%s15652_s0 + %s13207_s22]]   ;;  %s13210_s4 = smov 8  }
   0x7   :  { %s13289_s29 = sld [smem:[%s15652_s0 + %s13208_s26]]   ;;  %s13211_s10 = smov 9  }
   0x8   :  { %s13294_s3 = sld [smem:[%s15652_s0 + %s13209_s30]]   ;;  %s13212_s15 = smov 10  }
   0x9   :  { %s13299_s8 = sld [smem:[%s15652_s0 + %s13210_s4]]   ;;  %s13213_s20 = smov 11  }
   0xa   :  { %s13304_s14 = sld [smem:[%s15652_s0 + %s13211_s10]]   ;;  %s13214_s26 = smov 12  }
   0xb   :  { %s13309_s19 = sld [smem:[%s15652_s0 + %s13212_s15]]   ;;  %s13215_s1 = smov 13  }
   0xc   :  { %s13314_s24 = sld [smem:[%s15652_s0 + %s13213_s20]]   ;;  %s13216_s7 = smov 14  }
   0xd   :  { %s13319_s30 = sld [smem:[%s15652_s0 + %s13214_s26]]   ;;  %s13217_s15 = smov 15  }
   0xe   :  { %s13324_s6 = sld [smem:[%s15652_s0 + %s13215_s1]]   ;;  %s13218_s22 = smov 16  }
   0xf   :  { %s13329_s12 = sld [smem:[%s15652_s0 + %s13216_s7]]   ;;  %s13219_s28 = smov 17  }
  0x10   :  { %s13334_s20 = sld [smem:[%s15652_s0 + %s13217_s15]]   ;;  %s13220_s7 = smov 18  }
  0x11   :  { %s13339_s27 = sld [smem:[%s15652_s0 + %s13218_s22]]   ;;  %s13221_s15 = smov 19  }
  0x12   :  { %s13344_s4 = sld [smem:[%s15652_s0 + %s13219_s28]]   ;;  %s13222_s22 = smov 20  }
  0x13   :  { %15658 = sst [smem:[#allocation23_spill]] %s13319_s30  ;;  %s13223_s28 = smov 21  }
  0x14   :  { %15659 = sst [smem:[#allocation24_spill]] %s13324_s6  ;;  %s13231_s1 = smov 29  }
  0x15   :  { %15660 = sst [smem:[#allocation25_spill]] %s13329_s12  ;;  %s13232_s10 = smov 30  }
  0x16   :  { %15661 = sst [smem:[#allocation26_spill]] %s13334_s20 }
  0x17   :  { %15662 = sst [smem:[#allocation27_spill]] %s13339_s27 }
  0x18   :  { %15663 = sst [smem:[#allocation28_spill]] %s13344_s4 }
  0x19   :  { %s13349_s12 = sld [smem:[%s15652_s0 + %s13220_s7]]   ;;  %s13224_s7 = smov 22  }
  0x1a   :  { %s13354_s20 = sld [smem:[%s15652_s0 + %s13221_s15]]   ;;  %s13225_s15 = smov 23  }
  0x1b   :  { %s13359_s27 = sld [smem:[%s15652_s0 + %s13222_s22]]   ;;  %s13226_s22 = smov 24  }
  0x1c   :  { %s13364_s4 = sld [smem:[%s15652_s0 + %s13223_s28]]   ;;  %s13227_s28 = smov 25  }
  0x1d   :  { %s13374_s30 = sld [smem:[%s15652_s0 + %s13225_s15]]   ;;  %s13229_s15 = smov 27  }
  0x1e   :  { %s13384_s6 = sld [smem:[%s15652_s0 + %s13227_s28]]  }
  0x1f   :  { %15664 = sst [smem:[#allocation29_spill]] %s13349_s12 }
  0x20   :  { %s13369_s12 = sld [smem:[%s15652_s0 + %s13224_s7]]   ;;  %s13228_s7 = smov 26  }
  0x21   :  { %15665 = sst [smem:[#allocation30_spill]] %s13359_s27 }
  0x22   :  { %s13379_s27 = sld [smem:[%s15652_s0 + %s13226_s22]]   ;;  %s13230_s22 = smov 28  }
  0x23   :  { %15667 = sst [smem:[#allocation32_spill]] %s13374_s30 }
  0x24   :  { %15669 = sst [smem:[#allocation34_spill]] %s13384_s6 }
  0x25   :  { %s13394_s30 = sld [smem:[%s15652_s0 + %s13229_s15]]  }
  0x26   :  { %15666 = sst [smem:[#allocation31_spill]] %s13369_s12 }
  0x27   :  { %s13389_s12 = sld [smem:[%s15652_s0 + %s13228_s7]]  }
  0x28   :  { %15668 = sst [smem:[#allocation33_spill]] %s13379_s27 }
  0x29   :  { %s10718_s27 = sld [smem:[%s15652_s0 + %s13230_s22]]  }
  0x2a   :  { %s13402_s6 = sld [smem:[%s15652_s0 + %s13231_s1]]  }
  0x2d   :  { %15670 = sst [smem:[#allocation35_spill]] %s13389_s12 }
  0x2e   :  { %s13407_s12 = sld [smem:[%s15652_s0 + %s13232_s10]]  }
  0x2f   :  { %v67_v0 = vstv %s10718_s27 }
  0x30   :  { %68 = vst [vmem:[#allocation9] sm:$0x1] %v67_v0 }
  0x31   :  { %69 = vsyncpa [#allocation11], 0 }
  0x32   :  { %70 = vsyncpa [#allocation14], 0 }
  0x33   :  { %71 = vsyncpa [#allocation17], 0 }
  0x34   :  { %72 = vsyncpa [#allocation12], 0  ;;  %s13233_s15 = smov [#allocation13]   ;;  %s13234_s18 = smov [#allocation10]  }
  0x35   :  { %s127_s16 = sshll.u32 %s13233_s15, 4  ;;  %s80_s22 = sshll.u32 %s13234_s18, 4  ;;  %s128_s16 = int_to_ptr.vmem [resolvable:$true] %s127_s16  ;;  %s13409_s22 = int_to_ptr.vmem [resolvable:$true] %s80_s22 }
  0x36   :  { %s13085_s23 = scalar_lea.hbm %s13354_s20, 64 }
  0x37   :  { %p13086_p0 = scmp.ne.s32.totalorder %s13354_s20, %s13085_s23  ;;  %p13089_p1 = scmp.lt.u32.totalorder %s13085_s23, %s13354_s20 }
  0x39   :  { %p13091_p2 = pnand %p13089_p1, %p13086_p0 }
  0x3b   :  { %13094 = shalt.err (!%p13091_p2)
}
  0x3c   :  { %s13095_s0 = scalar_lea.vmem %s128_s16, 64  ;;  %p13100_p4 = scmp.lt.s32.totalorder %s128_s16, %s128_s16 }
  0x3d   :  { %p13096_p3 = scmp.ne.s32.totalorder %s128_s16, %s13095_s0  ;;  %p13101_p5 = scmp.lt.s32.totalorder %s13095_s0, %s13095_s0 }
  0x3f   :  { %p13102_p6 = por %p13101_p5, %p13100_p4 }
  0x41   :  { %p13103_p7 = pnand %p13102_p6, %p13096_p3 }
  0x43   :  { %13106 = shalt.err (!%p13103_p7)
}
  0x44   :  { %130 = dma.hbm_to_vmem [thread:$0]  %s13354_s20, 64, %s128_s16, [#allocation14]  }
  0x45   :  { %s13107_s27 = scalar_lea.hbm %s13264_s9, 256 }
  0x46   :  { %p13108_p8 = scmp.ne.s32.totalorder %s13264_s9, %s13107_s27  ;;  %p13111_p9 = scmp.lt.u32.totalorder %s13107_s27, %s13264_s9 }
  0x48   :  { %p13113_p10 = pnand %p13111_p9, %p13108_p8 }
  0x4a   :  { %13116 = shalt.err (!%p13113_p10)
}
  0x4b   :  { %s13117_s26 = scalar_lea.vmem %s13409_s22, 256  ;;  %p13122_p12 = scmp.lt.s32.totalorder %s13409_s22, %s13409_s22 }
  0x4c   :  { %p13118_p11 = scmp.ne.s32.totalorder %s13409_s22, %s13117_s26  ;;  %p13123_p13 = scmp.lt.s32.totalorder %s13117_s26, %s13117_s26 }
  0x4e   :  { %p13124_p0 = por %p13123_p13, %p13122_p12 }
  0x50   :  { %p13125_p1 = pnand %p13124_p0, %p13118_p11 }
  0x52   :  { %13128 = shalt.err (!%p13125_p1)
}
  0x53   :  { %s13235_s1 = smov 64   ;;  %s13236_s20 = smov 4  }
  0x54   :  { %86 = dma.hbm_to_vmem [thread:$0]  %s13264_s9, 256, %s13409_s22, [#allocation11], %s13235_s1, %s13235_s1, %s13236_s20  }
  0x55   :  { %s13237_s28 = smov [#allocation15]   ;;  %s13238_s10 = smov [#allocation16]  }
  0x56   :  { %s138_s2 = sshll.u32 %s13237_s28, 4  ;;  %s161_s7 = sshll.u32 %s13238_s10, 4  ;;  %s139_s2 = int_to_ptr.vmem [resolvable:$true] %s138_s2  ;;  %s162_s7 = int_to_ptr.vmem [resolvable:$true] %s161_s7 }
  0x57   :  { %s13129_s11 = scalar_lea.hbm %s13364_s4, 1024 }
  0x58   :  { %p13130_p2 = scmp.ne.s32.totalorder %s13364_s4, %s13129_s11  ;;  %p13133_p3 = scmp.lt.u32.totalorder %s13129_s11, %s13364_s4 }
  0x5a   :  { %p13135_p4 = pnand %p13133_p3, %p13130_p2 }
  0x5c   :  { %13138 = shalt.err (!%p13135_p4)
}
  0x5d   :  { %s13139_s15 = scalar_lea.vmem %s139_s2, 1024  ;;  %p13144_p6 = scmp.lt.s32.totalorder %s139_s2, %s139_s2 }
  0x5e   :  { %p13140_p5 = scmp.ne.s32.totalorder %s139_s2, %s13139_s15  ;;  %p13145_p7 = scmp.lt.s32.totalorder %s13139_s15, %s13139_s15 }
  0x60   :  { %p13146_p8 = por %p13145_p7, %p13144_p6 }
  0x62   :  { %p13147_p9 = pnand %p13146_p8, %p13140_p5 }
  0x64   :  { %13150 = shalt.err (!%p13147_p9)
}
  0x65   :  { %144 = dma.hbm_to_vmem [thread:$0]  %s13364_s4, 1024, %s139_s2, [#allocation14], %s13235_s1, %s13235_s1, %s13236_s20  }
  0x66   :  { %s13151_s9 = scalar_lea.hbm %s13394_s30, 80 }
  0x67   :  { %p13152_p10 = scmp.ne.s32.totalorder %s13394_s30, %s13151_s9  ;;  %p13155_p11 = scmp.lt.u32.totalorder %s13151_s9, %s13394_s30 }
  0x69   :  { %p13157_p12 = pnand %p13155_p11, %p13152_p10 }
  0x6b   :  { %13160 = shalt.err (!%p13157_p12)
}
  0x6c   :  { %s13161_s16 = scalar_lea.vmem %s162_s7, 80  ;;  %s13165_s18 = scalar_lea.vmem %s162_s7, 96 }
  0x6d   :  { %p13162_p13 = scmp.ne.s32.totalorder %s162_s7, %s13161_s16  ;;  %p13166_p0 = scmp.lt.s32.totalorder %s162_s7, %s162_s7 }
  0x6e   :  { %p13167_p1 = scmp.lt.s32.totalorder %s13165_s18, %s13161_s16 }
  0x70   :  { %p13168_p2 = por %p13167_p1, %p13166_p0 }
  0x72   :  { %p13169_p3 = pnand %p13168_p2, %p13162_p13 }
  0x74   :  { %13172 = shalt.err (!%p13169_p3)
}
  0x75   :  { %164 = dma.hbm_to_vmem [thread:$0]  %s13394_s30, 80, %s162_s7, [#allocation17]  }
  0x76   :  { %13195 = dma.done.wait [#allocation11], 256  }
  0x77   :  { %13196 = vsyncadd [#allocation11], 4294967040 }
  0x78   :  { %13197 = dma.done.wait [#allocation14], 1088  }
  0x79   :  { %13198 = vsyncadd [#allocation14], 4294966208 }
  0x7a   :  { %13199 = dma.done.wait [#allocation17], 80  }
  0x7b   :  { %13200 = vsyncadd [#allocation17], 4294967216  ;;  %vm477_vm0 = vcmask 1044480   ;;  %vm478_vm1 = vcmask 1045504   ;;  %v13239_v1 = vmov 65535   ;;  %v12535_v3 = vld [vmem:[#allocation10] sm:$0xff]  }
  0x7c   :  { %v479_v2 = vsel %vm477_vm0, 4294967295, %v13239_v1  ;;  %v12536_v5 = vld [vmem:[#allocation10 + $0x8] sm:$0x3f]   ;;  %12039 = vmatprep.subr.bf16.mxu0 %v12535_v3  ;;  %v406_v6 = vld [vmem:[%s13259_s5] sm:$0xff]  ;;  %vm452_vm2 = vcmask 220160   ;;  %v408_v10 = vld [vmem:[%s13259_s5 + $0x10] sm:$0xff] }
  0x7d   :  { %v480_v4 = vsel %vm478_vm1, %v479_v2, 0  ;;  %v407_v7 = vld [vmem:[%s13259_s5 + $0x8] sm:$0xff]  ;;  %12040 = vmatpush3.bf16.msra.mxu0 %v12535_v3  ;;  %v409_v11 = vld [vmem:[%s13259_s5 + $0x18] sm:$0xff]  ;;  %v410_v12 = vld [vmem:[%s13259_s5 + $0x20] sm:$0xff]  ;;  %vm184_vm3 = vcmask 130048   ;;  %vm186_vm4 = vcmask 123904  }
  0x7e   :  { %v482_v8 = vand.u32 %v12536_v5, %v480_v4  ;;  %v422_v9 = vpack.c.bf16 %v407_v7, %v406_v6  ;;  %v411_v13 = vld [vmem:[%s13259_s5 + $0x28] sm:$0xff]  ;;  %v423_v14 = vpack.c.bf16 %v409_v11, %v408_v10  ;;  %v412_v16 = vld [vmem:[%s13259_s5 + $0x30] sm:$0xff]  ;;  %v413_v17 = vld [vmem:[%s13259_s5 + $0x38] sm:$0xff]  ;;  %vm195_vm5 = vcmask 122880   ;;  %s13244_s30 = smov 32   ;;  %s13245_s4 = smov 80  }
  0x7f   :  { %v424_v15 = vpack.c.bf16 %v411_v13, %v410_v12  ;;  %v414_v18 = vld [vmem:[%s13259_s5 + $0x40] sm:$0xff]  ;;  %v415_v19 = vld [vmem:[%s13259_s5 + $0x48] sm:$0xff]  ;;  %v425_v20 = vpack.c.bf16 %v413_v17, %v412_v16  ;;  %v416_v22 = vld [vmem:[%s13259_s5 + $0x50] sm:$0xff]  ;;  %v13240_v31 = vmov 0.0   ;;  %v13241_v33 = vmov 0   ;;  %s13247_s22 = smov 96  }
  0x80   :  { %12041 = vmatprep.subr.bf16.mxu0 %v482_v8  ;;  %12043 = vmatprep.mubr.msk.bf16.mxu0 %vm452_vm2, %v422_v9  ;;  %v426_v21 = vpack.c.bf16 %v415_v19, %v414_v18  ;;  %v417_v23 = vld [vmem:[%s13259_s5 + $0x58] sm:$0xff]  ;;  %v418_v24 = vld [vmem:[%s13259_s5 + $0x60] sm:$0xff]  ;;  %v419_v25 = vld [vmem:[%s13259_s5 + $0x68] sm:$0xff]  ;;  %185 = vst.msk [vmem:[#allocation2] sm:$0xff] %vm184_vm3, %v13240_v31  ;;  %vm1224_vm6 = vcmask 261120   ;;  %vm1241_vm7 = vcmask 392192  }
  0x81   :  { %12042 = vmatpush3.bf16.msra.mxu0 %v482_v8  ;;  %v427_v26 = vpack.c.bf16 %v417_v23, %v416_v22  ;;  %v428_v27 = vpack.c.bf16 %v419_v25, %v418_v24  ;;  %v420_v28 = vld [vmem:[%s13259_s5 + $0x70] sm:$0xff]  ;;  %v421_v29 = vld [vmem:[%s13259_s5 + $0x78] sm:$0xff]  ;;  %187 = vst.msk [vmem:[#allocation2 + $0x8] sm:$0x3] %vm186_vm4, %v13240_v31  ;;  %189 = vst.msk [vmem:[#allocation2 + $0xa8] sm:$0x3] %vm186_vm4, %v13240_v31  ;;  %1445 = vmatprep.subr.bf16.mxu1 %v13241_v33 }
  0x82   :  { %v429_v30 = vpack.c.bf16 %v421_v29, %v420_v28  ;;  %188 = vst.msk [vmem:[#allocation2 + $0xa0] sm:$0xff] %vm184_vm3, %v13240_v31  ;;  %191 = vst.msk [vmem:[#allocation2 + $0x90] sm:$0xff] %vm184_vm3, %v13240_v31  ;;  %v12537_v32 = vld [vmem:[%s13274_s17] sm:$0xff]   ;;  %2124 = vmatprep.subr.bf16.mxu0 %v13241_v33  ;;  %v12538_v34 = vld [vmem:[%s13274_s17 + $0x8] sm:$0xff]   ;;  %s13242_s5 = smov 16   ;;  %vm1258_vm8 = vcmask 523264  }
  0x83   :  { %192 = vst.msk [vmem:[#allocation2 + $0x98] sm:$0x3] %vm186_vm4, %v13240_v31  ;;  %194 = vst.msk [vmem:[#allocation2 + $0x138] sm:$0x3] %vm186_vm4, %v13240_v31  ;;  %1446 = vmatpush1.bf16.msra.mxu1 %v12537_v32  ;;  %v13634_v35 = vld [vmem:[%s13269_s13] ss:$0 sm:$0xff] }
  0x84   :  { %12044 = vmatmul.mubr.msk.bf16.vlgmr.msra.gmra.mrb[0].mxu0 %vm452_vm2, %v423_v14  ;;  %193 = vst.msk [vmem:[#allocation2 + $0x130] sm:$0xff] %vm184_vm3, %v13240_v31  ;;  %298 = vst [vmem:[#allocation5] sm:$0x3f] %v13240_v31  ;;  %1447 = vmatprep.subr.bf16.mxu1 %v13241_v33  ;;  %v12539_v36 = vld [vmem:[%s13274_s17 + $0x10] sm:$0xff]   ;;  %v12540_v42 = vld [vmem:[%s13274_s17 + $0x18] sm:$0xff]   ;;  %s13243_s13 = smov 48  }
  0x85   :  { %12047 = vmatprep.mubr.msk.bf16.mxu0 %vm452_vm2, %v424_v15  ;;  %299 = vst [vmem:[#allocation5 + $0x30] sm:$0x3f] %v13240_v31  ;;  %301 = vst [vmem:[#allocation5 + $0x28] sm:$0x3f] %v13240_v31  ;;  %v12541_v50 = vld [vmem:[%s13274_s17 + $0x20] sm:$0xff]   ;;  %v12542_v56 = vld [vmem:[%s13274_s17 + $0x28] sm:$0xff]  }
  0x86   :  { %302 = vst [vmem:[#allocation5 + $0x58] sm:$0x3f] %v13240_v31  ;;  %304 = vst [vmem:[#allocation5 + $0x8] sm:$0x1] %v13240_v31  ;;  %v12543_v13 = vld [vmem:[%s13274_s17 + $0x30] sm:$0xff]   ;;  %v12544_v19 = vld [vmem:[%s13274_s17 + $0x38] sm:$0xff]  }
  0x87   :  { %305 = vst [vmem:[#allocation5 + $0x10] sm:$0x1] %v13240_v31  ;;  %306 = vst [vmem:[#allocation5 + $0x18] sm:$0x1] %v13240_v31  ;;  %1448 = vmatpush1.bf16.msra.mxu1 %v12538_v34  ;;  %vm1275_vm9 = vcmask 654336   ;;  %vm1292_vm10 = vcmask 785408  }
  0x88   :  { %307 = vst [vmem:[#allocation5 + $0x20] sm:$0x1] %v13240_v31  ;;  %310 = vst [vmem:[#allocation5 + $0x38] sm:$0x1] %v13240_v31  ;;  %1449 = vmatprep.subr.bf16.mxu1 %v13241_v33  ;;  %v631_v58 = vld [vmem:[#allocation2 + $0x1] sm:$0xff]  ;;  %vm1309_vm11 = vcmask 916480  }
  0x89   :  { %311 = vst [vmem:[#allocation5 + $0x40] sm:$0x1] %v13240_v31  ;;  %312 = vst [vmem:[#allocation5 + $0x48] sm:$0x1] %v13240_v31  ;;  %vm236_vm12 = vcmask 259072   ;;  %vm242_vm13 = vcmask 253952  }
  0x8a   :  { %313 = vst [vmem:[#allocation5 + $0x50] sm:$0x1] %v13240_v31  ;;  %316 = vst [vmem:[#allocation5 + $0xd] sm:$0x1] %v13240_v31  ;;  %vm2190_vm14 = vcmask 257024   ;;  %vm267_vm15 = vcmask 521216  }
  0x8b   :  { %317 = vst [vmem:[#allocation5 + $0x15] sm:$0x1] %v13240_v31  ;;  %318 = vst [vmem:[#allocation5 + $0x1d] sm:$0x1] %v13240_v31  ;;  %1450 = vmatpush1.bf16.msra.mxu1 %v12539_v36  ;;  %vm273_vm0 = vcmask 516096   ;;  %vm3499_vm1 = vcmask 519168  }
  0x8c   :  { %12048 = vmatmul.mubr.msk.bf16.gmra.mrb[4].mxu0 %vm452_vm2, %v425_v20  ;;  %319 = vst [vmem:[#allocation5 + $0x25] sm:$0x1] %v13240_v31  ;;  %322 = vst [vmem:[#allocation5 + $0x3d] sm:$0x1] %v13240_v31  ;;  %1451 = vmatprep.subr.bf16.mxu1 %v13241_v33  ;;  %s15679_s23 = sld [smem:[#allocation30_spill]]  ;;  %vm7849_vm4 = vcmask 1041409  }
  0x8d   :  { %12051 = vmatprep.mubr.msk.bf16.mxu0 %vm452_vm2, %v426_v21  ;;  %323 = vst [vmem:[#allocation5 + $0x45] sm:$0x1] %v13240_v31  ;;  %324 = vst [vmem:[#allocation5 + $0x4d] sm:$0x1] %v13240_v31  ;;  %s15680_s0 = sld [smem:[#allocation34_spill]]  ;;  %s15681_s27 = sld [smem:[#allocation31_spill]] }
  0x8e   :  { %325 = vst [vmem:[#allocation5 + $0x55] sm:$0x1] %v13240_v31  ;;  %327 = vst [vmem:[#allocation6] sm:$0xf] %v13240_v31  ;;  %s15682_s26 = sld [smem:[#allocation33_spill]]  ;;  %s15683_s20 = sld [smem:[#allocation35_spill]] }
  0x8f   :  { %328 = vst [vmem:[#allocation6 + $0x10] sm:$0xf] %v13240_v31  ;;  %330 = vst [vmem:[#allocation6 + $0xc] sm:$0xf] %v13240_v31  ;;  %1452 = vmatpush1.bf16.msra.mxu1 %v12540_v42 }
  0x90   :  { %331 = vst [vmem:[#allocation6 + $0x1c] sm:$0xf] %v13240_v31  ;;  %333 = vst [vmem:[#allocation6 + $0x4] sm:$0x1] %v13240_v31  ;;  %1453 = vmatprep.subr.bf16.mxu1 %v13241_v33 }
  0x91   :  { %334 = vst [vmem:[#allocation6 + $0x8] sm:$0x1] %v13240_v31  ;;  %337 = vst [vmem:[#allocation6 + $0x14] sm:$0x1] %v13240_v31 }
  0x92   :  { %338 = vst [vmem:[#allocation6 + $0x18] sm:$0x1] %v13240_v31  ;;  %341 = vst [vmem:[#allocation6 + $0x7] sm:$0x1] %v13240_v31 }
  0x93   :  { %342 = vst [vmem:[#allocation6 + $0xb] sm:$0x1] %v13240_v31  ;;  %345 = vst [vmem:[#allocation6 + $0x17] sm:$0x1] %v13240_v31  ;;  %1454 = vmatpush1.bf16.msra.mxu1 %v12541_v50 }
  0x94   :  { %12052 = vmatmul.mubr.msk.bf16.gmra.mrb[8].mxu0 %vm452_vm2, %v427_v26  ;;  %346 = vst [vmem:[#allocation6 + $0x1b] sm:$0x1] %v13240_v31  ;;  %348 = vst [vmem:[#allocation7] sm:$0x3f] %v13240_v31  ;;  %1455 = vmatprep.subr.bf16.mxu1 %v13241_v33 }
  0x95   :  { %12055 = vmatprep.mubr.msk.bf16.mxu0 %vm452_vm2, %v428_v27  ;;  %349 = vst [vmem:[#allocation7 + $0x30] sm:$0x3f] %v13240_v31  ;;  %351 = vst [vmem:[#allocation7 + $0x28] sm:$0x3f] %v13240_v31 }
  0x96   :  { %352 = vst [vmem:[#allocation7 + $0x58] sm:$0x3f] %v13240_v31  ;;  %354 = vst [vmem:[#allocation7 + $0x8] sm:$0x1] %v13240_v31 }
  0x97   :  { %355 = vst [vmem:[#allocation7 + $0x10] sm:$0x1] %v13240_v31  ;;  %356 = vst [vmem:[#allocation7 + $0x18] sm:$0x1] %v13240_v31  ;;  %1456 = vmatpush1.bf16.msra.mxu1 %v12542_v56 }
  0x98   :  { %357 = vst [vmem:[#allocation7 + $0x20] sm:$0x1] %v13240_v31  ;;  %360 = vst [vmem:[#allocation7 + $0x38] sm:$0x1] %v13240_v31  ;;  %1457 = vmatprep.subr.bf16.mxu1 %v13241_v33 }
  0x99   :  { %361 = vst [vmem:[#allocation7 + $0x40] sm:$0x1] %v13240_v31  ;;  %362 = vst [vmem:[#allocation7 + $0x48] sm:$0x1] %v13240_v31 }
  0x9a   :  { %363 = vst [vmem:[#allocation7 + $0x50] sm:$0x1] %v13240_v31  ;;  %366 = vst [vmem:[#allocation7 + $0xd] sm:$0x1] %v13240_v31 }
  0x9b   :  { %367 = vst [vmem:[#allocation7 + $0x15] sm:$0x1] %v13240_v31  ;;  %368 = vst [vmem:[#allocation7 + $0x1d] sm:$0x1] %v13240_v31  ;;  %1458 = vmatpush1.bf16.msra.mxu1 %v12543_v13 }
  0x9c   :  { %12056 = vmatmul.mubr.msk.bf16.gmra.mrb[12].mxu0 %vm452_vm2, %v429_v30  ;;  %369 = vst [vmem:[#allocation7 + $0x25] sm:$0x1] %v13240_v31  ;;  %372 = vst [vmem:[#allocation7 + $0x3d] sm:$0x1] %v13240_v31  ;;  %1459 = vmatprep.subr.bf16.mxu1 %v13241_v33  ;;  %vm13249_vm2 = vmmov 0  }
  0x9d   :  { %373 = vst [vmem:[#allocation7 + $0x45] sm:$0x1] %v13240_v31  ;;  %374 = vst [vmem:[#allocation7 + $0x4d] sm:$0x1] %v13240_v31 }
  0x9e   :  { %375 = vst [vmem:[#allocation7 + $0x55] sm:$0x1] %v13240_v31  ;;  %199 = vst.msk [vmem:[#allocation2 + $0x30] sm:$0x1] %vm195_vm5, %v13240_v31 }
  0x9f   :  { %200 = vst.msk [vmem:[#allocation2 + $0x40] sm:$0x1] %vm195_vm5, %v13240_v31  ;;  %197 = vst.msk [vmem:[#allocation2 + $0x10] sm:$0x1] %vm195_vm5, %v13240_v31  ;;  %1460 = vmatpush1.bf16.msra.mxu1 %v12544_v19 }
  0xa0   :  { %198 = vst.msk [vmem:[#allocation2 + $0x20] sm:$0x1] %vm195_vm5, %v13240_v31  ;;  %201 = vst.msk [vmem:[#allocation2 + $0x50] sm:$0x1] %vm195_vm5, %v13240_v31  ;;  %1461 = vmatprep.subr.bf16.mxu1 %v13241_v33 }
  0xa1   :  { %202 = vst.msk [vmem:[#allocation2 + $0x60] sm:$0x1] %vm195_vm5, %v13240_v31  ;;  %203 = vst.msk [vmem:[#allocation2 + $0x70] sm:$0x1] %vm195_vm5, %v13240_v31 }
  0xa2   :  { %204 = vst.msk [vmem:[#allocation2 + $0x80] sm:$0x1] %vm195_vm5, %v13240_v31  ;;  %207 = vst.msk [vmem:[#allocation2 + $0xb0] sm:$0x1] %vm195_vm5, %v13240_v31 }
  0xa3   :  { %208 = vst.msk [vmem:[#allocation2 + $0xc0] sm:$0x1] %vm195_vm5, %v13240_v31  ;;  %209 = vst.msk [vmem:[#allocation2 + $0xd0] sm:$0x1] %vm195_vm5, %v13240_v31 }
  0xa4   :  { %210 = vst.msk [vmem:[#allocation2 + $0xe0] sm:$0x1] %vm195_vm5, %v13240_v31  ;;  %211 = vst.msk [vmem:[#allocation2 + $0xf0] sm:$0x1] %vm195_vm5, %v13240_v31 }
  0xa5   :  { %212 = vst.msk [vmem:[#allocation2 + $0x100] sm:$0x1] %vm195_vm5, %v13240_v31  ;;  %213 = vst.msk [vmem:[#allocation2 + $0x110] sm:$0x1] %vm195_vm5, %v13240_v31 }
  0xa6   :  { %214 = vst.msk [vmem:[#allocation2 + $0x120] sm:$0x1] %vm195_vm5, %v13240_v31  ;;  %217 = vst.msk [vmem:[#allocation2 + $0x19] sm:$0x1] %vm195_vm5, %v13240_v31 }
  0xa7   :  { %218 = vst.msk [vmem:[#allocation2 + $0x29] sm:$0x1] %vm195_vm5, %v13240_v31  ;;  %219 = vst.msk [vmem:[#allocation2 + $0x39] sm:$0x1] %vm195_vm5, %v13240_v31 }
  0xa8   :  { %220 = vst.msk [vmem:[#allocation2 + $0x49] sm:$0x1] %vm195_vm5, %v13240_v31  ;;  %221 = vst.msk [vmem:[#allocation2 + $0x59] sm:$0x1] %vm195_vm5, %v13240_v31 }
  0xa9   :  { %222 = vst.msk [vmem:[#allocation2 + $0x69] sm:$0x1] %vm195_vm5, %v13240_v31  ;;  %223 = vst.msk [vmem:[#allocation2 + $0x79] sm:$0x1] %vm195_vm5, %v13240_v31 }
  0xaa   :  { %224 = vst.msk [vmem:[#allocation2 + $0x89] sm:$0x1] %vm195_vm5, %v13240_v31  ;;  %227 = vst.msk [vmem:[#allocation2 + $0xb9] sm:$0x1] %vm195_vm5, %v13240_v31 }
  0xab   :  { %228 = vst.msk [vmem:[#allocation2 + $0xc9] sm:$0x1] %vm195_vm5, %v13240_v31  ;;  %229 = vst.msk [vmem:[#allocation2 + $0xd9] sm:$0x1] %vm195_vm5, %v13240_v31 }
  0xac   :  { %230 = vst.msk [vmem:[#allocation2 + $0xe9] sm:$0x1] %vm195_vm5, %v13240_v31  ;;  %231 = vst.msk [vmem:[#allocation2 + $0xf9] sm:$0x1] %vm195_vm5, %v13240_v31 }
  0xad   :  { %232 = vst.msk [vmem:[#allocation2 + $0x109] sm:$0x1] %vm195_vm5, %v13240_v31  ;;  %233 = vst.msk [vmem:[#allocation2 + $0x119] sm:$0x1] %vm195_vm5, %v13240_v31 }
  0xae   :  { %234 = vst.msk [vmem:[#allocation2 + $0x129] sm:$0x1] %vm195_vm5, %v13240_v31  ;;  %196 = vst.msk [vmem:[#allocation2] sm:$0x1] %vm195_vm5, %v13240_v31 }
  0xaf   :  { %205 = vst.msk [vmem:[#allocation2 + $0x90] sm:$0x1] %vm195_vm5, %v13240_v31  ;;  %206 = vst.msk [vmem:[#allocation2 + $0xa0] sm:$0x1] %vm195_vm5, %v13240_v31 }
  0xb0   :  { %215 = vst.msk [vmem:[#allocation2 + $0x130] sm:$0x1] %vm195_vm5, %v13240_v31  ;;  %216 = vst.msk [vmem:[#allocation2 + $0x9] sm:$0x1] %vm195_vm5, %v13240_v31 }
  0xb1   :  { %225 = vst.msk [vmem:[#allocation2 + $0x99] sm:$0x1] %vm195_vm5, %v13240_v31  ;;  %226 = vst.msk [vmem:[#allocation2 + $0xa9] sm:$0x1] %vm195_vm5, %v13240_v31 }
  0xb2   :  { %235 = vst.msk [vmem:[#allocation2 + $0x139] sm:$0x1] %vm195_vm5, %v13240_v31  ;;  %303 = vst [vmem:[#allocation5] sm:$0x1] %v13240_v31  ;;  %vm7941_vm5 = vcmask 9216  }
  0xb3   :  { %308 = vst [vmem:[#allocation5 + $0x28] sm:$0x1] %v13240_v31  ;;  %309 = vst [vmem:[#allocation5 + $0x30] sm:$0x1] %v13240_v31 }
  0xb4   :  { %314 = vst [vmem:[#allocation5 + $0x58] sm:$0x1] %v13240_v31  ;;  %315 = vst [vmem:[#allocation5 + $0x5] sm:$0x1] %v13240_v31 }
  0xb5   :  { %320 = vst [vmem:[#allocation5 + $0x2d] sm:$0x1] %v13240_v31  ;;  %321 = vst [vmem:[#allocation5 + $0x35] sm:$0x1] %v13240_v31 }
  0xb6   :  { %326 = vst [vmem:[#allocation5 + $0x5d] sm:$0x1] %v13240_v31  ;;  %332 = vst [vmem:[#allocation6] sm:$0x1] %v13240_v31 }
  0xb7   :  { %335 = vst [vmem:[#allocation6 + $0xc] sm:$0x1] %v13240_v31  ;;  %336 = vst [vmem:[#allocation6 + $0x10] sm:$0x1] %v13240_v31  ;;  %v647_v0 = vld [vmem:[#allocation2 + $0x2] sm:$0xff] }
  0xb8   :  { %339 = vst [vmem:[#allocation6 + $0x1c] sm:$0x1] %v13240_v31  ;;  %340 = vst [vmem:[#allocation6 + $0x3] sm:$0x1] %v13240_v31 }
  0xb9   :  { %343 = vst [vmem:[#allocation6 + $0xf] sm:$0x1] %v13240_v31  ;;  %344 = vst [vmem:[#allocation6 + $0x13] sm:$0x1] %v13240_v31 }
  0xba   :  { %347 = vst [vmem:[#allocation6 + $0x1f] sm:$0x1] %v13240_v31  ;;  %353 = vst [vmem:[#allocation7] sm:$0x1] %v13240_v31 }
  0xbb   :  { %358 = vst [vmem:[#allocation7 + $0x28] sm:$0x1] %v13240_v31  ;;  %359 = vst [vmem:[#allocation7 + $0x30] sm:$0x1] %v13240_v31 }
  0xbc   :  { %364 = vst [vmem:[#allocation7 + $0x58] sm:$0x1] %v13240_v31  ;;  %365 = vst [vmem:[#allocation7 + $0x5] sm:$0x1] %v13240_v31 }
  0xbd   :  { %370 = vst [vmem:[#allocation7 + $0x2d] sm:$0x1] %v13240_v31  ;;  %371 = vst [vmem:[#allocation7 + $0x35] sm:$0x1] %v13240_v31 }
  0xbe   :  { %376 = vst [vmem:[#allocation7 + $0x5d] sm:$0x1] %v13240_v31  ;;  %240 = vst.msk [vmem:[#allocation3 + $0x28] sm:$0x3f] %vm236_vm12, %v13240_v31 }
  0xbf   :  { %237 = vst.msk [vmem:[#allocation3] sm:$0x3f] %vm236_vm12, %v13240_v31  ;;  %238 = vst.msk [vmem:[#allocation3 + $0x30] sm:$0x3f] %vm236_vm12, %v13240_v31 }
  0xc0   :  { %241 = vst.msk [vmem:[#allocation3 + $0x58] sm:$0x3f] %vm236_vm12, %v13240_v31 }
  0xc1   :  { %244 = vst.msk [vmem:[#allocation3 + $0x8] sm:$0x1] %vm242_vm13, %v13240_v31  ;;  %245 = vst.msk [vmem:[#allocation3 + $0x10] sm:$0x1] %vm242_vm13, %v13240_v31 }
  0xc2   :  { %246 = vst.msk [vmem:[#allocation3 + $0x18] sm:$0x1] %vm242_vm13, %v13240_v31  ;;  %247 = vst.msk [vmem:[#allocation3 + $0x20] sm:$0x1] %vm242_vm13, %v13240_v31 }
  0xc3   :  { %250 = vst.msk [vmem:[#allocation3 + $0x38] sm:$0x1] %vm242_vm13, %v13240_v31  ;;  %251 = vst.msk [vmem:[#allocation3 + $0x40] sm:$0x1] %vm242_vm13, %v13240_v31 }
  0xc4   :  { %252 = vst.msk [vmem:[#allocation3 + $0x48] sm:$0x1] %vm242_vm13, %v13240_v31  ;;  %253 = vst.msk [vmem:[#allocation3 + $0x50] sm:$0x1] %vm242_vm13, %v13240_v31 }
  0xc5   :  { %256 = vst.msk [vmem:[#allocation3 + $0xd] sm:$0x1] %vm242_vm13, %v13240_v31  ;;  %257 = vst.msk [vmem:[#allocation3 + $0x15] sm:$0x1] %vm242_vm13, %v13240_v31 }
  0xc6   :  { %258 = vst.msk [vmem:[#allocation3 + $0x1d] sm:$0x1] %vm242_vm13, %v13240_v31  ;;  %259 = vst.msk [vmem:[#allocation3 + $0x25] sm:$0x1] %vm242_vm13, %v13240_v31 }
  0xc7   :  { %262 = vst.msk [vmem:[#allocation3 + $0x3d] sm:$0x1] %vm242_vm13, %v13240_v31  ;;  %263 = vst.msk [vmem:[#allocation3 + $0x45] sm:$0x1] %vm242_vm13, %v13240_v31 }
  0xc8   :  { %264 = vst.msk [vmem:[#allocation3 + $0x4d] sm:$0x1] %vm242_vm13, %v13240_v31  ;;  %265 = vst.msk [vmem:[#allocation3 + $0x55] sm:$0x1] %vm242_vm13, %v13240_v31 }
  0xc9   :  { %248 = vst.msk [vmem:[#allocation3 + $0x28] sm:$0x1] %vm242_vm13, %v13240_v31  ;;  %260 = vst.msk [vmem:[#allocation3 + $0x2d] sm:$0x1] %vm242_vm13, %v13240_v31 }
  0xca   :  { %243 = vst.msk [vmem:[#allocation3] sm:$0x1] %vm242_vm13, %v13240_v31  ;;  %249 = vst.msk [vmem:[#allocation3 + $0x30] sm:$0x1] %vm242_vm13, %v13240_v31 }
  0xcb   :  { %254 = vst.msk [vmem:[#allocation3 + $0x58] sm:$0x1] %vm242_vm13, %v13240_v31  ;;  %255 = vst.msk [vmem:[#allocation3 + $0x5] sm:$0x1] %vm242_vm13, %v13240_v31 }
  0xcc   :  { %261 = vst.msk [vmem:[#allocation3 + $0x35] sm:$0x1] %vm242_vm13, %v13240_v31  ;;  %266 = vst.msk [vmem:[#allocation3 + $0x5d] sm:$0x1] %vm242_vm13, %v13240_v31 }
  0xcd   :  { %271 = vst.msk [vmem:[#allocation4 + $0x28] sm:$0x3f] %vm267_vm15, %v13240_v31  ;;  %268 = vst.msk [vmem:[#allocation4] sm:$0x3f] %vm267_vm15, %v13240_v31 }
  0xce   :  { %269 = vst.msk [vmem:[#allocation4 + $0x30] sm:$0x3f] %vm267_vm15, %v13240_v31  ;;  %272 = vst.msk [vmem:[#allocation4 + $0x58] sm:$0x3f] %vm267_vm15, %v13240_v31 }
  0xcf   :  { %275 = vst.msk [vmem:[#allocation4 + $0x8] sm:$0x1] %vm273_vm0, %v13240_v31  ;;  %276 = vst.msk [vmem:[#allocation4 + $0x10] sm:$0x1] %vm273_vm0, %v13240_v31 }
  0xd0   :  { %277 = vst.msk [vmem:[#allocation4 + $0x18] sm:$0x1] %vm273_vm0, %v13240_v31  ;;  %278 = vst.msk [vmem:[#allocation4 + $0x20] sm:$0x1] %vm273_vm0, %v13240_v31 }
  0xd1   :  { %281 = vst.msk [vmem:[#allocation4 + $0x38] sm:$0x1] %vm273_vm0, %v13240_v31  ;;  %282 = vst.msk [vmem:[#allocation4 + $0x40] sm:$0x1] %vm273_vm0, %v13240_v31 }
  0xd2   :  { %283 = vst.msk [vmem:[#allocation4 + $0x48] sm:$0x1] %vm273_vm0, %v13240_v31  ;;  %284 = vst.msk [vmem:[#allocation4 + $0x50] sm:$0x1] %vm273_vm0, %v13240_v31 }
  0xd3   :  { %287 = vst.msk [vmem:[#allocation4 + $0xd] sm:$0x1] %vm273_vm0, %v13240_v31  ;;  %288 = vst.msk [vmem:[#allocation4 + $0x15] sm:$0x1] %vm273_vm0, %v13240_v31 }
  0xd4   :  { %289 = vst.msk [vmem:[#allocation4 + $0x1d] sm:$0x1] %vm273_vm0, %v13240_v31  ;;  %290 = vst.msk [vmem:[#allocation4 + $0x25] sm:$0x1] %vm273_vm0, %v13240_v31 }
  0xd5   :  { %293 = vst.msk [vmem:[#allocation4 + $0x3d] sm:$0x1] %vm273_vm0, %v13240_v31  ;;  %294 = vst.msk [vmem:[#allocation4 + $0x45] sm:$0x1] %vm273_vm0, %v13240_v31 }
  0xd6   :  { %295 = vst.msk [vmem:[#allocation4 + $0x4d] sm:$0x1] %vm273_vm0, %v13240_v31  ;;  %296 = vst.msk [vmem:[#allocation4 + $0x55] sm:$0x1] %vm273_vm0, %v13240_v31 }
  0xd7   :  { %377 = vst.msk [vmem:[#allocation8] sm:$0x3f] %vm267_vm15, %v13240_v31  ;;  %378 = vst.msk [vmem:[#allocation8 + $0x30] sm:$0x3f] %vm267_vm15, %v13240_v31 }
  0xd8   :  { %380 = vst.msk [vmem:[#allocation8 + $0x28] sm:$0x3f] %vm267_vm15, %v13240_v31  ;;  %381 = vst.msk [vmem:[#allocation8 + $0x58] sm:$0x3f] %vm267_vm15, %v13240_v31 }
  0xd9   :  { %383 = vst.msk [vmem:[#allocation8 + $0x8] sm:$0x1] %vm273_vm0, %v13240_v31  ;;  %384 = vst.msk [vmem:[#allocation8 + $0x10] sm:$0x1] %vm273_vm0, %v13240_v31 }
  0xda   :  { %385 = vst.msk [vmem:[#allocation8 + $0x18] sm:$0x1] %vm273_vm0, %v13240_v31  ;;  %386 = vst.msk [vmem:[#allocation8 + $0x20] sm:$0x1] %vm273_vm0, %v13240_v31 }
  0xdb   :  { %389 = vst.msk [vmem:[#allocation8 + $0x38] sm:$0x1] %vm273_vm0, %v13240_v31  ;;  %390 = vst.msk [vmem:[#allocation8 + $0x40] sm:$0x1] %vm273_vm0, %v13240_v31 }
  0xdc   :  { %391 = vst.msk [vmem:[#allocation8 + $0x48] sm:$0x1] %vm273_vm0, %v13240_v31  ;;  %392 = vst.msk [vmem:[#allocation8 + $0x50] sm:$0x1] %vm273_vm0, %v13240_v31 }
  0xdd   :  { %395 = vst.msk [vmem:[#allocation8 + $0xd] sm:$0x1] %vm273_vm0, %v13240_v31  ;;  %396 = vst.msk [vmem:[#allocation8 + $0x15] sm:$0x1] %vm273_vm0, %v13240_v31 }
  0xde   :  { %397 = vst.msk [vmem:[#allocation8 + $0x1d] sm:$0x1] %vm273_vm0, %v13240_v31  ;;  %398 = vst.msk [vmem:[#allocation8 + $0x25] sm:$0x1] %vm273_vm0, %v13240_v31 }
  0xdf   :  { %401 = vst.msk [vmem:[#allocation8 + $0x3d] sm:$0x1] %vm273_vm0, %v13240_v31  ;;  %402 = vst.msk [vmem:[#allocation8 + $0x45] sm:$0x1] %vm273_vm0, %v13240_v31 }
  0xe0   :  { %403 = vst.msk [vmem:[#allocation8 + $0x4d] sm:$0x1] %vm273_vm0, %v13240_v31  ;;  %404 = vst.msk [vmem:[#allocation8 + $0x55] sm:$0x1] %vm273_vm0, %v13240_v31 }
  0xe1   :  { %291 = vst.msk [vmem:[#allocation4 + $0x2d] sm:$0x1] %vm273_vm0, %v13240_v31  ;;  %279 = vst.msk [vmem:[#allocation4 + $0x28] sm:$0x1] %vm273_vm0, %v13240_v31 }
  0xe2   :  { %274 = vst.msk [vmem:[#allocation4] sm:$0x1] %vm273_vm0, %v13240_v31  ;;  %280 = vst.msk [vmem:[#allocation4 + $0x30] sm:$0x1] %vm273_vm0, %v13240_v31 }
  0xe3   :  { %285 = vst.msk [vmem:[#allocation4 + $0x58] sm:$0x1] %vm273_vm0, %v13240_v31  ;;  %286 = vst.msk [vmem:[#allocation4 + $0x5] sm:$0x1] %vm273_vm0, %v13240_v31 }
  0xe4   :  { %292 = vst.msk [vmem:[#allocation4 + $0x35] sm:$0x1] %vm273_vm0, %v13240_v31  ;;  %297 = vst.msk [vmem:[#allocation4 + $0x5d] sm:$0x1] %vm273_vm0, %v13240_v31 }
  0xe5   :  { %382 = vst.msk [vmem:[#allocation8] sm:$0x1] %vm273_vm0, %v13240_v31  ;;  %387 = vst.msk [vmem:[#allocation8 + $0x28] sm:$0x1] %vm273_vm0, %v13240_v31 }
  0xe6   :  { %388 = vst.msk [vmem:[#allocation8 + $0x30] sm:$0x1] %vm273_vm0, %v13240_v31  ;;  %393 = vst.msk [vmem:[#allocation8 + $0x58] sm:$0x1] %vm273_vm0, %v13240_v31 }
  0xe7   :  { %394 = vst.msk [vmem:[#allocation8 + $0x5] sm:$0x1] %vm273_vm0, %v13240_v31  ;;  %399 = vst.msk [vmem:[#allocation8 + $0x2d] sm:$0x1] %vm273_vm0, %v13240_v31 }
  0xe8   :  { %400 = vst.msk [vmem:[#allocation8 + $0x35] sm:$0x1] %vm273_vm0, %v13240_v31  ;;  %405 = vst.msk [vmem:[#allocation8 + $0x5d] sm:$0x1] %vm273_vm0, %v13240_v31 }
 0x157   :  { %v12045_v37 = vpop.f32.mrb[0].mxu0 }
 0x158   :  { %v527_v38 = vadd.f32 %v12045_v37, %v13634_v35  ;;  %v518_v39 = vpop.f32.mrb[1].mxu0 }
 0x159   :  { %v519_v40 = vadd.f32 %v13634_v35, %v518_v39  ;;  %v12046_v41 = vpop.f32.mrb[2].mxu0  ;;  %v12545_v39 = vld [vmem:[%s13274_s17 + $0x40] sm:$0xff]   ;;  %s13246_s17 = smov 112  }
 0x15a   :  { %v583_v43 = vmax.f32 %v527_v38, 0.0  ;;  %v530_v44 = vadd.f32 %v12046_v41, %v13634_v35  ;;  %v521_v45 = vpop.f32.mrb[3].mxu0  ;;  %1462 = vmatpush1.bf16.msra.mxu1 %v12545_v39 }
 0x15b   :  { %v581_v46 = vmax.f32 %v519_v40, 0.0  ;;  %v522_v47 = vadd.f32 %v13634_v35, %v521_v45 }
 0x15c   :  { %601 = vst.msk [vmem:[#allocation2 + $0x31] sm:$0xff] %vm184_vm3, %v583_v43  ;;  %v584_v48 = vmax.f32 %v530_v44, 0.0 }
 0x15d   :  { %599 = vst.msk [vmem:[#allocation2 + $0x11] sm:$0xff] %vm184_vm3, %v581_v46  ;;  %v582_v49 = vmax.f32 %v522_v47, 0.0 }
 0x15e   :  { %602 = vst.msk [vmem:[#allocation2 + $0x41] sm:$0xff] %vm184_vm3, %v584_v48 }
 0x15f   :  { %600 = vst.msk [vmem:[#allocation2 + $0x21] sm:$0xff] %vm184_vm3, %v582_v49  ;;  %v12049_v51 = vpop.f32.mrb[4].mxu0 }
 0x160   :  { %v543_v52 = vadd.f32 %v12049_v51, %v13634_v35  ;;  %v534_v53 = vpop.f32.mrb[5].mxu0 }
 0x161   :  { %v535_v54 = vadd.f32 %v13634_v35, %v534_v53  ;;  %v12050_v55 = vpop.f32.mrb[6].mxu0 }
 0x162   :  { %v587_v57 = vmax.f32 %v543_v52, 0.0  ;;  %v546_v59 = vadd.f32 %v12050_v55, %v13634_v35  ;;  %v537_v60 = vpop.f32.mrb[7].mxu0 }
 0x163   :  { %v585_v61 = vmax.f32 %v535_v54, 0.0  ;;  %v538_v62 = vadd.f32 %v13634_v35, %v537_v60  ;;  %v13662_v3 = vld [vmem:[#allocation2 + $0x30] sm:$0xff] }
 0x164   :  { %605 = vst.msk [vmem:[#allocation2 + $0x71] sm:$0xff] %vm184_vm3, %v587_v57  ;;  %v13657_v63 = vld [vmem:[#allocation2 + $0x11] sm:$0xff]  ;;  %v588_v1 = vmax.f32 %v546_v59, 0.0 }
 0x165   :  { %603 = vst.msk [vmem:[#allocation2 + $0x51] sm:$0xff] %vm184_vm3, %v585_v61  ;;  %v12255_v2 = vpack.i.bf16 %v13657_v63, %v631_v58  ;;  %v13664_v4 = vld [vmem:[#allocation2 + $0x40] sm:$0xff]  ;;  %v13666_v5 = vld [vmem:[#allocation2 + $0x32] sm:$0xff]  ;;  %v586_v6 = vmax.f32 %v538_v62, 0.0 }
 0x166   :  { %v12265_v7 = vpack.i.bf16 %v13664_v4, %v13662_v3  ;;  %v13670_v8 = vld [vmem:[#allocation2 + $0x22] sm:$0xff]  ;;  %v648_v9 = vld [vmem:[#allocation2 + $0x12] sm:$0xff]  ;;  %606 = vst.msk [vmem:[#allocation2 + $0x81] sm:$0xff] %vm184_vm3, %v588_v1 }
 0x167   :  { %v13672_v10 = vld [vmem:[#allocation2 + $0x42] sm:$0xff]  ;;  %12256 = vrot.lane.b32.xlu0 %v12255_v2, %s13242_s5  ;;  %v1327_v11 = vpack.c.bf16 %v13666_v5, %v13670_v8  ;;  %604 = vst.msk [vmem:[#allocation2 + $0x61] sm:$0xff] %vm184_vm3, %v586_v6  ;;  %v12053_v12 = vpop.f32.mrb[8].mxu0  ;;  %v12260_v16 = vpack.i.bf16 %v648_v9, %v647_v0  ;;  %v681_v28 = vld [vmem:[#allocation2 + $0x31] sm:$0xff]  ;;  %v12290_v42 = vpack.i.bf16 %v13670_v8, %v648_v9 }
 0x168   :  { %12266 = vrot.lane.b32.xlu1 %v12265_v7, %s13243_s13  ;;  %v559_v14 = vadd.f32 %v12053_v12, %v13634_v35  ;;  %v550_v15 = vpop.f32.mrb[9].mxu0  ;;  %v12275_v20 = vpack.i.bf16 %v13672_v10, %v13666_v5  ;;  %v682_v21 = vld [vmem:[#allocation2 + $0x41] sm:$0xff]  ;;  %v13693_v32 = vld [vmem:[#allocation2 + $0x10] sm:$0xff]  ;;  %v12310_v55 = vpack.i.bf16 %v13666_v5, %v13670_v8 }
 0x169   :  { %10742 = vmatprep.mubr.msk.bf16.mxu1 %vm184_vm3, %v1327_v11  ;;  %v551_v17 = vadd.f32 %v13634_v35, %v550_v15  ;;  %v12054_v18 = vpop.f32.mrb[10].mxu0  ;;  %v664_v25 = vld [vmem:[#allocation2 + $0x20] sm:$0xff]  ;;  %v12270_v30 = vpack.i.bf16 %v682_v21, %v681_v28  ;;  %v719_v1 = vld [vmem:[#allocation2 + $0x90] sm:$0xff] }
 0x16a   :  { %v591_v22 = vmax.f32 %v559_v14, 0.0  ;;  %v562_v23 = vadd.f32 %v12054_v18, %v13634_v35  ;;  %v553_v24 = vpop.f32.mrb[11].mxu0  ;;  %v12280_v36 = vpack.i.bf16 %v664_v25, %v13693_v32  ;;  %v680_v37 = vld [vmem:[#allocation2 + $0x21] sm:$0xff]  ;;  %v12295_v54 = vpack.i.bf16 %v13662_v3, %v664_v25  ;;  %v735_v8 = vld [vmem:[#allocation2 + $0x91] sm:$0xff] }
 0x16b   :  { %12261 = vrot.lane.b32.xlu0 %v12260_v16, %s13244_s30  ;;  %v589_v26 = vmax.f32 %v551_v17, 0.0  ;;  %v554_v27 = vadd.f32 %v13634_v35, %v553_v24  ;;  %v12285_v45 = vpack.i.bf16 %v680_v37, %v13657_v63  ;;  %v12300_v52 = vpack.i.bf16 %v681_v28, %v680_v37  ;;  %v685_v60 = vld [vmem:[#allocation2 + $0x71] sm:$0xff]  ;;  %v639_v18 = vld [vmem:[#allocation2 + $0xa1] sm:$0xff] }
 0x16c   :  { %12276 = vrot.lane.b32.xlu1 %v12275_v20, %s13245_s4  ;;  %609 = vst.msk [vmem:[#allocation2 + $0xd1] sm:$0xff] %vm184_vm3, %v591_v22  ;;  %v592_v29 = vmax.f32 %v562_v23, 0.0  ;;  %v731_v56 = vld [vmem:[#allocation2 + $0x51] sm:$0xff]  ;;  %v655_v20 = vld [vmem:[#allocation2 + $0xa2] sm:$0xff] }
 0x16d   :  { %607 = vst.msk [vmem:[#allocation2 + $0xb1] sm:$0xff] %vm184_vm3, %v589_v26  ;;  %v590_v34 = vmax.f32 %v554_v27, 0.0  ;;  %v12320_v58 = vpack.i.bf16 %v731_v56, %v682_v21  ;;  %v13726_v59 = vld [vmem:[#allocation2 + $0x52] sm:$0xff]  ;;  %v686_v61 = vld [vmem:[#allocation2 + $0x81] sm:$0xff] }
 0x16e   :  { %610 = vst.msk [vmem:[#allocation2 + $0xe1] sm:$0xff] %vm184_vm3, %v592_v29  ;;  %v669_v62 = vld [vmem:[#allocation2 + $0x70] sm:$0xff]  ;;  %v670_v63 = vld [vmem:[#allocation2 + $0x80] sm:$0xff]  ;;  %v12330_v0 = vpack.i.bf16 %v13726_v59, %v13672_v10  ;;  %v12340_v2 = vpack.i.bf16 %v686_v61, %v685_v60  ;;  %v12355_v13 = vpack.i.bf16 %v735_v8, %v686_v61 }
 0x16f   :  { %12271 = vrot.lane.b32.xlu0 %v12270_v30, %s13235_s1  ;;  %608 = vst.msk [vmem:[#allocation2 + $0xc1] sm:$0xff] %vm184_vm3, %v590_v34  ;;  %v12057_v38 = vpop.f32.mrb[12].mxu0  ;;  %v13734_v3 = vld [vmem:[#allocation2 + $0x72] sm:$0xff]  ;;  %v12335_v5 = vpack.i.bf16 %v670_v63, %v669_v62  ;;  %v13740_v6 = vld [vmem:[#allocation2 + $0x60] sm:$0xff]  ;;  %v12350_v7 = vpack.i.bf16 %v719_v1, %v670_v63 }
 0x170   :  { %12281 = vrot.lane.b32.xlu1 %v12280_v36, %s13243_s13  ;;  %v575_v40 = vadd.f32 %v12057_v38, %v13634_v35  ;;  %v566_v41 = vpop.f32.mrb[13].mxu0  ;;  %v13746_v10 = vld [vmem:[#allocation2 + $0x62] sm:$0xff]  ;;  %v12375_v17 = vpack.i.bf16 %v669_v62, %v13740_v6 }
 0x171   :  { %v567_v43 = vadd.f32 %v13634_v35, %v566_v41  ;;  %v12058_v44 = vpop.f32.mrb[14].mxu0  ;;  %v684_v12 = vld [vmem:[#allocation2 + $0x61] sm:$0xff]  ;;  %v12370_v14 = vpack.i.bf16 %v13746_v10, %v13726_v59  ;;  %v12390_v22 = vpack.i.bf16 %v13734_v3, %v13746_v10 }
 0x172   :  { %v595_v46 = vmax.f32 %v575_v40, 0.0  ;;  %v578_v47 = vadd.f32 %v12058_v44, %v13634_v35  ;;  %v569_v48 = vpop.f32.mrb[15].mxu0  ;;  %v12365_v15 = vpack.i.bf16 %v684_v12, %v731_v56  ;;  %v12380_v16 = vpack.i.bf16 %v685_v60, %v684_v12 }
 0x173   :  { %12291 = vrot.lane.b32.xlu0 %v12290_v42, %s13245_s4  ;;  %v593_v49 = vmax.f32 %v567_v43, 0.0  ;;  %v570_v50 = vadd.f32 %v13634_v35, %v569_v48  ;;  %v13718_v35 = vld [vmem:[#allocation2 + $0x50] sm:$0xff] }
 0x174   :  { %12286 = vrot.lane.b32.xlu1 %v12285_v45, %s13235_s1  ;;  %613 = vst.msk [vmem:[#allocation2 + $0x111] sm:$0xff] %vm184_vm3, %v595_v46  ;;  %v596_v51 = vmax.f32 %v578_v47, 0.0  ;;  %v12315_v57 = vpack.i.bf16 %v13718_v35, %v13664_v4  ;;  %v13736_v4 = vld [vmem:[#allocation2 + $0x82] sm:$0xff]  ;;  %v12360_v11 = vpack.i.bf16 %v13740_v6, %v13718_v35  ;;  %v640_v19 = vld [vmem:[#allocation2 + $0xb1] sm:$0xff] }
 0x175   :  { %611 = vst.msk [vmem:[#allocation2 + $0xf1] sm:$0xff] %vm184_vm3, %v593_v49  ;;  %v594_v53 = vmax.f32 %v570_v50, 0.0  ;;  %v12345_v9 = vpack.i.bf16 %v13736_v4, %v13734_v3  ;;  %v656_v21 = vld [vmem:[#allocation2 + $0xb2] sm:$0xff]  ;;  %v690_v24 = vld [vmem:[#allocation2 + $0xe1] sm:$0xff]  ;;  %v12395_v25 = vpack.i.bf16 %v640_v19, %v639_v18 }
 0x176   :  { %614 = vst.msk [vmem:[#allocation2 + $0x121] sm:$0xff] %vm184_vm3, %v596_v51  ;;  %v689_v23 = vld [vmem:[#allocation2 + $0xd1] sm:$0xff]  ;;  %v674_v27 = vld [vmem:[#allocation2 + $0xe0] sm:$0xff]  ;;  %v12400_v28 = vpack.i.bf16 %v656_v21, %v655_v20 }
 0x177   :  { %12301 = vrot.lane.b32.xlu0 %v12300_v52, %s13246_s17  ;;  %612 = vst.msk [vmem:[#allocation2 + $0x101] sm:$0xff] %vm184_vm3, %v594_v53  ;;  %v13762_v26 = vld [vmem:[#allocation2 + $0xd0] sm:$0xff]  ;;  %v12410_v29 = vpack.i.bf16 %v690_v24, %v689_v23  ;;  %v13770_v36 = vld [vmem:[#allocation2 + $0xc0] sm:$0xff] }
 0x178   :  { %12296 = vrot.lane.b32.xlu1 %v12295_v54, %s13247_s22  ;;  %v12405_v30 = vpack.i.bf16 %v674_v27, %v13762_v26  ;;  %v13768_v34 = vld [vmem:[#allocation2 + $0xb0] sm:$0xff]  ;;  %v13774_v38 = vld [vmem:[#allocation2 + $0xe2] sm:$0xff]  ;;  %v12435_v46 = vpack.i.bf16 %v13762_v26, %v13770_v36 }
 0x179   :  { %v13772_v37 = vld [vmem:[#allocation2 + $0xd2] sm:$0xff]  ;;  %v13778_v39 = vld [vmem:[#allocation2 + $0xc2] sm:$0xff]  ;;  %v12420_v40 = vpack.i.bf16 %v13770_v36, %v13768_v34 }
 0x17a   :  { %v688_v41 = vld [vmem:[#allocation2 + $0xc1] sm:$0xff]  ;;  %v12415_v42 = vpack.i.bf16 %v13774_v38, %v13772_v37  ;;  %v12430_v43 = vpack.i.bf16 %v13778_v39, %v656_v21  ;;  %v12450_v48 = vpack.i.bf16 %v13772_v37, %v13778_v39 }
 0x17b   :  { %12311 = vrot.lane.b32.xlu0 %v12310_v55, %s13244_s30  ;;  %v12425_v44 = vpack.i.bf16 %v688_v41, %v640_v19  ;;  %v12440_v45 = vpack.i.bf16 %v689_v23, %v688_v41  ;;  %v693_v53 = vld [vmem:[#allocation2 + $0x111] sm:$0xff] }
 0x17c   :  { %12306 = vrot.lane.b32.xlu1 %v12300_v52, %s13242_s5  ;;  %v13793_v47 = vld [vmem:[#allocation2 + $0xf0] sm:$0xff] }
 0x17d   :  { %v739_v49 = vld [vmem:[#allocation2 + $0xf1] sm:$0xff]  ;;  %v12455_v50 = vpack.i.bf16 %v13793_v47, %v674_v27  ;;  %v694_v54 = vld [vmem:[#allocation2 + $0x121] sm:$0xff] }
 0x17e   :  { %v13800_v51 = vld [vmem:[#allocation2 + $0xf2] sm:$0xff]  ;;  %v12460_v52 = vpack.i.bf16 %v739_v49, %v690_v24  ;;  %v678_v56 = vld [vmem:[#allocation2 + $0x120] sm:$0xff]  ;;  %v12480_v60 = vpack.i.bf16 %v694_v54, %v693_v53 }
 0x17f   :  { %12316 = vrot.lane.b32.xlu0 %v12315_v57, %s13247_s22  ;;  %v13804_v55 = vld [vmem:[#allocation2 + $0x110] sm:$0xff]  ;;  %v12470_v57 = vpack.i.bf16 %v13800_v51, %v13774_v38  ;;  %v692_v61 = vld [vmem:[#allocation2 + $0x101] sm:$0xff] }
 0x180   :  { %12321 = vrot.lane.b32.xlu1 %v12320_v58, %s13246_s17  ;;  %v12475_v62 = vpack.i.bf16 %v678_v56, %v13804_v55  ;;  %v13815_v63 = vld [vmem:[#allocation2 + $0x102] sm:$0xff]  ;;  %v12490_v1 = vpack.i.bf16 %v692_v61, %v739_v49  ;;  %v12505_v8 = vpack.i.bf16 %v693_v53, %v692_v61 }
 0x181   :  { %v615_v27 = vld [vmem:[#allocation2] sm:$0xff] }
 0x183   :  { %12326 = vrot.lane.b32.xlu0 %v12320_v58, %s13242_s5  ;;  %v13810_v58 = vld [vmem:[#allocation2 + $0x100] sm:$0xff] }
 0x184   :  { %12331 = vrot.lane.b32.xlu1 %v12330_v0, %s13244_s30  ;;  %v12485_v0 = vpack.i.bf16 %v13810_v58, %v13793_v47 }
 0x187   :  { %12341 = vrot.lane.b32.xlu0 %v12340_v2, %s13235_s1  ;;  %v12495_v2 = vpack.i.bf16 %v13815_v63, %v13800_v51 }
 0x188   :  { %12336 = vrot.lane.b32.xlu1 %v12335_v5, %s13243_s13  ;;  %v12500_v5 = vpack.i.bf16 %v13804_v55, %v13810_v58 }
 0x18b   :  { %12351 = vrot.lane.b32.xlu0 %v12350_v7, %s13247_s22  ;;  %v13827_v7 = vld [vmem:[#allocation2 + $0x112] sm:$0xff] }
 0x18c   :  { %12346 = vrot.lane.b32.xlu1 %v12345_v9, %s13245_s4  ;;  %v13829_v9 = vld [vmem:[#allocation2 + $0x122] sm:$0xff]  ;;  %v12520_v12 = vpack.i.bf16 %v13827_v7, %v13815_v63 }
 0x18f   :  { %12361 = vrot.lane.b32.xlu0 %v12360_v11, %s13243_s13  ;;  %v727_v11 = vld [vmem:[#allocation2 + $0x130] sm:$0xff] }
 0x190   :  { %12356 = vrot.lane.b32.xlu1 %v12355_v13, %s13246_s17  ;;  %v743_v13 = vld [vmem:[#allocation2 + $0x131] sm:$0xff] }
 0x193   :  { %12371 = vrot.lane.b32.xlu0 %v12370_v14, %s13245_s4  ;;  %v12515_v14 = vpack.i.bf16 %v13829_v9, %v13827_v7 }
 0x194   :  { %12366 = vrot.lane.b32.xlu1 %v12365_v15, %s13235_s1  ;;  %v12525_v15 = vpack.i.bf16 %v727_v11, %v678_v56 }
 0x197   :  { %12381 = vrot.lane.b32.xlu0 %v12380_v16, %s13246_s17 }
 0x198   :  { %12376 = vrot.lane.b32.xlu1 %v12375_v17, %s13247_s22  ;;  %v1590_v17 = vld [vmem:[#allocation2 + $0x1] ss:$2 sm:$0xf] }
 0x19b   :  { %12391 = vrot.lane.b32.xlu0 %v12390_v22, %s13244_s30 }
 0x19c   :  { %12386 = vrot.lane.b32.xlu1 %v12380_v16, %s13242_s5  ;;  %v12530_v16 = vpack.i.bf16 %v743_v13, %v694_v54 }
 0x19f   :  { %12396 = vrot.lane.b32.xlu0 %v12395_v25, %s13242_s5 }
 0x1a0   :  { %12401 = vrot.lane.b32.xlu1 %v12400_v28, %s13244_s30 }
 0x1a3   :  { %12411 = vrot.lane.b32.xlu0 %v12410_v29, %s13235_s1 }
 0x1a4   :  { %12406 = vrot.lane.b32.xlu1 %v12405_v30, %s13243_s13 }
 0x1a7   :  { %12421 = vrot.lane.b32.xlu0 %v12420_v40, %s13243_s13 }
 0x1a8   :  { %12416 = vrot.lane.b32.xlu1 %v12415_v42, %s13245_s4 }
 0x1ab   :  { %12431 = vrot.lane.b32.xlu0 %v12430_v43, %s13245_s4 }
 0x1ac   :  { %12426 = vrot.lane.b32.xlu1 %v12425_v44, %s13235_s1 }
 0x1af   :  { %12441 = vrot.lane.b32.xlu0 %v12440_v45, %s13246_s17 }
 0x1b0   :  { %12436 = vrot.lane.b32.xlu1 %v12435_v46, %s13247_s22 }
 0x1b3   :  { %12451 = vrot.lane.b32.xlu0 %v12450_v48, %s13244_s30 }
 0x1b4   :  { %12446 = vrot.lane.b32.xlu1 %v12440_v45, %s13242_s5 }
 0x1b7   :  { %12456 = vrot.lane.b32.xlu0 %v12455_v50, %s13247_s22 }
 0x1b8   :  { %12461 = vrot.lane.b32.xlu1 %v12460_v52, %s13246_s17 }
 0x1bb   :  { %12466 = vrot.lane.b32.xlu0 %v12460_v52, %s13242_s5 }
 0x1bc   :  { %12471 = vrot.lane.b32.xlu1 %v12470_v57, %s13244_s30 }
 0x1bf   :  { %12481 = vrot.lane.b32.xlu0 %v12480_v60, %s13235_s1 }
 0x1c0   :  { %12476 = vrot.lane.b32.xlu1 %v12475_v62, %s13243_s13 }
 0x1c3   :  { %12486 = vrot.lane.b32.xlu0 %v12485_v0, %s13243_s13 }
 0x1c4   :  { %12491 = vrot.lane.b32.xlu1 %v12490_v1, %s13235_s1 }
 0x1c7   :  { %12496 = vrot.lane.b32.xlu0 %v12495_v2, %s13245_s4 }
 0x1c8   :  { %12501 = vrot.lane.b32.xlu1 %v12500_v5, %s13247_s22 }
 0x1cb   :  { %12506 = vrot.lane.b32.xlu0 %v12505_v8, %s13246_s17 }
 0x1cc   :  { %12511 = vrot.lane.b32.xlu1 %v12505_v8, %s13242_s5 }
 0x1cf   :  { %12521 = vrot.lane.b32.xlu0 %v12520_v12, %s13244_s30 }
 0x1d0   :  { %12516 = vrot.lane.b32.xlu1 %v12515_v14, %s13245_s4 }
 0x1d3   :  { %12526 = vrot.lane.b32.xlu0 %v12525_v15, %s13247_s22 }
 0x1d4   :  { %12531 = vrot.lane.b32.xlu1 %v12530_v16, %s13246_s17 }
 0x1d7   :  { %1723 = vrot.lane.b32.xlu0 %v1590_v17, %s13242_s5 }
 0x1d9   :  { %v12257_v18 = vpop.permute.xlu0 %12256 }
 0x1da   :  { %v13842_v19 = vpop.permute.xlu1 %12266  ;;  %v12259_v23 = vunpack.i.h.bf16 %v12257_v18  ;;  %v12258_v24 = vunpack.i.l.bf16 %v12257_v18 }
 0x1dc   :  { %v1209_v42 = vsel %vm184_vm3, %v13693_v32, %v12259_v23  ;;  %v1208_v43 = vsel %vm184_vm3, %v615_v27, %v12258_v24  ;;  %v13079_v24 = vld [vmem:[#allocation2 + $0x42] sm:$0xff]  ;;  %v12269_v27 = vunpack.i.h.bf16 %v13842_v19 }
 0x1dd   :  { %v12262_v20 = vpop.permute.xlu0 %12261 }
 0x1de   :  { %v13844_v21 = vpop.permute.xlu1 %12276  ;;  %v12264_v28 = vunpack.i.h.bf16 %v12262_v20  ;;  %v12263_v29 = vunpack.i.l.bf16 %v12262_v20 }
 0x1e0   :  { %v1225_v45 = vsel %vm1224_vm6, %v1208_v43, %v12263_v29  ;;  %v1226_v46 = vsel %vm1224_vm6, %v1209_v42, %v12264_v28  ;;  %v12268_v28 = vunpack.i.l.bf16 %v13842_v19  ;;  %v13080_v29 = vld [vmem:[#allocation2 + $0x30] sm:$0xff]  ;;  %v12279_v19 = vunpack.i.h.bf16 %v13844_v21 }
 0x1e1   :  { %v13846_v22 = vpop.permute.xlu0 %12271 }
 0x1e2   :  { %v12282_v25 = vpop.permute.xlu1 %12281  ;;  %v12274_v43 = vunpack.i.h.bf16 %v13846_v22 }
 0x1e3   :  { %v12284_v30 = vunpack.i.h.bf16 %v12282_v25  ;;  %v12283_v40 = vunpack.i.l.bf16 %v12282_v25  ;;  %v1329_v25 = vpack.c.bf16 %v13726_v59, %v13079_v24 }
 0x1e5   :  { %v12292_v41 = vpop.permute.xlu0 %12291  ;;  %v1242_v50 = vsel %vm1241_vm7, %v1225_v45, %v12283_v40  ;;  %v1243_v52 = vsel %vm1241_vm7, %v1226_v46, %v12284_v30  ;;  %v13081_v40 = vld [vmem:[#allocation2 + $0x20] sm:$0xff] }
 0x1e6   :  { %v12287_v44 = vpop.permute.xlu1 %12286  ;;  %v12294_v32 = vunpack.i.h.bf16 %v12292_v41  ;;  %v12293_v57 = vunpack.i.l.bf16 %v12292_v41 }
 0x1e7   :  { %v12289_v48 = vunpack.i.h.bf16 %v12287_v44  ;;  %v12288_v49 = vunpack.i.l.bf16 %v12287_v44  ;;  %v12273_v44 = vunpack.i.l.bf16 %v13846_v22 }
 0x1e9   :  { %v1259_v53 = vsel %vm1258_vm8, %v1242_v50, %v12288_v49  ;;  %v1260_v54 = vsel %vm1258_vm8, %v1243_v52, %v12289_v48  ;;  %v12302_v56 = vpop.permute.xlu0 %12301  ;;  %v12278_v48 = vunpack.i.l.bf16 %v13844_v21 }
 0x1ea   :  { %v12297_v60 = vpop.permute.xlu1 %12296  ;;  %v12304_v0 = vunpack.i.h.bf16 %v12302_v56  ;;  %v12303_v1 = vunpack.i.l.bf16 %v12302_v56  ;;  %v1276_v2 = vsel %vm1275_vm9, %v1259_v53, %v12293_v57  ;;  %v1277_v5 = vsel %vm1275_vm9, %v1260_v54, %v12294_v32 }
 0x1eb   :  { %v12299_v61 = vunpack.i.h.bf16 %v12297_v60  ;;  %v12298_v62 = vunpack.i.l.bf16 %v12297_v60 }
 0x1ed   :  { %v12312_v8 = vpop.permute.xlu0 %12311  ;;  %v1293_v11 = vsel %vm1292_vm10, %v1276_v2, %v12298_v62  ;;  %v1294_v12 = vsel %vm1292_vm10, %v1277_v5, %v12299_v61 }
 0x1ee   :  { %v12307_v13 = vpop.permute.xlu1 %12306  ;;  %v1310_v14 = vsel %vm1309_vm11, %v1293_v11, %v12303_v1  ;;  %v1311_v15 = vsel %vm1309_vm11, %v1294_v12, %v12304_v0  ;;  %v12314_v20 = vunpack.i.h.bf16 %v12312_v8  ;;  %v12313_v23 = vunpack.i.l.bf16 %v12312_v8 }
 0x1ef   :  { %v12309_v16 = vunpack.i.h.bf16 %v12307_v13  ;;  %v12308_v17 = vunpack.i.l.bf16 %v12307_v13  ;;  %v1326_v18 = vpack.c.bf16 %v1311_v15, %v1310_v14  ;;  %v1331_v11 = vpack.c.bf16 %v13734_v3, %v13746_v10  ;;  %v13082_v3 = vld [vmem:[#allocation2 + $0x40] sm:$0xff] }
 0x1f1   :  { %v1211_v30 = vsel %vm184_vm3, %v13080_v29, %v12309_v16  ;;  %v1210_v41 = vsel %vm184_vm3, %v13081_v40, %v12308_v17  ;;  %v12317_v42 = vpop.permute.xlu0 %12316  ;;  %1478 = vmatmul.mubr.bf16.vlgmr.msra.gmra.mrb[0].mxu1 %v1326_v18 }
 0x1f2   :  { %v1227_v45 = vsel %vm1224_vm6, %v1210_v41, %v12313_v23  ;;  %v1228_v59 = vsel %vm1224_vm6, %v1211_v30, %v12314_v20  ;;  %v12322_v46 = vpop.permute.xlu1 %12321  ;;  %10743 = vmatprep.mubr.msk.bf16.mxu1 %vm184_vm3, %v1329_v25  ;;  %v12319_v52 = vunpack.i.h.bf16 %v12317_v42  ;;  %v12318_v53 = vunpack.i.l.bf16 %v12317_v42 }
 0x1f3   :  { %v1244_v49 = vsel %vm1241_vm7, %v1227_v45, %v12268_v28  ;;  %v1245_v50 = vsel %vm1241_vm7, %v1228_v59, %v12269_v27  ;;  %v12324_v56 = vunpack.i.h.bf16 %v12322_v46  ;;  %v12323_v32 = vunpack.i.l.bf16 %v12322_v46 }
 0x1f4   :  { %v1261_v54 = vsel %vm1258_vm8, %v1244_v49, %v12273_v44  ;;  %v1262_v22 = vsel %vm1258_vm8, %v1245_v50, %v12274_v43 }
 0x1f5   :  { %v12327_v57 = vpop.permute.xlu0 %12326  ;;  %v1278_v60 = vsel %vm1275_vm9, %v1261_v54, %v12278_v48  ;;  %v1279_v61 = vsel %vm1275_vm9, %v1262_v22, %v12279_v19 }
 0x1f6   :  { %v12332_v62 = vpop.permute.xlu1 %12331  ;;  %v1295_v21 = vsel %vm1292_vm10, %v1278_v60, %v12318_v53  ;;  %v1296_v0 = vsel %vm1292_vm10, %v1279_v61, %v12319_v52  ;;  %v12329_v15 = vunpack.i.h.bf16 %v12327_v57  ;;  %v12328_v16 = vunpack.i.l.bf16 %v12327_v57  ;;  %v751_v60 = vld [vmem:[#allocation2 + $0x92] sm:$0xff] }
 0x1f7   :  { %v1312_v1 = vsel %vm1309_vm11, %v1295_v21, %v12323_v32  ;;  %v1313_v2 = vsel %vm1309_vm11, %v1296_v0, %v12324_v56  ;;  %v12334_v20 = vunpack.i.h.bf16 %v12332_v62  ;;  %v12333_v23 = vunpack.i.l.bf16 %v12332_v62 }
 0x1f8   :  { %v1328_v5 = vpack.c.bf16 %v1313_v2, %v1312_v1  ;;  %v1213_v24 = vsel %vm184_vm3, %v13718_v35, %v12329_v15  ;;  %v1212_v10 = vsel %vm184_vm3, %v13082_v3, %v12328_v16  ;;  %v1333_v15 = vpack.c.bf16 %v751_v60, %v13736_v4 }
 0x1f9   :  { %v13885_v8 = vpop.permute.xlu0 %12341  ;;  %v1229_v30 = vsel %vm1224_vm6, %v1212_v10, %v12333_v23  ;;  %v1230_v40 = vsel %vm1224_vm6, %v1213_v24, %v12334_v20  ;;  %v13083_v20 = vld [vmem:[#allocation2 + $0x70] sm:$0xff] }
 0x1fa   :  { %v13889_v12 = vpop.permute.xlu1 %12336  ;;  %1486 = vmatmul.mubr.bf16.gmra.mrb[4].mxu1 %v1328_v5  ;;  %v12344_v10 = vunpack.i.h.bf16 %v13885_v8 }
 0x1fb   :  { %10744 = vmatprep.mubr.msk.bf16.mxu1 %vm184_vm3, %v1331_v11  ;;  %v12339_v16 = vunpack.i.h.bf16 %v13889_v12 }
 0x1fd   :  { %v13892_v13 = vpop.permute.xlu0 %12351 }
 0x1fe   :  { %v13894_v14 = vpop.permute.xlu1 %12346 }
 0x201   :  { %v12362_v17 = vpop.permute.xlu0 %12361 }
 0x202   :  { %v13896_v18 = vpop.permute.xlu1 %12356  ;;  %v12364_v25 = vunpack.i.h.bf16 %v12362_v17  ;;  %v12363_v27 = vunpack.i.l.bf16 %v12362_v17  ;;  %v12338_v17 = vunpack.i.l.bf16 %v13889_v12  ;;  %v12349_v12 = vunpack.i.h.bf16 %v13894_v14 }
 0x204   :  { %v1246_v43 = vsel %vm1241_vm7, %v1229_v30, %v12363_v27  ;;  %v1247_v44 = vsel %vm1241_vm7, %v1230_v40, %v12364_v25  ;;  %v12343_v25 = vunpack.i.l.bf16 %v13885_v8  ;;  %v12354_v40 = vunpack.i.h.bf16 %v13892_v13 }
 0x205   :  { %v12372_v28 = vpop.permute.xlu0 %12371 }
 0x206   :  { %v12367_v29 = vpop.permute.xlu1 %12366  ;;  %v12374_v46 = vunpack.i.h.bf16 %v12372_v28  ;;  %v12373_v19 = vunpack.i.l.bf16 %v12372_v28 }
 0x207   :  { %v12369_v41 = vunpack.i.h.bf16 %v12367_v29  ;;  %v12368_v42 = vunpack.i.l.bf16 %v12367_v29  ;;  %v12348_v29 = vunpack.i.l.bf16 %v13894_v14 }
 0x209   :  { %v1263_v45 = vsel %vm1258_vm8, %v1246_v43, %v12368_v42  ;;  %v1264_v35 = vsel %vm1258_vm8, %v1247_v44, %v12369_v41  ;;  %v12382_v59 = vpop.permute.xlu0 %12381  ;;  %v12353_v41 = vunpack.i.l.bf16 %v13892_v13  ;;  %v12359_v43 = vunpack.i.h.bf16 %v13896_v18 }
 0x20a   :  { %v12377_v48 = vpop.permute.xlu1 %12376  ;;  %v12384_v52 = vunpack.i.h.bf16 %v12382_v59  ;;  %v12383_v53 = vunpack.i.l.bf16 %v12382_v59  ;;  %v1280_v54 = vsel %vm1275_vm9, %v1263_v45, %v12373_v19  ;;  %v1281_v22 = vsel %vm1275_vm9, %v1264_v35, %v12374_v46 }
 0x20b   :  { %v12379_v49 = vunpack.i.h.bf16 %v12377_v48  ;;  %v12378_v50 = vunpack.i.l.bf16 %v12377_v48  ;;  %v12358_v44 = vunpack.i.l.bf16 %v13896_v18  ;;  %v623_v18 = vld [vmem:[#allocation2 + $0xa0] sm:$0xff] }
 0x20d   :  { %v12392_v56 = vpop.permute.xlu0 %12391  ;;  %v1297_v32 = vsel %vm1292_vm10, %v1280_v54, %v12378_v50  ;;  %v1298_v57 = vsel %vm1292_vm10, %v1281_v22, %v12379_v49  ;;  %v1335_v54 = vpack.c.bf16 %v13772_v37, %v13778_v39 }
 0x20e   :  { %v12387_v61 = vpop.permute.xlu1 %12386  ;;  %v1314_v62 = vsel %vm1309_vm11, %v1297_v32, %v12383_v53  ;;  %v1315_v21 = vsel %vm1309_vm11, %v1298_v57, %v12384_v52  ;;  %v12394_v5 = vunpack.i.h.bf16 %v12392_v56  ;;  %v12393_v11 = vunpack.i.l.bf16 %v12392_v56 }
 0x20f   :  { %v12389_v0 = vunpack.i.h.bf16 %v12387_v61  ;;  %v12388_v1 = vunpack.i.l.bf16 %v12387_v61  ;;  %v1330_v2 = vpack.c.bf16 %v1315_v21, %v1314_v62 }
 0x211   :  { %v1215_v23 = vsel %vm184_vm3, %v13083_v20, %v12389_v0  ;;  %v1214_v24 = vsel %vm184_vm3, %v13740_v6, %v12388_v1  ;;  %v12397_v3 = vpop.permute.xlu0 %12396  ;;  %1494 = vmatmul.mubr.bf16.gmra.mrb[8].mxu1 %v1330_v2 }
 0x212   :  { %v1231_v27 = vsel %vm1224_vm6, %v1214_v24, %v12393_v11  ;;  %v1232_v4 = vsel %vm1224_vm6, %v1215_v23, %v12394_v5  ;;  %v12402_v28 = vpop.permute.xlu1 %12401  ;;  %10745 = vmatprep.mubr.msk.bf16.mxu1 %vm184_vm3, %v1333_v15  ;;  %v12399_v49 = vunpack.i.h.bf16 %v12397_v3  ;;  %v12398_v50 = vunpack.i.l.bf16 %v12397_v3 }
 0x213   :  { %v1248_v30 = vsel %vm1241_vm7, %v1231_v27, %v12338_v17  ;;  %v1249_v6 = vsel %vm1241_vm7, %v1232_v4, %v12339_v16  ;;  %v12404_v56 = vunpack.i.h.bf16 %v12402_v28  ;;  %v12403_v32 = vunpack.i.l.bf16 %v12402_v28 }
 0x214   :  { %v1265_v8 = vsel %vm1258_vm8, %v1248_v30, %v12343_v25  ;;  %v1266_v42 = vsel %vm1258_vm8, %v1249_v6, %v12344_v10  ;;  %v1217_v57 = vsel %vm184_vm3, %v13768_v34, %v12399_v49  ;;  %v1216_v60 = vsel %vm184_vm3, %v623_v18, %v12398_v50 }
 0x215   :  { %v13934_v45 = vpop.permute.xlu0 %12411  ;;  %v1282_v14 = vsel %vm1275_vm9, %v1265_v8, %v12348_v29  ;;  %v1283_v35 = vsel %vm1275_vm9, %v1266_v42, %v12349_v12  ;;  %v1233_v1 = vsel %vm1224_vm6, %v1216_v60, %v12403_v32  ;;  %v1234_v37 = vsel %vm1224_vm6, %v1217_v57, %v12404_v56 }
 0x216   :  { %v13938_v59 = vpop.permute.xlu1 %12406  ;;  %v1299_v46 = vsel %vm1292_vm10, %v1282_v14, %v12353_v41  ;;  %v1300_v13 = vsel %vm1292_vm10, %v1283_v35, %v12354_v40  ;;  %v1337_v14 = vpack.c.bf16 %v13800_v51, %v13774_v38  ;;  %v12414_v49 = vunpack.i.h.bf16 %v13934_v45 }
 0x217   :  { %v1316_v19 = vsel %vm1309_vm11, %v1299_v46, %v12358_v44  ;;  %v1317_v48 = vsel %vm1309_vm11, %v1300_v13, %v12359_v43  ;;  %v12409_v35 = vunpack.i.h.bf16 %v13938_v59  ;;  %v12408_v46 = vunpack.i.l.bf16 %v13938_v59 }
 0x218   :  { %v1332_v52 = vpack.c.bf16 %v1317_v48, %v1316_v19  ;;  %v12413_v50 = vunpack.i.l.bf16 %v13934_v45 }
 0x219   :  { %v12422_v53 = vpop.permute.xlu0 %12421 }
 0x21a   :  { %v13946_v22 = vpop.permute.xlu1 %12416  ;;  %1502 = vmatmul.mubr.bf16.gmra.mrb[12].mxu1 %v1332_v52  ;;  %v12424_v61 = vunpack.i.h.bf16 %v12422_v53  ;;  %v12423_v62 = vunpack.i.l.bf16 %v12422_v53 }
 0x21b   :  { %10746 = vmatprep.mubr.msk.bf16.mxu1 %vm184_vm3, %v1335_v54  ;;  %v12419_v59 = vunpack.i.h.bf16 %v13946_v22 }
 0x21c   :  { %v1250_v5 = vsel %vm1241_vm7, %v1233_v1, %v12423_v62  ;;  %v1251_v11 = vsel %vm1241_vm7, %v1234_v37, %v12424_v61 }
 0x21d   :  { %v12432_v21 = vpop.permute.xlu0 %12431 }
 0x21e   :  { %v12427_v0 = vpop.permute.xlu1 %12426  ;;  %v12434_v17 = vunpack.i.h.bf16 %v12432_v21  ;;  %v12433_v20 = vunpack.i.l.bf16 %v12432_v21 }
 0x21f   :  { %v12429_v39 = vunpack.i.h.bf16 %v12427_v0  ;;  %v12428_v2 = vunpack.i.l.bf16 %v12427_v0 }
 0x221   :  { %v1267_v15 = vsel %vm1258_vm8, %v1250_v5, %v12428_v2  ;;  %v1268_v34 = vsel %vm1258_vm8, %v1251_v11, %v12429_v39  ;;  %v12442_v16 = vpop.permute.xlu0 %12441 }
 0x222   :  { %v12437_v23 = vpop.permute.xlu1 %12436  ;;  %v12444_v10 = vunpack.i.h.bf16 %v12442_v16  ;;  %v12443_v25 = vunpack.i.l.bf16 %v12442_v16  ;;  %v1284_v27 = vsel %vm1275_vm9, %v1267_v15, %v12433_v20  ;;  %v1285_v4 = vsel %vm1275_vm9, %v1268_v34, %v12434_v17 }
 0x223   :  { %v12439_v24 = vunpack.i.h.bf16 %v12437_v23  ;;  %v12438_v3 = vunpack.i.l.bf16 %v12437_v23  ;;  %v1339_v15 = vpack.c.bf16 %v13827_v7, %v13815_v63  ;;  %v13084_v23 = vld [vmem:[#allocation2 + $0xe0] sm:$0xff] }
 0x225   :  { %v12452_v28 = vpop.permute.xlu0 %12451  ;;  %v1301_v12 = vsel %vm1292_vm10, %v1284_v27, %v12438_v3  ;;  %v1302_v29 = vsel %vm1292_vm10, %v1285_v4, %v12439_v24 }
 0x226   :  { %v12447_v30 = vpop.permute.xlu1 %12446  ;;  %v1318_v6 = vsel %vm1309_vm11, %v1301_v12, %v12443_v25  ;;  %v1319_v40 = vsel %vm1309_vm11, %v1302_v29, %v12444_v10  ;;  %v12454_v43 = vunpack.i.h.bf16 %v12452_v28  ;;  %v12453_v44 = vunpack.i.l.bf16 %v12452_v28 }
 0x227   :  { %v12449_v41 = vunpack.i.h.bf16 %v12447_v30  ;;  %v12448_v8 = vunpack.i.l.bf16 %v12447_v30  ;;  %v1334_v42 = vpack.c.bf16 %v1319_v40, %v1318_v6 }
 0x229   :  { %v1219_v13 = vsel %vm184_vm3, %v13762_v26, %v12449_v41  ;;  %v1218_v19 = vsel %vm184_vm3, %v13770_v36, %v12448_v8  ;;  %v12457_v48 = vpop.permute.xlu0 %12456  ;;  %1510 = vmatmul.mubr.bf16.gmra.mrb[16].mxu1 %v1334_v42  ;;  %v12418_v26 = vunpack.i.l.bf16 %v13946_v22 }
 0x22a   :  { %v1235_v52 = vsel %vm1224_vm6, %v1218_v19, %v12453_v44  ;;  %v1236_v38 = vsel %vm1224_vm6, %v1219_v13, %v12454_v43  ;;  %v12462_v51 = vpop.permute.xlu1 %12461  ;;  %10747 = vmatprep.mubr.msk.bf16.mxu1 %vm184_vm3, %v1337_v14  ;;  %v12459_v53 = vunpack.i.h.bf16 %v12457_v48  ;;  %v12458_v54 = vunpack.i.l.bf16 %v12457_v48 }
 0x22b   :  { %v1252_v18 = vsel %vm1241_vm7, %v1235_v52, %v12408_v46  ;;  %v1253_v36 = vsel %vm1241_vm7, %v1236_v38, %v12409_v35  ;;  %v12464_v32 = vunpack.i.h.bf16 %v12462_v51  ;;  %v12463_v57 = vunpack.i.l.bf16 %v12462_v51  ;;  %v759_v38 = vld [vmem:[#allocation2 + $0x132] sm:$0xff] }
 0x22c   :  { %v1269_v56 = vsel %vm1258_vm8, %v1252_v18, %v12413_v50  ;;  %v1270_v45 = vsel %vm1258_vm8, %v1253_v36, %v12414_v49 }
 0x22d   :  { %v12467_v60 = vpop.permute.xlu0 %12466  ;;  %v1286_v61 = vsel %vm1275_vm9, %v1269_v56, %v12418_v26  ;;  %v1287_v62 = vsel %vm1275_vm9, %v1270_v45, %v12419_v59  ;;  %v1341_v56 = vpack.c.bf16 %v759_v38, %v13829_v9 }
 0x22e   :  { %v12472_v21 = vpop.permute.xlu1 %12471  ;;  %v1303_v22 = vsel %vm1292_vm10, %v1286_v61, %v12458_v54  ;;  %v1304_v0 = vsel %vm1292_vm10, %v1287_v62, %v12459_v53  ;;  %v12469_v39 = vunpack.i.h.bf16 %v12467_v60  ;;  %v12468_v2 = vunpack.i.l.bf16 %v12467_v60 }
 0x22f   :  { %v1320_v1 = vsel %vm1309_vm11, %v1303_v22, %v12463_v57  ;;  %v1321_v37 = vsel %vm1309_vm11, %v1304_v0, %v12464_v32  ;;  %v12474_v16 = vunpack.i.h.bf16 %v12472_v21  ;;  %v12473_v17 = vunpack.i.l.bf16 %v12472_v21 }
 0x230   :  { %v1336_v5 = vpack.c.bf16 %v1321_v37, %v1320_v1  ;;  %v1221_v20 = vsel %vm184_vm3, %v13793_v47, %v12469_v39  ;;  %v1220_v24 = vsel %vm184_vm3, %v13084_v23, %v12468_v2 }
 0x231   :  { %v13989_v11 = vpop.permute.xlu0 %12481  ;;  %v1237_v4 = vsel %vm1224_vm6, %v1220_v24, %v12473_v17  ;;  %v1238_v63 = vsel %vm1224_vm6, %v1221_v20, %v12474_v16  ;;  %v1606_v24 = vld [vmem:[#allocation2 + $0x2] ss:$2 sm:$0xf] }
 0x232   :  { %v12477_v34 = vpop.permute.xlu1 %12476  ;;  %1518 = vmatmul.mubr.bf16.gmra.mrb[20].mxu1 %v1336_v5  ;;  %v12484_v61 = vunpack.i.h.bf16 %v13989_v11  ;;  %v12483_v62 = vunpack.i.l.bf16 %v13989_v11  ;;  %1755 = vrot.lane.b32.xlu0 %v1606_v24, %s13244_s30 }
 0x233   :  { %10748 = vmatprep.mubr.msk.bf16.mxu1 %vm184_vm3, %v1339_v15  ;;  %v12479_v45 = vunpack.i.h.bf16 %v12477_v34  ;;  %v12478_v32 = vunpack.i.l.bf16 %v12477_v34 }
 0x235   :  { %v12487_v3 = vpop.permute.xlu0 %12486 }
 0x236   :  { %v12489_v10 = vunpack.i.h.bf16 %v12487_v3  ;;  %v12488_v25 = vunpack.i.l.bf16 %v12487_v3  ;;  %v12492_v27 = vpop.permute.xlu1 %12491 }
 0x237   :  { %v12494_v7 = vunpack.i.h.bf16 %v12492_v27  ;;  %v12493_v28 = vunpack.i.l.bf16 %v12492_v27  ;;  %v1598_v27 = vld [vmem:[#allocation2 + $0xa1] ss:$2 sm:$0xf] }
 0x238   :  { %v1254_v12 = vsel %vm1241_vm7, %v1237_v4, %v12488_v25  ;;  %v1255_v29 = vsel %vm1241_vm7, %v1238_v63, %v12489_v10  ;;  %1731 = vrot.lane.b32.xlu0 %v1598_v27, %s13242_s5  ;;  %v1614_v4 = vld [vmem:[#allocation2 + $0xa2] ss:$2 sm:$0xf]  ;;  %v14033_v63 = vld [vmem:[%s13279_s21] ss:$0 sm:$0xff]  ;;  %s15671_s21 = sld [smem:[#allocation24_spill]] }
 0x239   :  { %v12497_v30 = vpop.permute.xlu0 %12496  ;;  %v1271_v41 = vsel %vm1258_vm8, %v1254_v12, %v12493_v28  ;;  %v1272_v8 = vsel %vm1258_vm8, %v1255_v29, %v12494_v7 }
 0x23a   :  { %v12499_v6 = vunpack.i.h.bf16 %v12497_v30  ;;  %v12498_v47 = vunpack.i.l.bf16 %v12497_v30  ;;  %v12502_v40 = vpop.permute.xlu1 %12501 }
 0x23b   :  { %v12504_v42 = vunpack.i.h.bf16 %v12502_v40  ;;  %v12503_v43 = vunpack.i.l.bf16 %v12502_v40 }
 0x23c   :  { %v1288_v44 = vsel %vm1275_vm9, %v1271_v41, %v12498_v47  ;;  %v1289_v14 = vsel %vm1275_vm9, %v1272_v8, %v12499_v6  ;;  %1763 = vrot.lane.b32.xlu0 %v1614_v4, %s13244_s30 }
 0x23d   :  { %v12507_v35 = vpop.permute.xlu0 %12506  ;;  %v1305_v50 = vsel %vm1292_vm10, %v1288_v44, %v12503_v43  ;;  %v1306_v52 = vsel %vm1292_vm10, %v1289_v14, %v12504_v42 }
 0x23e   :  { %v12509_v46 = vunpack.i.h.bf16 %v12507_v35  ;;  %v12508_v13 = vunpack.i.l.bf16 %v12507_v35  ;;  %v12512_v19 = vpop.permute.xlu1 %12511 }
 0x23f   :  { %v12514_v48 = vunpack.i.h.bf16 %v12512_v19  ;;  %v12513_v49 = vunpack.i.l.bf16 %v12512_v19 }
 0x240   :  { %v1322_v51 = vsel %vm1309_vm11, %v1305_v50, %v12508_v13  ;;  %v1323_v59 = vsel %vm1309_vm11, %v1306_v52, %v12509_v46 }
 0x241   :  { %v12522_v26 = vpop.permute.xlu0 %12521  ;;  %v1338_v18 = vpack.c.bf16 %v1323_v59, %v1322_v51  ;;  %v1223_v57 = vsel %vm184_vm3, %v13804_v55, %v12514_v48  ;;  %v1222_v60 = vsel %vm184_vm3, %v13810_v58, %v12513_v49  ;;  %v12546_v59 = vld [vmem:[%s13284_s25] sm:$0xff]  }
 0x242   :  { %v12524_v36 = vunpack.i.h.bf16 %v12522_v26  ;;  %v12523_v53 = vunpack.i.l.bf16 %v12522_v26  ;;  %v12517_v54 = vpop.permute.xlu1 %12516  ;;  %2125 = vmatpush1.bf16.msra.mxu0 %v12546_v59 }
 0x243   :  { %1526 = vmatmul.mubr.bf16.gmra.mrb[24].mxu1 %v1338_v18  ;;  %v12519_v1 = vunpack.i.h.bf16 %v12517_v54  ;;  %v12518_v55 = vunpack.i.l.bf16 %v12517_v54  ;;  %2126 = vmatprep.subr.bf16.mxu0 %v13241_v33  ;;  %v12547_v54 = vld [vmem:[%s13284_s25 + $0x8] sm:$0xff]  }
 0x244   :  { %v1240_v21 = vsel %vm1224_vm6, %v1223_v57, %v12524_v36  ;;  %v1239_v22 = vsel %vm1224_vm6, %v1222_v60, %v12523_v53  ;;  %10749 = vmatprep.mubr.msk.bf16.mxu1 %vm184_vm3, %v1341_v56 }
 0x245   :  { %v1257_v9 = vsel %vm1241_vm7, %v1240_v21, %v12479_v45  ;;  %v1256_v0 = vsel %vm1241_vm7, %v1239_v22, %v12478_v32  ;;  %v12527_v37 = vpop.permute.xlu0 %12526  ;;  %v12548_v22 = vld [vmem:[%s13284_s25 + $0x10] sm:$0xff]  }
 0x246   :  { %v1273_v58 = vsel %vm1258_vm8, %v1256_v0, %v12483_v62  ;;  %v1274_v39 = vsel %vm1258_vm8, %v1257_v9, %v12484_v61  ;;  %v12529_v2 = vunpack.i.h.bf16 %v12527_v37  ;;  %v12528_v5 = vunpack.i.l.bf16 %v12527_v37  ;;  %v12532_v11 = vpop.permute.xlu1 %12531  ;;  %2127 = vmatpush1.bf16.msra.mxu0 %v12547_v54 }
 0x247   :  { %v1290_v15 = vsel %vm1275_vm9, %v1273_v58, %v12518_v55  ;;  %v1291_v34 = vsel %vm1275_vm9, %v1274_v39, %v12519_v1  ;;  %v12534_v16 = vunpack.i.h.bf16 %v12532_v11  ;;  %v12533_v17 = vunpack.i.l.bf16 %v12532_v11  ;;  %2128 = vmatprep.subr.bf16.mxu0 %v13241_v33  ;;  %v12549_v1 = vld [vmem:[%s13284_s25 + $0x18] sm:$0xff]  }
 0x248   :  { %v1307_v20 = vsel %vm1292_vm10, %v1290_v15, %v12528_v5  ;;  %v1308_v23 = vsel %vm1292_vm10, %v1291_v34, %v12529_v2  ;;  %v12550_v34 = vld [vmem:[%s13284_s25 + $0x20] sm:$0xff]  }
 0x249   :  { %v1324_v3 = vsel %vm1309_vm11, %v1307_v20, %v12533_v17  ;;  %v1325_v10 = vsel %vm1309_vm11, %v1308_v23, %v12534_v16  ;;  %v12551_v23 = vld [vmem:[%s13284_s25 + $0x28] sm:$0xff]  }
 0x24a   :  { %v1340_v25 = vpack.c.bf16 %v1325_v10, %v1324_v3  ;;  %2129 = vmatpush1.bf16.msra.mxu0 %v12548_v22  ;;  %v12552_v3 = vld [vmem:[%s13284_s25 + $0x30] sm:$0xff]  }
 0x24b   :  { %2130 = vmatprep.subr.bf16.mxu0 %v13241_v33 }
 0x24c   :  { %1534 = vmatmul.mubr.bf16.gmra.mrb[28].mxu1 %v1340_v25 }
 0x24e   :  { %2131 = vmatpush1.bf16.msra.mxu0 %v12549_v1 }
 0x24f   :  { %2132 = vmatprep.subr.bf16.mxu0 %v13241_v33 }
 0x252   :  { %2133 = vmatpush1.bf16.msra.mxu0 %v12550_v34 }
 0x253   :  { %2134 = vmatprep.subr.bf16.mxu0 %v13241_v33 }
 0x256   :  { %2135 = vmatpush1.bf16.msra.mxu0 %v12551_v23 }
 0x257   :  { %2136 = vmatprep.subr.bf16.mxu0 %v13241_v33 }
 0x25a   :  { %2137 = vmatpush1.bf16.msra.mxu0 %v12552_v3 }
 0x25b   :  { %2138 = vmatprep.subr.bf16.mxu0 %v13241_v33 }
 0x2c4   :  { %v1479_v7 = vpop.f32.mrb[0].mxu1 }
 0x2c5   :  { %v1480_v28 = vadd.f32 %v14033_v63, %v1479_v7  ;;  %v1481_v12 = vpop.f32.mrb[1].mxu1 }
 0x2c6   :  { %v1482_v29 = vpop.f32.mrb[2].mxu1 }
 0x2c7   :  { %v1542_v30 = vmax.f32 %v1480_v28, 0.0  ;;  %v1483_v6 = vadd.f32 %v14033_v63, %v1482_v29  ;;  %v1484_v47 = vpop.f32.mrb[3].mxu1 }
 0x2c8   :  { %v12553_v47 = vld [vmem:[%s13284_s25 + $0x38] sm:$0xff]  }
 0x2c9   :  { %1558 = vst.msk [vmem:[#allocation2 + $0x11] sm:$0xff] %vm184_vm3, %v1542_v30  ;;  %v1543_v40 = vmax.f32 %v1483_v6, 0.0  ;;  %2139 = vmatpush1.bf16.msra.mxu0 %v12553_v47 }
 0x2ca   :  { %2140 = vmatprep.subr.bf16.mxu0 %v13241_v33 }
 0x2cb   :  { %1559 = vst.msk [vmem:[#allocation2 + $0x21] sm:$0xff] %vm184_vm3, %v1543_v40 }
 0x2cd   :  { %v1487_v41 = vpop.f32.mrb[4].mxu1 }
 0x2ce   :  { %v1488_v8 = vadd.f32 %v14033_v63, %v1487_v41  ;;  %v1489_v42 = vpop.f32.mrb[5].mxu1 }
 0x2cf   :  { %v1490_v43 = vpop.f32.mrb[6].mxu1 }
 0x2d0   :  { %v1544_v44 = vmax.f32 %v1488_v8, 0.0  ;;  %v1491_v14 = vadd.f32 %v14033_v63, %v1490_v43  ;;  %v1492_v35 = vpop.f32.mrb[7].mxu1  ;;  %v1621_v46 = vld [vmem:[#allocation2 + $0x10] ss:$2 sm:$0xf] }
 0x2d1   :  { %1787 = vrot.lane.b32.xlu0 %v1621_v46, %s13243_s13  ;;  %v1637_v48 = vld [vmem:[#allocation2 + $0x11] ss:$2 sm:$0xf]  ;;  %v1653_v50 = vld [vmem:[#allocation2 + $0x12] ss:$2 sm:$0xf] }
 0x2d2   :  { %1560 = vst.msk [vmem:[#allocation2 + $0x31] sm:$0xff] %vm184_vm3, %v1544_v44  ;;  %v1545_v13 = vmax.f32 %v1491_v14, 0.0  ;;  %v1592_v19 = vld [vmem:[#allocation2 + $0x21] ss:$2 sm:$0xf] }
 0x2d3   :  { %1725 = vrot.lane.b32.xlu1 %v1592_v19, %s13242_s5  ;;  %v1608_v49 = vld [vmem:[#allocation2 + $0x22] ss:$2 sm:$0xf]  ;;  %v1684_v26 = vld [vmem:[#allocation2 + $0x21] ss:$2 sm:$0xf] }
 0x2d4   :  { %1561 = vst.msk [vmem:[#allocation2 + $0x41] sm:$0xff] %vm184_vm3, %v1545_v13  ;;  %v1668_v38 = vld [vmem:[#allocation2 + $0x20] ss:$2 sm:$0xf] }
 0x2d5   :  { %1819 = vrot.lane.b32.xlu0 %v1637_v48, %s13235_s1  ;;  %v1700_v4 = vld [vmem:[#allocation2 + $0x22] ss:$2 sm:$0xf] }
 0x2d6   :  { %v12554_v19 = vld [vmem:[%s13284_s25 + $0x40] sm:$0xff]   ;;  %s15672_s25 = sld [smem:[#allocation23_spill]] }
 0x2d7   :  { %1757 = vrot.lane.b32.xlu1 %v1608_v49, %s13244_s30  ;;  %2141 = vmatpush1.bf16.msra.mxu0 %v12554_v19 }
 0x2d9   :  { %1851 = vrot.lane.b32.xlu0 %v1653_v50, %s13245_s4  ;;  %v1623_v52 = vld [vmem:[#allocation2 + $0x30] ss:$2 sm:$0xf]  ;;  %v1639_v51 = vld [vmem:[#allocation2 + $0x31] ss:$2 sm:$0xf] }
 0x2da   :  { %v1655_v18 = vld [vmem:[#allocation2 + $0x32] ss:$2 sm:$0xf] }
 0x2db   :  { %1789 = vrot.lane.b32.xlu1 %v1623_v52, %s13243_s13  ;;  %v1594_v53 = vld [vmem:[#allocation2 + $0x41] ss:$2 sm:$0xf]  ;;  %v1670_v57 = vld [vmem:[#allocation2 + $0x40] ss:$2 sm:$0xf] }
 0x2dc   :  { %v1610_v21 = vld [vmem:[#allocation2 + $0x42] ss:$2 sm:$0xf]  ;;  %v1686_v0 = vld [vmem:[#allocation2 + $0x41] ss:$2 sm:$0xf] }
 0x2dd   :  { %1883 = vrot.lane.b32.xlu0 %v1668_v38, %s13247_s22  ;;  %v1702_v27 = vld [vmem:[#allocation2 + $0x42] ss:$2 sm:$0xf] }
 0x2de   :  { %v10751_v30 = vcombine.low %v1700_v4, %v1702_v27 }
 0x2df   :  { %1821 = vrot.lane.b32.xlu1 %v1639_v51, %s13235_s1 }
 0x2e1   :  { %1915 = vrot.lane.b32.xlu0 %v1684_v26, %s13246_s17 }
 0x2e3   :  { %1853 = vrot.lane.b32.xlu1 %v1655_v18, %s13245_s4 }
 0x2e4   :  { %v1495_v36 = vpop.f32.mrb[8].mxu1 }
 0x2e5   :  { %v1496_v56 = vadd.f32 %v14033_v63, %v1495_v36  ;;  %v1497_v45 = vpop.f32.mrb[9].mxu1  ;;  %1727 = vrot.lane.b32.xlu0 %v1594_v53, %s13242_s5 }
 0x2e6   :  { %v1498_v32 = vpop.f32.mrb[10].mxu1 }
 0x2e7   :  { %v1546_v60 = vmax.f32 %v1496_v56, 0.0  ;;  %v1499_v61 = vadd.f32 %v14033_v63, %v1498_v32  ;;  %v1500_v62 = vpop.f32.mrb[11].mxu1  ;;  %1885 = vrot.lane.b32.xlu1 %v1670_v57, %s13247_s22 }
 0x2e9   :  { %1562 = vst.msk [vmem:[#allocation2 + $0x51] sm:$0xff] %vm184_vm3, %v1546_v60  ;;  %v1547_v9 = vmax.f32 %v1499_v61, 0.0  ;;  %1759 = vrot.lane.b32.xlu0 %v1610_v21, %s13244_s30 }
 0x2eb   :  { %1563 = vst.msk [vmem:[#allocation2 + $0x61] sm:$0xff] %vm184_vm3, %v1547_v9  ;;  %1917 = vrot.lane.b32.xlu1 %v1686_v0, %s13246_s17 }
 0x2ed   :  { %v1503_v55 = vpop.f32.mrb[12].mxu1 }
 0x2ee   :  { %v1504_v37 = vadd.f32 %v14033_v63, %v1503_v55  ;;  %v1505_v58 = vpop.f32.mrb[13].mxu1 }
 0x2ef   :  { %v1506_v39 = vpop.f32.mrb[14].mxu1 }
 0x2f0   :  { %v1548_v2 = vmax.f32 %v1504_v37, 0.0  ;;  %v1507_v5 = vadd.f32 %v14033_v63, %v1506_v39  ;;  %v1508_v11 = vpop.f32.mrb[15].mxu1  ;;  %v1625_v15 = vld [vmem:[#allocation2 + $0x50] ss:$2 sm:$0xf] }
 0x2f1   :  { %1791 = vrot.lane.b32.xlu0 %v1625_v15, %s13243_s13  ;;  %v1641_v20 = vld [vmem:[#allocation2 + $0x51] ss:$2 sm:$0xf]  ;;  %v1657_v10 = vld [vmem:[#allocation2 + $0x52] ss:$2 sm:$0xf] }
 0x2f2   :  { %1564 = vst.msk [vmem:[#allocation2 + $0x71] sm:$0xff] %vm184_vm3, %v1548_v2  ;;  %v1549_v16 = vmax.f32 %v1507_v5, 0.0  ;;  %v1596_v17 = vld [vmem:[#allocation2 + $0x61] ss:$2 sm:$0xf] }
 0x2f3   :  { %1729 = vrot.lane.b32.xlu1 %v1596_v17, %s13242_s5  ;;  %v1612_v24 = vld [vmem:[#allocation2 + $0x62] ss:$2 sm:$0xf]  ;;  %v1688_v46 = vld [vmem:[#allocation2 + $0x61] ss:$2 sm:$0xf] }
 0x2f4   :  { %1565 = vst.msk [vmem:[#allocation2 + $0x81] sm:$0xff] %vm184_vm3, %v1549_v16  ;;  %v1704_v7 = vld [vmem:[#allocation2 + $0x62] ss:$2 sm:$0xf] }
 0x2f5   :  { %1823 = vrot.lane.b32.xlu0 %v1641_v20, %s13235_s1  ;;  %v1672_v29 = vld [vmem:[#allocation2 + $0x60] ss:$2 sm:$0xf] }
 0x2f7   :  { %1761 = vrot.lane.b32.xlu1 %v1612_v24, %s13244_s30 }
 0x2f9   :  { %1855 = vrot.lane.b32.xlu0 %v1657_v10, %s13245_s4  ;;  %v1627_v25 = vld [vmem:[#allocation2 + $0x70] ss:$2 sm:$0xf]  ;;  %v1643_v42 = vld [vmem:[#allocation2 + $0x71] ss:$2 sm:$0xf] }
 0x2fa   :  { %v1659_v48 = vld [vmem:[#allocation2 + $0x72] ss:$2 sm:$0xf] }
 0x2fb   :  { %1793 = vrot.lane.b32.xlu1 %v1627_v25, %s13243_s13  ;;  %v1706_v28 = vld [vmem:[#allocation2 + $0x82] ss:$2 sm:$0xf]  ;;  %v1690_v53 = vld [vmem:[#allocation2 + $0x81] ss:$2 sm:$0xf] }
 0x2fc   :  { %v1511_v12 = vpop.f32.mrb[16].mxu1  ;;  %v10753_v6 = vcombine.low %v1704_v7, %v1706_v28  ;;  %v1674_v38 = vld [vmem:[#allocation2 + $0x80] ss:$2 sm:$0xf] }
 0x2fd   :  { %v1512_v40 = vadd.f32 %v14033_v63, %v1511_v12  ;;  %v1513_v41 = vpop.f32.mrb[17].mxu1  ;;  %1887 = vrot.lane.b32.xlu0 %v1672_v29, %s13247_s22 }
 0x2fe   :  { %v1514_v8 = vpop.f32.mrb[18].mxu1  ;;  %v2036_v43 = vpack.c.bf16 %v10753_v6, %v10751_v30 }
 0x2ff   :  { %v1550_v44 = vmax.f32 %v1512_v40, 0.0  ;;  %v1515_v14 = vadd.f32 %v14033_v63, %v1514_v8  ;;  %v1516_v35 = vpop.f32.mrb[19].mxu1  ;;  %1825 = vrot.lane.b32.xlu1 %v1643_v42, %s13235_s1 }
 0x300   :  { %10768 = vmatprep.mubr.msk.bf16.mxu0 %vm184_vm3, %v2036_v43  ;;  %v2251_v35 = vld [vmem:[#allocation3 + $0x28] sm:$0xf] }
 0x301   :  { %1566 = vst.msk [vmem:[#allocation2 + $0xb1] sm:$0xff] %vm184_vm3, %v1550_v44  ;;  %v1551_v13 = vmax.f32 %v1515_v14, 0.0  ;;  %1919 = vrot.lane.b32.xlu0 %v1688_v46, %s13246_s17  ;;  %v2207_v14 = vld [vmem:[#allocation3 + $0x1] sm:$0xf] }
 0x303   :  { %1567 = vst.msk [vmem:[#allocation2 + $0xc1] sm:$0xff] %vm184_vm3, %v1551_v13  ;;  %1857 = vrot.lane.b32.xlu1 %v1659_v48, %s13245_s4 }
 0x305   :  { %v1519_v49 = vpop.f32.mrb[20].mxu1 }
 0x306   :  { %v1520_v50 = vadd.f32 %v14033_v63, %v1519_v49  ;;  %v1521_v52 = vpop.f32.mrb[21].mxu1 }
 0x307   :  { %v1522_v51 = vpop.f32.mrb[22].mxu1  ;;  %1889 = vrot.lane.b32.xlu1 %v1674_v38, %s13247_s22 }
 0x308   :  { %v1552_v33 = vmax.f32 %v1520_v50, 0.0  ;;  %v1523_v59 = vadd.f32 %v14033_v63, %v1522_v51  ;;  %v1524_v26 = vpop.f32.mrb[23].mxu1  ;;  %v1629_v18 = vld [vmem:[#allocation2 + $0xb0] ss:$2 sm:$0xf] }
 0x309   :  { %1795 = vrot.lane.b32.xlu0 %v1629_v18, %s13243_s13  ;;  %v1645_v54 = vld [vmem:[#allocation2 + $0xb1] ss:$2 sm:$0xf]  ;;  %v1661_v45 = vld [vmem:[#allocation2 + $0xb2] ss:$2 sm:$0xf] }
 0x30a   :  { %1568 = vst.msk [vmem:[#allocation2 + $0xd1] sm:$0xff] %vm184_vm3, %v1552_v33  ;;  %v1553_v36 = vmax.f32 %v1523_v59, 0.0  ;;  %v1600_v56 = vld [vmem:[#allocation2 + $0xc1] ss:$2 sm:$0xf] }
 0x30b   :  { %1921 = vrot.lane.b32.xlu1 %v1690_v53, %s13246_s17  ;;  %v1616_v32 = vld [vmem:[#allocation2 + $0xc2] ss:$2 sm:$0xf]  ;;  %v1692_v9 = vld [vmem:[#allocation2 + $0xc1] ss:$2 sm:$0xf] }
 0x30c   :  { %1569 = vst.msk [vmem:[#allocation2 + $0xe1] sm:$0xff] %vm184_vm3, %v1553_v36  ;;  %v1676_v57 = vld [vmem:[#allocation2 + $0xc0] ss:$2 sm:$0xf] }
 0x30d   :  { %1827 = vrot.lane.b32.xlu0 %v1645_v54, %s13235_s1 }
 0x30f   :  { %1733 = vrot.lane.b32.xlu1 %v1600_v56, %s13242_s5 }
 0x311   :  { %1859 = vrot.lane.b32.xlu0 %v1661_v45, %s13245_s4  ;;  %v1631_v61 = vld [vmem:[#allocation2 + $0xd0] ss:$2 sm:$0xf]  ;;  %v1647_v37 = vld [vmem:[#allocation2 + $0xd1] ss:$2 sm:$0xf] }
 0x312   :  { %v1663_v2 = vld [vmem:[#allocation2 + $0xd2] ss:$2 sm:$0xf] }
 0x313   :  { %1765 = vrot.lane.b32.xlu1 %v1616_v32, %s13244_s30  ;;  %v1602_v39 = vld [vmem:[#allocation2 + $0xe1] ss:$2 sm:$0xf]  ;;  %v1618_v34 = vld [vmem:[#allocation2 + $0xe2] ss:$2 sm:$0xf] }
 0x314   :  { %v1678_v24 = vld [vmem:[#allocation2 + $0xe0] ss:$2 sm:$0xf]  ;;  %v1694_v25 = vld [vmem:[#allocation2 + $0xe1] ss:$2 sm:$0xf] }
 0x315   :  { %1891 = vrot.lane.b32.xlu0 %v1676_v57, %s13247_s22  ;;  %v1574_v57 = vld [vmem:[#allocation2] ss:$2 sm:$0xf] }
 0x316   :  { %v1527_v60 = vpop.f32.mrb[24].mxu1 }
 0x317   :  { %v1528_v62 = vadd.f32 %v14033_v63, %v1527_v60  ;;  %v1529_v21 = vpop.f32.mrb[25].mxu1  ;;  %1797 = vrot.lane.b32.xlu1 %v1631_v61, %s13243_s13 }
 0x318   :  { %v1530_v22 = vpop.f32.mrb[26].mxu1  ;;  %v1576_v21 = vld [vmem:[#allocation2 + $0x20] ss:$2 sm:$0xf] }
 0x319   :  { %v1554_v0 = vmax.f32 %v1528_v62, 0.0  ;;  %v1531_v1 = vadd.f32 %v14033_v63, %v1530_v22  ;;  %v1532_v55 = vpop.f32.mrb[27].mxu1  ;;  %1923 = vrot.lane.b32.xlu0 %v1692_v9, %s13246_s17 }
 0x31a   :  { %v1578_v55 = vld [vmem:[#allocation2 + $0x40] ss:$2 sm:$0xf] }
 0x31b   :  { %1570 = vst.msk [vmem:[#allocation2 + $0xf1] sm:$0xff] %vm184_vm3, %v1554_v0  ;;  %v1555_v58 = vmax.f32 %v1531_v1, 0.0  ;;  %1829 = vrot.lane.b32.xlu1 %v1647_v37, %s13235_s1  ;;  %v1580_v37 = vld [vmem:[#allocation2 + $0x60] ss:$2 sm:$0xf] }
 0x31d   :  { %1571 = vst.msk [vmem:[#allocation2 + $0x101] sm:$0xff] %vm184_vm3, %v1555_v58  ;;  %1735 = vrot.lane.b32.xlu0 %v1602_v39, %s13242_s5 }
 0x31f   :  { %v1535_v5 = vpop.f32.mrb[28].mxu1  ;;  %1861 = vrot.lane.b32.xlu1 %v1663_v2, %s13245_s4 }
 0x320   :  { %v1536_v11 = vadd.f32 %v14033_v63, %v1535_v5  ;;  %v1537_v15 = vpop.f32.mrb[29].mxu1 }
 0x321   :  { %v1538_v16 = vpop.f32.mrb[30].mxu1  ;;  %1767 = vrot.lane.b32.xlu0 %v1618_v34, %s13244_s30 }
 0x322   :  { %v1556_v17 = vmax.f32 %v1536_v11, 0.0  ;;  %v1539_v20 = vadd.f32 %v14033_v63, %v1538_v16  ;;  %v1540_v23 = vpop.f32.mrb[31].mxu1  ;;  %v1633_v10 = vld [vmem:[#allocation2 + $0xf0] ss:$2 sm:$0xf]  ;;  %v14128_v63 = vpop.permute.xlu0 %1723 }
 0x323   :  { %1893 = vrot.lane.b32.xlu1 %v1678_v24, %s13247_s22  ;;  %v1649_v27 = vld [vmem:[#allocation2 + $0xf1] ss:$2 sm:$0xf]  ;;  %v1665_v7 = vld [vmem:[#allocation2 + $0xf2] ss:$2 sm:$0xf]  ;;  %v1939_v62 = vsel %vm184_vm3, %v1574_v57, %v14128_v63 }
 0x324   :  { %1572 = vst.msk [vmem:[#allocation2 + $0x111] sm:$0xff] %vm184_vm3, %v1556_v17  ;;  %v1557_v3 = vmax.f32 %v1539_v20, 0.0  ;;  %v1604_v4 = vld [vmem:[#allocation2 + $0x101] ss:$2 sm:$0xf] }
 0x325   :  { %1799 = vrot.lane.b32.xlu0 %v1633_v10, %s13243_s13  ;;  %v1620_v28 = vld [vmem:[#allocation2 + $0x102] ss:$2 sm:$0xf]  ;;  %v1696_v6 = vld [vmem:[#allocation2 + $0x101] ss:$2 sm:$0xf] }
 0x326   :  { %1573 = vst.msk [vmem:[#allocation2 + $0x121] sm:$0xff] %vm184_vm3, %v1557_v3  ;;  %v1680_v12 = vld [vmem:[#allocation2 + $0x100] ss:$2 sm:$0xf]  ;;  %v14133_v29 = vpop.permute.xlu0 %1755 }
 0x327   :  { %1925 = vrot.lane.b32.xlu1 %v1694_v25, %s13246_s17  ;;  %v1947_v0 = vsel %vm1224_vm6, %v1939_v62, %v14133_v29 }
 0x329   :  { %1831 = vrot.lane.b32.xlu0 %v1649_v27, %s13235_s1 }
 0x32a   :  { %v14138_v40 = vpop.permute.xlu0 %1731 }
 0x32b   :  { %1737 = vrot.lane.b32.xlu1 %v1604_v4, %s13242_s5  ;;  %v1635_v30 = vld [vmem:[#allocation2 + $0x110] ss:$2 sm:$0xf]  ;;  %v1651_v47 = vld [vmem:[#allocation2 + $0x111] ss:$2 sm:$0xf] }
 0x32c   :  { %v1667_v41 = vld [vmem:[#allocation2 + $0x112] ss:$2 sm:$0xf] }
 0x32d   :  { %1863 = vrot.lane.b32.xlu0 %v1665_v7, %s13245_s4  ;;  %v1682_v42 = vld [vmem:[#allocation2 + $0x120] ss:$2 sm:$0xf]  ;;  %v1698_v43 = vld [vmem:[#allocation2 + $0x121] ss:$2 sm:$0xf] }
 0x32e   :  { %v14177_v8 = vpop.permute.xlu0 %1763  ;;  %v1714_v63 = vld [vmem:[#allocation2 + $0x122] ss:$2 sm:$0xf] }
 0x32f   :  { %1769 = vrot.lane.b32.xlu1 %v1620_v28, %s13244_s30 }
 0x331   :  { %1895 = vrot.lane.b32.xlu0 %v1680_v12, %s13247_s22 }
 0x333   :  { %1801 = vrot.lane.b32.xlu1 %v1635_v30, %s13243_s13 }
 0x335   :  { %1927 = vrot.lane.b32.xlu0 %v1696_v6, %s13246_s17 }
 0x337   :  { %1833 = vrot.lane.b32.xlu1 %v1651_v47, %s13235_s1 }
 0x339   :  { %2280 = vrot.lane.b32.xlu0 %v2207_v14, %s13244_s30 }
 0x33b   :  { %1865 = vrot.lane.b32.xlu1 %v1667_v41, %s13245_s4 }
 0x33f   :  { %1897 = vrot.lane.b32.xlu1 %v1682_v42, %s13247_s22  ;;  %v1710_v42 = vld [vmem:[#allocation2 + $0xe2] ss:$2 sm:$0xf] }
 0x343   :  { %1929 = vrot.lane.b32.xlu1 %v1698_v43, %s13246_s17  ;;  %v1788_v44 = vpop.permute.xlu0 %1787  ;;  %v1712_v43 = vld [vmem:[#allocation2 + $0x102] ss:$2 sm:$0xf] }
 0x344   :  { %v1955_v17 = vsel %vm1241_vm7, %v1947_v0, %v1788_v44 }
 0x345   :  { %v1726_v46 = vpop.permute.xlu1 %1725 }
 0x346   :  { %v1940_v9 = vsel %vm184_vm3, %v1576_v21, %v1726_v46  ;;  %v10757_v46 = vcombine.low %v1712_v43, %v1714_v63 }
 0x347   :  { %v1820_v13 = vpop.permute.xlu0 %1819  ;;  %2414 = vrot.lane.b32.xlu1 %v2251_v35, %s13235_s1 }
 0x348   :  { %v1963_v3 = vsel %vm1258_vm8, %v1955_v17, %v1820_v13 }
 0x349   :  { %v1758_v19 = vpop.permute.xlu1 %1757 }
 0x34a   :  { %v1948_v1 = vsel %vm1224_vm6, %v1940_v9, %v1758_v19 }
 0x34b   :  { %v1852_v48 = vpop.permute.xlu0 %1851 }
 0x34c   :  { %v1971_v7 = vsel %vm1275_vm9, %v1963_v3, %v1852_v48 }
 0x34d   :  { %v1790_v49 = vpop.permute.xlu1 %1789 }
 0x34e   :  { %v1956_v39 = vsel %vm1241_vm7, %v1948_v1, %v1790_v49  ;;  %v1708_v49 = vld [vmem:[#allocation2 + $0xc2] ss:$2 sm:$0xf] }
 0x34f   :  { %v1884_v50 = vpop.permute.xlu0 %1883  ;;  %v1582_v1 = vld [vmem:[#allocation2 + $0xa0] ss:$2 sm:$0xf] }
 0x350   :  { %v1979_v30 = vsel %vm1292_vm10, %v1971_v7, %v1884_v50 }
 0x351   :  { %v1822_v52 = vpop.permute.xlu1 %1821 }
 0x352   :  { %v1964_v11 = vsel %vm1258_vm8, %v1956_v39, %v1822_v52  ;;  %v10755_v52 = vcombine.low %v1708_v49, %v1710_v42  ;;  %v1943_v39 = vsel %vm184_vm3, %v1582_v1, %v14138_v40  ;;  %v2259_v49 = vld [vmem:[#allocation3 + $0x29] sm:$0xf] }
 0x353   :  { %v1916_v38 = vpop.permute.xlu0 %1915  ;;  %2446 = vrot.lane.b32.xlu1 %v2259_v49, %s13247_s22 }
 0x354   :  { %v1987_v44 = vsel %vm1309_vm11, %v1979_v30, %v1916_v38 }
 0x355   :  { %v1854_v51 = vpop.permute.xlu1 %1853 }
 0x356   :  { %v1972_v20 = vsel %vm1275_vm9, %v1964_v11, %v1854_v51  ;;  %v1586_v11 = vld [vmem:[#allocation2 + $0xe0] ss:$2 sm:$0xf] }
 0x357   :  { %v1728_v33 = vpop.permute.xlu0 %1727 }
 0x358   :  { %v1941_v2 = vsel %vm184_vm3, %v1578_v55, %v1728_v33  ;;  %v2038_v33 = vpack.c.bf16 %v10757_v46, %v10755_v52  ;;  %v1584_v55 = vld [vmem:[#allocation2 + $0xc0] ss:$2 sm:$0xf] }
 0x359   :  { %v1886_v59 = vpop.permute.xlu1 %1885  ;;  %v2215_v52 = vld [vmem:[#allocation3 + $0x2] sm:$0xf] }
 0x35a   :  { %v1980_v10 = vsel %vm1292_vm10, %v1972_v20, %v1886_v59  ;;  %v1951_v20 = vsel %vm1224_vm6, %v1943_v39, %v14177_v8  ;;  %2312 = vrot.lane.b32.xlu0 %v2215_v52, %s13235_s1  ;;  %v12559_v39 = vld [vmem:[%s13294_s3 + $0x50] sm:$0xff]  }
 0x35b   :  { %v1760_v26 = vpop.permute.xlu0 %1759 }
 0x35c   :  { %v1949_v15 = vsel %vm1224_vm6, %v1941_v2, %v1760_v26 }
 0x35d   :  { %v1918_v18 = vpop.permute.xlu1 %1917 }
 0x35e   :  { %v1988_v28 = vsel %vm1309_vm11, %v1980_v10, %v1918_v18 }
 0x35f   :  { %v10750_v13 = vcombine.low %v1987_v44, %v1988_v28 }
 0x363   :  { %v1792_v36 = vpop.permute.xlu0 %1791 }
 0x364   :  { %v1957_v23 = vsel %vm1241_vm7, %v1949_v15, %v1792_v36  ;;  %v1588_v15 = vld [vmem:[#allocation2 + $0x100] ss:$2 sm:$0xf] }
 0x365   :  { %v1730_v53 = vpop.permute.xlu1 %1729 }
 0x366   :  { %v1942_v5 = vsel %vm184_vm3, %v1580_v37, %v1730_v53 }
 0x367   :  { %v1824_v54 = vpop.permute.xlu0 %1823 }
 0x368   :  { %v1965_v25 = vsel %vm1258_vm8, %v1957_v23, %v1824_v54 }
 0x369   :  { %v1762_v56 = vpop.permute.xlu1 %1761 }
 0x36a   :  { %v1950_v34 = vsel %vm1224_vm6, %v1942_v5, %v1762_v56 }
 0x36b   :  { %v1856_v45 = vpop.permute.xlu0 %1855 }
 0x36c   :  { %v1973_v12 = vsel %vm1275_vm9, %v1965_v25, %v1856_v45 }
 0x36d   :  { %v1794_v32 = vpop.permute.xlu1 %1793 }
 0x36e   :  { %v1958_v24 = vsel %vm1241_vm7, %v1950_v34, %v1794_v32 }
 0x36f   :  { %v1888_v60 = vpop.permute.xlu0 %1887 }
 0x370   :  { %v1981_v6 = vsel %vm1292_vm10, %v1973_v12, %v1888_v60 }
 0x371   :  { %v1826_v61 = vpop.permute.xlu1 %1825 }
 0x372   :  { %v1966_v27 = vsel %vm1258_vm8, %v1958_v24, %v1826_v61 }
 0x373   :  { %v1920_v58 = vpop.permute.xlu0 %1919 }
 0x374   :  { %v1989_v14 = vsel %vm1309_vm11, %v1981_v6, %v1920_v58 }
 0x375   :  { %v1858_v22 = vpop.permute.xlu1 %1857 }
 0x376   :  { %v1974_v29 = vsel %vm1275_vm9, %v1966_v27, %v1858_v22 }
 0x379   :  { %v1890_v16 = vpop.permute.xlu1 %1889 }
 0x37a   :  { %v1982_v47 = vsel %vm1292_vm10, %v1974_v29, %v1890_v16 }
 0x37b   :  { %v1796_v4 = vpop.permute.xlu0 %1795 }
 0x37c   :  { %v1959_v10 = vsel %vm1241_vm7, %v1951_v20, %v1796_v4  ;;  %v12563_v20 = vld [vmem:[%s13294_s3 + $0x60] sm:$0xff]  }
 0x37d   :  { %v1922_v41 = vpop.permute.xlu1 %1921 }
 0x37e   :  { %v1990_v35 = vsel %vm1309_vm11, %v1982_v47, %v1922_v41 }
 0x37f   :  { %v10752_v19 = vcombine.low %v1989_v14, %v1990_v35  ;;  %v1828_v48 = vpop.permute.xlu0 %1827 }
 0x380   :  { %v1967_v7 = vsel %vm1258_vm8, %v1959_v10, %v1828_v48  ;;  %v12566_v10 = vld [vmem:[%s13294_s3 + $0x28] sm:$0xff]  }
 0x381   :  { %v2035_v50 = vpack.c.bf16 %v10752_v19, %v10750_v13  ;;  %v1734_v51 = vpop.permute.xlu1 %1733 }
 0x382   :  { %v1944_v2 = vsel %vm184_vm3, %v1584_v55, %v1734_v51  ;;  %v2211_v51 = vld [vmem:[#allocation3 + $0x31] sm:$0xf] }
 0x383   :  { %2157 = vmatmul.mubr.bf16.vlgmr.msra.gmra.mrb[16].mxu0 %v2035_v50  ;;  %v1860_v59 = vpop.permute.xlu0 %1859  ;;  %v2255_v50 = vld [vmem:[#allocation3 + $0x58] sm:$0xf]  ;;  %2288 = vrot.lane.b32.xlu0 %v2211_v51, %s13244_s30 }
 0x384   :  { %10769 = vmatprep.mubr.msk.bf16.mxu0 %vm184_vm3, %v2038_v33  ;;  %v1975_v30 = vsel %vm1275_vm9, %v1967_v7, %v1860_v59  ;;  %2422 = vrot.lane.b32.xlu1 %v2255_v50, %s13235_s1  ;;  %v2263_v33 = vld [vmem:[#allocation3 + $0x59] sm:$0xf]  ;;  %v2219_v59 = vld [vmem:[#allocation3 + $0x32] sm:$0xf] }
 0x385   :  { %v1766_v26 = vpop.permute.xlu1 %1765  ;;  %v12568_v7 = vld [vmem:[%s13294_s3 + $0x30] sm:$0xff]  }
 0x386   :  { %v1952_v5 = vsel %vm1224_vm6, %v1944_v2, %v1766_v26  ;;  %v14267_v26 = vld [vmem:[%s13289_s29] ss:$0 sm:$0xff]  ;;  %v12560_v2 = vld [vmem:[%s13294_s3 + $0x10] sm:$0xff]   ;;  %s15673_s29 = sld [smem:[#allocation26_spill]] }
 0x387   :  { %v1892_v18 = vpop.permute.xlu0 %1891  ;;  %2320 = vrot.lane.b32.xlu0 %v2219_v59, %s13235_s1 }
 0x388   :  { %v1983_v41 = vsel %vm1292_vm10, %v1975_v30, %v1892_v18  ;;  %2454 = vrot.lane.b32.xlu1 %v2263_v33, %s13247_s22 }
 0x389   :  { %v1798_v38 = vpop.permute.xlu1 %1797 }
 0x38a   :  { %v1960_v34 = vsel %vm1241_vm7, %v1952_v5, %v1798_v38 }
 0x38b   :  { %v1924_v36 = vpop.permute.xlu0 %1923 }
 0x38c   :  { %v1991_v14 = vsel %vm1309_vm11, %v1983_v41, %v1924_v36 }
 0x38d   :  { %v1830_v53 = vpop.permute.xlu1 %1829 }
 0x38e   :  { %v1968_v23 = vsel %vm1258_vm8, %v1960_v34, %v1830_v53  ;;  %v12562_v34 = vld [vmem:[%s13294_s3 + $0x18] sm:$0xff]  }
 0x38f   :  { %v1736_v54 = vpop.permute.xlu0 %1735 }
 0x390   :  { %v1945_v16 = vsel %vm184_vm3, %v1586_v11, %v1736_v54 }
 0x391   :  { %v1862_v56 = vpop.permute.xlu1 %1861 }
 0x392   :  { %v1976_v25 = vsel %vm1275_vm9, %v1968_v23, %v1862_v56  ;;  %v12564_v23 = vld [vmem:[%s13294_s3 + $0x20] sm:$0xff]  }
 0x393   :  { %v1768_v45 = vpop.permute.xlu0 %1767 }
 0x394   :  { %v1953_v24 = vsel %vm1224_vm6, %v1945_v16, %v1768_v45 }
 0x395   :  { %v1894_v32 = vpop.permute.xlu1 %1893 }
 0x396   :  { %v1984_v28 = vsel %vm1292_vm10, %v1976_v25, %v1894_v32 }
 0x397   :  { %v1800_v60 = vpop.permute.xlu0 %1799 }
 0x398   :  { %v1961_v27 = vsel %vm1241_vm7, %v1953_v24, %v1800_v60 }
 0x399   :  { %v1926_v57 = vpop.permute.xlu1 %1925 }
 0x39a   :  { %v1992_v6 = vsel %vm1309_vm11, %v1984_v28, %v1926_v57 }
 0x39b   :  { %v1832_v62 = vpop.permute.xlu0 %1831  ;;  %v10754_v13 = vcombine.low %v1991_v14, %v1992_v6 }
 0x39c   :  { %v1969_v8 = vsel %vm1258_vm8, %v1961_v27, %v1832_v62  ;;  %v12556_v62 = vld [vmem:[%s13294_s3] sm:$0xff]  }
 0x39d   :  { %v1738_v61 = vpop.permute.xlu1 %1737 }
 0x39e   :  { %v1946_v17 = vsel %vm184_vm3, %v1588_v15, %v1738_v61  ;;  %v12555_v61 = vld [vmem:[%s13294_s3 + $0x40] sm:$0xff]   ;;  %v12561_v15 = vld [vmem:[%s13294_s3 + $0x58] sm:$0xff]   ;;  %vm7795_vm3 = vcmask 1043456  }
 0x39f   :  { %v1864_v9 = vpop.permute.xlu0 %1863  ;;  %11369 = vmatprep.subr.bf16.mxu0 %v12555_v61 }
 0x3a0   :  { %v1977_v4 = vsel %vm1275_vm9, %v1969_v8, %v1864_v9  ;;  %11370 = vmatpush3.bf16.msra.mxu0 %v12556_v62 }
 0x3a1   :  { %v1770_v21 = vpop.permute.xlu1 %1769 }
 0x3a2   :  { %v1954_v40 = vsel %vm1224_vm6, %v1946_v17, %v1770_v21 }
 0x3a3   :  { %v1896_v37 = vpop.permute.xlu0 %1895 }
 0x3a4   :  { %v1985_v42 = vsel %vm1292_vm10, %v1977_v4, %v1896_v37  ;;  %v12557_v37 = vld [vmem:[%s13294_s3 + $0x48] sm:$0xff]  }
 0x3a5   :  { %v1802_v22 = vpop.permute.xlu1 %1801  ;;  %11371 = vmatprep.subr.bf16.mxu0 %v12557_v37 }
 0x3a6   :  { %v1962_v63 = vsel %vm1241_vm7, %v1954_v40, %v1802_v22 }
 0x3a7   :  { %v1928_v12 = vpop.permute.xlu0 %1927 }
 0x3a8   :  { %v1993_v35 = vsel %vm1309_vm11, %v1985_v42, %v1928_v12  ;;  %v12569_v12 = vld [vmem:[%s13294_s3 + $0x78] sm:$0xff]  }
 0x3a9   :  { %v1834_v0 = vpop.permute.xlu1 %1833 }
 0x3aa   :  { %v1970_v29 = vsel %vm1258_vm8, %v1962_v63, %v1834_v0  ;;  %v12567_v63 = vld [vmem:[%s13294_s3 + $0x70] sm:$0xff]  }
 0x3ad   :  { %v1866_v58 = vpop.permute.xlu1 %1865 }
 0x3ae   :  { %v1978_v47 = vsel %vm1275_vm9, %v1970_v29, %v1866_v58  ;;  %v12558_v58 = vld [vmem:[%s13294_s3 + $0x8] sm:$0xff]   ;;  %v12570_v29 = vld [vmem:[%s13294_s3 + $0x38] sm:$0xff]  }
 0x3af   :  { %11372 = vmatpush3.bf16.msra.mxu0 %v12558_v58 }
 0x3b0   :  { %11373 = vmatprep.subr.bf16.mxu0 %v12559_v39 }
 0x3b1   :  { %v1898_v3 = vpop.permute.xlu1 %1897 }
 0x3b2   :  { %v1986_v43 = vsel %vm1292_vm10, %v1978_v47, %v1898_v3  ;;  %v12565_v3 = vld [vmem:[%s13294_s3 + $0x68] sm:$0xff]  }
 0x3b3   :  { %11374 = vmatpush3.bf16.msra.mxu0 %v12560_v2 }
 0x3b4   :  { %11375 = vmatprep.subr.bf16.mxu0 %v12561_v15 }
 0x3b5   :  { %v1930_v44 = vpop.permute.xlu1 %1929 }
 0x3b6   :  { %v1994_v46 = vsel %vm1309_vm11, %v1986_v43, %v1930_v44 }
 0x3b7   :  { %v10756_v19 = vcombine.low %v1993_v35, %v1994_v46  ;;  %11376 = vmatpush3.bf16.msra.mxu0 %v12562_v34 }
 0x3b8   :  { %11377 = vmatprep.subr.bf16.mxu0 %v12563_v20 }
 0x3b9   :  { %v2037_v48 = vpack.c.bf16 %v10756_v19, %v10754_v13 }
 0x3bb   :  { %2165 = vmatmul.mubr.bf16.gmra.mrb[20].mxu0 %v2037_v48 }
 0x3bc   :  { %11378 = vmatpush3.bf16.msra.mxu0 %v12564_v23 }
 0x3bd   :  { %11379 = vmatprep.subr.bf16.mxu0 %v12565_v3 }
 0x3c0   :  { %11380 = vmatpush3.bf16.msra.mxu0 %v12566_v10 }
 0x3c1   :  { %11381 = vmatprep.subr.bf16.mxu0 %v12567_v63  ;;  %v2199_v63 = vld [vmem:[#allocation3] sm:$0xf] }
 0x3c4   :  { %11382 = vmatpush3.bf16.msra.mxu0 %v12568_v7 }
 0x3c5   :  { %11383 = vmatprep.subr.bf16.mxu0 %v12569_v12 }
 0x3c8   :  { %11384 = vmatpush3.bf16.msra.mxu0 %v12570_v29 }
 0x456   :  { %v2158_v18 = vpop.f32.mrb[16].mxu0 }
 0x457   :  { %v2159_v38 = vadd.f32 %v14267_v26, %v2158_v18  ;;  %v2160_v36 = vpop.f32.mrb[17].mxu0 }
 0x458   :  { %v2161_v53 = vpop.f32.mrb[18].mxu0 }
 0x459   :  { %v2173_v54 = vmax.f32 %v2159_v38, 0.0  ;;  %v2162_v56 = vadd.f32 %v14267_v26, %v2161_v53  ;;  %v2163_v45 = vpop.f32.mrb[19].mxu0 }
 0x45b   :  { %v2181_v32 = vcombine.high %v2173_v54, %v2173_v54  ;;  %2191 = vst.msk [vmem:[#allocation3 + $0x9] sm:$0xf] %vm2190_vm14, %v2173_v54  ;;  %v2174_v57 = vmax.f32 %v2162_v56, 0.0  ;;  %v14330_v56 = vld [vmem:[%s13294_s3 + $0x80] sm:$0xff]  }
 0x45c   :  { %12059 = vmatprep.subr.bf16.mxu0 %v14330_v56 }
 0x45d   :  { %2192 = vst.msk [vmem:[#allocation3 + $0x11] sm:$0xf] %vm2190_vm14, %v2181_v32  ;;  %v2182_v60 = vcombine.high %v2174_v57, %v2174_v57  ;;  %2193 = vst.msk [vmem:[#allocation3 + $0x19] sm:$0xf] %vm2190_vm14, %v2174_v57 }
 0x45f   :  { %2194 = vst.msk [vmem:[#allocation3 + $0x21] sm:$0xf] %vm2190_vm14, %v2182_v60 }
 0x462   :  { %v2239_v21 = vld [vmem:[#allocation3 + $0xa] sm:$0xf] }
 0x463   :  { %v2208_v22 = vld [vmem:[#allocation3 + $0x9] sm:$0xf]  ;;  %2376 = vrot.lane.b32.xlu0 %v2239_v21, %s13244_s30  ;;  %v2415_v21 = vpop.permute.xlu1 %2414 }
 0x464   :  { %2282 = vrot.lane.b32.xlu1 %v2208_v22, %s13244_s30  ;;  %v2223_v9 = vld [vmem:[#allocation3 + $0x8] sm:$0xf]  ;;  %v2241_v1 = vld [vmem:[#allocation3 + $0x1a] sm:$0xf]  ;;  %v2240_v55 = vld [vmem:[#allocation3 + $0x12] sm:$0xf]  ;;  %v2281_v22 = vpop.permute.xlu0 %2280 }
 0x465   :  { %v2216_v0 = vld [vmem:[#allocation3 + $0xa] sm:$0xf]  ;;  %v2210_v5 = vld [vmem:[#allocation3 + $0x19] sm:$0xf]  ;;  %v2209_v11 = vld [vmem:[#allocation3 + $0x11] sm:$0xf] }
 0x466   :  { %v2249_v16 = vld [vmem:[#allocation3 + $0x18] sm:$0xf]  ;;  %v2248_v17 = vld [vmem:[#allocation3 + $0x10] sm:$0xf]  ;;  %v2242_v30 = vld [vmem:[#allocation3 + $0x22] sm:$0xf] }
 0x467   :  { %2344 = vrot.lane.b32.xlu0 %v2223_v9, %s13247_s22  ;;  %v2218_v24 = vld [vmem:[#allocation3 + $0x1a] sm:$0xf]  ;;  %v2217_v40 = vld [vmem:[#allocation3 + $0x12] sm:$0xf]  ;;  %v2250_v6 = vld [vmem:[#allocation3 + $0x20] sm:$0xf] }
 0x468   :  { %2314 = vrot.lane.b32.xlu1 %v2216_v0, %s13235_s1  ;;  %v2257_v25 = vld [vmem:[#allocation3 + $0x19] sm:$0xf]  ;;  %v2256_v27 = vld [vmem:[#allocation3 + $0x11] sm:$0xf]  ;;  %v2226_v4 = vld [vmem:[#allocation3 + $0x20] sm:$0xf] }
 0x469   :  { %v2224_v28 = vld [vmem:[#allocation3 + $0x10] sm:$0xf]  ;;  %v2225_v8 = vld [vmem:[#allocation3 + $0x18] sm:$0xf]  ;;  %v2258_v47 = vld [vmem:[#allocation3 + $0x21] sm:$0xf] }
 0x46a   :  { %v2200_v12 = vld [vmem:[#allocation3 + $0x8] sm:$0xf] }
 0x46b   :  { %2380 = vrot.lane.b32.xlu0 %v2241_v1, %s13244_s30  ;;  %v2447_v1 = vpop.permute.xlu1 %2446  ;;  %v2231_v29 = vld [vmem:[#allocation3 + $0x9] sm:$0xf] }
 0x46c   :  { %2378 = vrot.lane.b32.xlu1 %v2240_v55, %s13244_s30  ;;  %v2313_v55 = vpop.permute.xlu0 %2312 }
 0x46f   :  { %2284 = vrot.lane.b32.xlu0 %v2209_v11, %s13244_s30  ;;  %v14341_v37 = vpop.permute.xlu1 %2422 }
 0x470   :  { %2286 = vrot.lane.b32.xlu1 %v2210_v5, %s13244_s30  ;;  %v14343_v58 = vpop.permute.xlu0 %2288 }
 0x473   :  { %2408 = vrot.lane.b32.xlu0 %v2248_v17, %s13235_s1  ;;  %v14345_v39 = vpop.permute.xlu1 %2454 }
 0x474   :  { %2410 = vrot.lane.b32.xlu1 %v2249_v16, %s13235_s1  ;;  %v14347_v2 = vpop.permute.xlu0 %2320 }
 0x477   :  { %2316 = vrot.lane.b32.xlu0 %v2217_v40, %s13235_s1 }
 0x478   :  { %2318 = vrot.lane.b32.xlu1 %v2218_v24, %s13235_s1 }
 0x47b   :  { %2440 = vrot.lane.b32.xlu0 %v2256_v27, %s13247_s22 }
 0x47c   :  { %2442 = vrot.lane.b32.xlu1 %v2257_v25, %s13247_s22 }
 0x47f   :  { %2348 = vrot.lane.b32.xlu0 %v2225_v8, %s13247_s22  ;;  %v2464_v8 = vsel %vm1224_vm6, %v2199_v63, %v2281_v22 }
 0x480   :  { %2346 = vrot.lane.b32.xlu1 %v2224_v28, %s13247_s22 }
 0x483   :  { %2412 = vrot.lane.b32.xlu0 %v2250_v6, %s13235_s1 }
 0x484   :  { %2382 = vrot.lane.b32.xlu1 %v2242_v30, %s13244_s30  ;;  %v2472_v30 = vsel %vm1258_vm8, %v2464_v8, %v2313_v55 }
 0x487   :  { %2444 = vrot.lane.b32.xlu0 %v2258_v47, %s13247_s22  ;;  %v2232_v47 = vld [vmem:[#allocation3 + $0x11] sm:$0xf] }
 0x488   :  { %2350 = vrot.lane.b32.xlu1 %v2226_v4, %s13247_s22 }
 0x48e   :  { %v2166_v41 = vpop.f32.mrb[20].mxu0 }
 0x48f   :  { %v2167_v42 = vadd.f32 %v14267_v26, %v2166_v41  ;;  %v2168_v43 = vpop.f32.mrb[21].mxu0  ;;  %v2233_v41 = vld [vmem:[#allocation3 + $0x19] sm:$0xf] }
 0x490   :  { %v2169_v44 = vpop.f32.mrb[22].mxu0 }
 0x491   :  { %v2175_v14 = vmax.f32 %v2167_v42, 0.0  ;;  %v2170_v35 = vadd.f32 %v14267_v26, %v2169_v44  ;;  %v2171_v46 = vpop.f32.mrb[23].mxu0  ;;  %v2234_v42 = vld [vmem:[#allocation3 + $0x21] sm:$0xf] }
 0x493   :  { %v2183_v13 = vcombine.high %v2175_v14, %v2175_v14  ;;  %2195 = vst.msk [vmem:[#allocation3 + $0x39] sm:$0xf] %vm2190_vm14, %v2175_v14  ;;  %v2176_v19 = vmax.f32 %v2170_v35, 0.0 }
 0x495   :  { %2196 = vst.msk [vmem:[#allocation3 + $0x41] sm:$0xf] %vm2190_vm14, %v2183_v13  ;;  %v2184_v48 = vcombine.high %v2176_v19, %v2176_v19  ;;  %2197 = vst.msk [vmem:[#allocation3 + $0x49] sm:$0xf] %vm2190_vm14, %v2176_v19  ;;  %v2202_v13 = vld [vmem:[#allocation3 + $0x18] sm:$0xf] }
 0x497   :  { %2198 = vst.msk [vmem:[#allocation3 + $0x51] sm:$0xf] %vm2190_vm14, %v2184_v48 }
 0x49a   :  { %v2243_v49 = vld [vmem:[#allocation3 + $0x3a] sm:$0xf] }
 0x49b   :  { %v2212_v52 = vld [vmem:[#allocation3 + $0x39] sm:$0xf]  ;;  %2384 = vrot.lane.b32.xlu0 %v2243_v49, %s13244_s30  ;;  %v2201_v49 = vld [vmem:[#allocation3 + $0x10] sm:$0xf] }
 0x49c   :  { %2290 = vrot.lane.b32.xlu1 %v2212_v52, %s13244_s30  ;;  %v2227_v50 = vld [vmem:[#allocation3 + $0x38] sm:$0xf]  ;;  %v2245_v33 = vld [vmem:[#allocation3 + $0x4a] sm:$0xf]  ;;  %v2244_v59 = vld [vmem:[#allocation3 + $0x42] sm:$0xf] }
 0x49d   :  { %v2220_v51 = vld [vmem:[#allocation3 + $0x3a] sm:$0xf]  ;;  %v2214_v26 = vld [vmem:[#allocation3 + $0x49] sm:$0xf]  ;;  %v2213_v18 = vld [vmem:[#allocation3 + $0x41] sm:$0xf] }
 0x49e   :  { %v2253_v38 = vld [vmem:[#allocation3 + $0x48] sm:$0xf]  ;;  %v2252_v36 = vld [vmem:[#allocation3 + $0x40] sm:$0xf]  ;;  %v2254_v60 = vld [vmem:[#allocation3 + $0x50] sm:$0xf] }
 0x49f   :  { %2352 = vrot.lane.b32.xlu0 %v2227_v50, %s13247_s22  ;;  %v2222_v53 = vld [vmem:[#allocation3 + $0x4a] sm:$0xf]  ;;  %v2221_v54 = vld [vmem:[#allocation3 + $0x42] sm:$0xf]  ;;  %v2246_v61 = vld [vmem:[#allocation3 + $0x52] sm:$0xf] }
 0x4a0   :  { %2322 = vrot.lane.b32.xlu1 %v2220_v51, %s13235_s1  ;;  %v2261_v45 = vld [vmem:[#allocation3 + $0x49] sm:$0xf]  ;;  %v2260_v32 = vld [vmem:[#allocation3 + $0x41] sm:$0xf]  ;;  %v2262_v62 = vld [vmem:[#allocation3 + $0x51] sm:$0xf] }
 0x4a1   :  { %v2228_v57 = vld [vmem:[#allocation3 + $0x40] sm:$0xf]  ;;  %v2230_v9 = vld [vmem:[#allocation3 + $0x50] sm:$0xf]  ;;  %v2229_v0 = vld [vmem:[#allocation3 + $0x48] sm:$0xf] }
 0x4a3   :  { %2388 = vrot.lane.b32.xlu0 %v2245_v33, %s13244_s30 }
 0x4a4   :  { %2386 = vrot.lane.b32.xlu1 %v2244_v59, %s13244_s30 }
 0x4a7   :  { %2292 = vrot.lane.b32.xlu0 %v2213_v18, %s13244_s30 }
 0x4a8   :  { %2294 = vrot.lane.b32.xlu1 %v2214_v26, %s13244_s30 }
 0x4ab   :  { %2416 = vrot.lane.b32.xlu0 %v2252_v36, %s13235_s1 }
 0x4ac   :  { %2418 = vrot.lane.b32.xlu1 %v2253_v38, %s13235_s1 }
 0x4af   :  { %2324 = vrot.lane.b32.xlu0 %v2221_v54, %s13235_s1 }
 0x4b0   :  { %2326 = vrot.lane.b32.xlu1 %v2222_v53, %s13235_s1 }
 0x4b3   :  { %2448 = vrot.lane.b32.xlu0 %v2260_v32, %s13247_s22 }
 0x4b4   :  { %2450 = vrot.lane.b32.xlu1 %v2261_v45, %s13247_s22 }
 0x4b7   :  { %2420 = vrot.lane.b32.xlu0 %v2254_v60, %s13235_s1 }
 0x4b8   :  { %2354 = vrot.lane.b32.xlu1 %v2228_v57, %s13247_s22 }
 0x4bb   :  { %2452 = vrot.lane.b32.xlu0 %v2262_v62, %s13247_s22 }
 0x4bc   :  { %2390 = vrot.lane.b32.xlu1 %v2246_v61, %s13244_s30 }
 0x4bf   :  { %2356 = vrot.lane.b32.xlu0 %v2229_v0, %s13247_s22 }
 0x4c0   :  { %2358 = vrot.lane.b32.xlu1 %v2230_v9, %s13247_s22 }
 0x4d5   :  { %v2377_v11 = vpop.permute.xlu0 %2376 }
 0x4d6   :  { %v2283_v5 = vpop.permute.xlu1 %2282  ;;  %v2488_v4 = vsel %vm1224_vm6, %v2231_v29, %v2377_v11  ;;  %v12572_v11 = vld [vmem:[%s13294_s3 + $0x88] sm:$0xff]   ;;  %v2236_v29 = vld [vmem:[#allocation3 + $0x41] sm:$0xf]  ;;  %s15674_s3 = sld [smem:[#allocation25_spill]] }
 0x4d7   :  { %v2465_v6 = vsel %vm1224_vm6, %v2200_v12, %v2283_v5  ;;  %v2235_v12 = vld [vmem:[#allocation3 + $0x39] sm:$0xf] }
 0x4d9   :  { %v2345_v34 = vpop.permute.xlu0 %2344 }
 0x4da   :  { %v2315_v15 = vpop.permute.xlu1 %2314  ;;  %v2480_v38 = vsel %vm1292_vm10, %v2472_v30, %v2345_v34  ;;  %v2204_v30 = vld [vmem:[#allocation3 + $0x38] sm:$0xf] }
 0x4db   :  { %v2473_v14 = vsel %vm1258_vm8, %v2465_v6, %v2315_v15 }
 0x4dd   :  { %v2381_v17 = vpop.permute.xlu0 %2380 }
 0x4de   :  { %v2379_v16 = vpop.permute.xlu1 %2378  ;;  %v2490_v46 = vsel %vm1224_vm6, %v2233_v41, %v2381_v17 }
 0x4df   :  { %v2489_v35 = vsel %vm1224_vm6, %v2232_v47, %v2379_v16 }
 0x4e1   :  { %v2285_v23 = vpop.permute.xlu0 %2284 }
 0x4e2   :  { %v2287_v20 = vpop.permute.xlu1 %2286  ;;  %v2466_v33 = vsel %vm1224_vm6, %v2201_v49, %v2285_v23 }
 0x4e3   :  { %v2467_v48 = vsel %vm1224_vm6, %v2202_v13, %v2287_v20  ;;  %v2206_v13 = vld [vmem:[#allocation3 + $0x48] sm:$0xf] }
 0x4e5   :  { %v2409_v40 = vpop.permute.xlu0 %2408 }
 0x4e6   :  { %v2411_v24 = vpop.permute.xlu1 %2410  ;;  %v2496_v50 = vsel %vm1258_vm8, %v2488_v4, %v2409_v40 }
 0x4e7   :  { %v2497_v52 = vsel %vm1258_vm8, %v2489_v35, %v2411_v24 }
 0x4e9   :  { %v2317_v10 = vpop.permute.xlu0 %2316 }
 0x4ea   :  { %v2319_v3 = vpop.permute.xlu1 %2318  ;;  %v2474_v53 = vsel %vm1258_vm8, %v2466_v33, %v2317_v10 }
 0x4eb   :  { %v2475_v36 = vsel %vm1258_vm8, %v2467_v48, %v2319_v3 }
 0x4ed   :  { %v2441_v27 = vpop.permute.xlu0 %2440 }
 0x4ee   :  { %v2443_v25 = vpop.permute.xlu1 %2442  ;;  %v2504_v26 = vsel %vm1292_vm10, %v2496_v50, %v2441_v27  ;;  %v2205_v50 = vld [vmem:[#allocation3 + $0x40] sm:$0xf] }
 0x4ef   :  { %v2505_v59 = vsel %vm1292_vm10, %v2497_v52, %v2443_v25 }
 0x4f1   :  { %v2349_v28 = vpop.permute.xlu0 %2348 }
 0x4f2   :  { %v2347_v7 = vpop.permute.xlu1 %2346  ;;  %v2482_v57 = vsel %vm1292_vm10, %v2474_v53, %v2349_v28 }
 0x4f3   :  { %v2481_v18 = vsel %vm1292_vm10, %v2473_v14, %v2347_v7  ;;  %v2203_v7 = vld [vmem:[#allocation3 + $0x30] sm:$0xf] }
 0x4f4   :  { %v10770_v22 = vcombine.low %v2480_v38, %v2481_v18  ;;  %v2238_v14 = vld [vmem:[#allocation3 + $0x51] sm:$0xf] }
 0x4f5   :  { %v2413_v44 = vpop.permute.xlu0 %2412 }
 0x4f6   :  { %v2383_v43 = vpop.permute.xlu1 %2382  ;;  %v2498_v54 = vsel %vm1258_vm8, %v2490_v46, %v2413_v44 }
 0x4f7   :  { %v2491_v19 = vsel %vm1224_vm6, %v2234_v42, %v2383_v43  ;;  %v2237_v42 = vld [vmem:[#allocation3 + $0x49] sm:$0xf] }
 0x4f8   :  { %v2499_v51 = vsel %vm1258_vm8, %v2491_v19, %v2415_v21  ;;  %v10771_v21 = vcombine.low %v2504_v26, %v2505_v59 }
 0x4f9   :  { %v2445_v32 = vpop.permute.xlu0 %2444  ;;  %v2507_v61 = vsel %vm1292_vm10, %v2499_v51, %v2447_v1 }
 0x4fa   :  { %v2351_v45 = vpop.permute.xlu1 %2350  ;;  %v2506_v62 = vsel %vm1292_vm10, %v2498_v54, %v2445_v32 }
 0x4fb   :  { %v2483_v60 = vsel %vm1292_vm10, %v2475_v36, %v2351_v45  ;;  %v10773_v0 = vcombine.low %v2506_v62, %v2507_v61  ;;  %v12574_v62 = vld [vmem:[#allocation3 + $0x22] ss:$8 sps:$4 sm:$0xff]  }
 0x4fc   :  { %v10772_v9 = vcombine.low %v2482_v57, %v2483_v60 }
 0x4fd   :  { %v2569_v5 = vpack.c.bf16 %v10773_v0, %v10771_v21 }
 0x4fe   :  { %v2568_v55 = vpack.c.bf16 %v10772_v9, %v10770_v22  ;;  %v12573_v9 = vld [vmem:[#allocation3 + $0x12] ss:$8 sps:$4 sm:$0xff]  }
 0x4ff   :  { %2763 = vmatprep.mubr.bf16.mxu0 %v2569_v5  ;;  %v12576_v5 = vld [vmem:[#allocation3 + $0x52] ss:$8 sps:$4 sm:$0xff]  }
 0x500   :  { %2764 = vmatmul.mubr.bf16.vlgmr.msra.gmra.mrb[24].mxu0 %v2568_v55  ;;  %v2570_v55 = vpack.c.bf16 %v12574_v62, %v12573_v9 }
 0x501   :  { %12060 = vmatpush3.bf16.msra.mxu0 %v14330_v56  ;;  %v2468_v56 = vsel %vm1224_vm6, %v2203_v7, %v14343_v58 }
 0x502   :  { %12061 = vmatprep.subr.bf16.mxu0 %v12572_v11  ;;  %v2476_v47 = vsel %vm1258_vm8, %v2468_v56, %v14347_v2 }
 0x505   :  { %12062 = vmatpush3.bf16.msra.mxu0 %v12572_v11  ;;  %v12575_v11 = vld [vmem:[#allocation3 + $0x42] ss:$8 sps:$4 sm:$0xff]  }
 0x50d   :  { %v2385_v34 = vpop.permute.xlu0 %2384 }
 0x50e   :  { %v2291_v15 = vpop.permute.xlu1 %2290  ;;  %v2492_v6 = vsel %vm1224_vm6, %v2235_v12, %v2385_v34  ;;  %v2861_v34 = vld [vmem:[#allocation3 + $0x1] sm:$0xf] }
 0x50f   :  { %v2469_v41 = vsel %vm1224_vm6, %v2204_v30, %v2291_v15  ;;  %v2573_v15 = vpack.c.bf16 %v12576_v5, %v12575_v11  ;;  %2933 = vrot.lane.b32.xlu0 %v2861_v34, %s13244_s30  ;;  %v12586_v34 = vld [vmem:[%s13304_s14 + $0x8] sm:$0xff]  }
 0x511   :  { %v2353_v17 = vpop.permute.xlu0 %2352 }
 0x512   :  { %v2323_v16 = vpop.permute.xlu1 %2322  ;;  %v2484_v60 = vsel %vm1292_vm10, %v2476_v47, %v2353_v17  ;;  %v2869_v17 = vld [vmem:[#allocation3 + $0x2] sm:$0xf] }
 0x513   :  { %v2477_v2 = vsel %vm1258_vm8, %v2469_v41, %v2323_v16  ;;  %v2904_v16 = vld [vmem:[#allocation3 + $0x28] sm:$0xf]  ;;  %2965 = vrot.lane.b32.xlu0 %v2869_v17, %s13235_s1 }
 0x514   :  { %3067 = vrot.lane.b32.xlu1 %v2904_v16, %s13235_s1  ;;  %v12587_v16 = vld [vmem:[%s13304_s14 + $0x50] sm:$0xff]  }
 0x515   :  { %v2389_v20 = vpop.permute.xlu0 %2388 }
 0x516   :  { %v2387_v1 = vpop.permute.xlu1 %2386  ;;  %v2494_v46 = vsel %vm1224_vm6, %v2237_v42, %v2389_v20  ;;  %v2865_v20 = vld [vmem:[#allocation3 + $0x31] sm:$0xf] }
 0x517   :  { %v2493_v4 = vsel %vm1224_vm6, %v2236_v29, %v2387_v1  ;;  %v2912_v1 = vld [vmem:[#allocation3 + $0x29] sm:$0xf]  ;;  %2941 = vrot.lane.b32.xlu0 %v2865_v20, %s13244_s30  ;;  %v12588_v20 = vld [vmem:[%s13304_s14 + $0x10] sm:$0xff]  }
 0x518   :  { %3099 = vrot.lane.b32.xlu1 %v2912_v1, %s13247_s22 }
 0x519   :  { %v2293_v24 = vpop.permute.xlu0 %2292 }
 0x51a   :  { %v2295_v23 = vpop.permute.xlu1 %2294  ;;  %v2470_v59 = vsel %vm1224_vm6, %v2205_v50, %v2293_v24  ;;  %v2873_v24 = vld [vmem:[#allocation3 + $0x32] sm:$0xf] }
 0x51b   :  { %v2471_v52 = vsel %vm1224_vm6, %v2206_v13, %v2295_v23  ;;  %v2908_v23 = vld [vmem:[#allocation3 + $0x58] sm:$0xf]  ;;  %2973 = vrot.lane.b32.xlu0 %v2873_v24, %s13235_s1 }
 0x51c   :  { %3075 = vrot.lane.b32.xlu1 %v2908_v23, %s13235_s1  ;;  %v12589_v23 = vld [vmem:[%s13304_s14 + $0x58] sm:$0xff]  }
 0x51d   :  { %v2417_v3 = vpop.permute.xlu0 %2416 }
 0x51e   :  { %v2419_v40 = vpop.permute.xlu1 %2418  ;;  %v2500_v44 = vsel %vm1258_vm8, %v2492_v6, %v2417_v3  ;;  %v12578_v3 = vld [vmem:[%s13304_s14 + $0x88] sm:$0xff]  }
 0x51f   :  { %v2501_v43 = vsel %vm1258_vm8, %v2493_v4, %v2419_v40  ;;  %v12577_v40 = vld [vmem:[%s13304_s14 + $0x80] sm:$0xff]  }
 0x520   :  { %12067 = vmatprep.subr.bf16.mxu0 %v12577_v40  ;;  %v10778_v4 = vld [vmem:[%s13299_s8] ss:$0 sm:$0xff]  ;;  %s15675_s8 = sld [smem:[#allocation28_spill]] }
 0x521   :  { %v2325_v25 = vpop.permute.xlu0 %2324 }
 0x522   :  { %v2327_v10 = vpop.permute.xlu1 %2326  ;;  %v2478_v53 = vsel %vm1258_vm8, %v2470_v59, %v2325_v25 }
 0x523   :  { %v2479_v36 = vsel %vm1258_vm8, %v2471_v52, %v2327_v10 }
 0x525   :  { %v2449_v63 = vpop.permute.xlu0 %2448 }
 0x526   :  { %v2451_v27 = vpop.permute.xlu1 %2450  ;;  %v2508_v48 = vsel %vm1292_vm10, %v2500_v44, %v2449_v63 }
 0x527   :  { %v2509_v19 = vsel %vm1292_vm10, %v2501_v43, %v2451_v27 }
 0x528   :  { %v10775_v54 = vcombine.low %v2508_v48, %v2509_v19 }
 0x529   :  { %v2421_v8 = vpop.permute.xlu0 %2420 }
 0x52a   :  { %v2355_v28 = vpop.permute.xlu1 %2354  ;;  %v2502_v51 = vsel %vm1258_vm8, %v2494_v46, %v2421_v8 }
 0x52b   :  { %v2485_v26 = vsel %vm1292_vm10, %v2477_v2, %v2355_v28 }
 0x52c   :  { %v10774_v21 = vcombine.low %v2484_v60, %v2485_v26 }
 0x52d   :  { %v2453_v58 = vpop.permute.xlu0 %2452 }
 0x52e   :  { %v2391_v35 = vpop.permute.xlu1 %2390  ;;  %v2510_v38 = vsel %vm1292_vm10, %v2502_v51, %v2453_v58 }
 0x52f   :  { %v2495_v49 = vsel %vm1224_vm6, %v2238_v14, %v2391_v35 }
 0x530   :  { %v2503_v33 = vsel %vm1258_vm8, %v2495_v49, %v14341_v37 }
 0x531   :  { %v2511_v18 = vsel %vm1292_vm10, %v2503_v33, %v14345_v39  ;;  %v2357_v57 = vpop.permute.xlu0 %2356 }
 0x532   :  { %v10777_v45 = vcombine.low %v2510_v38, %v2511_v18  ;;  %v2359_v32 = vpop.permute.xlu1 %2358  ;;  %v2486_v61 = vsel %vm1292_vm10, %v2478_v53, %v2357_v57 }
 0x533   :  { %v2487_v37 = vsel %vm1292_vm10, %v2479_v36, %v2359_v32 }
 0x534   :  { %v10776_v22 = vcombine.low %v2486_v61, %v2487_v37  ;;  %v2572_v39 = vpack.c.bf16 %v10777_v45, %v10775_v54 }
 0x536   :  { %2771 = vmatprep.mubr.bf16.mxu0 %v2572_v39  ;;  %v2571_v0 = vpack.c.bf16 %v10776_v22, %v10774_v21 }
 0x538   :  { %2772 = vmatmul.mubr.bf16.gmra.mrb[28].mxu0 %v2571_v0  ;;  %v12583_v0 = vld [vmem:[%s13304_s14 + $0x40] sm:$0xff]  }
 0x539   :  { %12063 = vmatprep.mubr.msk.bf16.mxu0 %vm1224_vm6, %v2570_v55  ;;  %v12584_v55 = vld [vmem:[%s13304_s14] sm:$0xff]   ;;  %11401 = vmatprep.subr.bf16.mxu1 %v12583_v0 }
 0x53a   :  { %11402 = vmatpush3.bf16.msra.mxu1 %v12584_v55 }
 0x540   :  { %12064 = vmatmul.mubr.msk.bf16.vlgmr.msra.gmra.mrb[32].mxu0 %vm1224_vm6, %v2573_v15  ;;  %v12585_v15 = vld [vmem:[%s13304_s14 + $0x48] sm:$0xff]  }
 0x541   :  { %12068 = vmatpush3.bf16.msra.mxu0 %v12577_v40  ;;  %11403 = vmatprep.subr.bf16.mxu1 %v12585_v15 }
 0x542   :  { %12069 = vmatprep.subr.bf16.mxu0 %v12578_v3  ;;  %11404 = vmatpush3.bf16.msra.mxu1 %v12586_v34 }
 0x543   :  { %11405 = vmatprep.subr.bf16.mxu1 %v12587_v16 }
 0x545   :  { %12070 = vmatpush3.bf16.msra.mxu0 %v12578_v3  ;;  %v12590_v3 = vld [vmem:[%s13304_s14 + $0x18] sm:$0xff]  }
 0x546   :  { %11406 = vmatpush3.bf16.msra.mxu1 %v12588_v20 }
 0x547   :  { %11407 = vmatprep.subr.bf16.mxu1 %v12589_v23 }
 0x54a   :  { %11408 = vmatpush3.bf16.msra.mxu1 %v12590_v3 }
 0x5d3   :  { %v11385_v10 = vpop.f32.mrb[24].mxu0 }
 0x5d4   :  { %v11386_v25 = vpop.f32.mrb[25].mxu0 }
 0x5d5   :  { %v11387_v27 = vadd.f32 %v11386_v25, %v11385_v10  ;;  %v11388_v63 = vpop.f32.mrb[26].mxu0 }
 0x5d6   :  { %v11389_v7 = vpop.f32.mrb[27].mxu0 }
 0x5d7   :  { %v11390_v28 = vadd.f32 %v11389_v7, %v11388_v63  ;;  %v2766_v42 = vadd.f32 %v11387_v27, %v10778_v4  ;;  %v12591_v27 = vld [vmem:[%s13304_s14 + $0x60] sm:$0xff]  }
 0x5d8   :  { %v12592_v63 = vld [vmem:[%s13304_s14 + $0x20] sm:$0xff]   ;;  %11409 = vmatprep.subr.bf16.mxu1 %v12591_v27 }
 0x5d9   :  { %v2769_v46 = vadd.f32 %v11390_v28, %v10778_v4  ;;  %11410 = vmatpush3.bf16.msra.mxu1 %v12592_v63 }
 0x60b   :  { %v11391_v8 = vpop.f32.mrb[28].mxu0 }
 0x60c   :  { %v11392_v56 = vpop.f32.mrb[29].mxu0 }
 0x60d   :  { %v11393_v12 = vadd.f32 %v11392_v56, %v11391_v8  ;;  %v11394_v29 = vpop.f32.mrb[30].mxu0 }
 0x60e   :  { %v11395_v30 = vpop.f32.mrb[31].mxu0 }
 0x60f   :  { %v11396_v6 = vadd.f32 %v11395_v30, %v11394_v29  ;;  %v2774_v47 = vadd.f32 %v11393_v12, %v10778_v4  ;;  %v12593_v12 = vld [vmem:[%s13304_s14 + $0x68] sm:$0xff]  }
 0x610   :  { %v12594_v29 = vld [vmem:[%s13304_s14 + $0x28] sm:$0xff]   ;;  %11411 = vmatprep.subr.bf16.mxu1 %v12593_v12 }
 0x611   :  { %v2777_v14 = vadd.f32 %v11396_v6, %v10778_v4  ;;  %11412 = vmatpush3.bf16.msra.mxu1 %v12594_v29  ;;  %v2853_v29 = vld [vmem:[#allocation3] sm:$0xf] }
 0x613   :  { %v12065_v41 = vpop.f32.mrb[32].mxu0 }
 0x614   :  { %v2823_v43 = vadd.f32 %v12065_v41, %v2774_v47  ;;  %v2814_v44 = vpop.f32.mrb[33].mxu0  ;;  %v12595_v41 = vld [vmem:[%s13304_s14 + $0x70] sm:$0xff]  }
 0x615   :  { %v2815_v35 = vadd.f32 %v2814_v44, %v2766_v42  ;;  %v12066_v58 = vpop.f32.mrb[34].mxu0  ;;  %v12596_v42 = vld [vmem:[%s13304_s14 + $0x30] sm:$0xff]   ;;  %11413 = vmatprep.subr.bf16.mxu1 %v12595_v41 }
 0x616   :  { %v2831_v13 = vmax.f32 %v2823_v43, 0.0  ;;  %v2826_v19 = vadd.f32 %v12066_v58, %v2777_v14  ;;  %v2817_v48 = vpop.f32.mrb[35].mxu0  ;;  %11414 = vmatpush3.bf16.msra.mxu1 %v12596_v42  ;;  %v12597_v58 = vld [vmem:[%s13304_s14 + $0x78] sm:$0xff]  }
 0x617   :  { %v2829_v49 = vmax.f32 %v2815_v35, 0.0  ;;  %v2818_v2 = vadd.f32 %v2817_v48, %v2769_v46  ;;  %v12598_v46 = vld [vmem:[%s13304_s14 + $0x38] sm:$0xff]   ;;  %11415 = vmatprep.subr.bf16.mxu1 %v12597_v58  ;;  %s15676_s14 = sld [smem:[#allocation27_spill]] }
 0x618   :  { %v2839_v52 = vcombine.high %v2831_v13, %v2831_v13  ;;  %2849 = vst.msk [vmem:[#allocation3 + $0x39] sm:$0xf] %vm2190_vm14, %v2831_v13  ;;  %v2832_v50 = vmax.f32 %v2826_v19, 0.0 }
 0x619   :  { %v2837_v51 = vcombine.high %v2829_v49, %v2829_v49  ;;  %2845 = vst.msk [vmem:[#allocation3 + $0x9] sm:$0xf] %vm2190_vm14, %v2829_v49  ;;  %v2830_v33 = vmax.f32 %v2818_v2, 0.0  ;;  %v2916_v2 = vld [vmem:[#allocation3 + $0x59] sm:$0xf] }
 0x61a   :  { %2850 = vst.msk [vmem:[#allocation3 + $0x41] sm:$0xf] %vm2190_vm14, %v2839_v52  ;;  %v2840_v59 = vcombine.high %v2832_v50, %v2832_v50  ;;  %2851 = vst.msk [vmem:[#allocation3 + $0x49] sm:$0xf] %vm2190_vm14, %v2832_v50  ;;  %11416 = vmatpush3.bf16.msra.mxu1 %v12598_v46 }
 0x61b   :  { %2846 = vst.msk [vmem:[#allocation3 + $0x11] sm:$0xf] %vm2190_vm14, %v2837_v51  ;;  %v2838_v26 = vcombine.high %v2830_v33, %v2830_v33  ;;  %2847 = vst.msk [vmem:[#allocation3 + $0x19] sm:$0xf] %vm2190_vm14, %v2830_v33 }
 0x61c   :  { %2852 = vst.msk [vmem:[#allocation3 + $0x51] sm:$0xf] %vm2190_vm14, %v2840_v59 }
 0x61d   :  { %2848 = vst.msk [vmem:[#allocation3 + $0x21] sm:$0xf] %vm2190_vm14, %v2838_v26 }
 0x61f   :  { %v2897_v18 = vld [vmem:[#allocation3 + $0x3a] sm:$0xf] }
 0x620   :  { %v2866_v38 = vld [vmem:[#allocation3 + $0x39] sm:$0xf]  ;;  %3037 = vrot.lane.b32.xlu0 %v2897_v18, %s13244_s30  ;;  %v2893_v53 = vld [vmem:[#allocation3 + $0xa] sm:$0xf]  ;;  %v2934_v18 = vpop.permute.xlu0 %2933 }
 0x621   :  { %2943 = vrot.lane.b32.xlu1 %v2866_v38, %s13244_s30  ;;  %v2874_v36 = vld [vmem:[#allocation3 + $0x3a] sm:$0xf]  ;;  %v12581_v60 = vld [vmem:[#allocation3 + $0x42] ss:$8 sps:$4 sm:$0xff]   ;;  %v3068_v38 = vpop.permute.xlu1 %3067 }
 0x622   :  { %v12579_v54 = vld [vmem:[#allocation3 + $0x12] ss:$8 sps:$4 sm:$0xff]   ;;  %v2877_v37 = vld [vmem:[#allocation3 + $0x8] sm:$0xf]  ;;  %v2898_v39 = vld [vmem:[#allocation3 + $0x42] sm:$0xf] }
 0x623   :  { %v12582_v32 = vld [vmem:[#allocation3 + $0x52] ss:$8 sps:$4 sm:$0xff]   ;;  %v2862_v61 = vld [vmem:[#allocation3 + $0x9] sm:$0xf]  ;;  %v2867_v9 = vld [vmem:[#allocation3 + $0x41] sm:$0xf] }
 0x624   :  { %3029 = vrot.lane.b32.xlu0 %v2893_v53, %s13244_s30  ;;  %v12580_v45 = vld [vmem:[#allocation3 + $0x22] ss:$8 sps:$4 sm:$0xff]   ;;  %v3226_v62 = vpack.c.bf16 %v12582_v32, %v12581_v60  ;;  %v2895_v25 = vld [vmem:[#allocation3 + $0x1a] sm:$0xf]  ;;  %v2894_v7 = vld [vmem:[#allocation3 + $0x12] sm:$0xf] }
 0x625   :  { %2975 = vrot.lane.b32.xlu1 %v2874_v36, %s13235_s1  ;;  %v3223_v57 = vpack.c.bf16 %v12580_v45, %v12579_v54  ;;  %v2899_v21 = vld [vmem:[#allocation3 + $0x4a] sm:$0xf]  ;;  %v2905_v11 = vld [vmem:[#allocation3 + $0x40] sm:$0xf]  ;;  %v2863_v28 = vld [vmem:[#allocation3 + $0x11] sm:$0xf]  ;;  %v2966_v36 = vpop.permute.xlu0 %2965  ;;  %v3100_v53 = vpop.permute.xlu1 %3099 }
 0x626   :  { %v2870_v22 = vld [vmem:[#allocation3 + $0xa] sm:$0xf]  ;;  %v2875_v1 = vld [vmem:[#allocation3 + $0x42] sm:$0xf]  ;;  %v2864_v8 = vld [vmem:[#allocation3 + $0x19] sm:$0xf] }
 0x627   :  { %12071 = vmatprep.mubr.msk.bf16.mxu0 %vm1224_vm6, %v3223_v57  ;;  %v2868_v5 = vld [vmem:[#allocation3 + $0x49] sm:$0xf]  ;;  %v2913_v40 = vld [vmem:[#allocation3 + $0x41] sm:$0xf]  ;;  %v2901_v56 = vld [vmem:[#allocation3 + $0x10] sm:$0xf] }
 0x628   :  { %2997 = vrot.lane.b32.xlu0 %v2877_v37, %s13247_s22  ;;  %12072 = vmatmul.mubr.msk.bf16.vlgmr.msra.gmra.mrb[36].mxu0 %vm1224_vm6, %v3226_v62  ;;  %v2906_v17 = vld [vmem:[#allocation3 + $0x48] sm:$0xf]  ;;  %v2902_v30 = vld [vmem:[#allocation3 + $0x18] sm:$0xf]  ;;  %v2871_v6 = vld [vmem:[#allocation3 + $0x12] sm:$0xf] }
 0x629   :  { %2935 = vrot.lane.b32.xlu1 %v2862_v61, %s13244_s30  ;;  %v2876_v24 = vld [vmem:[#allocation3 + $0x4a] sm:$0xf]  ;;  %v2872_v4 = vld [vmem:[#allocation3 + $0x1a] sm:$0xf]  ;;  %v2909_v47 = vld [vmem:[#allocation3 + $0x11] sm:$0xf]  ;;  %v14482_v54 = vpop.permute.xlu0 %2941  ;;  %v14484_v45 = vpop.permute.xlu1 %3075 }
 0x62a   :  { %v2914_v10 = vld [vmem:[#allocation3 + $0x49] sm:$0xf]  ;;  %v2910_v43 = vld [vmem:[#allocation3 + $0x19] sm:$0xf]  ;;  %v2878_v14 = vld [vmem:[#allocation3 + $0x10] sm:$0xf] }
 0x62b   :  { %v2879_v44 = vld [vmem:[#allocation3 + $0x18] sm:$0xf]  ;;  %v2907_v35 = vld [vmem:[#allocation3 + $0x50] sm:$0xf]  ;;  %v2903_v19 = vld [vmem:[#allocation3 + $0x20] sm:$0xf] }
 0x62c   :  { %3041 = vrot.lane.b32.xlu0 %v2899_v21, %s13244_s30  ;;  %v2900_v13 = vld [vmem:[#allocation3 + $0x52] sm:$0xf]  ;;  %v2896_v48 = vld [vmem:[#allocation3 + $0x22] sm:$0xf]  ;;  %v2881_v51 = vld [vmem:[#allocation3 + $0x38] sm:$0xf] }
 0x62d   :  { %2967 = vrot.lane.b32.xlu1 %v2870_v22, %s13235_s1  ;;  %v2911_v49 = vld [vmem:[#allocation3 + $0x21] sm:$0xf]  ;;  %v2915_v52 = vld [vmem:[#allocation3 + $0x51] sm:$0xf]  ;;  %v2883_v59 = vld [vmem:[#allocation3 + $0x48] sm:$0xf]  ;;  %v14486_v32 = vpop.permute.xlu0 %2973 }
 0x62e   :  { %v2880_v50 = vld [vmem:[#allocation3 + $0x20] sm:$0xf]  ;;  %v2884_v26 = vld [vmem:[#allocation3 + $0x50] sm:$0xf]  ;;  %v2887_v41 = vld [vmem:[#allocation3 + $0x19] sm:$0xf] }
 0x62f   :  { %v2882_v33 = vld [vmem:[#allocation3 + $0x40] sm:$0xf] }
 0x630   :  { %2945 = vrot.lane.b32.xlu0 %v2867_v9, %s13244_s30 }
 0x631   :  { %3039 = vrot.lane.b32.xlu1 %v2898_v39, %s13244_s30 }
 0x634   :  { %3069 = vrot.lane.b32.xlu0 %v2905_v11, %s13235_s1 }
 0x635   :  { %2947 = vrot.lane.b32.xlu1 %v2868_v5, %s13244_s30 }
 0x638   :  { %2977 = vrot.lane.b32.xlu0 %v2875_v1, %s13235_s1 }
 0x639   :  { %3071 = vrot.lane.b32.xlu1 %v2906_v17, %s13235_s1 }
 0x63c   :  { %3101 = vrot.lane.b32.xlu0 %v2913_v40, %s13247_s22 }
 0x63d   :  { %2979 = vrot.lane.b32.xlu1 %v2876_v24, %s13235_s1 }
 0x640   :  { %3033 = vrot.lane.b32.xlu0 %v2895_v25, %s13244_s30 }
 0x641   :  { %3103 = vrot.lane.b32.xlu1 %v2914_v10, %s13247_s22 }
 0x644   :  { %2937 = vrot.lane.b32.xlu0 %v2863_v28, %s13244_s30 }
 0x645   :  { %3031 = vrot.lane.b32.xlu1 %v2894_v7, %s13244_s30 }
 0x648   :  { %3061 = vrot.lane.b32.xlu0 %v2901_v56, %s13235_s1 }
 0x649   :  { %2939 = vrot.lane.b32.xlu1 %v2864_v8, %s13244_s30 }
 0x64c   :  { %2969 = vrot.lane.b32.xlu0 %v2871_v6, %s13235_s1 }
 0x64d   :  { %3063 = vrot.lane.b32.xlu1 %v2902_v30, %s13235_s1  ;;  %v2886_v30 = vld [vmem:[#allocation3 + $0x11] sm:$0xf] }
 0x650   :  { %3093 = vrot.lane.b32.xlu0 %v2909_v47, %s13247_s22  ;;  %v2885_v47 = vld [vmem:[#allocation3 + $0x9] sm:$0xf] }
 0x651   :  { %2971 = vrot.lane.b32.xlu1 %v2872_v4, %s13235_s1  ;;  %v3117_v4 = vsel %vm1224_vm6, %v2853_v29, %v2934_v18 }
 0x654   :  { %3001 = vrot.lane.b32.xlu0 %v2879_v44, %s13247_s22 }
 0x655   :  { %3095 = vrot.lane.b32.xlu1 %v2910_v43, %s13247_s22  ;;  %v2888_v43 = vld [vmem:[#allocation3 + $0x21] sm:$0xf] }
 0x658   :  { %3073 = vrot.lane.b32.xlu0 %v2907_v35, %s13235_s1 }
 0x659   :  { %2999 = vrot.lane.b32.xlu1 %v2878_v14, %s13247_s22 }
 0x65c   :  { %3065 = vrot.lane.b32.xlu0 %v2903_v19, %s13235_s1 }
 0x65d   :  { %3043 = vrot.lane.b32.xlu1 %v2900_v13, %s13244_s30  ;;  %v2892_v13 = vld [vmem:[#allocation3 + $0x51] sm:$0xf] }
 0x660   :  { %3097 = vrot.lane.b32.xlu0 %v2911_v49, %s13247_s22 }
 0x661   :  { %3035 = vrot.lane.b32.xlu1 %v2896_v48, %s13244_s30 }
 0x664   :  { %3105 = vrot.lane.b32.xlu0 %v2915_v52, %s13247_s22 }
 0x665   :  { %3107 = vrot.lane.b32.xlu1 %v2916_v2, %s13247_s22 }
 0x668   :  { %3005 = vrot.lane.b32.xlu0 %v2881_v51, %s13247_s22  ;;  %v2854_v51 = vld [vmem:[#allocation3 + $0x8] sm:$0xf] }
 0x669   :  { %3003 = vrot.lane.b32.xlu1 %v2880_v50, %s13247_s22  ;;  %v3125_v50 = vsel %vm1258_vm8, %v3117_v4, %v2966_v36 }
 0x66c   :  { %3009 = vrot.lane.b32.xlu0 %v2883_v59, %s13247_s22 }
 0x66d   :  { %3007 = vrot.lane.b32.xlu1 %v2882_v33, %s13247_s22  ;;  %v2891_v33 = vld [vmem:[#allocation3 + $0x49] sm:$0xf] }
 0x671   :  { %3011 = vrot.lane.b32.xlu1 %v2884_v26, %s13247_s22 }
 0x692   :  { %v14490_v60 = vpop.permute.xlu0 %3037 }
 0x693   :  { %v14488_v57 = vpop.permute.xlu1 %2943 }
 0x696   :  { %v3030_v61 = vpop.permute.xlu0 %3029 }
 0x697   :  { %v14492_v37 = vpop.permute.xlu1 %2975  ;;  %v3141_v35 = vsel %vm1224_vm6, %v2885_v47, %v3030_v61  ;;  %v2889_v61 = vld [vmem:[#allocation3 + $0x39] sm:$0xf] }
 0x69a   :  { %v14494_v21 = vpop.permute.xlu0 %2997 }
 0x69b   :  { %v2936_v62 = vpop.permute.xlu1 %2935 }
 0x69e   :  { %v3042_v39 = vpop.permute.xlu0 %3041 }
 0x69f   :  { %v2968_v22 = vpop.permute.xlu1 %2967 }
 0x6a2   :  { %v14496_v0 = vpop.permute.xlu0 %2945 }
 0x6a3   :  { %v3040_v9 = vpop.permute.xlu1 %3039 }
 0x6a6   :  { %v14500_v5 = vpop.permute.xlu0 %3069 }
 0x6a7   :  { %v14498_v55 = vpop.permute.xlu1 %2947 }
 0x6aa   :  { %v14504_v15 = vpop.permute.xlu0 %2977 }
 0x6ab   :  { %v14502_v11 = vpop.permute.xlu1 %3071 }
 0x6ae   :  { %v14508_v16 = vpop.permute.xlu0 %3101 }
 0x6af   :  { %v14506_v34 = vpop.permute.xlu1 %2979 }
 0x6b2   :  { %v3034_v1 = vpop.permute.xlu0 %3033 }
 0x6b3   :  { %v14510_v17 = vpop.permute.xlu1 %3103  ;;  %v3143_v58 = vsel %vm1224_vm6, %v2887_v41, %v3034_v1  ;;  %v3118_v1 = vsel %vm1224_vm6, %v2854_v51, %v2936_v62  ;;  %v2855_v62 = vld [vmem:[#allocation3 + $0x10] sm:$0xf] }
 0x6b4   :  { %v3126_v36 = vsel %vm1258_vm8, %v3118_v1, %v2968_v22 }
 0x6b6   :  { %v2938_v23 = vpop.permute.xlu0 %2937 }
 0x6b7   :  { %v3032_v20 = vpop.permute.xlu1 %3031  ;;  %v3119_v22 = vsel %vm1224_vm6, %v2855_v62, %v2938_v23 }
 0x6b8   :  { %v3142_v6 = vsel %vm1224_vm6, %v2886_v30, %v3032_v20  ;;  %v3147_v20 = vsel %vm1224_vm6, %v2891_v33, %v3042_v39  ;;  %v2856_v30 = vld [vmem:[#allocation3 + $0x18] sm:$0xf] }
 0x6ba   :  { %v3062_v40 = vpop.permute.xlu0 %3061 }
 0x6bb   :  { %v2940_v24 = vpop.permute.xlu1 %2939  ;;  %v3149_v48 = vsel %vm1258_vm8, %v3141_v35, %v3062_v40 }
 0x6bc   :  { %v3120_v47 = vsel %vm1224_vm6, %v2856_v30, %v2940_v24 }
 0x6be   :  { %v2970_v10 = vpop.permute.xlu0 %2969 }
 0x6bf   :  { %v3064_v3 = vpop.permute.xlu1 %3063  ;;  %v3127_v41 = vsel %vm1258_vm8, %v3119_v22, %v2970_v10 }
 0x6c0   :  { %v3150_v42 = vsel %vm1258_vm8, %v3142_v6, %v3064_v3 }
 0x6c2   :  { %v3094_v27 = vpop.permute.xlu0 %3093 }
 0x6c3   :  { %v2972_v25 = vpop.permute.xlu1 %2971  ;;  %v3157_v59 = vsel %vm1292_vm10, %v3149_v48, %v3094_v27  ;;  %v2859_v48 = vld [vmem:[#allocation3 + $0x40] sm:$0xf] }
 0x6c6   :  { %v3002_v7 = vpop.permute.xlu0 %3001 }
 0x6c7   :  { %v3096_v63 = vpop.permute.xlu1 %3095  ;;  %v3135_v23 = vsel %vm1292_vm10, %v3127_v41, %v3002_v7  ;;  %v12608_v41 = vld [vmem:[%s13314_s24 + $0x88] sm:$0xff]  }
 0x6c8   :  { %v3158_v46 = vsel %vm1292_vm10, %v3150_v42, %v3096_v63  ;;  %v3128_v42 = vsel %vm1258_vm8, %v3120_v47, %v2972_v25 }
 0x6c9   :  { %v10800_v40 = vcombine.low %v3157_v59, %v3158_v46 }
 0x6ca   :  { %v3074_v8 = vpop.permute.xlu0 %3073 }
 0x6cb   :  { %v3000_v28 = vpop.permute.xlu1 %2999  ;;  %v3155_v27 = vsel %vm1258_vm8, %v3147_v20, %v3074_v8  ;;  %v3516_v20 = vld [vmem:[#allocation4 + $0x1] sm:$0xf] }
 0x6cc   :  { %v3134_v8 = vsel %vm1292_vm10, %v3126_v36, %v3000_v28  ;;  %3589 = vrot.lane.b32.xlu0 %v3516_v20, %s13235_s1  ;;  %v12602_v36 = vld [vmem:[%s13314_s24 + $0xc0] sm:$0xff]   ;;  %v12622_v20 = vld [vmem:[%s13314_s24 + $0xe8] sm:$0xff]  }
 0x6cd   :  { %11461 = vmatprep.subr.bf16.mxu1 %v12602_v36  ;;  %v12626_v36 = vld [vmem:[%s13314_s24 + $0xf0] sm:$0xff]  }
 0x6ce   :  { %v3066_v12 = vpop.permute.xlu0 %3065 }
 0x6cf   :  { %v3044_v56 = vpop.permute.xlu1 %3043  ;;  %v3151_v2 = vsel %vm1258_vm8, %v3143_v58, %v3066_v12  ;;  %v2890_v12 = vld [vmem:[#allocation3 + $0x41] sm:$0xf]  ;;  %v2858_v58 = vld [vmem:[#allocation3 + $0x38] sm:$0xf] }
 0x6d0   :  { %v3148_v49 = vsel %vm1224_vm6, %v2892_v13, %v3044_v56  ;;  %v3146_v29 = vsel %vm1224_vm6, %v2890_v12, %v3040_v9  ;;  %v12603_v12 = vld [vmem:[%s13314_s24 + $0x8] sm:$0xff]  }
 0x6d2   :  { %v3098_v14 = vpop.permute.xlu0 %3097 }
 0x6d3   :  { %v3036_v44 = vpop.permute.xlu1 %3035  ;;  %v3159_v18 = vsel %vm1292_vm10, %v3151_v2, %v3098_v14  ;;  %v2857_v14 = vld [vmem:[#allocation3 + $0x30] sm:$0xf] }
 0x6d4   :  { %v3144_v19 = vsel %vm1224_vm6, %v2888_v43, %v3036_v44  ;;  %v3121_v13 = vsel %vm1224_vm6, %v2857_v14, %v14482_v54 }
 0x6d5   :  { %v3152_v52 = vsel %vm1258_vm8, %v3144_v19, %v3068_v38  ;;  %v3145_v38 = vsel %vm1224_vm6, %v2889_v61, %v14490_v60  ;;  %v3154_v60 = vsel %vm1258_vm8, %v3146_v29, %v14502_v11  ;;  %v3129_v54 = vsel %vm1258_vm8, %v3121_v13, %v14486_v32  ;;  %v10807_v29 = vld [vmem:[%s13309_s19] ss:$0 sm:$0xff]  ;;  %s15677_s19 = sld [smem:[#allocation32_spill]] }
 0x6d6   :  { %v3160_v26 = vsel %vm1292_vm10, %v3152_v52, %v3100_v53  ;;  %v3106_v56 = vpop.permute.xlu0 %3105  ;;  %v3156_v53 = vsel %vm1258_vm8, %v3148_v49, %v14484_v45  ;;  %v3133_v45 = vsel %vm1292_vm10, %v3125_v50, %v14494_v21  ;;  %v3162_v9 = vsel %vm1292_vm10, %v3154_v60, %v14510_v17  ;;  %v2860_v49 = vld [vmem:[#allocation3 + $0x48] sm:$0xf] }
 0x6d7   :  { %v10802_v3 = vcombine.low %v3159_v18, %v3160_v26  ;;  %v3108_v63 = vpop.permute.xlu1 %3107  ;;  %v3163_v6 = vsel %vm1292_vm10, %v3155_v27, %v3106_v56  ;;  %v3153_v11 = vsel %vm1258_vm8, %v3145_v38, %v14500_v5  ;;  %v10799_v17 = vcombine.low %v3133_v45, %v3134_v8  ;;  %v12600_v56 = vld [vmem:[%s13314_s24] sm:$0xff]   ;;  %v12601_v38 = vld [vmem:[%s13314_s24 + $0x48] sm:$0xff]   ;;  %v12605_v8 = vld [vmem:[%s13314_s24 + $0x50] sm:$0xff]  }
 0x6d8   :  { %v3164_v39 = vsel %vm1292_vm10, %v3156_v53, %v3108_v63  ;;  %v3161_v21 = vsel %vm1292_vm10, %v3153_v11, %v14508_v16  ;;  %v3122_v5 = vsel %vm1224_vm6, %v2858_v58, %v14488_v57  ;;  %v3123_v16 = vsel %vm1224_vm6, %v2859_v48, %v14496_v0  ;;  %v12599_v63 = vld [vmem:[%s13314_s24 + $0x40] sm:$0xff]   ;;  %v12606_v45 = vld [vmem:[%s13314_s24 + $0xc8] sm:$0xff]   ;;  %v12612_v58 = vld [vmem:[%s13314_s24 + $0x90] sm:$0xff]  }
 0x6d9   :  { %v3222_v4 = vpack.c.bf16 %v10802_v3, %v10800_v40  ;;  %v10806_v24 = vcombine.low %v3163_v6, %v3164_v39  ;;  %v10804_v10 = vcombine.low %v3161_v21, %v3162_v9  ;;  %v3130_v19 = vsel %vm1258_vm8, %v3122_v5, %v14492_v37  ;;  %v3572_v40 = vld [vmem:[#allocation4 + $0x59] sm:$0xf]  ;;  %v3520_v3 = vld [vmem:[#allocation4 + $0x31] sm:$0xf]  ;;  %11433 = vmatprep.subr.bf16.mxu0 %v12599_v63  ;;  %v12604_v27 = vld [vmem:[%s13314_s24 + $0x80] sm:$0xff]  }
 0x6da   :  { %v3006_v44 = vpop.permute.xlu0 %3005  ;;  %v3124_v52 = vsel %vm1224_vm6, %v2860_v49, %v14498_v55  ;;  %v3131_v57 = vsel %vm1258_vm8, %v3123_v16, %v14504_v15  ;;  %3597 = vrot.lane.b32.xlu0 %v3520_v3, %s13235_s1  ;;  %11434 = vmatpush3.bf16.msra.mxu0 %v12600_v56  ;;  %v12607_v9 = vld [vmem:[%s13314_s24 + $0x10] sm:$0xff]   ;;  %v12609_v21 = vld [vmem:[%s13314_s24 + $0x58] sm:$0xff]   ;;  %v12613_v5 = vld [vmem:[%s13314_s24 + $0x60] sm:$0xff]  }
 0x6db   :  { %v3004_v43 = vpop.permute.xlu1 %3003  ;;  %3416 = vmatprep.mubr.bf16.mxu1 %v3222_v4  ;;  %v3225_v7 = vpack.c.bf16 %v10806_v24, %v10804_v10  ;;  %v3132_v37 = vsel %vm1258_vm8, %v3124_v52, %v14506_v34  ;;  %v3137_v33 = vsel %vm1292_vm10, %v3129_v54, %v3006_v44  ;;  %v3568_v34 = vld [vmem:[#allocation4 + $0x29] sm:$0xf]  ;;  %11435 = vmatprep.subr.bf16.mxu0 %v12601_v38  ;;  %v12625_v38 = vld [vmem:[%s13314_s24 + $0x78] sm:$0xff]  }
 0x6dc   :  { %v3136_v28 = vsel %vm1292_vm10, %v3128_v42, %v3004_v43  ;;  %3691 = vrot.lane.b32.xlu1 %v3568_v34, %s13235_s1  ;;  %v12621_v34 = vld [vmem:[%s13314_s24 + $0x70] sm:$0xff]   ;;  %v12624_v63 = vld [vmem:[%s13314_s24 + $0xa8] sm:$0xff]  }
 0x6dd   :  { %v10801_v35 = vcombine.low %v3135_v23, %v3136_v28 }
 0x6de   :  { %v3010_v2 = vpop.permute.xlu0 %3009  ;;  %11436 = vmatpush3.bf16.msra.mxu0 %v12603_v12  ;;  %v12627_v12 = vld [vmem:[%s13314_s24 + $0x38] sm:$0xff]  }
 0x6df   :  { %v3221_v25 = vpack.c.bf16 %v10801_v35, %v10799_v17  ;;  %v3008_v46 = vpop.permute.xlu1 %3007  ;;  %v3139_v0 = vsel %vm1292_vm10, %v3131_v57, %v3010_v2  ;;  %11437 = vmatprep.subr.bf16.mxu0 %v12605_v8  ;;  %v12610_v17 = vld [vmem:[%s13314_s24 + $0xd0] sm:$0xff]   ;;  %v12611_v35 = vld [vmem:[%s13314_s24 + $0x18] sm:$0xff]  }
 0x6e0   :  { %v3138_v50 = vsel %vm1292_vm10, %v3130_v19, %v3008_v46  ;;  %3699 = vrot.lane.b32.xlu1 %v3572_v40, %s13235_s1  ;;  %v12615_v19 = vld [vmem:[%s13314_s24 + $0x20] sm:$0xff]   ;;  %v12616_v2 = vld [vmem:[%s13314_s24 + $0x98] sm:$0xff]   ;;  %v12623_v40 = vld [vmem:[%s13314_s24 + $0x30] sm:$0xff]  }
 0x6e1   :  { %3417 = vmatmul.mubr.bf16.vlgmr.msra.gmra.mrb[32].mxu1 %v3221_v25  ;;  %v10803_v55 = vcombine.low %v3137_v33, %v3138_v50 }
 0x6e2   :  { %3424 = vmatprep.mubr.bf16.mxu1 %v3225_v7  ;;  %11462 = vmatpush3.bf16.msra.mxu1 %v12604_v27  ;;  %v12614_v7 = vld [vmem:[%s13314_s24 + $0xd8] sm:$0xff]   ;;  %v12628_v27 = vld [vmem:[%s13314_s24 + $0xb0] sm:$0xff]  }
 0x6e3   :  { %v3012_v51 = vpop.permute.xlu1 %3011  ;;  %11463 = vmatprep.subr.bf16.mxu1 %v12606_v45  ;;  %11438 = vmatpush3.bf16.msra.mxu0 %v12607_v9 }
 0x6e4   :  { %v3140_v59 = vsel %vm1292_vm10, %v3132_v37, %v3012_v51  ;;  %11439 = vmatprep.subr.bf16.mxu0 %v12609_v21 }
 0x6e5   :  { %v10805_v26 = vcombine.low %v3139_v0, %v3140_v59  ;;  %v12617_v59 = vld [vmem:[%s13314_s24 + $0x68] sm:$0xff]  }
 0x6e6   :  { %11464 = vmatpush3.bf16.msra.mxu1 %v12608_v41 }
 0x6e7   :  { %v3224_v18 = vpack.c.bf16 %v10805_v26, %v10803_v55  ;;  %11465 = vmatprep.subr.bf16.mxu1 %v12610_v17  ;;  %11440 = vmatpush3.bf16.msra.mxu0 %v12611_v35  ;;  %v12618_v55 = vld [vmem:[%s13314_s24 + $0xe0] sm:$0xff]  }
 0x6e8   :  { %11441 = vmatprep.subr.bf16.mxu0 %v12613_v5 }
 0x6e9   :  { %3425 = vmatmul.mubr.bf16.gmra.mrb[36].mxu1 %v3224_v18 }
 0x6ea   :  { %11466 = vmatpush3.bf16.msra.mxu1 %v12612_v58 }
 0x6eb   :  { %11467 = vmatprep.subr.bf16.mxu1 %v12614_v7  ;;  %11442 = vmatpush3.bf16.msra.mxu0 %v12615_v19 }
 0x6ec   :  { %11443 = vmatprep.subr.bf16.mxu0 %v12617_v59 }
 0x6ee   :  { %11468 = vmatpush3.bf16.msra.mxu1 %v12616_v2 }
 0x6ef   :  { %11469 = vmatprep.subr.bf16.mxu1 %v12618_v55 }
 0x6fb   :  { %v14575_v61 = vpop.f32.mrb[36].mxu0 }
 0x6fc   :  { %v14577_v32 = vpop.f32.mrb[37].mxu0 }
 0x6fd   :  { %v14579_v1 = vpop.f32.mrb[38].mxu0 }
 0x6fe   :  { %v14581_v15 = vpop.f32.mrb[39].mxu0 }
 0x73e   :  { %v3590_v21 = vpop.permute.xlu0 %3589 }
 0x74c   :  { %v14778_v35 = vpop.permute.xlu0 %3597 }
 0x7b4   :  { %v11417_v53 = vpop.f32.mrb[32].mxu1 }
 0x7b5   :  { %v11418_v62 = vpop.f32.mrb[33].mxu1 }
 0x7b6   :  { %v11419_v30 = vadd.f32 %v11418_v62, %v11417_v53  ;;  %v11420_v39 = vpop.f32.mrb[34].mxu1  ;;  %v12629_v53 = vld [vmem:[%s13314_s24 + $0xf8] sm:$0xff]  }
 0x7b7   :  { %v11421_v6 = vpop.f32.mrb[35].mxu1 }
 0x7b8   :  { %v3419_v4 = vadd.f32 %v11419_v30, %v10807_v29  ;;  %v11422_v60 = vadd.f32 %v11421_v6, %v11420_v39  ;;  %v12630_v30 = vld [vmem:[%s13314_s24 + $0xb8] sm:$0xff]  }
 0x7ba   :  { %v3468_v22 = vadd.f32 %v14577_v32, %v3419_v4  ;;  %v3422_v47 = vadd.f32 %v11422_v60, %v10807_v29  ;;  %v12620_v32 = vld [vmem:[%s13314_s24 + $0xa0] sm:$0xff]  }
 0x7bb   :  { %11470 = vmatpush3.bf16.msra.mxu1 %v12620_v32 }
 0x7bc   :  { %v3482_v42 = vmax.f32 %v3468_v22, 0.0  ;;  %v3471_v43 = vadd.f32 %v14581_v15, %v3422_v47  ;;  %v11423_v44 = vpop.f32.mrb[36].mxu1  ;;  %11471 = vmatprep.subr.bf16.mxu1 %v12622_v20  ;;  %v14761_v22 = vld [vmem:[%s13314_s24 + $0x100] sm:$0xff]  }
 0x7bd   :  { %v11424_v11 = vpop.f32.mrb[37].mxu1 }
 0x7be   :  { %v3490_v23 = vcombine.high %v3482_v42, %v3482_v42  ;;  %3500 = vst.msk [vmem:[#allocation4 + $0x9] sm:$0xf] %vm3499_vm1, %v3482_v42  ;;  %v3483_v24 = vmax.f32 %v3471_v43, 0.0  ;;  %v11425_v28 = vadd.f32 %v11424_v11, %v11423_v44  ;;  %v11426_v14 = vpop.f32.mrb[38].mxu1 }
 0x7bf   :  { %v11427_v10 = vpop.f32.mrb[39].mxu1  ;;  %11472 = vmatpush3.bf16.msra.mxu1 %v12624_v63 }
 0x7c0   :  { %3501 = vst.msk [vmem:[#allocation4 + $0x11] sm:$0xf] %vm3499_vm1, %v3490_v23  ;;  %v3491_v25 = vcombine.high %v3483_v24, %v3483_v24  ;;  %3502 = vst.msk [vmem:[#allocation4 + $0x19] sm:$0xf] %vm3499_vm1, %v3483_v24  ;;  %v3427_v46 = vadd.f32 %v11425_v28, %v10807_v29  ;;  %v11428_v13 = vadd.f32 %v11427_v10, %v11426_v14  ;;  %11473 = vmatprep.subr.bf16.mxu1 %v12626_v36  ;;  %v3692_v14 = vpop.permute.xlu1 %3691 }
 0x7c2   :  { %3503 = vst.msk [vmem:[#allocation4 + $0x21] sm:$0xf] %vm3499_vm1, %v3491_v25  ;;  %v3476_v48 = vadd.f32 %v14575_v61, %v3427_v46  ;;  %v3430_v49 = vadd.f32 %v11428_v13, %v10807_v29  ;;  %v12619_v61 = vld [vmem:[%s13314_s24 + $0x28] sm:$0xff]  }
 0x7c3   :  { %11444 = vmatpush3.bf16.msra.mxu0 %v12619_v61  ;;  %11474 = vmatpush3.bf16.msra.mxu1 %v12628_v27  ;;  %v3560_v61 = vld [vmem:[#allocation4 + $0x28] sm:$0xf] }
 0x7c4   :  { %v3484_v16 = vmax.f32 %v3476_v48, 0.0  ;;  %v3479_v52 = vadd.f32 %v14579_v1, %v3430_v49  ;;  %11445 = vmatprep.subr.bf16.mxu0 %v12621_v34  ;;  %11475 = vmatprep.subr.bf16.mxu1 %v12629_v53  ;;  %v14776_v17 = vpop.permute.xlu1 %3699 }
 0x7c5   :  { %v3532_v50 = vld [vmem:[#allocation4 + $0x8] sm:$0xf] }
 0x7c6   :  { %v3517_v54 = vld [vmem:[#allocation4 + $0x9] sm:$0xf]  ;;  %v3492_v57 = vcombine.high %v3484_v16, %v3484_v16  ;;  %3504 = vst.msk [vmem:[#allocation4 + $0x39] sm:$0xf] %vm3499_vm1, %v3484_v16  ;;  %v3485_v37 = vmax.f32 %v3479_v52, 0.0  ;;  %3621 = vrot.lane.b32.xlu0 %v3532_v50, %s13235_s1 }
 0x7c7   :  { %3591 = vrot.lane.b32.xlu1 %v3517_v54, %s13235_s1  ;;  %v3548_v33 = vld [vmem:[#allocation4 + $0xa] sm:$0xf]  ;;  %v3533_v0 = vld [vmem:[#allocation4 + $0x10] sm:$0xf]  ;;  %v3534_v26 = vld [vmem:[#allocation4 + $0x18] sm:$0xf]  ;;  %11446 = vmatpush3.bf16.msra.mxu0 %v12623_v40 }
 0x7c8   :  { %3505 = vst.msk [vmem:[#allocation4 + $0x41] sm:$0xf] %vm3499_vm1, %v3492_v57  ;;  %v3493_v51 = vcombine.high %v3485_v37, %v3485_v37  ;;  %3506 = vst.msk [vmem:[#allocation4 + $0x49] sm:$0xf] %vm3499_vm1, %v3485_v37  ;;  %v3519_v18 = vld [vmem:[#allocation4 + $0x19] sm:$0xf]  ;;  %11447 = vmatprep.subr.bf16.mxu0 %v12625_v38  ;;  %11476 = vmatpush3.bf16.msra.mxu1 %v12630_v30 }
 0x7c9   :  { %v3566_v1 = vld [vmem:[#allocation4 + $0x19] sm:$0xf]  ;;  %v3518_v15 = vld [vmem:[#allocation4 + $0x11] sm:$0xf]  ;;  %v3535_v29 = vld [vmem:[#allocation4 + $0x20] sm:$0xf] }
 0x7ca   :  { %3507 = vst.msk [vmem:[#allocation4 + $0x51] sm:$0xf] %vm3499_vm1, %v3493_v51  ;;  %3653 = vrot.lane.b32.xlu0 %v3548_v33, %s13235_s1  ;;  %v3549_v3 = vld [vmem:[#allocation4 + $0x12] sm:$0xf]  ;;  %v3550_v62 = vld [vmem:[#allocation4 + $0x1a] sm:$0xf] }
 0x7cb   :  { %3623 = vrot.lane.b32.xlu1 %v3533_v0, %s13235_s1  ;;  %v3565_v56 = vld [vmem:[#allocation4 + $0x11] sm:$0xf]  ;;  %11448 = vmatpush3.bf16.msra.mxu0 %v12627_v12  ;;  %v3551_v39 = vld [vmem:[#allocation4 + $0x22] sm:$0xf]  ;;  %v3525_v52 = vld [vmem:[#allocation4 + $0xa] sm:$0xf] }
 0x7cc   :  { %v3567_v6 = vld [vmem:[#allocation4 + $0x21] sm:$0xf]  ;;  %12075 = vmatprep.subr.bf16.mxu0 %v14761_v22  ;;  %v3510_v2 = vld [vmem:[#allocation4 + $0x10] sm:$0xf]  ;;  %v3509_v57 = vld [vmem:[#allocation4 + $0x8] sm:$0xf] }
 0x7cd   :  { %v3536_v4 = vld [vmem:[#allocation4 + $0x38] sm:$0xf]  ;;  %v3524_v16 = vld [vmem:[#allocation4 + $0x2] sm:$0xf]  ;;  %v3526_v59 = vld [vmem:[#allocation4 + $0x12] sm:$0xf] }
 0x7ce   :  { %3625 = vrot.lane.b32.xlu0 %v3534_v26, %s13235_s1  ;;  %v3521_v60 = vld [vmem:[#allocation4 + $0x39] sm:$0xf]  ;;  %v3508_v54 = vld [vmem:[#allocation4] sm:$0xf]  ;;  %v3557_v63 = vld [vmem:[#allocation4 + $0x10] sm:$0xf] }
 0x7cf   :  { %3595 = vrot.lane.b32.xlu1 %v3519_v18, %s13235_s1  ;;  %v3552_v47 = vld [vmem:[#allocation4 + $0x3a] sm:$0xf]  ;;  %v3537_v8 = vld [vmem:[#allocation4 + $0x40] sm:$0xf]  ;;  %v3538_v45 = vld [vmem:[#allocation4 + $0x48] sm:$0xf]  ;;  %v3709_v20 = vsel %vm1258_vm8, %v3508_v54, %v3590_v21 }
 0x7d0   :  { %v3523_v9 = vld [vmem:[#allocation4 + $0x49] sm:$0xf]  ;;  %v3522_v42 = vld [vmem:[#allocation4 + $0x41] sm:$0xf]  ;;  %v3511_v51 = vld [vmem:[#allocation4 + $0x18] sm:$0xf] }
 0x7d1   :  { %v3570_v41 = vld [vmem:[#allocation4 + $0x49] sm:$0xf]  ;;  %v3539_v43 = vld [vmem:[#allocation4 + $0x50] sm:$0xf]  ;;  %v3569_v44 = vld [vmem:[#allocation4 + $0x41] sm:$0xf] }
 0x7d2   :  { %3593 = vrot.lane.b32.xlu0 %v3518_v15, %s13235_s1  ;;  %v3553_v11 = vld [vmem:[#allocation4 + $0x42] sm:$0xf]  ;;  %v3571_v23 = vld [vmem:[#allocation4 + $0x51] sm:$0xf]  ;;  %v3554_v28 = vld [vmem:[#allocation4 + $0x4a] sm:$0xf] }
 0x7d3   :  { %3687 = vrot.lane.b32.xlu1 %v3566_v1, %s13235_s1  ;;  %v3555_v24 = vld [vmem:[#allocation4 + $0x52] sm:$0xf]  ;;  %v3527_v55 = vld [vmem:[#allocation4 + $0x1a] sm:$0xf]  ;;  %v3540_v36 = vld [vmem:[#allocation4 + $0x9] sm:$0xf] }
 0x7d4   :  { %v3558_v12 = vld [vmem:[#allocation4 + $0x18] sm:$0xf] }
 0x7d6   :  { %3685 = vrot.lane.b32.xlu0 %v3565_v56, %s13235_s1 }
 0x7d7   :  { %3655 = vrot.lane.b32.xlu1 %v3549_v3, %s13235_s1  ;;  %v3541_v3 = vld [vmem:[#allocation4 + $0x11] sm:$0xf] }
 0x7da   :  { %3657 = vrot.lane.b32.xlu0 %v3550_v62, %s13235_s1 }
 0x7db   :  { %3627 = vrot.lane.b32.xlu1 %v3535_v29, %s13235_s1  ;;  %v3736_v29 = vsel %vm1258_vm8, %v3560_v61, %v3692_v14 }
 0x7de   :  { %3689 = vrot.lane.b32.xlu0 %v3567_v6, %s13235_s1  ;;  %v3543_v6 = vld [vmem:[#allocation4 + $0x21] sm:$0xf] }
 0x7df   :  { %3659 = vrot.lane.b32.xlu1 %v3551_v39, %s13235_s1  ;;  %v3542_v39 = vld [vmem:[#allocation4 + $0x19] sm:$0xf] }
 0x7e2   :  { %3629 = vrot.lane.b32.xlu0 %v3536_v4, %s13235_s1 }
 0x7e3   :  { %3599 = vrot.lane.b32.xlu1 %v3521_v60, %s13235_s1  ;;  %v3559_v60 = vld [vmem:[#allocation4 + $0x20] sm:$0xf] }
 0x7e6   :  { %3661 = vrot.lane.b32.xlu0 %v3552_v47, %s13235_s1 }
 0x7e7   :  { %3631 = vrot.lane.b32.xlu1 %v3537_v8, %s13235_s1 }
 0x7ea   :  { %3633 = vrot.lane.b32.xlu0 %v3538_v45, %s13235_s1 }
 0x7eb   :  { %3603 = vrot.lane.b32.xlu1 %v3523_v9, %s13235_s1 }
 0x7ee   :  { %3601 = vrot.lane.b32.xlu0 %v3522_v42, %s13235_s1 }
 0x7ef   :  { %3695 = vrot.lane.b32.xlu1 %v3570_v41, %s13235_s1 }
 0x7f2   :  { %3693 = vrot.lane.b32.xlu0 %v3569_v44, %s13235_s1 }
 0x7f3   :  { %3635 = vrot.lane.b32.xlu1 %v3539_v43, %s13235_s1  ;;  %v12632_v43 = vld [vmem:[%s13314_s24 + $0x108] sm:$0xff]  }
 0x7f6   :  { %3697 = vrot.lane.b32.xlu0 %v3571_v23, %s13235_s1 }
 0x7f7   :  { %3663 = vrot.lane.b32.xlu1 %v3553_v11, %s13235_s1 }
 0x7fa   :  { %3665 = vrot.lane.b32.xlu0 %v3554_v28, %s13235_s1 }
 0x7fb   :  { %3667 = vrot.lane.b32.xlu1 %v3555_v24, %s13235_s1 }
 0x838   :  { %v3622_v58 = vpop.permute.xlu0 %3621 }
 0x839   :  { %v3592_v10 = vpop.permute.xlu1 %3591  ;;  %v3717_v32 = vsel %vm1258_vm8, %v3524_v16, %v3622_v58  ;;  %v12633_v58 = vld [vmem:[%s13314_s24 + $0x110] sm:$0xff]   ;;  %v3529_v16 = vld [vmem:[#allocation4 + $0x3a] sm:$0xf] }
 0x83a   :  { %v3710_v33 = vsel %vm1258_vm8, %v3509_v57, %v3592_v10  ;;  %v3515_v57 = vld [vmem:[#allocation4 + $0x48] sm:$0xf] }
 0x83b   :  { %v10828_v38 = vcombine.low %v3709_v20, %v3710_v33  ;;  %v3530_v33 = vld [vmem:[#allocation4 + $0x42] sm:$0xf] }
 0x83c   :  { %v3654_v46 = vpop.permute.xlu0 %3653 }
 0x83d   :  { %v3624_v25 = vpop.permute.xlu1 %3623  ;;  %v3725_v62 = vsel %vm1258_vm8, %v3540_v36, %v3654_v46 }
 0x83e   :  { %v3718_v37 = vsel %vm1258_vm8, %v3525_v52, %v3624_v25  ;;  %v3512_v52 = vld [vmem:[#allocation4 + $0x30] sm:$0xf] }
 0x83f   :  { %v10829_v40 = vcombine.low %v3717_v32, %v3718_v37 }
 0x840   :  { %v3626_v5 = vpop.permute.xlu0 %3625 }
 0x841   :  { %v3596_v13 = vpop.permute.xlu1 %3595  ;;  %v3719_v1 = vsel %vm1258_vm8, %v3526_v59, %v3626_v5 }
 0x842   :  { %v3712_v0 = vsel %vm1258_vm8, %v3511_v51, %v3596_v13  ;;  %v12636_v13 = vld [vmem:[%s13314_s24 + $0x118] sm:$0xff]   ;;  %s15678_s24 = sld [smem:[#allocation29_spill]] }
 0x844   :  { %v3594_v19 = vpop.permute.xlu0 %3593 }
 0x845   :  { %v3688_v7 = vpop.permute.xlu1 %3687  ;;  %v3711_v50 = vsel %vm1258_vm8, %v3510_v2, %v3594_v19  ;;  %v3528_v2 = vld [vmem:[#allocation4 + $0x32] sm:$0xf] }
 0x846   :  { %v10832_v15 = vcombine.low %v3711_v50, %v3712_v0  ;;  %v3734_v30 = vsel %vm1258_vm8, %v3558_v12, %v3688_v7  ;;  %v3513_v50 = vld [vmem:[#allocation4 + $0x38] sm:$0xf]  ;;  %v3531_v0 = vld [vmem:[#allocation4 + $0x4a] sm:$0xf]  ;;  %v3563_v12 = vld [vmem:[#allocation4 + $0x50] sm:$0xf] }
 0x848   :  { %v3686_v49 = vpop.permute.xlu0 %3685  ;;  %v3837_v45 = vpack.c.bf16 %v10832_v15, %v10828_v38  ;;  %v3713_v15 = vsel %vm1258_vm8, %v3512_v52, %v14778_v35  ;;  %v3562_v38 = vld [vmem:[#allocation4 + $0x48] sm:$0xf]  ;;  %v12650_v52 = vld [vmem:[%s15671_s21 + $0x90] sm:$0xff]  }
 0x849   :  { %v3656_v48 = vpop.permute.xlu1 %3655  ;;  %v3733_v53 = vsel %vm1258_vm8, %v3557_v63, %v3686_v49  ;;  %v3514_v49 = vld [vmem:[#allocation4 + $0x40] sm:$0xf] }
 0x84a   :  { %v3726_v27 = vsel %vm1258_vm8, %v3541_v3, %v3656_v48  ;;  %v10831_v11 = vcombine.low %v3733_v53, %v3734_v30  ;;  %v12635_v3 = vld [vmem:[#allocation4 + $0x22] ss:$8 sps:$4 sm:$0xff]  }
 0x84b   :  { %v10830_v44 = vcombine.low %v3725_v62, %v3726_v27 }
 0x84c   :  { %v3658_v18 = vpop.permute.xlu0 %3657 }
 0x84d   :  { %v3628_v26 = vpop.permute.xlu1 %3627  ;;  %v3727_v9 = vsel %vm1258_vm8, %v3542_v39, %v3658_v18 }
 0x84e   :  { %v3720_v34 = vsel %vm1258_vm8, %v3527_v55, %v3628_v26 }
 0x84f   :  { %v10833_v56 = vcombine.low %v3719_v1, %v3720_v34  ;;  %v3564_v1 = vld [vmem:[#allocation4 + $0x58] sm:$0xf] }
 0x850   :  { %v3690_v47 = vpop.permute.xlu0 %3689  ;;  %v3740_v62 = vsel %vm1258_vm8, %v3564_v1, %v14776_v17  ;;  %v3546_v17 = vld [vmem:[#allocation4 + $0x49] sm:$0xf]  ;;  %v12664_v1 = vld [vmem:[%s15671_s21 + $0xf0] sm:$0xff]  }
 0x851   :  { %v3660_v4 = vpop.permute.xlu1 %3659  ;;  %v3838_v8 = vpack.c.bf16 %v10833_v56, %v10829_v40  ;;  %v3735_v42 = vsel %vm1258_vm8, %v3559_v60, %v3690_v47  ;;  %v3561_v40 = vld [vmem:[#allocation4 + $0x40] sm:$0xf] }
 0x852   :  { %v3728_v41 = vsel %vm1258_vm8, %v3543_v6, %v3660_v4  ;;  %v10835_v24 = vcombine.low %v3735_v42, %v3736_v29  ;;  %v12634_v29 = vld [vmem:[#allocation4 + $0x12] ss:$8 sps:$4 sm:$0xff]   ;;  %v3545_v4 = vld [vmem:[#allocation4 + $0x41] sm:$0xf] }
 0x853   :  { %v10834_v23 = vcombine.low %v3727_v9, %v3728_v41  ;;  %4180 = vmatprep.mubr.bf16.mxu0 %v3838_v8  ;;  %v3841_v47 = vpack.c.bf16 %v12635_v3, %v12634_v29  ;;  %v3547_v9 = vld [vmem:[#allocation4 + $0x51] sm:$0xf]  ;;  %v12669_v3 = vld [vmem:[%s15671_s21 + $0x38] sm:$0xff]   ;;  %v10844_v29 = vld [vmem:[%s15672_s25] ss:$0 sm:$0xff] }
 0x854   :  { %4181 = vmatmul.mubr.bf16.vlgmr.msra.gmra.mrb[40].mxu0 %v3837_v45  ;;  %v3630_v21 = vpop.permute.xlu0 %3629  ;;  %v3840_v10 = vpack.c.bf16 %v10835_v24, %v10831_v11  ;;  %v3544_v45 = vld [vmem:[#allocation4 + $0x39] sm:$0xf] }
 0x855   :  { %v3839_v28 = vpack.c.bf16 %v10834_v23, %v10830_v44  ;;  %v3600_v14 = vpop.permute.xlu1 %3599  ;;  %12076 = vmatpush3.bf16.msra.mxu0 %v14761_v22  ;;  %v3721_v26 = vsel %vm1258_vm8, %v3528_v2, %v3630_v21  ;;  %v12638_v24 = vld [vmem:[#allocation4 + $0x52] ss:$8 sps:$4 sm:$0xff]   ;;  %v12637_v21 = vld [vmem:[#allocation4 + $0x42] ss:$8 sps:$4 sm:$0xff]  }
 0x856   :  { %12077 = vmatprep.subr.bf16.mxu0 %v12632_v43  ;;  %4229 = vmatprep.mubr.bf16.mxu1 %v3840_v10  ;;  %v3714_v37 = vsel %vm1258_vm8, %v3513_v50, %v3600_v14  ;;  %v12647_v2 = vld [vmem:[%s15671_s21 + $0x50] sm:$0xff]   ;;  %v12651_v50 = vld [vmem:[%s15671_s21 + $0x58] sm:$0xff]  }
 0x857   :  { %4230 = vmatmul.mubr.bf16.vlgmr.msra.gmra.mrb[40].mxu1 %v3839_v28  ;;  %v10836_v63 = vcombine.low %v3713_v15, %v3714_v37  ;;  %v12654_v37 = vld [vmem:[%s15671_s21 + $0x98] sm:$0xff]   ;;  %v12665_v15 = vld [vmem:[%s15671_s21 + $0x30] sm:$0xff]  }
 0x858   :  { %v3662_v46 = vpop.permute.xlu0 %3661 }
 0x859   :  { %v3632_v25 = vpop.permute.xlu1 %3631  ;;  %12078 = vmatpush3.bf16.msra.mxu0 %v12632_v43  ;;  %v3729_v44 = vsel %vm1258_vm8, %v3544_v45, %v3662_v46  ;;  %v12640_v46 = vld [vmem:[%s15671_s21 + $0xc0] sm:$0xff]  }
 0x85a   :  { %12079 = vmatprep.subr.bf16.mxu0 %v12633_v58  ;;  %v3722_v54 = vsel %vm1258_vm8, %v3529_v16, %v3632_v25  ;;  %v12639_v25 = vld [vmem:[%s15671_s21 + $0x40] sm:$0xff]   ;;  %v12648_v16 = vld [vmem:[%s15671_s21 + $0xd0] sm:$0xff]  }
 0x85b   :  { %v10837_v34 = vcombine.low %v3721_v26, %v3722_v54  ;;  %11495 = vmatprep.subr.bf16.mxu1 %v12639_v25  ;;  %v12652_v54 = vld [vmem:[%s15671_s21 + $0xd8] sm:$0xff]   ;;  %v12660_v26 = vld [vmem:[%s15671_s21 + $0xe8] sm:$0xff]  }
 0x85c   :  { %v3634_v7 = vpop.permute.xlu0 %3633 }
 0x85d   :  { %v3604_v5 = vpop.permute.xlu1 %3603  ;;  %12080 = vmatpush3.bf16.msra.mxu0 %v12633_v58  ;;  %v3723_v18 = vsel %vm1258_vm8, %v3530_v33, %v3634_v7  ;;  %v3846_v58 = vpack.c.bf16 %v12638_v24, %v12637_v21  ;;  %v12643_v7 = vld [vmem:[%s15671_s21 + $0x48] sm:$0xff]   ;;  %v12656_v33 = vld [vmem:[%s15671_s21 + $0xe0] sm:$0xff]  }
 0x85e   :  { %12081 = vmatprep.subr.bf16.mxu0 %v12636_v13  ;;  %v3716_v51 = vsel %vm1258_vm8, %v3515_v57, %v3604_v5  ;;  %v12642_v5 = vld [vmem:[%s15671_s21 + $0x80] sm:$0xff]   ;;  %v12653_v57 = vld [vmem:[%s15671_s21 + $0x18] sm:$0xff]  }
 0x860   :  { %v3602_v48 = vpop.permute.xlu0 %3601 }
 0x861   :  { %v3696_v19 = vpop.permute.xlu1 %3695  ;;  %12082 = vmatpush3.bf16.msra.mxu0 %v12636_v13  ;;  %v3715_v22 = vsel %vm1258_vm8, %v3514_v49, %v3602_v48  ;;  %v12641_v13 = vld [vmem:[%s15671_s21] sm:$0xff]   ;;  %v12645_v48 = vld [vmem:[%s15671_s21 + $0x8] sm:$0xff]  }
 0x862   :  { %v10840_v61 = vcombine.low %v3715_v22, %v3716_v51  ;;  %v3738_v30 = vsel %vm1258_vm8, %v3562_v38, %v3696_v19  ;;  %11517 = vmatprep.subr.bf16.mxu0 %v12640_v46  ;;  %11496 = vmatpush3.bf16.msra.mxu1 %v12641_v13  ;;  %v12644_v19 = vld [vmem:[%s15671_s21 + $0xc8] sm:$0xff]   ;;  %v12649_v22 = vld [vmem:[%s15671_s21 + $0x10] sm:$0xff]   ;;  %v12655_v51 = vld [vmem:[%s15671_s21 + $0x60] sm:$0xff]  }
 0x863   :  { %v12646_v49 = vld [vmem:[%s15671_s21 + $0x88] sm:$0xff]   ;;  %11497 = vmatprep.subr.bf16.mxu1 %v12643_v7  ;;  %v12672_v38 = vld [vmem:[%s15671_s21 + $0x1c0] sm:$0xff]  }
 0x864   :  { %v3694_v55 = vpop.permute.xlu0 %3693  ;;  %v3842_v39 = vpack.c.bf16 %v10840_v61, %v10836_v63  ;;  %v12662_v61 = vld [vmem:[%s15671_s21 + $0xa8] sm:$0xff]   ;;  %v12670_v63 = vld [vmem:[%s15671_s21 + $0xb8] sm:$0xff]  }
 0x865   :  { %v3636_v59 = vpop.permute.xlu1 %3635  ;;  %v3737_v56 = vsel %vm1258_vm8, %v3561_v40, %v3694_v55  ;;  %v12659_v55 = vld [vmem:[%s15671_s21 + $0x68] sm:$0xff]   ;;  %v12668_v40 = vld [vmem:[%s15671_s21 + $0xf8] sm:$0xff]  }
 0x866   :  { %v3724_v32 = vsel %vm1258_vm8, %v3531_v0, %v3636_v59  ;;  %v10839_v6 = vcombine.low %v3737_v56, %v3738_v30  ;;  %11498 = vmatpush3.bf16.msra.mxu1 %v12645_v48  ;;  %v12657_v0 = vld [vmem:[%s15671_s21 + $0x20] sm:$0xff]  }
 0x867   :  { %v10841_v20 = vcombine.low %v3723_v18, %v3724_v32  ;;  %11499 = vmatprep.subr.bf16.mxu1 %v12647_v2  ;;  %v12658_v59 = vld [vmem:[%s15671_s21 + $0xa0] sm:$0xff]   ;;  %v12661_v18 = vld [vmem:[%s15671_s21 + $0x28] sm:$0xff]   ;;  %v12663_v32 = vld [vmem:[%s15671_s21 + $0x70] sm:$0xff]  }
 0x868   :  { %v3698_v27 = vpop.permute.xlu0 %3697  ;;  %v12671_v56 = vld [vmem:[%s15671_s21 + $0x140] sm:$0xff]  }
 0x869   :  { %v3664_v36 = vpop.permute.xlu1 %3663  ;;  %v3843_v53 = vpack.c.bf16 %v10841_v20, %v10837_v34  ;;  %v3739_v35 = vsel %vm1258_vm8, %v3563_v12, %v3698_v27  ;;  %v12666_v34 = vld [vmem:[%s15671_s21 + $0xb0] sm:$0xff]   ;;  %v12667_v20 = vld [vmem:[%s15671_s21 + $0x78] sm:$0xff]  }
 0x86a   :  { %v10843_v60 = vcombine.low %v3739_v35, %v3740_v62  ;;  %v3730_v8 = vsel %vm1258_vm8, %v3545_v4, %v3664_v36  ;;  %11500 = vmatpush3.bf16.msra.mxu1 %v12649_v22 }
 0x86b   :  { %4188 = vmatprep.mubr.bf16.mxu0 %v3843_v53  ;;  %v10838_v28 = vcombine.low %v3729_v44, %v3730_v8  ;;  %11501 = vmatprep.subr.bf16.mxu1 %v12651_v50 }
 0x86c   :  { %4189 = vmatmul.mubr.bf16.gmra.mrb[44].mxu0 %v3842_v39  ;;  %v3666_v42 = vpop.permute.xlu0 %3665  ;;  %v3845_v43 = vpack.c.bf16 %v10843_v60, %v10839_v6 }
 0x86d   :  { %v3668_v41 = vpop.permute.xlu1 %3667  ;;  %12083 = vmatprep.mubr.msk.bf16.mxu0 %vm1258_vm8, %v3841_v47  ;;  %v3731_v23 = vsel %vm1258_vm8, %v3546_v17, %v3666_v42 }
 0x86e   :  { %v3732_v11 = vsel %vm1258_vm8, %v3547_v9, %v3668_v41  ;;  %4237 = vmatprep.mubr.bf16.mxu1 %v3845_v43  ;;  %11502 = vmatpush3.bf16.msra.mxu1 %v12653_v57  ;;  %v13248_v57 = vmov 1983009808  }
 0x86f   :  { %v10842_v14 = vcombine.low %v3731_v23, %v3732_v11  ;;  %11503 = vmatprep.subr.bf16.mxu1 %v12655_v51  ;;  %v4431_v51 = vlaneseq }
 0x871   :  { %v3844_v10 = vpack.c.bf16 %v10842_v14, %v10838_v28 }
 0x872   :  { %11504 = vmatpush3.bf16.msra.mxu1 %v12657_v0 }
 0x873   :  { %4238 = vmatmul.mubr.bf16.gmra.mrb[44].mxu1 %v3844_v10  ;;  %11505 = vmatprep.subr.bf16.mxu1 %v12659_v55  ;;  %v4320_v55 = vld [vmem:[#allocation5] ss:$2 sm:$0x3] }
 0x874   :  { %12084 = vmatmul.mubr.msk.bf16.vlgmr.msra.gmra.mrb[48].mxu0 %vm1258_vm8, %v3846_v58 }
 0x875   :  { %11518 = vmatpush3.bf16.msra.mxu0 %v12642_v5 }
 0x876   :  { %11519 = vmatprep.subr.bf16.mxu0 %v12644_v19  ;;  %11506 = vmatpush3.bf16.msra.mxu1 %v12661_v18 }
 0x877   :  { %11507 = vmatprep.subr.bf16.mxu1 %v12663_v32 }
 0x879   :  { %11520 = vmatpush3.bf16.msra.mxu0 %v12646_v49 }
 0x87a   :  { %11521 = vmatprep.subr.bf16.mxu0 %v12648_v16  ;;  %11508 = vmatpush3.bf16.msra.mxu1 %v12665_v15 }
 0x87b   :  { %11509 = vmatprep.subr.bf16.mxu1 %v12667_v20  ;;  %v4332_v20 = vld [vmem:[#allocation5 + $0x31] ss:$2 sm:$0x3] }
 0x87d   :  { %11522 = vmatpush3.bf16.msra.mxu0 %v12650_v52 }
 0x87e   :  { %11523 = vmatprep.subr.bf16.mxu0 %v12652_v54  ;;  %11510 = vmatpush3.bf16.msra.mxu1 %v12669_v3  ;;  %v4336_v3 = vld [vmem:[#allocation5 + $0x2] ss:$2 sm:$0x3] }
 0x87f   :  { %11539 = vmatprep.subr.bf16.mxu1 %v12671_v56 }
 0x881   :  { %11524 = vmatpush3.bf16.msra.mxu0 %v12654_v37  ;;  %v4429_v37 = vunpack.c.l.s4 %v13248_v57 }
 0x882   :  { %11525 = vmatprep.subr.bf16.mxu0 %v12656_v33 }
 0x883   :  { %v4430_v32 = vunpack.c.0.s8 %v4429_v37 }
 0x885   :  { %11526 = vmatpush3.bf16.msra.mxu0 %v12658_v59 }
 0x886   :  { %11527 = vmatprep.subr.bf16.mxu0 %v12660_v26 }
 0x889   :  { %11528 = vmatpush3.bf16.msra.mxu0 %v12662_v61  ;;  %v4328_v61 = vld [vmem:[#allocation5 + $0x1] ss:$2 sm:$0x3] }
 0x88a   :  { %11529 = vmatprep.subr.bf16.mxu0 %v12664_v1  ;;  %v14855_v1 = vshrl.u32 %v4431_v51, 7 }
 0x88c   :  { %v14858_v56 = vsub.s32 %v4430_v32, %v14855_v1 }
 0x88d   :  { %11530 = vmatpush3.bf16.msra.mxu0 %v12666_v34  ;;  %v4324_v34 = vld [vmem:[#allocation5 + $0x30] ss:$2 sm:$0x3] }
 0x88e   :  { %11531 = vmatprep.subr.bf16.mxu0 %v12668_v40  ;;  %v4426_v40 = vcombine.low %v4320_v55, %v4328_v61 }
 0x891   :  { %11532 = vmatpush3.bf16.msra.mxu0 %v12670_v63 }
 0x892   :  { %11561 = vmatprep.subr.bf16.mxu0 %v12672_v38  ;;  %v4340_v38 = vld [vmem:[#allocation5 + $0x32] ss:$2 sm:$0x3] }
 0x927   :  { %v11449_v36 = vpop.f32.mrb[40].mxu0 }
 0x928   :  { %v11450_v12 = vpop.f32.mrb[41].mxu0 }
 0x929   :  { %v11451_v27 = vadd.f32 %v11450_v12, %v11449_v36  ;;  %v11452_v53 = vpop.f32.mrb[42].mxu0 }
 0x92a   :  { %v11453_v62 = vpop.f32.mrb[43].mxu0  ;;  %v11477_v35 = vpop.f32.mrb[40].mxu1 }
 0x92b   :  { %v11454_v30 = vadd.f32 %v11453_v62, %v11452_v53  ;;  %v11478_v39 = vpop.f32.mrb[41].mxu1  ;;  %v4183_v6 = vadd.f32 %v11451_v27, %v10844_v29  ;;  %v4508_v27 = vcombine.low %v4324_v34, %v4332_v20 }
 0x92c   :  { %v11479_v4 = vadd.f32 %v11478_v39, %v11477_v35  ;;  %v11480_v60 = vpop.f32.mrb[42].mxu1 }
 0x92d   :  { %v11481_v47 = vpop.f32.mrb[43].mxu1  ;;  %v4186_v8 = vadd.f32 %v11454_v30, %v10844_v29  ;;  %v4434_v30 = vrot.slane %v4426_v40, %v14858_v56 }
 0x92e   :  { %v11482_v45 = vadd.f32 %v11481_v47, %v11480_v60  ;;  %v4232_v9 = vadd.f32 %v11479_v4, %v4183_v6 }
 0x930   :  { %v4235_v41 = vadd.f32 %v11482_v45, %v4186_v8 }
 0x93f   :  { %v11455_v17 = vpop.f32.mrb[44].mxu0 }
 0x940   :  { %v11456_v42 = vpop.f32.mrb[45].mxu0 }
 0x941   :  { %v11457_v43 = vadd.f32 %v11456_v42, %v11455_v17  ;;  %v11458_v44 = vpop.f32.mrb[46].mxu0  ;;  %v4516_v17 = vrot.slane %v4508_v27, %v14858_v56 }
 0x942   :  { %v11459_v11 = vpop.f32.mrb[47].mxu0 }
 0x943   :  { %v11460_v23 = vadd.f32 %v11459_v11, %v11458_v44  ;;  %v4191_v21 = vadd.f32 %v11457_v43, %v10844_v29 }
 0x945   :  { %v4194_v7 = vadd.f32 %v11460_v23, %v10844_v29 }
 0x946   :  { %v11483_v24 = vpop.f32.mrb[44].mxu1 }
 0x947   :  { %v11484_v28 = vpop.f32.mrb[45].mxu1  ;;  %v12085_v14 = vpop.f32.mrb[48].mxu0 }
 0x948   :  { %v11485_v10 = vadd.f32 %v11484_v28, %v11483_v24  ;;  %v11486_v58 = vpop.f32.mrb[46].mxu1  ;;  %v4280_v25 = vpop.f32.mrb[49].mxu0 }
 0x949   :  { %v4281_v46 = vadd.f32 %v4280_v25, %v4232_v9  ;;  %v11487_v13 = vpop.f32.mrb[47].mxu1  ;;  %v12086_v5 = vpop.f32.mrb[50].mxu0 }
 0x94a   :  { %v4240_v19 = vadd.f32 %v11485_v10, %v4191_v21  ;;  %v11488_v48 = vadd.f32 %v11487_v13, %v11486_v58  ;;  %v4283_v49 = vpop.f32.mrb[51].mxu0 }
 0x94b   :  { %v4295_v2 = vmax.f32 %v4281_v46, 0.0  ;;  %v4284_v16 = vadd.f32 %v4283_v49, %v4235_v41 }
 0x94c   :  { %v4289_v22 = vadd.f32 %v12085_v14, %v4240_v19  ;;  %v4243_v52 = vadd.f32 %v11488_v48, %v4194_v7 }
 0x94d   :  { %v4303_v50 = vcombine.high %v4295_v2, %v4295_v2  ;;  %4312 = vst [vmem:[#allocation5 + $0x9] sm:$0xf] %v4295_v2  ;;  %v4296_v54 = vmax.f32 %v4284_v16, 0.0 }
 0x94e   :  { %v4297_v33 = vmax.f32 %v4289_v22, 0.0  ;;  %v4292_v0 = vadd.f32 %v12086_v5, %v4243_v52 }
 0x94f   :  { %4313 = vst [vmem:[#allocation5 + $0x11] sm:$0xf] %v4303_v50  ;;  %v4304_v59 = vcombine.high %v4296_v54, %v4296_v54  ;;  %4314 = vst [vmem:[#allocation5 + $0x19] sm:$0xf] %v4296_v54 }
 0x950   :  { %v4305_v26 = vcombine.high %v4297_v33, %v4297_v33  ;;  %4316 = vst [vmem:[#allocation5 + $0x39] sm:$0xf] %v4297_v33  ;;  %v4298_v18 = vmax.f32 %v4292_v0, 0.0 }
 0x951   :  { %4315 = vst [vmem:[#allocation5 + $0x21] sm:$0xf] %v4304_v59 }
 0x952   :  { %4317 = vst [vmem:[#allocation5 + $0x41] sm:$0xf] %v4305_v26  ;;  %v4306_v15 = vcombine.high %v4298_v18, %v4298_v18  ;;  %4318 = vst [vmem:[#allocation5 + $0x49] sm:$0xf] %v4298_v18 }
 0x954   :  { %4319 = vst [vmem:[#allocation5 + $0x51] sm:$0xf] %v4306_v15  ;;  %v4343_v63 = vld [vmem:[#allocation5 + $0x8] ss:$2 sm:$0x3] }
 0x955   :  { %v4427_v53 = vcombine.low %v4336_v3, %v4343_v63  ;;  %v4351_v29 = vld [vmem:[#allocation5 + $0x9] ss:$2 sm:$0x3]  ;;  %v4359_v62 = vld [vmem:[#allocation5 + $0xa] ss:$2 sm:$0x3] }
 0x956   :  { %v4322_v36 = vld [vmem:[#allocation5 + $0x10] ss:$2 sm:$0x3]  ;;  %v4330_v12 = vld [vmem:[#allocation5 + $0x11] ss:$2 sm:$0x3]  ;;  %v4443_v10 = vcombine.low %v4351_v29, %v4359_v62 }
 0x957   :  { %v4467_v35 = vcombine.low %v4322_v36, %v4330_v12  ;;  %v4338_v39 = vld [vmem:[#allocation5 + $0x12] ss:$2 sm:$0x3]  ;;  %v4345_v6 = vld [vmem:[#allocation5 + $0x18] ss:$2 sm:$0x3]  ;;  %v4441_v11 = vrot.slane %v4427_v53, %v14858_v56 }
 0x958   :  { %v4347_v4 = vld [vmem:[#allocation5 + $0x38] ss:$2 sm:$0x3]  ;;  %v4468_v60 = vcombine.low %v4338_v39, %v4345_v6  ;;  %v4353_v47 = vld [vmem:[#allocation5 + $0x19] ss:$2 sm:$0x3]  ;;  %v4451_v57 = vrot.slane %v4443_v10, %v14858_v56 }
 0x959   :  { %v4326_v8 = vld [vmem:[#allocation5 + $0x40] ss:$2 sm:$0x3]  ;;  %v4334_v45 = vld [vmem:[#allocation5 + $0x41] ss:$2 sm:$0x3]  ;;  %v4475_v9 = vrot.slane %v4467_v35, %v14858_v56  ;;  %v4509_v41 = vcombine.low %v4340_v38, %v4347_v4 }
 0x95a   :  { %v4549_v42 = vcombine.low %v4326_v8, %v4334_v45  ;;  %v4342_v43 = vld [vmem:[#allocation5 + $0x42] ss:$2 sm:$0x3]  ;;  %v4349_v44 = vld [vmem:[#allocation5 + $0x48] ss:$2 sm:$0x3]  ;;  %v4482_v23 = vrot.slane %v4468_v60, %v14858_v56 }
 0x95b   :  { %v10883_v24 = vcombine.low %v4434_v30, %v4475_v9  ;;  %v4550_v28 = vcombine.low %v4342_v43, %v4349_v44  ;;  %v4355_v14 = vld [vmem:[#allocation5 + $0x39] ss:$2 sm:$0x3]  ;;  %v4357_v21 = vld [vmem:[#allocation5 + $0x49] ss:$2 sm:$0x3]  ;;  %v4523_v5 = vrot.slane %v4509_v41, %v14858_v56 }
 0x95c   :  { %v4557_v58 = vrot.slane %v4549_v42, %v14858_v56  ;;  %v10884_v25 = vcombine.low %v4441_v11, %v4482_v23  ;;  %v4361_v46 = vld [vmem:[#allocation5 + $0x1a] ss:$2 sm:$0x3]  ;;  %v4365_v19 = vld [vmem:[#allocation5 + $0x4a] ss:$2 sm:$0x3] }
 0x95d   :  { %v4363_v13 = vld [vmem:[#allocation5 + $0x3a] ss:$2 sm:$0x3]  ;;  %v4564_v7 = vrot.slane %v4550_v28, %v14858_v56  ;;  %v4484_v48 = vcombine.low %v4353_v47, %v4361_v46  ;;  %v4566_v16 = vcombine.low %v4357_v21, %v4365_v19  ;;  %v4367_v22 = vld [vmem:[#allocation5 + $0x10] ss:$2 sm:$0x3]  ;;  %v4600_v50 = vrot.slane %v10883_v24, %v14858_v56 }
 0x95e   :  { %v4525_v49 = vcombine.low %v4355_v14, %v4363_v13  ;;  %v10885_v2 = vcombine.low %v4516_v17, %v4557_v58  ;;  %v4369_v52 = vld [vmem:[#allocation5 + $0x20] ss:$2 sm:$0x3]  ;;  %v4375_v33 = vld [vmem:[#allocation5 + $0x11] ss:$2 sm:$0x3]  ;;  %v4607_v59 = vrot.slane %v10884_v25, %v14858_v56 }
 0x95f   :  { %v10886_v54 = vcombine.low %v4523_v5, %v4564_v7  ;;  %v4492_v37 = vrot.slane %v4484_v48, %v14858_v56  ;;  %v4371_v51 = vld [vmem:[#allocation5 + $0x40] ss:$2 sm:$0x3]  ;;  %v4574_v26 = vrot.slane %v4566_v16, %v14858_v56  ;;  %v4377_v18 = vld [vmem:[#allocation5 + $0x21] ss:$2 sm:$0x3]  ;;  %v4444_v34 = vcombine.low %v4367_v22, %v4375_v33 }
 0x960   :  { %v4614_v0 = vrot.slane %v10885_v2, %v14858_v56  ;;  %v4533_v55 = vrot.slane %v4525_v49, %v14858_v56  ;;  %v4379_v61 = vld [vmem:[#allocation5 + $0x41] ss:$2 sm:$0x3]  ;;  %v4485_v20 = vcombine.low %v4369_v52, %v4377_v18  ;;  %v4373_v38 = vld [vmem:[#allocation5 + $0x50] ss:$2 sm:$0x3] }
 0x961   :  { %v4621_v32 = vrot.slane %v10886_v54, %v14858_v56  ;;  %v10887_v15 = vcombine.low %v4451_v57, %v4492_v37  ;;  %v4381_v36 = vld [vmem:[#allocation5 + $0x51] ss:$2 sm:$0x3]  ;;  %v12673_v53 = vld [vmem:[%s15671_s21 + $0x100] sm:$0xff]   ;;  %v4526_v62 = vcombine.low %v4371_v51, %v4379_v61  ;;  %v12675_v60 = vld [vmem:[%s15671_s21 + $0x148] sm:$0xff]   ;;  %v4458_v45 = vrot.slane %v4444_v34, %v14858_v56 }
 0x962   :  { %v4622_v40 = vcombine.low %v4600_v50, %v4614_v0  ;;  %v4623_v3 = vcombine.high %v4600_v50, %v4614_v0  ;;  %v10889_v63 = vcombine.low %v4533_v55, %v4574_v26  ;;  %v4499_v29 = vrot.slane %v4485_v20, %v14858_v56  ;;  %v12674_v39 = vld [vmem:[%s15671_s21 + $0x180] sm:$0xff]   ;;  %v12676_v17 = vld [vmem:[%s15671_s21 + $0x1c8] sm:$0xff]   ;;  %v12679_v14 = vld [vmem:[%s15671_s21 + $0x150] sm:$0xff]  }
 0x963   :  { %v4625_v12 = vcombine.high %v4607_v59, %v4621_v32  ;;  %v4624_v27 = vcombine.low %v4607_v59, %v4621_v32  ;;  %v14880_v6 = vrot.slane %v10887_v15, %v14858_v56  ;;  %v4567_v9 = vcombine.low %v4373_v38, %v4381_v36  ;;  %v12677_v11 = vld [vmem:[%s15671_s21 + $0x108] sm:$0xff]   ;;  %v12680_v21 = vld [vmem:[%s15671_s21 + $0x1d0] sm:$0xff]   ;;  %v12683_v5 = vld [vmem:[%s15671_s21 + $0x158] sm:$0xff]  }
 0x964   :  { %v4688_v30 = vpack.c.bf16 %v4622_v40, %v4622_v40  ;;  %v4689_v35 = vpack.c.bf16 %v4623_v3, %v4623_v3  ;;  %v14883_v4 = vrot.slane %v10889_v63, %v14858_v56  ;;  %v4540_v42 = vrot.slane %v4526_v62, %v14858_v56  ;;  %v12678_v24 = vld [vmem:[%s15671_s21 + $0x188] sm:$0xff]   ;;  %v12681_v25 = vld [vmem:[%s15671_s21 + $0x110] sm:$0xff]   ;;  %v12684_v7 = vld [vmem:[%s15671_s21 + $0x1d8] sm:$0xff]  }
 0x965   :  { %v4691_v47 = vpack.c.bf16 %v4625_v12, %v4625_v12  ;;  %v4690_v8 = vpack.c.bf16 %v4624_v27, %v4624_v27  ;;  %v4581_v43 = vrot.slane %v4567_v9, %v14858_v56  ;;  %v10888_v44 = vcombine.low %v4458_v45, %v4499_v29  ;;  %v12682_v46 = vld [vmem:[%s15671_s21 + $0x190] sm:$0xff]   ;;  %v12685_v48 = vld [vmem:[%s15671_s21 + $0x118] sm:$0xff]   ;;  %v12687_v2 = vld [vmem:[%s15671_s21 + $0x160] sm:$0xff]  }
 0x966   :  { %5312 = vmatprep.mubr.bf16.mxu1 %v4689_v35  ;;  %v4659_v41 = vcombine.high %v14880_v6, %v14883_v4  ;;  %v12686_v49 = vld [vmem:[%s15671_s21 + $0x198] sm:$0xff]   ;;  %v12688_v16 = vld [vmem:[%s15671_s21 + $0x1e0] sm:$0xff]   ;;  %v12691_v50 = vld [vmem:[%s15671_s21 + $0x168] sm:$0xff]   ;;  %v4658_v32 = vcombine.low %v14880_v6, %v14883_v4 }
 0x967   :  { %5352 = vmatprep.mubr.bf16.mxu0 %v4691_v47  ;;  %5313 = vmatmul.mubr.bf16.vlgmr.msra.gmra.mrb[48].mxu1 %v4688_v30  ;;  %v10890_v28 = vcombine.low %v4540_v42, %v4581_v43  ;;  %v4643_v10 = vrot.slane %v10888_v44, %v14858_v56  ;;  %v12689_v22 = vld [vmem:[%s15671_s21 + $0x120] sm:$0xff]   ;;  %v12692_v54 = vld [vmem:[%s15671_s21 + $0x1e8] sm:$0xff]   ;;  %v12695_v51 = vld [vmem:[%s15671_s21 + $0x170] sm:$0xff]  }
 0x968   :  { %5353 = vmatmul.mubr.bf16.vlgmr.msra.gmra.mrb[52].mxu0 %v4690_v8  ;;  %11540 = vmatpush3.bf16.msra.mxu1 %v12673_v53  ;;  %v4693_v23 = vpack.c.bf16 %v4659_v41, %v4659_v41  ;;  %v12690_v52 = vld [vmem:[%s15671_s21 + $0x1a0] sm:$0xff]   ;;  %v12693_v57 = vld [vmem:[%s15671_s21 + $0x128] sm:$0xff]   ;;  %v12696_v33 = vld [vmem:[%s15671_s21 + $0x1f0] sm:$0xff]   ;;  %v4692_v20 = vpack.c.bf16 %v4658_v32, %v4658_v32 }
 0x969   :  { %11562 = vmatpush3.bf16.msra.mxu0 %v12674_v39  ;;  %11541 = vmatprep.subr.bf16.mxu1 %v12675_v60  ;;  %v4657_v58 = vrot.slane %v10890_v28, %v14858_v56  ;;  %v12694_v37 = vld [vmem:[%s15671_s21 + $0x1a8] sm:$0xff]   ;;  %v12697_v0 = vld [vmem:[%s15671_s21 + $0x130] sm:$0xff]   ;;  %v12699_v55 = vld [vmem:[%s15671_s21 + $0x178] sm:$0xff]  }
 0x96a   :  { %5392 = vmatprep.mubr.bf16.mxu1 %v4693_v23  ;;  %11563 = vmatprep.subr.bf16.mxu0 %v12676_v17  ;;  %v12698_v59 = vld [vmem:[%s15671_s21 + $0x1b0] sm:$0xff]   ;;  %v12700_v26 = vld [vmem:[%s15671_s21 + $0x1f8] sm:$0xff]   ;;  %v12703_v34 = vld [vmem:[%s15671_s21 + $0x200] sm:$0xff]  }
 0x96b   :  { %v4661_v13 = vcombine.high %v4643_v10, %v4657_v58  ;;  %v12701_v18 = vld [vmem:[%s15671_s21 + $0x138] sm:$0xff]   ;;  %v4660_v15 = vcombine.low %v4643_v10, %v4657_v58  ;;  %v12704_v3 = vld [vmem:[%s15671_s21 + $0x208] sm:$0xff]   ;;  %v12705_v63 = vld [vmem:[%s15671_s21 + $0x210] sm:$0xff]  }
 0x96c   :  { %11542 = vmatpush3.bf16.msra.mxu1 %v12677_v11  ;;  %v12702_v61 = vld [vmem:[%s15671_s21 + $0x1b8] sm:$0xff]   ;;  %v4389_v36 = vld [vmem:[#allocation5 + $0x52] ss:$2 sm:$0x3]  ;;  %v12707_v12 = vld [vmem:[%s15671_s21 + $0x220] sm:$0xff]  }
 0x96d   :  { %11564 = vmatpush3.bf16.msra.mxu0 %v12678_v24  ;;  %11543 = vmatprep.subr.bf16.mxu1 %v12679_v14  ;;  %v4695_v19 = vpack.c.bf16 %v4661_v13, %v4661_v13  ;;  %v4694_v40 = vpack.c.bf16 %v4660_v15, %v4660_v15  ;;  %v12706_v38 = vld [vmem:[%s15671_s21 + $0x218] sm:$0xff]   ;;  %v4385_v27 = vld [vmem:[#allocation5 + $0x22] ss:$2 sm:$0x3]  ;;  %v4589_v29 = vrot.slane %v4389_v36, %v14858_v56  ;;  %v12708_v39 = vld [vmem:[%s15671_s21 + $0x228] sm:$0xff]  }
 0x96e   :  { %11565 = vmatprep.subr.bf16.mxu0 %v12680_v21  ;;  %v4387_v53 = vld [vmem:[#allocation5 + $0x42] ss:$2 sm:$0x3]  ;;  %v4383_v62 = vld [vmem:[#allocation5 + $0x12] ss:$2 sm:$0x3]  ;;  %v4507_v30 = vrot.slane %v4385_v27, %v14858_v56 }
 0x96f   :  { %5432 = vmatprep.mubr.bf16.mxu0 %v4695_v19  ;;  %v4548_v35 = vrot.slane %v4387_v53, %v14858_v56  ;;  %v4466_v6 = vrot.slane %v4383_v62, %v14858_v56  ;;  %v12709_v47 = vld [vmem:[%s15671_s21 + $0x230] sm:$0xff]   ;;  %v12710_v9 = vld [vmem:[%s15671_s21 + $0x238] sm:$0xff]   ;;  %v12711_v42 = vld [vmem:[%s15673_s29 + $0x40] sm:$0xff]  }
 0x970   :  { %11544 = vmatpush3.bf16.msra.mxu1 %v12681_v25  ;;  %v12712_v43 = vld [vmem:[%s15673_s29] sm:$0xff]   ;;  %v12713_v44 = vld [vmem:[%s15673_s29 + $0x48] sm:$0xff]   ;;  %v12717_v28 = vld [vmem:[%s15673_s29 + $0x50] sm:$0xff]  }
 0x971   :  { %11566 = vmatpush3.bf16.msra.mxu0 %v12682_v46  ;;  %11545 = vmatprep.subr.bf16.mxu1 %v12683_v5  ;;  %v4663_v4 = vcombine.low %v4548_v35, %v4589_v29  ;;  %v4662_v60 = vcombine.low %v4466_v6, %v4507_v30  ;;  %v12714_v11 = vld [vmem:[%s15673_s29 + $0xc0] sm:$0xff]   ;;  %v12715_v23 = vld [vmem:[%s15673_s29 + $0x8] sm:$0xff]   ;;  %v12719_v21 = vld [vmem:[%s15673_s29 + $0x10] sm:$0xff]  }
 0x972   :  { %11567 = vmatprep.subr.bf16.mxu0 %v12684_v7  ;;  %v12716_v24 = vld [vmem:[%s15673_s29 + $0x80] sm:$0xff]   ;;  %v12718_v14 = vld [vmem:[%s15673_s29 + $0xc8] sm:$0xff]   ;;  %v12721_v58 = vld [vmem:[%s15673_s29 + $0x58] sm:$0xff]  }
 0x973   :  { %v4677_v8 = vrot.slane %v4663_v4, %v14858_v56  ;;  %v4670_v45 = vrot.slane %v4662_v60, %v14858_v56  ;;  %v12720_v10 = vld [vmem:[%s15673_s29 + $0x88] sm:$0xff]   ;;  %v12722_v25 = vld [vmem:[%s15673_s29 + $0xd0] sm:$0xff]   ;;  %v12723_v46 = vld [vmem:[%s15673_s29 + $0x18] sm:$0xff]  }
 0x974   :  { %11546 = vmatpush3.bf16.msra.mxu1 %v12685_v48  ;;  %v12724_v13 = vld [vmem:[%s15673_s29 + $0x90] sm:$0xff]   ;;  %v12725_v5 = vld [vmem:[%s15673_s29 + $0x60] sm:$0xff]   ;;  %v12726_v7 = vld [vmem:[%s15673_s29 + $0xd8] sm:$0xff]  }
 0x975   :  { %11568 = vmatpush3.bf16.msra.mxu0 %v12686_v49  ;;  %11547 = vmatprep.subr.bf16.mxu1 %v12687_v2  ;;  %v4678_v41 = vcombine.low %v4670_v45, %v4677_v8  ;;  %v12727_v19 = vld [vmem:[%s15673_s29 + $0x20] sm:$0xff]   ;;  %v12728_v48 = vld [vmem:[%s15673_s29 + $0x98] sm:$0xff]   ;;  %v12729_v49 = vld [vmem:[%s15673_s29 + $0x68] sm:$0xff]  }
 0x976   :  { %11569 = vmatprep.subr.bf16.mxu0 %v12688_v16  ;;  %v12730_v2 = vld [vmem:[%s15673_s29 + $0xe0] sm:$0xff]   ;;  %v12731_v16 = vld [vmem:[%s15673_s29 + $0x28] sm:$0xff]  }
 0x977   :  { %v4696_v17 = vpack.c.bf16 %v4678_v41, %v4678_v41  ;;  %v10891_v15 = vld [vmem:[%s15674_s3] ss:$0 sm:$0xff] }
 0x978   :  { %11548 = vmatpush3.bf16.msra.mxu1 %v12689_v22  ;;  %v12732_v22 = vld [vmem:[%s15673_s29 + $0xa0] sm:$0xff]  }
 0x979   :  { %11570 = vmatpush3.bf16.msra.mxu0 %v12690_v52  ;;  %11549 = vmatprep.subr.bf16.mxu1 %v12691_v50  ;;  %v12733_v52 = vld [vmem:[%s15673_s29 + $0x70] sm:$0xff]   ;;  %v12734_v50 = vld [vmem:[%s15673_s29 + $0xe8] sm:$0xff]  }
 0x97a   :  { %11571 = vmatprep.subr.bf16.mxu0 %v12692_v54  ;;  %v12735_v54 = vld [vmem:[%s15673_s29 + $0x30] sm:$0xff]  }
 0x97c   :  { %11550 = vmatpush3.bf16.msra.mxu1 %v12693_v57  ;;  %v12736_v57 = vld [vmem:[%s15673_s29 + $0xa8] sm:$0xff]  }
 0x97d   :  { %11572 = vmatpush3.bf16.msra.mxu0 %v12694_v37  ;;  %11551 = vmatprep.subr.bf16.mxu1 %v12695_v51  ;;  %v12737_v37 = vld [vmem:[%s15673_s29 + $0x78] sm:$0xff]   ;;  %v12738_v51 = vld [vmem:[%s15673_s29 + $0xf0] sm:$0xff]  }
 0x97e   :  { %11573 = vmatprep.subr.bf16.mxu0 %v12696_v33  ;;  %v12739_v33 = vld [vmem:[%s15673_s29 + $0x38] sm:$0xff]  }
 0x980   :  { %11552 = vmatpush3.bf16.msra.mxu1 %v12697_v0  ;;  %v12740_v0 = vld [vmem:[%s15673_s29 + $0xb0] sm:$0xff]  }
 0x981   :  { %11574 = vmatpush3.bf16.msra.mxu0 %v12698_v59  ;;  %11553 = vmatprep.subr.bf16.mxu1 %v12699_v55  ;;  %v12741_v59 = vld [vmem:[%s15673_s29 + $0xf8] sm:$0xff]   ;;  %v12742_v55 = vld [vmem:[%s15673_s29 + $0x140] sm:$0xff]  }
 0x982   :  { %11575 = vmatprep.subr.bf16.mxu0 %v12700_v26  ;;  %v12743_v26 = vld [vmem:[%s15673_s29 + $0xb8] sm:$0xff]  }
 0x984   :  { %11554 = vmatpush3.bf16.msra.mxu1 %v12701_v18  ;;  %v12746_v18 = vld [vmem:[%s15673_s29 + $0x1c0] sm:$0xff]  }
 0x985   :  { %11576 = vmatpush3.bf16.msra.mxu0 %v12702_v61  ;;  %12087 = vmatprep.subr.bf16.mxu1 %v13240_v31 }
 0x986   :  { %11592 = vmatprep.subr.bf16.mxu0 %v12711_v42 }
 0x987   :  { %5393 = vmatmul.mubr.bf16.vlgmr.msra.gmra.mrb[52].mxu1 %v4692_v20 }
 0x988   :  { %5433 = vmatmul.mubr.bf16.vlgmr.msra.gmra.mrb[56].mxu0 %v4694_v40  ;;  %12088 = vmatpush3.bf16.msra.mxu1 %v12703_v34 }
 0x989   :  { %12089 = vmatprep.subr.bf16.mxu1 %v13240_v31  ;;  %12103 = vmatprep.mubr.msk.bf16.mxu1 %vm13249_vm2, %v13240_v31 }
 0x98a   :  { %11593 = vmatpush3.bf16.msra.mxu0 %v12712_v43 }
 0x98b   :  { %11594 = vmatprep.subr.bf16.mxu0 %v12713_v44 }
 0x98c   :  { %12090 = vmatpush3.bf16.msra.mxu1 %v12704_v3 }
 0x98d   :  { %12091 = vmatprep.subr.bf16.mxu1 %v13240_v31 }
 0x98e   :  { %11595 = vmatpush3.bf16.msra.mxu0 %v12715_v23 }
 0x98f   :  { %11596 = vmatprep.subr.bf16.mxu0 %v12717_v28  ;;  %v5508_v28 = vld [vmem:[#allocation6] sm:$0x3] }
 0x990   :  { %12092 = vmatpush3.bf16.msra.mxu1 %v12705_v63 }
 0x991   :  { %12093 = vmatprep.subr.bf16.mxu1 %v13240_v31 }
 0x992   :  { %11597 = vmatpush3.bf16.msra.mxu0 %v12719_v21 }
 0x993   :  { %11598 = vmatprep.subr.bf16.mxu0 %v12721_v58  ;;  %v5510_v58 = vld [vmem:[#allocation6 + $0x10] sm:$0x3] }
 0x994   :  { %12094 = vmatpush3.bf16.msra.mxu1 %v12706_v38 }
 0x995   :  { %12095 = vmatprep.subr.bf16.mxu1 %v13240_v31 }
 0x996   :  { %11599 = vmatpush3.bf16.msra.mxu0 %v12723_v46  ;;  %v5534_v46 = vld [vmem:[#allocation6 + $0xc] sm:$0x3] }
 0x997   :  { %11600 = vmatprep.subr.bf16.mxu0 %v12725_v5 }
 0x998   :  { %12096 = vmatpush3.bf16.msra.mxu1 %v12707_v12 }
 0x999   :  { %12097 = vmatprep.subr.bf16.mxu1 %v13240_v31 }
 0x99a   :  { %11601 = vmatpush3.bf16.msra.mxu0 %v12727_v19  ;;  %v5538_v19 = vld [vmem:[#allocation6 + $0xd] sm:$0x3] }
 0x99b   :  { %11602 = vmatprep.subr.bf16.mxu0 %v12729_v49 }
 0x99c   :  { %12098 = vmatpush3.bf16.msra.mxu1 %v12708_v39 }
 0x99d   :  { %12099 = vmatprep.subr.bf16.mxu1 %v13240_v31 }
 0x99e   :  { %11603 = vmatpush3.bf16.msra.mxu0 %v12731_v16 }
 0x99f   :  { %11604 = vmatprep.subr.bf16.mxu0 %v12733_v52  ;;  %v5518_v52 = vld [vmem:[#allocation6 + $0x12] sm:$0x3] }
 0x9a0   :  { %12100 = vmatpush3.bf16.msra.mxu1 %v12709_v47 }
 0x9a1   :  { %12101 = vmatprep.subr.bf16.mxu1 %v13240_v31 }
 0x9a2   :  { %11605 = vmatpush3.bf16.msra.mxu0 %v12735_v54 }
 0x9a3   :  { %11606 = vmatprep.subr.bf16.mxu0 %v12737_v37 }
 0x9a4   :  { %12102 = vmatpush3.bf16.msra.mxu1 %v12710_v9 }
 0x9a5   :  { %11614 = vmatprep.subr.bf16.mxu1 %v12714_v11 }
 0x9a6   :  { %11607 = vmatpush3.bf16.msra.mxu0 %v12739_v33 }
 0x9a7   :  { %12104 = vmatmul.mubr.bf16.vlgmr.msra.gmra.mrb[56].mxu1 %v4696_v17  ;;  %11636 = vmatprep.subr.bf16.mxu0 %v12742_v55 }
 0x9a8   :  { %11615 = vmatpush3.bf16.msra.mxu1 %v12716_v24 }
 0x9a9   :  { %11616 = vmatprep.subr.bf16.mxu1 %v12718_v14  ;;  %v5512_v14 = vld [vmem:[#allocation6 + $0x1] sm:$0x3] }
 0x9aa   :  { %v5581_v5 = vcombine.low %v5508_v28, %v5512_v14 }
 0x9ac   :  { %11617 = vmatpush3.bf16.msra.mxu1 %v12720_v10 }
 0x9ad   :  { %11618 = vmatprep.subr.bf16.mxu1 %v12722_v25  ;;  %v5514_v25 = vld [vmem:[#allocation6 + $0x11] sm:$0x3] }
 0x9ae   :  { %v5663_v49 = vcombine.low %v5510_v58, %v5514_v25 }
 0x9b0   :  { %11619 = vmatpush3.bf16.msra.mxu1 %v12724_v13 }
 0x9b1   :  { %11620 = vmatprep.subr.bf16.mxu1 %v12726_v7  ;;  %v5536_v7 = vld [vmem:[#allocation6 + $0x1c] sm:$0x3] }
 0x9b4   :  { %11621 = vmatpush3.bf16.msra.mxu1 %v12728_v48  ;;  %v5540_v48 = vld [vmem:[#allocation6 + $0x1d] sm:$0x3] }
 0x9b5   :  { %11622 = vmatprep.subr.bf16.mxu1 %v12730_v2  ;;  %v5516_v2 = vld [vmem:[#allocation6 + $0x2] sm:$0x3]  ;;  %v5722_v54 = vcombine.low %v5536_v7, %v5540_v48 }
 0x9b8   :  { %11623 = vmatpush3.bf16.msra.mxu1 %v12732_v22 }
 0x9b9   :  { %11624 = vmatprep.subr.bf16.mxu1 %v12734_v50  ;;  %v5640_v50 = vcombine.low %v5534_v46, %v5538_v19 }
 0x9bc   :  { %11625 = vmatpush3.bf16.msra.mxu1 %v12736_v57  ;;  %v5589_v57 = vrot.slane %v5581_v5, %v14858_v56 }
 0x9bd   :  { %11626 = vmatprep.subr.bf16.mxu1 %v12738_v51 }
 0x9c0   :  { %11627 = vmatpush3.bf16.msra.mxu1 %v12740_v0 }
 0x9c1   :  { %11628 = vmatprep.subr.bf16.mxu1 %v12741_v59 }
 0x9c4   :  { %11629 = vmatpush3.bf16.msra.mxu1 %v12743_v26 }
 0x9c5   :  { %11658 = vmatprep.subr.bf16.mxu1 %v12746_v18 }
 0xa3a   :  { %v11511_v61 = vpop.f32.mrb[48].mxu1 }
 0xa3b   :  { %v11533_v32 = vpop.f32.mrb[52].mxu0  ;;  %v11512_v34 = vpop.f32.mrb[49].mxu1 }
 0xa3c   :  { %v11513_v20 = vadd.f32 %v11512_v34, %v11511_v61  ;;  %v11534_v40 = vpop.f32.mrb[53].mxu0  ;;  %v11514_v3 = vpop.f32.mrb[50].mxu1 }
 0xa3d   :  { %v11535_v63 = vadd.f32 %v11534_v40, %v11533_v32  ;;  %v11536_v38 = vpop.f32.mrb[54].mxu0  ;;  %v11515_v36 = vpop.f32.mrb[51].mxu1 }
 0xa3e   :  { %v5315_v12 = vadd.f32 %v11513_v20, %v10891_v15  ;;  %v11537_v27 = vpop.f32.mrb[55].mxu0  ;;  %v5671_v15 = vrot.slane %v5663_v49, %v14858_v56 }
 0xa40   :  { %v5355_v53 = vadd.f32 %v11535_v63, %v5315_v12 }
 0xa5a   :  { %v11555_v29 = vpop.f32.mrb[52].mxu1 }
 0xa5b   :  { %v11577_v62 = vpop.f32.mrb[56].mxu0  ;;  %v11556_v30 = vpop.f32.mrb[53].mxu1 }
 0xa5c   :  { %v11557_v35 = vadd.f32 %v11556_v30, %v11555_v29  ;;  %v11578_v39 = vpop.f32.mrb[57].mxu0  ;;  %v11558_v6 = vpop.f32.mrb[54].mxu1  ;;  %v5736_v29 = vrot.slane %v5722_v54, %v14858_v56 }
 0xa5d   :  { %v11579_v4 = vadd.f32 %v11578_v39, %v11577_v62  ;;  %v11580_v60 = vpop.f32.mrb[58].mxu0  ;;  %v11559_v47 = vpop.f32.mrb[55].mxu1 }
 0xa5e   :  { %v5395_v8 = vadd.f32 %v11557_v35, %v5355_v53  ;;  %v11581_v45 = vpop.f32.mrb[59].mxu0  ;;  %v5654_v53 = vrot.slane %v5640_v50, %v14858_v56 }
 0xa60   :  { %v5435_v9 = vadd.f32 %v11579_v4, %v5395_v8 }
 0xa7a   :  { %v5474_v41 = vpop.f32.mrb[56].mxu1 }
 0xa7b   :  { %v5475_v17 = vadd.f32 %v5474_v41, %v5435_v9  ;;  %v12105_v42 = vpop.f32.mrb[57].mxu1 }
 0xa7c   :  { %v5477_v43 = vpop.f32.mrb[58].mxu1 }
 0xa7d   :  { %v5480_v44 = vmax.f32 %v5475_v17, 0.0  ;;  %v12106_v11 = vpop.f32.mrb[59].mxu1 }
 0xa7f   :  { %v5482_v23 = vcombine.high %v5480_v44, %v5480_v44  ;;  %v5489_v24 = vrot.slane %v5480_v44, %v14858_v56  ;;  %10964 = vst.sshfl [vmem:[#allocation6 + $0x5] sm:$0x3 pattern:$0x76325410] %v5480_v44 }
 0xa81   :  { %v5496_v21 = vrot.slane %v5482_v23, %v14858_v56  ;;  %v5497_v10 = vcombine.high %v5489_v24, %v5489_v24  ;;  %10965 = vst.sshfl [vmem:[#allocation6 + $0x15] sm:$0x3 pattern:$0x76325410] %v5482_v23 }
 0xa83   :  { %v5498_v13 = vcombine.high %v5496_v21, %v5496_v21  ;;  %5505 = vst [vmem:[#allocation6 + $0x9] sm:$0x3] %v5497_v10 }
 0xa85   :  { %5507 = vst [vmem:[#allocation6 + $0x19] sm:$0x3] %v5498_v13 }
 0xa86   :  { %v5509_v16 = vld [vmem:[#allocation6 + $0x4] sm:$0x3]  ;;  %v5528_v0 = vld [vmem:[#allocation6 + $0x6] sm:$0x3] }
 0xa87   :  { %v5513_v22 = vld [vmem:[#allocation6 + $0x5] sm:$0x3] }
 0xa88   :  { %v5622_v37 = vcombine.low %v5509_v16, %v5513_v22  ;;  %v5520_v51 = vld [vmem:[#allocation6 + $0x4] sm:$0x3]  ;;  %v5511_v59 = vld [vmem:[#allocation6 + $0x14] sm:$0x3]  ;;  %v5517_v26 = vld [vmem:[#allocation6 + $0x6] sm:$0x3] }
 0xa89   :  { %v5524_v33 = vld [vmem:[#allocation6 + $0x5] sm:$0x3]  ;;  %v5515_v55 = vld [vmem:[#allocation6 + $0x15] sm:$0x3]  ;;  %v5582_v18 = vcombine.low %v5516_v2, %v5520_v51 }
 0xa8a   :  { %v5598_v61 = vcombine.low %v5524_v33, %v5528_v0  ;;  %v5630_v32 = vrot.slane %v5622_v37, %v14858_v56  ;;  %v5704_v34 = vcombine.low %v5511_v59, %v5515_v55  ;;  %v5522_v20 = vld [vmem:[#allocation6 + $0x14] sm:$0x3]  ;;  %v5530_v3 = vld [vmem:[#allocation6 + $0x16] sm:$0x3]  ;;  %v5521_v63 = vld [vmem:[#allocation6 + $0x8] sm:$0x3] }
 0xa8b   :  { %v5526_v40 = vld [vmem:[#allocation6 + $0x15] sm:$0x3]  ;;  %v5664_v38 = vcombine.low %v5518_v52, %v5522_v20  ;;  %v5525_v36 = vld [vmem:[#allocation6 + $0x9] sm:$0x3]  ;;  %v5623_v39 = vcombine.low %v5517_v26, %v5521_v63  ;;  %v5596_v8 = vrot.slane %v5582_v18, %v14858_v56  ;;  %v12744_v37 = vld [vmem:[%s15673_s29 + $0x100] sm:$0xff]  }
 0xa8c   :  { %v5529_v12 = vld [vmem:[#allocation6 + $0xa] sm:$0x3]  ;;  %v5680_v27 = vcombine.low %v5526_v40, %v5530_v3  ;;  %v5712_v62 = vrot.slane %v5704_v34, %v14858_v56  ;;  %v10970_v30 = vcombine.low %v5589_v57, %v5630_v32  ;;  %v5519_v35 = vld [vmem:[#allocation6 + $0x16] sm:$0x3]  ;;  %v5533_v4 = vld [vmem:[#allocation6 + $0x8] sm:$0x3]  ;;  %v5606_v17 = vrot.slane %v5598_v61, %v14858_v56 }
 0xa8d   :  { %v5639_v6 = vcombine.low %v5525_v36, %v5529_v12  ;;  %v5537_v60 = vld [vmem:[#allocation6 + $0x9] sm:$0x3]  ;;  %v5523_v47 = vld [vmem:[#allocation6 + $0x18] sm:$0x3]  ;;  %v5678_v45 = vrot.slane %v5664_v38, %v14858_v56  ;;  %v5531_v41 = vld [vmem:[#allocation6 + $0x1a] sm:$0x3]  ;;  %v5637_v44 = vrot.slane %v5623_v39, %v14858_v56 }
 0xa8e   :  { %v5527_v9 = vld [vmem:[#allocation6 + $0x19] sm:$0x3]  ;;  %v5599_v42 = vcombine.low %v5533_v4, %v5537_v60  ;;  %v10972_v43 = vcombine.low %v5671_v15, %v5712_v62  ;;  %v5705_v11 = vcombine.low %v5519_v35, %v5523_v47  ;;  %v5688_v23 = vrot.slane %v5680_v27, %v14858_v56  ;;  %v12745_v0 = vld [vmem:[%s15673_s29 + $0x148] sm:$0xff]   ;;  %v12748_v63 = vld [vmem:[%s15673_s29 + $0x180] sm:$0xff]  }
 0xa8f   :  { %v5535_v24 = vld [vmem:[#allocation6 + $0x18] sm:$0x3]  ;;  %v5647_v14 = vrot.slane %v5639_v6, %v14858_v56  ;;  %v5721_v21 = vcombine.low %v5527_v9, %v5531_v41  ;;  %v5755_v25 = vrot.slane %v10970_v30, %v14858_v56  ;;  %v10971_v5 = vcombine.low %v5596_v8, %v5637_v44  ;;  %v12747_v3 = vld [vmem:[%s15673_s29 + $0x108] sm:$0xff]   ;;  %v12749_v36 = vld [vmem:[%s15673_s29 + $0x150] sm:$0xff]  }
 0xa90   :  { %v5539_v28 = vld [vmem:[#allocation6 + $0x19] sm:$0x3]  ;;  %v5613_v10 = vrot.slane %v5599_v42, %v14858_v56  ;;  %v5769_v46 = vrot.slane %v10972_v43, %v14858_v56  ;;  %v5719_v13 = vrot.slane %v5705_v11, %v14858_v56  ;;  %v12750_v12 = vld [vmem:[%s15673_s29 + $0x1c8] sm:$0xff]   ;;  %v12754_v30 = vld [vmem:[%s15673_s29 + $0x1d0] sm:$0xff]  }
 0xa91   :  { %v5681_v58 = vcombine.low %v5535_v24, %v5539_v28  ;;  %v5729_v7 = vrot.slane %v5721_v21, %v14858_v56  ;;  %v10974_v19 = vcombine.low %v5606_v17, %v5647_v14  ;;  %v5762_v51 = vrot.slane %v10971_v5, %v14858_v56  ;;  %v12753_v62 = vld [vmem:[%s15673_s29 + $0x158] sm:$0xff]   ;;  %v12756_v39 = vld [vmem:[%s15673_s29 + $0x190] sm:$0xff]   ;;  %v12757_v6 = vld [vmem:[%s15673_s29 + $0x160] sm:$0xff]  }
 0xa92   :  { %v10975_v49 = vcombine.low %v5613_v10, %v5654_v53  ;;  %v5778_v2 = vcombine.high %v5755_v25, %v5769_v46  ;;  %v5777_v16 = vcombine.low %v5755_v25, %v5769_v46  ;;  %v10973_v22 = vcombine.low %v5678_v45, %v5719_v13  ;;  %v12751_v53 = vld [vmem:[%s15673_s29 + $0x110] sm:$0xff]   ;;  %v12755_v35 = vld [vmem:[%s15673_s29 + $0x118] sm:$0xff]   ;;  %v12759_v60 = vld [vmem:[%s15673_s29 + $0x120] sm:$0xff]  }
 0xa93   :  { %v5695_v48 = vrot.slane %v5681_v58, %v14858_v56  ;;  %v10976_v52 = vcombine.low %v5688_v23, %v5729_v7  ;;  %v15006_v59 = vrot.slane %v10974_v19, %v14858_v56  ;;  %v12758_v4 = vld [vmem:[%s15673_s29 + $0x1d8] sm:$0xff]   ;;  %v12761_v8 = vld [vmem:[%s15673_s29 + $0x168] sm:$0xff]   ;;  %v12762_v45 = vld [vmem:[%s15673_s29 + $0x1e0] sm:$0xff]  }
 0xa94   :  { %v5844_v54 = vpack.c.bf16 %v5778_v2, %v5778_v2  ;;  %v5843_v57 = vpack.c.bf16 %v5777_v16, %v5777_v16  ;;  %v5776_v33 = vrot.slane %v10973_v22, %v14858_v56  ;;  %v15012_v26 = vrot.slane %v10975_v49, %v14858_v56  ;;  %v12760_v47 = vld [vmem:[%s15673_s29 + $0x198] sm:$0xff]   ;;  %v12763_v9 = vld [vmem:[%s15673_s29 + $0x128] sm:$0xff]   ;;  %v12764_v41 = vld [vmem:[%s15673_s29 + $0x1a0] sm:$0xff]  }
 0xa95   :  { %v10977_v50 = vcombine.low %v5695_v48, %v5736_v29  ;;  %v15009_v55 = vrot.slane %v10976_v52, %v14858_v56  ;;  %v12752_v29 = vld [vmem:[%s15673_s29 + $0x188] sm:$0xff]   ;;  %v12765_v17 = vld [vmem:[%s15673_s29 + $0x170] sm:$0xff]   ;;  %v12769_v11 = vld [vmem:[%s15673_s29 + $0x178] sm:$0xff]  }
 0xa96   :  { %6467 = vmatprep.mubr.bf16.mxu0 %v5844_v54  ;;  %v5780_v61 = vcombine.high %v5762_v51, %v5776_v33  ;;  %v5779_v32 = vcombine.low %v5762_v51, %v5776_v33  ;;  %v12766_v42 = vld [vmem:[%s15673_s29 + $0x1e8] sm:$0xff]   ;;  %v12767_v43 = vld [vmem:[%s15673_s29 + $0x130] sm:$0xff]   ;;  %v12771_v24 = vld [vmem:[%s15673_s29 + $0x138] sm:$0xff]  }
 0xa97   :  { %v15015_v18 = vrot.slane %v10977_v50, %v14858_v56  ;;  %6468 = vmatmul.mubr.bf16.vlgmr.msra.gmra.mrb[60].mxu0 %v5843_v57  ;;  %v5814_v15 = vcombine.high %v15006_v59, %v15009_v55  ;;  %v12768_v44 = vld [vmem:[%s15673_s29 + $0x1a8] sm:$0xff]   ;;  %v12770_v23 = vld [vmem:[%s15673_s29 + $0x1f0] sm:$0xff]   ;;  %v5813_v14 = vcombine.low %v15006_v59, %v15009_v55  ;;  %v12773_v21 = vld [vmem:[%s15673_s29 + $0x1f8] sm:$0xff]  }
 0xa98   :  { %11637 = vmatpush3.bf16.msra.mxu0 %v12744_v37  ;;  %v5846_v20 = vpack.c.bf16 %v5780_v61, %v5780_v61  ;;  %v5845_v40 = vpack.c.bf16 %v5779_v32, %v5779_v32  ;;  %v12772_v28 = vld [vmem:[%s15673_s29 + $0x1b0] sm:$0xff]   ;;  %v12774_v10 = vld [vmem:[%s15673_s29 + $0x1b8] sm:$0xff]   ;;  %v12775_v58 = vld [vmem:[%s15673_s29 + $0x200] sm:$0xff]  }
 0xa99   :  { %v5816_v34 = vcombine.high %v15012_v26, %v15015_v18  ;;  %11638 = vmatprep.subr.bf16.mxu0 %v12745_v0  ;;  %v5848_v38 = vpack.c.bf16 %v5814_v15, %v5814_v15  ;;  %v5847_v25 = vpack.c.bf16 %v5813_v14, %v5813_v14  ;;  %v5815_v46 = vcombine.low %v15012_v26, %v15015_v18  ;;  %v12776_v13 = vld [vmem:[%s15673_s29 + $0x208] sm:$0xff]   ;;  %v12777_v7 = vld [vmem:[%s15673_s29 + $0x210] sm:$0xff]   ;;  %v12778_v19 = vld [vmem:[%s15673_s29 + $0x218] sm:$0xff]  }
 0xa9a   :  { %6507 = vmatprep.mubr.bf16.mxu1 %v5846_v20  ;;  %v12779_v48 = vld [vmem:[%s15673_s29 + $0x220] sm:$0xff]   ;;  %v15065_v49 = vld.sshfl [vmem:[#allocation6 + $0x1e] sm:$0x3 pattern:$0x76325410]  ;;  %v12780_v22 = vld [vmem:[%s15673_s29 + $0x228] sm:$0xff]  }
 0xa9b   :  { %6547 = vmatprep.mubr.bf16.mxu0 %v5848_v38  ;;  %6508 = vmatmul.mubr.bf16.vlgmr.msra.gmra.mrb[60].mxu1 %v5845_v40  ;;  %v5850_v27 = vpack.c.bf16 %v5816_v34, %v5816_v34  ;;  %v5849_v5 = vpack.c.bf16 %v5815_v46, %v5815_v46  ;;  %v10968_v2 = vld.sshfl [vmem:[#allocation6 + $0x1a] sm:$0x3 pattern:$0x76325410]  ;;  %v12781_v57 = vld [vmem:[%s15673_s29 + $0x230] sm:$0xff]   ;;  %v12783_v55 = vld [vmem:[%s15675_s8 + $0x40] sm:$0xff]  }
 0xa9c   :  { %11639 = vmatpush3.bf16.msra.mxu0 %v12747_v3  ;;  %11659 = vmatpush3.bf16.msra.mxu1 %v12748_v63  ;;  %v15067_v16 = vld.sshfl [vmem:[#allocation6 + $0xe] sm:$0x3 pattern:$0x76325410]  ;;  %v5818_v50 = vcombine.low %v10968_v2, %v15065_v49  ;;  %v12782_v33 = vld [vmem:[%s15673_s29 + $0x238] sm:$0xff]   ;;  %v12784_v26 = vld [vmem:[%s15675_s8] sm:$0xff]  }
 0xa9d   :  { %6587 = vmatprep.mubr.bf16.mxu1 %v5850_v27  ;;  %11640 = vmatprep.subr.bf16.mxu0 %v12749_v36  ;;  %v10966_v52 = vld.sshfl [vmem:[#allocation6 + $0xa] sm:$0x3 pattern:$0x76325410]  ;;  %v12786_v61 = vld [vmem:[%s15675_s8 + $0xc0] sm:$0xff]   ;;  %v12789_v34 = vld [vmem:[%s15675_s8 + $0x50] sm:$0xff]  }
 0xa9e   :  { %11660 = vmatprep.subr.bf16.mxu1 %v12750_v12  ;;  %v5817_v54 = vcombine.low %v10966_v52, %v15067_v16  ;;  %v5832_v37 = vrot.slane %v5818_v50, %v14858_v56  ;;  %v12785_v18 = vld [vmem:[%s15675_s8 + $0x48] sm:$0xff]   ;;  %v12788_v15 = vld [vmem:[%s15675_s8 + $0x80] sm:$0xff]   ;;  %v12791_v40 = vld [vmem:[%s15675_s8 + $0x10] sm:$0xff]  }
 0xa9f   :  { %v12787_v32 = vld [vmem:[%s15675_s8 + $0x8] sm:$0xff]   ;;  %v12793_v63 = vld [vmem:[%s15675_s8 + $0x58] sm:$0xff]   ;;  %v12794_v38 = vld [vmem:[%s15675_s8 + $0xd0] sm:$0xff]  }
 0xaa0   :  { %11641 = vmatpush3.bf16.msra.mxu0 %v12751_v53  ;;  %11661 = vmatpush3.bf16.msra.mxu1 %v12752_v29  ;;  %v5825_v51 = vrot.slane %v5817_v54, %v14858_v56  ;;  %v12790_v20 = vld [vmem:[%s15675_s8 + $0xc8] sm:$0xff]   ;;  %v12795_v36 = vld [vmem:[%s15675_s8 + $0x18] sm:$0xff]   ;;  %v12796_v12 = vld [vmem:[%s15675_s8 + $0x90] sm:$0xff]  }
 0xaa1   :  { %11642 = vmatprep.subr.bf16.mxu0 %v12753_v62  ;;  %11662 = vmatprep.subr.bf16.mxu1 %v12754_v30  ;;  %v12792_v3 = vld [vmem:[%s15675_s8 + $0x88] sm:$0xff]   ;;  %v12797_v27 = vld [vmem:[%s15675_s8 + $0x60] sm:$0xff]   ;;  %v12798_v53 = vld [vmem:[%s15675_s8 + $0xd8] sm:$0xff]  }
 0xaa2   :  { %v5833_v0 = vcombine.low %v5825_v51, %v5832_v37  ;;  %v12799_v29 = vld [vmem:[%s15675_s8 + $0x20] sm:$0xff]   ;;  %v12800_v62 = vld [vmem:[%s15675_s8 + $0x98] sm:$0xff]   ;;  %v12801_v30 = vld [vmem:[%s15675_s8 + $0x68] sm:$0xff]  }
 0xaa4   :  { %11643 = vmatpush3.bf16.msra.mxu0 %v12755_v35  ;;  %11663 = vmatpush3.bf16.msra.mxu1 %v12756_v39  ;;  %v5851_v59 = vpack.c.bf16 %v5833_v0, %v5833_v0  ;;  %v12802_v35 = vld [vmem:[%s15675_s8 + $0xe0] sm:$0xff]   ;;  %v12803_v39 = vld [vmem:[%s15675_s8 + $0x28] sm:$0xff]  }
 0xaa5   :  { %11644 = vmatprep.subr.bf16.mxu0 %v12757_v6  ;;  %11664 = vmatprep.subr.bf16.mxu1 %v12758_v4  ;;  %v12804_v6 = vld [vmem:[%s15675_s8 + $0xa0] sm:$0xff]   ;;  %v12805_v4 = vld [vmem:[%s15675_s8 + $0x70] sm:$0xff]  }
 0xaa8   :  { %11645 = vmatpush3.bf16.msra.mxu0 %v12759_v60  ;;  %11665 = vmatpush3.bf16.msra.mxu1 %v12760_v47  ;;  %v12806_v60 = vld [vmem:[%s15675_s8 + $0xe8] sm:$0xff]   ;;  %v12807_v47 = vld [vmem:[%s15675_s8 + $0x30] sm:$0xff]  }
 0xaa9   :  { %11646 = vmatprep.subr.bf16.mxu0 %v12761_v8  ;;  %11666 = vmatprep.subr.bf16.mxu1 %v12762_v45  ;;  %v12808_v8 = vld [vmem:[%s15675_s8 + $0xa8] sm:$0xff]   ;;  %v12809_v45 = vld [vmem:[%s15675_s8 + $0x78] sm:$0xff]  }
 0xaac   :  { %11647 = vmatpush3.bf16.msra.mxu0 %v12763_v9  ;;  %11667 = vmatpush3.bf16.msra.mxu1 %v12764_v41  ;;  %v12810_v9 = vld [vmem:[%s15675_s8 + $0xf0] sm:$0xff]   ;;  %v12811_v41 = vld [vmem:[%s15675_s8 + $0x38] sm:$0xff]  }
 0xaad   :  { %11648 = vmatprep.subr.bf16.mxu0 %v12765_v17  ;;  %11668 = vmatprep.subr.bf16.mxu1 %v12766_v42  ;;  %v12812_v17 = vld [vmem:[%s15675_s8 + $0xb0] sm:$0xff]   ;;  %v12813_v42 = vld [vmem:[%s15675_s8 + $0xf8] sm:$0xff]  }
 0xab0   :  { %11649 = vmatpush3.bf16.msra.mxu0 %v12767_v43  ;;  %11669 = vmatpush3.bf16.msra.mxu1 %v12768_v44  ;;  %v12814_v43 = vld [vmem:[%s15675_s8 + $0x140] sm:$0xff]   ;;  %v12815_v44 = vld [vmem:[%s15675_s8 + $0xb8] sm:$0xff]  }
 0xab1   :  { %11650 = vmatprep.subr.bf16.mxu0 %v12769_v11  ;;  %11670 = vmatprep.subr.bf16.mxu1 %v12770_v23  ;;  %v12818_v11 = vld [vmem:[%s15675_s8 + $0x1c0] sm:$0xff]  }
 0xab4   :  { %11651 = vmatpush3.bf16.msra.mxu0 %v12771_v24  ;;  %11671 = vmatpush3.bf16.msra.mxu1 %v12772_v28 }
 0xab5   :  { %11672 = vmatprep.subr.bf16.mxu1 %v12773_v21  ;;  %12107 = vmatprep.subr.bf16.mxu0 %v13240_v31  ;;  %v10978_v21 = vld [vmem:[%s15676_s14] ss:$0 sm:$0xff] }
 0xab7   :  { %6548 = vmatmul.mubr.bf16.vlgmr.msra.gmra.mrb[64].mxu0 %v5847_v25 }
 0xab8   :  { %11673 = vmatpush3.bf16.msra.mxu1 %v12774_v10  ;;  %12108 = vmatpush3.bf16.msra.mxu0 %v12775_v58 }
 0xab9   :  { %12109 = vmatprep.subr.bf16.mxu0 %v13240_v31  ;;  %12123 = vmatprep.mubr.msk.bf16.mxu0 %vm13249_vm2, %v13240_v31 }
 0xaba   :  { %11689 = vmatprep.subr.bf16.mxu1 %v12783_v55 }
 0xabb   :  { %6588 = vmatmul.mubr.bf16.vlgmr.msra.gmra.mrb[64].mxu1 %v5849_v5 }
 0xabc   :  { %12110 = vmatpush3.bf16.msra.mxu0 %v12776_v13  ;;  %11690 = vmatpush3.bf16.msra.mxu1 %v12784_v26 }
 0xabd   :  { %12111 = vmatprep.subr.bf16.mxu0 %v13240_v31  ;;  %11691 = vmatprep.subr.bf16.mxu1 %v12785_v18 }
 0xac0   :  { %12112 = vmatpush3.bf16.msra.mxu0 %v12777_v7  ;;  %11692 = vmatpush3.bf16.msra.mxu1 %v12787_v32 }
 0xac1   :  { %12113 = vmatprep.subr.bf16.mxu0 %v13240_v31  ;;  %11693 = vmatprep.subr.bf16.mxu1 %v12789_v34 }
 0xac4   :  { %12114 = vmatpush3.bf16.msra.mxu0 %v12778_v19  ;;  %11694 = vmatpush3.bf16.msra.mxu1 %v12791_v40  ;;  %v6662_v40 = vld [vmem:[#allocation6] sm:$0x3] }
 0xac5   :  { %12115 = vmatprep.subr.bf16.mxu0 %v13240_v31  ;;  %11695 = vmatprep.subr.bf16.mxu1 %v12793_v63 }
 0xac8   :  { %12116 = vmatpush3.bf16.msra.mxu0 %v12779_v48  ;;  %11696 = vmatpush3.bf16.msra.mxu1 %v12795_v36  ;;  %v6664_v36 = vld [vmem:[#allocation6 + $0x10] sm:$0x3] }
 0xac9   :  { %12117 = vmatprep.subr.bf16.mxu0 %v13240_v31  ;;  %11697 = vmatprep.subr.bf16.mxu1 %v12797_v27  ;;  %v6687_v27 = vld [vmem:[#allocation6 + $0xc] sm:$0x3] }
 0xacc   :  { %12118 = vmatpush3.bf16.msra.mxu0 %v12780_v22  ;;  %11698 = vmatpush3.bf16.msra.mxu1 %v12799_v29 }
 0xacd   :  { %12119 = vmatprep.subr.bf16.mxu0 %v13240_v31  ;;  %11699 = vmatprep.subr.bf16.mxu1 %v12801_v30  ;;  %v6691_v30 = vld [vmem:[#allocation6 + $0xd] sm:$0x3] }
 0xad0   :  { %12120 = vmatpush3.bf16.msra.mxu0 %v12781_v57  ;;  %11700 = vmatpush3.bf16.msra.mxu1 %v12803_v39 }
 0xad1   :  { %12121 = vmatprep.subr.bf16.mxu0 %v13240_v31  ;;  %11701 = vmatprep.subr.bf16.mxu1 %v12805_v4 }
 0xad4   :  { %12122 = vmatpush3.bf16.msra.mxu0 %v12782_v33  ;;  %11702 = vmatpush3.bf16.msra.mxu1 %v12807_v47  ;;  %v6672_v47 = vld [vmem:[#allocation6 + $0x12] sm:$0x3] }
 0xad5   :  { %11711 = vmatprep.subr.bf16.mxu0 %v12786_v61  ;;  %11703 = vmatprep.subr.bf16.mxu1 %v12809_v45 }
 0xad7   :  { %12124 = vmatmul.mubr.bf16.vlgmr.msra.gmra.mrb[68].mxu0 %v5851_v59 }
 0xad8   :  { %11712 = vmatpush3.bf16.msra.mxu0 %v12788_v15  ;;  %11704 = vmatpush3.bf16.msra.mxu1 %v12811_v41 }
 0xad9   :  { %11713 = vmatprep.subr.bf16.mxu0 %v12790_v20  ;;  %11733 = vmatprep.subr.bf16.mxu1 %v12814_v43 }
 0xadc   :  { %11714 = vmatpush3.bf16.msra.mxu0 %v12792_v3  ;;  %v6666_v3 = vld [vmem:[#allocation6 + $0x1] sm:$0x3] }
 0xadd   :  { %11715 = vmatprep.subr.bf16.mxu0 %v12794_v38  ;;  %v6734_v29 = vcombine.low %v6662_v40, %v6666_v3 }
 0xae0   :  { %11716 = vmatpush3.bf16.msra.mxu0 %v12796_v12  ;;  %v6668_v12 = vld [vmem:[#allocation6 + $0x11] sm:$0x3] }
 0xae1   :  { %11717 = vmatprep.subr.bf16.mxu0 %v12798_v53  ;;  %v6816_v39 = vcombine.low %v6664_v36, %v6668_v12 }
 0xae4   :  { %11718 = vmatpush3.bf16.msra.mxu0 %v12800_v62  ;;  %v6689_v62 = vld [vmem:[#allocation6 + $0x1c] sm:$0x3] }
 0xae5   :  { %11719 = vmatprep.subr.bf16.mxu0 %v12802_v35  ;;  %v6693_v35 = vld [vmem:[#allocation6 + $0x1d] sm:$0x3] }
 0xae6   :  { %v6875_v45 = vcombine.low %v6689_v62, %v6693_v35 }
 0xae8   :  { %11720 = vmatpush3.bf16.msra.mxu0 %v12804_v6  ;;  %v6670_v6 = vld [vmem:[#allocation6 + $0x2] sm:$0x3] }
 0xae9   :  { %11721 = vmatprep.subr.bf16.mxu0 %v12806_v60 }
 0xaec   :  { %11722 = vmatpush3.bf16.msra.mxu0 %v12808_v8  ;;  %v6793_v8 = vcombine.low %v6687_v27, %v6691_v30 }
 0xaed   :  { %11723 = vmatprep.subr.bf16.mxu0 %v12810_v9  ;;  %v6742_v9 = vrot.slane %v6734_v29, %v14858_v56 }
 0xaf0   :  { %11724 = vmatpush3.bf16.msra.mxu0 %v12812_v17 }
 0xaf1   :  { %11725 = vmatprep.subr.bf16.mxu0 %v12813_v42 }
 0xaf4   :  { %11726 = vmatpush3.bf16.msra.mxu0 %v12815_v44 }
 0xaf5   :  { %11755 = vmatprep.subr.bf16.mxu0 %v12818_v11 }
 0xb6a   :  { %v11608_v23 = vpop.f32.mrb[60].mxu0 }
 0xb6b   :  { %v11609_v24 = vpop.f32.mrb[61].mxu0 }
 0xb6c   :  { %v11610_v28 = vadd.f32 %v11609_v24, %v11608_v23  ;;  %v11611_v14 = vpop.f32.mrb[62].mxu0 }
 0xb6d   :  { %v11612_v10 = vpop.f32.mrb[63].mxu0 }
 0xb6e   :  { %v11630_v58 = vpop.f32.mrb[60].mxu1  ;;  %v6470_v46 = vadd.f32 %v11610_v28, %v10978_v21  ;;  %v6824_v21 = vrot.slane %v6816_v39, %v14858_v56 }
 0xb6f   :  { %v11631_v25 = vpop.f32.mrb[61].mxu1 }
 0xb70   :  { %v11632_v13 = vadd.f32 %v11631_v25, %v11630_v58  ;;  %v11633_v5 = vpop.f32.mrb[62].mxu1 }
 0xb71   :  { %v11634_v7 = vpop.f32.mrb[63].mxu1 }
 0xb72   :  { %v6510_v19 = vadd.f32 %v11632_v13, %v6470_v46 }
 0xb8a   :  { %v11652_v48 = vpop.f32.mrb[64].mxu0 }
 0xb8b   :  { %v11653_v2 = vpop.f32.mrb[65].mxu0 }
 0xb8c   :  { %v11654_v22 = vadd.f32 %v11653_v2, %v11652_v48  ;;  %v11655_v52 = vpop.f32.mrb[66].mxu0  ;;  %v6807_v2 = vrot.slane %v6793_v8, %v14858_v56 }
 0xb8d   :  { %v11656_v50 = vpop.f32.mrb[67].mxu0 }
 0xb8e   :  { %v6550_v54 = vadd.f32 %v11654_v22, %v6510_v19  ;;  %v11674_v57 = vpop.f32.mrb[64].mxu1  ;;  %v6889_v22 = vrot.slane %v6875_v45, %v14858_v56 }
 0xb8f   :  { %v11675_v37 = vpop.f32.mrb[65].mxu1 }
 0xb90   :  { %v11676_v51 = vadd.f32 %v11675_v37, %v11674_v57  ;;  %v11677_v33 = vpop.f32.mrb[66].mxu1 }
 0xb91   :  { %v11678_v0 = vpop.f32.mrb[67].mxu1 }
 0xb92   :  { %v6590_v59 = vadd.f32 %v11676_v51, %v6550_v54 }
 0xbaa   :  { %v6629_v55 = vpop.f32.mrb[68].mxu0 }
 0xbab   :  { %v6630_v26 = vadd.f32 %v6629_v55, %v6590_v59  ;;  %v12125_v18 = vpop.f32.mrb[69].mxu0 }
 0xbac   :  { %v6632_v61 = vpop.f32.mrb[70].mxu0 }
 0xbad   :  { %v6635_v32 = vmax.f32 %v6630_v26, 0.0  ;;  %v12126_v15 = vpop.f32.mrb[71].mxu0 }
 0xbaf   :  { %v6637_v34 = vcombine.high %v6635_v32, %v6635_v32  ;;  %v6644_v20 = vrot.slane %v6635_v32, %v14858_v56  ;;  %11051 = vst.sshfl [vmem:[#allocation6 + $0x5] sm:$0x3 pattern:$0x76325410] %v6635_v32 }
 0xbb1   :  { %v6651_v63 = vrot.slane %v6637_v34, %v14858_v56  ;;  %v6652_v38 = vcombine.high %v6644_v20, %v6644_v20  ;;  %11052 = vst.sshfl [vmem:[#allocation6 + $0x15] sm:$0x3 pattern:$0x76325410] %v6637_v34 }
 0xbb3   :  { %v6653_v53 = vcombine.high %v6651_v63, %v6651_v63  ;;  %6659 = vst [vmem:[#allocation6 + $0x9] sm:$0x3] %v6652_v38 }
 0xbb5   :  { %6661 = vst [vmem:[#allocation6 + $0x19] sm:$0x3] %v6653_v53 }
 0xbb6   :  { %v6663_v4 = vld [vmem:[#allocation6 + $0x4] sm:$0x3]  ;;  %v6682_v43 = vld [vmem:[#allocation6 + $0x6] sm:$0x3] }
 0xbb7   :  { %v6667_v60 = vld [vmem:[#allocation6 + $0x5] sm:$0x3] }
 0xbb8   :  { %v6775_v41 = vcombine.low %v6663_v4, %v6667_v60  ;;  %v6674_v17 = vld [vmem:[#allocation6 + $0x4] sm:$0x3]  ;;  %v6665_v44 = vld [vmem:[#allocation6 + $0x14] sm:$0x3]  ;;  %v6671_v23 = vld [vmem:[#allocation6 + $0x6] sm:$0x3] }
 0xbb9   :  { %v6678_v42 = vld [vmem:[#allocation6 + $0x5] sm:$0x3]  ;;  %v6669_v11 = vld [vmem:[#allocation6 + $0x15] sm:$0x3]  ;;  %v6735_v24 = vcombine.low %v6670_v6, %v6674_v17 }
 0xbba   :  { %v6751_v28 = vcombine.low %v6678_v42, %v6682_v43  ;;  %v6783_v14 = vrot.slane %v6775_v41, %v14858_v56  ;;  %v6857_v10 = vcombine.low %v6665_v44, %v6669_v11  ;;  %v6676_v58 = vld [vmem:[#allocation6 + $0x14] sm:$0x3]  ;;  %v6684_v46 = vld [vmem:[#allocation6 + $0x16] sm:$0x3]  ;;  %v6675_v13 = vld [vmem:[#allocation6 + $0x8] sm:$0x3] }
 0xbbb   :  { %v6680_v25 = vld [vmem:[#allocation6 + $0x15] sm:$0x3]  ;;  %v6817_v5 = vcombine.low %v6672_v47, %v6676_v58  ;;  %v6679_v7 = vld [vmem:[#allocation6 + $0x9] sm:$0x3]  ;;  %v6776_v57 = vcombine.low %v6671_v23, %v6675_v13  ;;  %v6749_v59 = vrot.slane %v6735_v24, %v14858_v56  ;;  %v12816_v42 = vld [vmem:[%s15675_s8 + $0x100] sm:$0xff]  }
 0xbbc   :  { %v6683_v19 = vld [vmem:[#allocation6 + $0xa] sm:$0x3]  ;;  %v6833_v48 = vcombine.low %v6680_v25, %v6684_v46  ;;  %v6865_v52 = vrot.slane %v6857_v10, %v14858_v56  ;;  %v11057_v50 = vcombine.low %v6742_v9, %v6783_v14  ;;  %v6673_v54 = vld [vmem:[#allocation6 + $0x16] sm:$0x3]  ;;  %v6686_v51 = vld [vmem:[#allocation6 + $0x8] sm:$0x3]  ;;  %v6759_v61 = vrot.slane %v6751_v28, %v14858_v56 }
 0xbbd   :  { %v6792_v37 = vcombine.low %v6679_v7, %v6683_v19  ;;  %v6690_v33 = vld [vmem:[#allocation6 + $0x9] sm:$0x3]  ;;  %v6677_v0 = vld [vmem:[#allocation6 + $0x18] sm:$0x3]  ;;  %v6831_v55 = vrot.slane %v6817_v5, %v14858_v56  ;;  %v6685_v18 = vld [vmem:[#allocation6 + $0x1a] sm:$0x3]  ;;  %v6790_v34 = vrot.slane %v6776_v57, %v14858_v56 }
 0xbbe   :  { %v6681_v26 = vld [vmem:[#allocation6 + $0x19] sm:$0x3]  ;;  %v6752_v32 = vcombine.low %v6686_v51, %v6690_v33  ;;  %v11059_v15 = vcombine.low %v6824_v21, %v6865_v52  ;;  %v6858_v20 = vcombine.low %v6673_v54, %v6677_v0  ;;  %v6841_v40 = vrot.slane %v6833_v48, %v14858_v56  ;;  %v12817_v11 = vld [vmem:[%s15675_s8 + $0x148] sm:$0xff]   ;;  %v12820_v7 = vld [vmem:[%s15675_s8 + $0x180] sm:$0xff]  }
 0xbbf   :  { %v6688_v3 = vld [vmem:[#allocation6 + $0x18] sm:$0x3]  ;;  %v6800_v38 = vrot.slane %v6792_v37, %v14858_v56  ;;  %v6874_v36 = vcombine.low %v6681_v26, %v6685_v18  ;;  %v6908_v53 = vrot.slane %v11057_v50, %v14858_v56  ;;  %v11058_v30 = vcombine.low %v6749_v59, %v6790_v34  ;;  %v12819_v5 = vld [vmem:[%s15675_s8 + $0x108] sm:$0xff]   ;;  %v12821_v48 = vld [vmem:[%s15675_s8 + $0x150] sm:$0xff]  }
 0xbc0   :  { %v6692_v63 = vld [vmem:[#allocation6 + $0x19] sm:$0x3]  ;;  %v6766_v12 = vrot.slane %v6752_v32, %v14858_v56  ;;  %v6922_v29 = vrot.slane %v11059_v15, %v14858_v56  ;;  %v6872_v62 = vrot.slane %v6858_v20, %v14858_v56  ;;  %v12823_v52 = vld [vmem:[%s15675_s8 + $0x110] sm:$0xff]   ;;  %v12824_v50 = vld [vmem:[%s15675_s8 + $0x188] sm:$0xff]  }
 0xbc1   :  { %v6834_v27 = vcombine.low %v6688_v3, %v6692_v63  ;;  %v6882_v35 = vrot.slane %v6874_v36, %v14858_v56  ;;  %v11061_v39 = vcombine.low %v6759_v61, %v6800_v38  ;;  %v6915_v43 = vrot.slane %v11058_v30, %v14858_v56  ;;  %v12825_v54 = vld [vmem:[%s15675_s8 + $0x158] sm:$0xff]   ;;  %v12826_v57 = vld [vmem:[%s15675_s8 + $0x1d0] sm:$0xff]   ;;  %v12829_v33 = vld [vmem:[%s15675_s8 + $0x160] sm:$0xff]  }
 0xbc2   :  { %v11062_v4 = vcombine.low %v6766_v12, %v6807_v2  ;;  %v6931_v60 = vcombine.high %v6908_v53, %v6922_v29  ;;  %v6930_v47 = vcombine.low %v6908_v53, %v6922_v29  ;;  %v11060_v8 = vcombine.low %v6831_v55, %v6872_v62  ;;  %v12822_v2 = vld [vmem:[%s15675_s8 + $0x1c8] sm:$0xff]   ;;  %v12827_v37 = vld [vmem:[%s15675_s8 + $0x118] sm:$0xff]   ;;  %v12828_v51 = vld [vmem:[%s15675_s8 + $0x190] sm:$0xff]  }
 0xbc3   :  { %v6848_v6 = vrot.slane %v6834_v27, %v14858_v56  ;;  %v11063_v45 = vcombine.low %v6841_v40, %v6882_v35  ;;  %v15139_v23 = vrot.slane %v11061_v39, %v14858_v56  ;;  %v12830_v0 = vld [vmem:[%s15675_s8 + $0x1d8] sm:$0xff]   ;;  %v12831_v59 = vld [vmem:[%s15675_s8 + $0x120] sm:$0xff]   ;;  %v12833_v26 = vld [vmem:[%s15675_s8 + $0x168] sm:$0xff]  }
 0xbc4   :  { %v6997_v41 = vpack.c.bf16 %v6931_v60, %v6931_v60  ;;  %v6996_v17 = vpack.c.bf16 %v6930_v47, %v6930_v47  ;;  %v6929_v44 = vrot.slane %v11060_v8, %v14858_v56  ;;  %v15145_v28 = vrot.slane %v11062_v4, %v14858_v56  ;;  %v12832_v55 = vld [vmem:[%s15675_s8 + $0x198] sm:$0xff]   ;;  %v12834_v18 = vld [vmem:[%s15675_s8 + $0x1e0] sm:$0xff]   ;;  %v12835_v61 = vld [vmem:[%s15675_s8 + $0x128] sm:$0xff]  }
 0xbc5   :  { %v11064_v9 = vcombine.low %v6848_v6, %v6889_v22  ;;  %v15142_v24 = vrot.slane %v11063_v45, %v14858_v56  ;;  %v12836_v32 = vld [vmem:[%s15675_s8 + $0x1a0] sm:$0xff]   ;;  %v12837_v15 = vld [vmem:[%s15675_s8 + $0x170] sm:$0xff]   ;;  %v12838_v34 = vld [vmem:[%s15675_s8 + $0x1e8] sm:$0xff]  }
 0xbc6   :  { %7620 = vmatprep.mubr.bf16.mxu1 %v6997_v41  ;;  %v6933_v21 = vcombine.high %v6915_v43, %v6929_v44  ;;  %v6932_v10 = vcombine.low %v6915_v43, %v6929_v44  ;;  %v12839_v20 = vld [vmem:[%s15675_s8 + $0x130] sm:$0xff]   ;;  %v12840_v40 = vld [vmem:[%s15675_s8 + $0x1a8] sm:$0xff]   ;;  %v12841_v3 = vld [vmem:[%s15675_s8 + $0x178] sm:$0xff]  }
 0xbc7   :  { %v15148_v14 = vrot.slane %v11064_v9, %v14858_v56  ;;  %7621 = vmatmul.mubr.bf16.vlgmr.msra.gmra.mrb[68].mxu1 %v6996_v17  ;;  %v6967_v58 = vcombine.high %v15139_v23, %v15142_v24  ;;  %v12842_v63 = vld [vmem:[%s15675_s8 + $0x1f0] sm:$0xff]   ;;  %v12843_v38 = vld [vmem:[%s15675_s8 + $0x138] sm:$0xff]   ;;  %v6966_v12 = vcombine.low %v15139_v23, %v15142_v24  ;;  %v12847_v29 = vld [vmem:[%s15675_s8 + $0x200] sm:$0xff]  }
 0xbc8   :  { %11734 = vmatpush3.bf16.msra.mxu1 %v12816_v42  ;;  %v6999_v46 = vpack.c.bf16 %v6933_v21, %v6933_v21  ;;  %v6998_v13 = vpack.c.bf16 %v6932_v10, %v6932_v10  ;;  %v12844_v36 = vld [vmem:[%s15675_s8 + $0x1b0] sm:$0xff]   ;;  %v12845_v27 = vld [vmem:[%s15675_s8 + $0x1f8] sm:$0xff]   ;;  %v12848_v35 = vld [vmem:[%s15675_s8 + $0x208] sm:$0xff]  }
 0xbc9   :  { %v6969_v25 = vcombine.high %v15145_v28, %v15148_v14  ;;  %11735 = vmatprep.subr.bf16.mxu1 %v12817_v11  ;;  %v7001_v19 = vpack.c.bf16 %v6967_v58, %v6967_v58  ;;  %v12846_v53 = vld [vmem:[%s15675_s8 + $0x1b8] sm:$0xff]   ;;  %v7000_v62 = vpack.c.bf16 %v6966_v12, %v6966_v12  ;;  %v6968_v30 = vcombine.low %v15145_v28, %v15148_v14  ;;  %v12849_v6 = vld [vmem:[%s15675_s8 + $0x210] sm:$0xff]   ;;  %v12851_v60 = vld [vmem:[%s15675_s8 + $0x220] sm:$0xff]  }
 0xbca   :  { %7660 = vmatprep.mubr.bf16.mxu0 %v6999_v46  ;;  %v12850_v4 = vld [vmem:[%s15675_s8 + $0x218] sm:$0xff]   ;;  %v12852_v8 = vld [vmem:[%s15675_s8 + $0x228] sm:$0xff]   ;;  %v12853_v17 = vld [vmem:[%s15675_s8 + $0x230] sm:$0xff]  }
 0xbcb   :  { %7700 = vmatprep.mubr.bf16.mxu1 %v7001_v19  ;;  %7661 = vmatmul.mubr.bf16.vlgmr.msra.gmra.mrb[72].mxu0 %v6998_v13  ;;  %v7003_v22 = vpack.c.bf16 %v6969_v25, %v6969_v25  ;;  %v7002_v39 = vpack.c.bf16 %v6968_v30, %v6968_v30  ;;  %v11055_v47 = vld.sshfl [vmem:[#allocation6 + $0x1a] sm:$0x3 pattern:$0x76325410]  ;;  %v12855_v23 = vld [vmem:[%s15677_s19 + $0x40] sm:$0xff]   ;;  %v12859_v14 = vld [vmem:[%s15677_s19 + $0x48] sm:$0xff]  }
 0xbcc   :  { %11736 = vmatpush3.bf16.msra.mxu1 %v12819_v5  ;;  %11756 = vmatpush3.bf16.msra.mxu0 %v12820_v7  ;;  %v11053_v45 = vld.sshfl [vmem:[#allocation6 + $0xa] sm:$0x3 pattern:$0x76325410]  ;;  %v6971_v9 = vcombine.low %v11055_v47, %v15065_v49  ;;  %v12854_v44 = vld [vmem:[%s15675_s8 + $0x238] sm:$0xff]   ;;  %v12861_v10 = vld [vmem:[%s15677_s19 + $0x50] sm:$0xff]  }
 0xbcd   :  { %7740 = vmatprep.mubr.bf16.mxu0 %v7003_v22  ;;  %11737 = vmatprep.subr.bf16.mxu1 %v12821_v48  ;;  %v6970_v41 = vcombine.low %v11053_v45, %v15067_v16  ;;  %v12858_v49 = vld [vmem:[#allocation5 + $0x11] ss:$8 sps:$4 sm:$0xff]   ;;  %v12856_v16 = vld [vmem:[%s15677_s19] sm:$0xff]   ;;  %v12860_v21 = vld [vmem:[%s15677_s19 + $0x8] sm:$0xff]  }
 0xbce   :  { %11757 = vmatprep.subr.bf16.mxu0 %v12822_v2  ;;  %v6985_v42 = vrot.slane %v6971_v9, %v14858_v56  ;;  %v12857_v24 = vld [vmem:[#allocation5 + $0x1] ss:$8 sps:$4 sm:$0xff]   ;;  %v12862_v58 = vld [vmem:[%s15677_s19 + $0x10] sm:$0xff]   ;;  %v12863_v25 = vld [vmem:[%s15677_s19 + $0x58] sm:$0xff]  }
 0xbcf   :  { %v6978_v43 = vrot.slane %v6970_v41, %v14858_v56  ;;  %v8192_v56 = vpack.c.bf16 %v12858_v49, %v12857_v24  ;;  %v12864_v46 = vld [vmem:[%s15677_s19 + $0x18] sm:$0xff]   ;;  %v12865_v13 = vld [vmem:[%s15677_s19 + $0x60] sm:$0xff]   ;;  %v12867_v7 = vld [vmem:[%s15677_s19 + $0x68] sm:$0xff]  }
 0xbd0   :  { %11738 = vmatpush3.bf16.msra.mxu1 %v12823_v52  ;;  %11758 = vmatpush3.bf16.msra.mxu0 %v12824_v50  ;;  %v12866_v5 = vld [vmem:[%s15677_s19 + $0x20] sm:$0xff]   ;;  %v12868_v19 = vld [vmem:[%s15677_s19 + $0x28] sm:$0xff]   ;;  %v12869_v48 = vld [vmem:[%s15677_s19 + $0x70] sm:$0xff]  }
 0xbd1   :  { %11739 = vmatprep.subr.bf16.mxu1 %v12825_v54  ;;  %11759 = vmatprep.subr.bf16.mxu0 %v12826_v57  ;;  %v6986_v11 = vcombine.low %v6978_v43, %v6985_v42  ;;  %v12870_v2 = vld [vmem:[%s15677_s19 + $0x30] sm:$0xff]   ;;  %v12871_v22 = vld [vmem:[%s15677_s19 + $0x78] sm:$0xff]   ;;  %v12875_v54 = vld [vmem:[%s15677_s19 + $0x140] sm:$0xff]  }
 0xbd2   :  { %v12872_v52 = vld [vmem:[%s15677_s19 + $0x38] sm:$0xff]   ;;  %v12877_v57 = vld [vmem:[#allocation5 + $0x41] ss:$8 sps:$4 sm:$0xff]  }
 0xbd3   :  { %v7004_v28 = vpack.c.bf16 %v6986_v11, %v6986_v11  ;;  %v12874_v50 = vld [vmem:[#allocation5 + $0x10] ss:$8 sps:$4 sm:$0xff]   ;;  %v12890_v12 = vld [vmem:[%s15677_s19 + $0x120] sm:$0xff]   ;;  %v12902_v45 = vld [vmem:[%s15677_s19 + $0x208] sm:$0xff]  }
 0xbd4   :  { %11740 = vmatpush3.bf16.msra.mxu1 %v12827_v37  ;;  %11760 = vmatpush3.bf16.msra.mxu0 %v12828_v51  ;;  %v12873_v37 = vld [vmem:[#allocation5] ss:$8 sps:$4 sm:$0xff]   ;;  %v12876_v51 = vld [vmem:[#allocation5 + $0x31] ss:$8 sps:$4 sm:$0xff]  }
 0xbd5   :  { %11741 = vmatprep.subr.bf16.mxu1 %v12829_v33  ;;  %11761 = vmatprep.subr.bf16.mxu0 %v12830_v0  ;;  %v12878_v33 = vld [vmem:[%s15677_s19 + $0x100] sm:$0xff]   ;;  %v8191_v0 = vpack.c.bf16 %v12874_v50, %v12873_v37  ;;  %v12895_v30 = vld [vmem:[%s15677_s19 + $0x178] sm:$0xff]   ;;  %v12904_v41 = vld [vmem:[#allocation5 + $0x49] ss:$8 sps:$4 sm:$0xff]  }
 0xbd6   :  { %v12900_v47 = vld [vmem:[#allocation5 + $0x3a] ss:$8 sps:$4 sm:$0xff]   ;;  %v12910_v24 = vld [vmem:[%s15677_s19 + $0x228] sm:$0xff]  }
 0xbd7   :  { %v12907_v42 = vld [vmem:[#allocation5 + $0x22] ss:$8 sps:$4 sm:$0xff]  }
 0xbd8   :  { %11742 = vmatpush3.bf16.msra.mxu1 %v12831_v59  ;;  %11762 = vmatpush3.bf16.msra.mxu0 %v12832_v55  ;;  %v12879_v59 = vld [vmem:[%s15677_s19 + $0x148] sm:$0xff]   ;;  %v8201_v55 = vpack.c.bf16 %v12877_v57, %v12876_v51  ;;  %v12903_v43 = vld [vmem:[#allocation5 + $0x39] ss:$8 sps:$4 sm:$0xff]   ;;  %v11065_v57 = vld [vmem:[%s15678_s24] ss:$0 sm:$0xff] }
 0xbd9   :  { %11743 = vmatprep.subr.bf16.mxu1 %v12833_v26  ;;  %11763 = vmatprep.subr.bf16.mxu0 %v12834_v18  ;;  %v12880_v26 = vld [vmem:[%s15677_s19 + $0x108] sm:$0xff]   ;;  %v8204_v11 = vpack.c.bf16 %v12904_v41, %v12903_v43 }
 0xbda   :  { %v12882_v18 = vld [vmem:[#allocation5 + $0x40] ss:$8 sps:$4 sm:$0xff]  }
 0xbdc   :  { %11744 = vmatpush3.bf16.msra.mxu1 %v12835_v61  ;;  %11764 = vmatpush3.bf16.msra.mxu0 %v12836_v32  ;;  %v12883_v61 = vld [vmem:[%s15677_s19 + $0x150] sm:$0xff]   ;;  %v12886_v32 = vld [vmem:[#allocation5 + $0x1a] ss:$8 sps:$4 sm:$0xff]  }
 0xbdd   :  { %11745 = vmatprep.subr.bf16.mxu1 %v12837_v15  ;;  %11765 = vmatprep.subr.bf16.mxu0 %v12838_v34  ;;  %v12881_v15 = vld [vmem:[#allocation5 + $0x30] ss:$8 sps:$4 sm:$0xff]  }
 0xbde   :  { %v12884_v34 = vld [vmem:[%s15677_s19 + $0x110] sm:$0xff]  }
 0xbe0   :  { %11746 = vmatpush3.bf16.msra.mxu1 %v12839_v20  ;;  %11766 = vmatpush3.bf16.msra.mxu0 %v12840_v40  ;;  %v12885_v20 = vld [vmem:[#allocation5 + $0xa] ss:$8 sps:$4 sm:$0xff]   ;;  %v8200_v40 = vpack.c.bf16 %v12882_v18, %v12881_v15 }
 0xbe1   :  { %11747 = vmatprep.subr.bf16.mxu1 %v12841_v3  ;;  %11767 = vmatprep.subr.bf16.mxu0 %v12842_v63  ;;  %v12887_v3 = vld [vmem:[%s15677_s19 + $0x158] sm:$0xff]   ;;  %v8196_v63 = vpack.c.bf16 %v12886_v32, %v12885_v20 }
 0xbe4   :  { %11748 = vmatpush3.bf16.msra.mxu1 %v12843_v38  ;;  %11768 = vmatpush3.bf16.msra.mxu0 %v12844_v36  ;;  %v12888_v38 = vld [vmem:[%s15677_s19 + $0x118] sm:$0xff]   ;;  %v12889_v36 = vld [vmem:[%s15677_s19 + $0x160] sm:$0xff]  }
 0xbe5   :  { %11769 = vmatprep.subr.bf16.mxu0 %v12845_v27  ;;  %12127 = vmatprep.subr.bf16.mxu1 %v13240_v31  ;;  %v12891_v27 = vld [vmem:[%s15677_s19 + $0x168] sm:$0xff]  }
 0xbe7   :  { %7701 = vmatmul.mubr.bf16.vlgmr.msra.gmra.mrb[72].mxu1 %v7000_v62  ;;  %v12894_v62 = vld [vmem:[%s15677_s19 + $0x130] sm:$0xff]  }
 0xbe8   :  { %11770 = vmatpush3.bf16.msra.mxu0 %v12846_v53  ;;  %12128 = vmatpush3.bf16.msra.mxu1 %v12847_v29  ;;  %v12892_v53 = vld [vmem:[%s15677_s19 + $0x128] sm:$0xff]   ;;  %v12893_v29 = vld [vmem:[%s15677_s19 + $0x170] sm:$0xff]  }
 0xbe9   :  { %12129 = vmatprep.subr.bf16.mxu1 %v13240_v31  ;;  %12143 = vmatprep.mubr.msk.bf16.mxu1 %vm13249_vm2, %v13240_v31 }
 0xbea   :  { %12147 = vmatprep.subr.bf16.mxu0 %v13240_v31 }
 0xbeb   :  { %7741 = vmatmul.mubr.bf16.vlgmr.msra.gmra.mrb[76].mxu0 %v7002_v39  ;;  %v12898_v39 = vld [vmem:[#allocation5 + $0x19] ss:$8 sps:$4 sm:$0xff]  }
 0xbec   :  { %12130 = vmatpush3.bf16.msra.mxu1 %v12848_v35  ;;  %12163 = vmatprep.mubr.msk.bf16.mxu0 %vm13249_vm2, %v13240_v31  ;;  %v12896_v35 = vld [vmem:[%s15677_s19 + $0x138] sm:$0xff]  }
 0xbed   :  { %12131 = vmatprep.subr.bf16.mxu1 %v13240_v31 }
 0xbf0   :  { %12132 = vmatpush3.bf16.msra.mxu1 %v12849_v6  ;;  %v12899_v6 = vld [vmem:[%s15677_s19 + $0x200] sm:$0xff]  }
 0xbf1   :  { %12133 = vmatprep.subr.bf16.mxu1 %v13240_v31 }
 0xbf4   :  { %12134 = vmatpush3.bf16.msra.mxu1 %v12850_v4  ;;  %v12901_v4 = vld [vmem:[#allocation5 + $0x4a] ss:$8 sps:$4 sm:$0xff]  }
 0xbf5   :  { %12135 = vmatprep.subr.bf16.mxu1 %v13240_v31  ;;  %v8205_v9 = vpack.c.bf16 %v12901_v4, %v12900_v47 }
 0xbf8   :  { %12136 = vmatpush3.bf16.msra.mxu1 %v12851_v60  ;;  %v12897_v60 = vld [vmem:[#allocation5 + $0x9] ss:$8 sps:$4 sm:$0xff]  }
 0xbf9   :  { %12137 = vmatprep.subr.bf16.mxu1 %v13240_v31 }
 0xbfc   :  { %12138 = vmatpush3.bf16.msra.mxu1 %v12852_v8  ;;  %v8195_v8 = vpack.c.bf16 %v12898_v39, %v12897_v60 }
 0xbfd   :  { %12139 = vmatprep.subr.bf16.mxu1 %v13240_v31 }
 0xc00   :  { %12140 = vmatpush3.bf16.msra.mxu1 %v12853_v17  ;;  %v12905_v17 = vld [vmem:[%s15677_s19 + $0x210] sm:$0xff]  }
 0xc01   :  { %12141 = vmatprep.subr.bf16.mxu1 %v13240_v31 }
 0xc04   :  { %12142 = vmatpush3.bf16.msra.mxu1 %v12854_v44  ;;  %v12906_v44 = vld [vmem:[#allocation5 + $0x12] ss:$8 sps:$4 sm:$0xff]  }
 0xc05   :  { %11795 = vmatprep.subr.bf16.mxu1 %v12855_v23  ;;  %v12908_v23 = vld [vmem:[%s15677_s19 + $0x218] sm:$0xff]   ;;  %v8199_v49 = vpack.c.bf16 %v12907_v42, %v12906_v44 }
 0xc07   :  { %12144 = vmatmul.mubr.bf16.vlgmr.msra.gmra.mrb[76].mxu1 %v7004_v28  ;;  %v12911_v28 = vld [vmem:[%s15677_s19 + $0x230] sm:$0xff]  }
 0xc08   :  { %11796 = vmatpush3.bf16.msra.mxu1 %v12856_v16  ;;  %8824 = vmatprep.mubr.bf16.mxu1 %v8192_v56  ;;  %v12909_v16 = vld [vmem:[%s15677_s19 + $0x220] sm:$0xff]   ;;  %v12914_v56 = vld [vmem:[#allocation5 + $0x52] ss:$8 sps:$4 sm:$0xff]  }
 0xc09   :  { %11797 = vmatprep.subr.bf16.mxu1 %v12859_v14  ;;  %v12912_v14 = vld [vmem:[%s15677_s19 + $0x238] sm:$0xff]  }
 0xc0c   :  { %11798 = vmatpush3.bf16.msra.mxu1 %v12860_v21  ;;  %v12913_v21 = vld [vmem:[#allocation5 + $0x42] ss:$8 sps:$4 sm:$0xff]  }
 0xc0d   :  { %11799 = vmatprep.subr.bf16.mxu1 %v12861_v10  ;;  %v8208_v10 = vpack.c.bf16 %v12914_v56, %v12913_v21 }
 0xc10   :  { %11800 = vmatpush3.bf16.msra.mxu1 %v12862_v58  ;;  %v12915_v58 = vld [vmem:[#allocation15] sm:$0xff]  }
 0xc11   :  { %11801 = vmatprep.subr.bf16.mxu1 %v12863_v25  ;;  %12148 = vmatpush3.bf16.msra.mxu0 %v12915_v58  ;;  %v12916_v25 = vld [vmem:[#allocation15 + $0x8] sm:$0xff]  }
 0xc12   :  { %12149 = vmatprep.subr.bf16.mxu0 %v13240_v31 }
 0xc14   :  { %11802 = vmatpush3.bf16.msra.mxu1 %v12864_v46  ;;  %v12917_v46 = vld [vmem:[#allocation15 + $0x10] sm:$0xff]  }
 0xc15   :  { %11803 = vmatprep.subr.bf16.mxu1 %v12865_v13  ;;  %12150 = vmatpush3.bf16.msra.mxu0 %v12916_v25  ;;  %v12918_v13 = vld [vmem:[#allocation15 + $0x18] sm:$0xff]  }
 0xc16   :  { %12151 = vmatprep.subr.bf16.mxu0 %v13240_v31 }
 0xc18   :  { %11804 = vmatpush3.bf16.msra.mxu1 %v12866_v5  ;;  %v12919_v5 = vld [vmem:[#allocation15 + $0x20] sm:$0xff]  }
 0xc19   :  { %11805 = vmatprep.subr.bf16.mxu1 %v12867_v7  ;;  %12152 = vmatpush3.bf16.msra.mxu0 %v12917_v46  ;;  %v12920_v7 = vld [vmem:[#allocation15 + $0x28] sm:$0xff]  }
 0xc1a   :  { %12153 = vmatprep.subr.bf16.mxu0 %v13240_v31 }
 0xc1c   :  { %11806 = vmatpush3.bf16.msra.mxu1 %v12868_v19  ;;  %v12921_v19 = vld [vmem:[#allocation15 + $0x30] sm:$0xff]  }
 0xc1d   :  { %11807 = vmatprep.subr.bf16.mxu1 %v12869_v48  ;;  %12154 = vmatpush3.bf16.msra.mxu0 %v12918_v13  ;;  %v12922_v48 = vld [vmem:[#allocation15 + $0x38] sm:$0xff]   ;;  %v12926_v13 = vld [vmem:[#allocation5 + $0x18] ss:$8 sps:$4 sm:$0xff]  }
 0xc1e   :  { %12155 = vmatprep.subr.bf16.mxu0 %v13240_v31 }
 0xc20   :  { %11808 = vmatpush3.bf16.msra.mxu1 %v12870_v2  ;;  %v12923_v2 = vld [vmem:[%s15677_s19 + $0xc0] sm:$0xff]  }
 0xc21   :  { %11809 = vmatprep.subr.bf16.mxu1 %v12871_v22  ;;  %12156 = vmatpush3.bf16.msra.mxu0 %v12919_v5 }
 0xc22   :  { %12157 = vmatprep.subr.bf16.mxu0 %v13240_v31 }
 0xc24   :  { %11810 = vmatpush3.bf16.msra.mxu1 %v12872_v52 }
 0xc25   :  { %11851 = vmatprep.subr.bf16.mxu1 %v12875_v54  ;;  %12158 = vmatpush3.bf16.msra.mxu0 %v12920_v7  ;;  %v12924_v7 = vld [vmem:[%s15677_s19 + $0x80] sm:$0xff]  }
 0xc26   :  { %12159 = vmatprep.subr.bf16.mxu0 %v13240_v31 }
 0xc27   :  { %8825 = vmatmul.mubr.bf16.vlgmr.msra.gmra.mrb[80].mxu1 %v8191_v0 }
 0xc28   :  { %8832 = vmatprep.mubr.bf16.mxu1 %v8201_v55  ;;  %11852 = vmatpush3.bf16.msra.mxu1 %v12878_v33 }
 0xc29   :  { %11853 = vmatprep.subr.bf16.mxu1 %v12879_v59  ;;  %12160 = vmatpush3.bf16.msra.mxu0 %v12921_v19  ;;  %v12925_v19 = vld [vmem:[#allocation5 + $0x8] ss:$8 sps:$4 sm:$0xff]  }
 0xc2a   :  { %12161 = vmatprep.subr.bf16.mxu0 %v13240_v31 }
 0xc2c   :  { %11854 = vmatpush3.bf16.msra.mxu1 %v12880_v26 }
 0xc2d   :  { %11855 = vmatprep.subr.bf16.mxu1 %v12883_v61  ;;  %12162 = vmatpush3.bf16.msra.mxu0 %v12922_v48 }
 0xc2e   :  { %11823 = vmatprep.subr.bf16.mxu0 %v12923_v2  ;;  %v12927_v2 = vld [vmem:[%s15677_s19 + $0xc8] sm:$0xff]  }
 0xc2f   :  { %8833 = vmatmul.mubr.bf16.gmra.mrb[84].mxu1 %v8200_v40 }
 0xc30   :  { %11856 = vmatpush3.bf16.msra.mxu1 %v12884_v34  ;;  %8922 = vmatprep.mubr.bf16.mxu1 %v8196_v63 }
 0xc31   :  { %11857 = vmatprep.subr.bf16.mxu1 %v12887_v3 }
 0xc34   :  { %11858 = vmatpush3.bf16.msra.mxu1 %v12888_v38 }
 0xc35   :  { %11859 = vmatprep.subr.bf16.mxu1 %v12889_v36 }
 0xc38   :  { %11860 = vmatpush3.bf16.msra.mxu1 %v12890_v12 }
 0xc39   :  { %11861 = vmatprep.subr.bf16.mxu1 %v12891_v27 }
 0xc3c   :  { %11862 = vmatpush3.bf16.msra.mxu1 %v12892_v53 }
 0xc3d   :  { %11863 = vmatprep.subr.bf16.mxu1 %v12893_v29 }
 0xc40   :  { %11864 = vmatpush3.bf16.msra.mxu1 %v12894_v62  ;;  %v7792_v62 = vld [vmem:[#allocation13] sm:$0xf] }
 0xc41   :  { %11865 = vmatprep.subr.bf16.mxu1 %v12895_v30 }
 0xc44   :  { %11866 = vmatpush3.bf16.msra.mxu1 %v12896_v35 }
 0xc45   :  { %12167 = vmatprep.subr.bf16.mxu1 %v12899_v6 }
 0xc47   :  { %8923 = vmatmul.mubr.bf16.vlgmr.msra.gmra.mrb[88].mxu1 %v8195_v8 }
 0xc48   :  { %8930 = vmatprep.mubr.bf16.mxu1 %v8205_v9  ;;  %12168 = vmatpush3.bf16.msra.mxu1 %v12899_v6 }
 0xc49   :  { %12169 = vmatprep.subr.bf16.mxu1 %v12902_v45 }
 0xc4c   :  { %12170 = vmatpush3.bf16.msra.mxu1 %v12902_v45 }
 0xc4d   :  { %12171 = vmatprep.subr.bf16.mxu1 %v12905_v17 }
 0xc4f   :  { %8931 = vmatmul.mubr.bf16.gmra.mrb[92].mxu1 %v8204_v11 }
 0xc50   :  { %12172 = vmatpush3.bf16.msra.mxu1 %v12905_v17  ;;  %12183 = vmatprep.mubr.bf16.mxu1 %v8199_v49  ;;  %v11138_v49 = vld [vmem:[%s15679_s23] ss:$0 sm:$0xff] }
 0xc51   :  { %12173 = vmatprep.subr.bf16.mxu1 %v12908_v23 }
 0xc54   :  { %12174 = vmatpush3.bf16.msra.mxu1 %v12908_v23 }
 0xc55   :  { %12175 = vmatprep.subr.bf16.mxu1 %v12909_v16 }
 0xc58   :  { %12176 = vmatpush3.bf16.msra.mxu1 %v12909_v16 }
 0xc59   :  { %12177 = vmatprep.subr.bf16.mxu1 %v12910_v24 }
 0xc5c   :  { %12178 = vmatpush3.bf16.msra.mxu1 %v12910_v24 }
 0xc5d   :  { %12179 = vmatprep.subr.bf16.mxu1 %v12911_v28 }
 0xc60   :  { %12180 = vmatpush3.bf16.msra.mxu1 %v12911_v28 }
 0xc61   :  { %12181 = vmatprep.subr.bf16.mxu1 %v12912_v14 }
 0xc64   :  { %12182 = vmatpush3.bf16.msra.mxu1 %v12912_v14 }
 0xc67   :  { %12184 = vmatmul.mubr.bf16.vlgmr.msra.gmra.mrb[96].mxu1 %v8208_v10 }
 0xc9a   :  { %v11705_v22 = vpop.f32.mrb[68].mxu1 }
 0xc9b   :  { %v11706_v52 = vpop.f32.mrb[69].mxu1 }
 0xc9c   :  { %v11707_v50 = vadd.f32 %v11706_v52, %v11705_v22  ;;  %v11708_v54 = vpop.f32.mrb[70].mxu1  ;;  %v8194_v52 = vpack.c.bf16 %v12926_v13, %v12925_v19  ;;  %v12957_v13 = vld [vmem:[%s15677_s19 + $0x1e0] sm:$0xff]   ;;  %v12959_v19 = vld [vmem:[%s15677_s19 + $0x1e8] sm:$0xff]  }
 0xc9d   :  { %v11709_v37 = vpop.f32.mrb[71].mxu1 }
 0xc9e   :  { %v11727_v51 = vpop.f32.mrb[72].mxu0  ;;  %v7623_v0 = vadd.f32 %v11707_v50, %v11065_v57  ;;  %v12928_v37 = vld [vmem:[%s15677_s19 + $0x88] sm:$0xff]  }
 0xc9f   :  { %v11728_v33 = vpop.f32.mrb[73].mxu0 }
 0xca0   :  { %v11729_v59 = vadd.f32 %v11728_v33, %v11727_v51  ;;  %v11730_v55 = vpop.f32.mrb[74].mxu0  ;;  %v12929_v33 = vld [vmem:[%s15677_s19 + $0xd0] sm:$0xff]  }
 0xca1   :  { %v11731_v26 = vpop.f32.mrb[75].mxu0  ;;  %v12931_v55 = vld [vmem:[%s15677_s19 + $0xd8] sm:$0xff]  }
 0xca2   :  { %v7663_v18 = vadd.f32 %v11729_v59, %v7623_v0  ;;  %v12930_v59 = vld [vmem:[%s15677_s19 + $0x90] sm:$0xff]  }
 0xcba   :  { %v11749_v61 = vpop.f32.mrb[72].mxu1 }
 0xcbb   :  { %v11750_v32 = vpop.f32.mrb[73].mxu1 }
 0xcbc   :  { %v11751_v15 = vadd.f32 %v11750_v32, %v11749_v61  ;;  %v11752_v31 = vpop.f32.mrb[74].mxu1 }
 0xcbd   :  { %v11753_v34 = vpop.f32.mrb[75].mxu1 }
 0xcbe   :  { %v7703_v20 = vadd.f32 %v11751_v15, %v7663_v18  ;;  %v11771_v40 = vpop.f32.mrb[76].mxu0  ;;  %v12932_v15 = vld [vmem:[%s15677_s19 + $0x98] sm:$0xff]   ;;  %v12933_v34 = vld [vmem:[%s15677_s19 + $0xe0] sm:$0xff]  }
 0xcbf   :  { %v11772_v3 = vpop.f32.mrb[77].mxu0 }
 0xcc0   :  { %v11773_v63 = vadd.f32 %v11772_v3, %v11771_v40  ;;  %v11774_v38 = vpop.f32.mrb[78].mxu0  ;;  %v12934_v40 = vld [vmem:[%s15677_s19 + $0xa0] sm:$0xff]   ;;  %v12935_v3 = vld [vmem:[%s15677_s19 + $0xe8] sm:$0xff]  }
 0xcc1   :  { %v11775_v36 = vpop.f32.mrb[79].mxu0  ;;  %v12937_v38 = vld [vmem:[%s15677_s19 + $0xf0] sm:$0xff]  }
 0xcc2   :  { %v7743_v12 = vadd.f32 %v11773_v63, %v7703_v20  ;;  %v12936_v63 = vld [vmem:[%s15677_s19 + $0xa8] sm:$0xff]   ;;  %v12938_v36 = vld [vmem:[%s15677_s19 + $0xb0] sm:$0xff]  }
 0xcda   :  { %v7782_v27 = vpop.f32.mrb[76].mxu1 }
 0xcdb   :  { %v7783_v53 = vadd.f32 %v7782_v27, %v7743_v12  ;;  %v12145_v29 = vpop.f32.mrb[77].mxu1  ;;  %v12939_v12 = vld [vmem:[%s15677_s19 + $0xf8] sm:$0xff]  }
 0xcdc   :  { %v7785_v30 = vpop.f32.mrb[78].mxu1  ;;  %v12940_v27 = vld [vmem:[%s15677_s19 + $0xb8] sm:$0xff]   ;;  %v12943_v29 = vld [vmem:[%s15677_s19 + $0x1c0] sm:$0xff]  }
 0xcdd   :  { %v7788_v35 = vmax.f32 %v7783_v53, 0.0  ;;  %v12146_v39 = vpop.f32.mrb[79].mxu1  ;;  %v12942_v53 = vld [vmem:[#allocation5 + $0x12] ss:$8 sps:$4 sm:$0xff]   ;;  %v12941_v30 = vld [vmem:[#allocation5 + $0x2] ss:$8 sps:$4 sm:$0xff]  }
 0xcde   :  { %v12946_v39 = vld [vmem:[%s15677_s19 + $0x180] sm:$0xff]  }
 0xcdf   :  { %v7790_v6 = vcombine.high %v7788_v35, %v7788_v35  ;;  %v7793_v4 = vmul.f32 %v7792_v62, %v7788_v35  ;;  %v12944_v35 = vld [vmem:[#allocation5 + $0x38] ss:$8 sps:$4 sm:$0xff]  }
 0xce1   :  { %v7794_v60 = vmul.f32 %v7792_v62, %v7790_v6  ;;  %v7796_v47 = vsel %vm7795_vm3, %v7793_v4, 0.0  ;;  %v12945_v62 = vld [vmem:[#allocation5 + $0x48] ss:$8 sps:$4 sm:$0xff]   ;;  %v8193_v6 = vpack.c.bf16 %v12942_v53, %v12941_v30 }
 0xce2   :  { %v7797_v8 = vrot.slane %v7796_v47, 4  ;;  %v12947_v4 = vld [vmem:[%s15677_s19 + $0x1c8] sm:$0xff]   ;;  %v12980_v30 = vld [vmem:[%s15680_s0 + $0x10] sm:$0xff]  }
 0xce3   :  { %v7803_v45 = vsel %vm7795_vm3, %v7794_v60, 0.0  ;;  %v12976_v53 = vld [vmem:[%s15680_s0 + $0x8] sm:$0xff]  }
 0xce4   :  { %v7798_v9 = vadd.f32 %v7797_v8, %v7796_v47  ;;  %v7804_v41 = vrot.slane %v7803_v45, 4  ;;  %v8203_v47 = vpack.c.bf16 %v12945_v62, %v12944_v35  ;;  %v12979_v62 = vld [vmem:[%s15680_s0 + $0x50] sm:$0xff]  }
 0xce5   :  { %v12981_v35 = vld [vmem:[%s15680_s0 + $0xd0] sm:$0xff]  }
 0xce6   :  { %v7799_v17 = vrot.slane %v7798_v9, 2  ;;  %v7805_v42 = vadd.f32 %v7804_v41, %v7803_v45  ;;  %v12948_v41 = vld [vmem:[%s15677_s19 + $0x188] sm:$0xff]  }
 0xce8   :  { %v7800_v43 = vadd.f32 %v7799_v17, %v7798_v9  ;;  %v7806_v44 = vrot.slane %v7805_v42, 2 }
 0xcea   :  { %v7801_v11 = vrot.slane %v7800_v43, 1  ;;  %v7807_v23 = vadd.f32 %v7806_v44, %v7805_v42  ;;  %v12950_v42 = vld [vmem:[#allocation5 + $0x42] ss:$8 sps:$4 sm:$0xff]  }
 0xcec   :  { %v7802_v16 = vadd.f32 %v7801_v11, %v7800_v43  ;;  %v7808_v24 = vrot.slane %v7807_v23, 1  ;;  %v12951_v43 = vld [vmem:[%s15677_s19 + $0x1d0] sm:$0xff]   ;;  %v12954_v11 = vld [vmem:[#allocation5 + $0x21] ss:$8 sps:$4 sm:$0xff]  }
 0xcee   :  { %v7809_v28 = vadd.f32 %v7808_v24, %v7807_v23  ;;  %v7817_v14 = vadd.f32 %v11138_v49, %v7802_v16  ;;  %v12949_v23 = vld [vmem:[#allocation5 + $0x32] ss:$8 sps:$4 sm:$0xff]  }
 0xcef   :  { %v12953_v16 = vld [vmem:[#allocation5 + $0x11] ss:$8 sps:$4 sm:$0xff]   ;;  %v8202_v24 = vpack.c.bf16 %v12950_v42, %v12949_v23  ;;  %v12991_v42 = vld [vmem:[%s15680_s0 + $0x68] sm:$0xff]  }
 0xcf0   :  { %v7818_v56 = vadd.f32 %v11138_v49, %v7809_v28  ;;  %v7819_v21 = vpack.c.bf16 %v7817_v14, %v7817_v14  ;;  %v12952_v49 = vld [vmem:[%s15677_s19 + $0x190] sm:$0xff]   ;;  %v12955_v28 = vld [vmem:[%s15677_s19 + $0x1d8] sm:$0xff]  }
 0xcf1   :  { %v12995_v23 = vld [vmem:[%s15680_s0 + $0x70] sm:$0xff]  }
 0xcf2   :  { %v7820_v10 = vpack.c.bf16 %v7818_v56, %v7818_v56  ;;  %v7846_v25 = vunpack.c.l.b16 %v7819_v21  ;;  %v8198_v56 = vpack.c.bf16 %v12954_v11, %v12953_v16  ;;  %v12993_v11 = vld [vmem:[%s15680_s0 + $0xe8] sm:$0xff]   ;;  %v12997_v16 = vld [vmem:[%s15680_s0 + $0xf0] sm:$0xff]  }
 0xcf4   :  { %v7847_v58 = vunpack.c.l.b16 %v7820_v10 }
 0xcf6   :  { %v7848_v46 = vrot.slane %v7847_v58, 7 }
 0xcf8   :  { %v7850_v5 = vsel %vm7849_vm4, %v7848_v46, %v7846_v25  ;;  %v12956_v25 = vld [vmem:[%s15677_s19 + $0x198] sm:$0xff]  }
 0xcf9   :  { %v7851_v48 = vpack.c.b16 %v7850_v5, %v7850_v5 }
 0xcfa   :  { %v11811_v22 = vpop.f32.mrb[80].mxu1 }
 0xcfb   :  { %12164 = vmatmul.mubr.bf16.vlgmr.msra.gmra.mrb[80].mxu0 %v7851_v48  ;;  %v11812_v50 = vpop.f32.mrb[81].mxu1  ;;  %v12960_v48 = vld [vmem:[%s15677_s19 + $0x1a8] sm:$0xff]  }
 0xcfc   :  { %v15265_v54 = vadd.f32 %v11812_v50, %v11811_v22  ;;  %11824 = vmatpush3.bf16.msra.mxu0 %v12924_v7  ;;  %v11814_v57 = vpop.f32.mrb[82].mxu1  ;;  %8873 = vmatprep.mubr.bf16.mxu0 %v8194_v52  ;;  %v12958_v7 = vld [vmem:[%s15677_s19 + $0x1a0] sm:$0xff]   ;;  %v12962_v22 = vld [vmem:[%s15677_s19 + $0x1b0] sm:$0xff]   ;;  %v12963_v52 = vld [vmem:[%s15677_s19 + $0x1f8] sm:$0xff]  }
 0xcfd   :  { %v11815_v51 = vpop.f32.mrb[83].mxu1  ;;  %11825 = vmatprep.subr.bf16.mxu0 %v12927_v2  ;;  %v12961_v2 = vld [vmem:[%s15677_s19 + $0x1f0] sm:$0xff]   ;;  %v12964_v50 = vld [vmem:[%s15677_s19 + $0x1b8] sm:$0xff]  }
 0xcfe   :  { %v15269_v0 = vadd.f32 %v11815_v51, %v11814_v57  ;;  %v12966_v57 = vld [vmem:[#allocation5 + $0x20] ss:$8 sps:$4 sm:$0xff]   ;;  %v12965_v51 = vld [vmem:[#allocation5 + $0x10] ss:$8 sps:$4 sm:$0xff]  }
 0xd00   :  { %11826 = vmatpush3.bf16.msra.mxu0 %v12928_v37  ;;  %v12968_v37 = vld [vmem:[#allocation5 + $0x51] ss:$8 sps:$4 sm:$0xff]  }
 0xd01   :  { %11827 = vmatprep.subr.bf16.mxu0 %v12929_v33  ;;  %v12967_v33 = vld [vmem:[#allocation5 + $0x41] ss:$8 sps:$4 sm:$0xff]  }
 0xd02   :  { %v11817_v26 = vpop.f32.mrb[84].mxu1 }
 0xd03   :  { %v11818_v18 = vpop.f32.mrb[85].mxu1 }
 0xd04   :  { %v15273_v61 = vadd.f32 %v11818_v18, %v11817_v26  ;;  %11828 = vmatpush3.bf16.msra.mxu0 %v12930_v59  ;;  %v11820_v32 = vpop.f32.mrb[86].mxu1  ;;  %v8197_v59 = vpack.c.bf16 %v12966_v57, %v12965_v51  ;;  %v8207_v26 = vpack.c.bf16 %v12968_v37, %v12967_v33 }
 0xd05   :  { %v11821_v31 = vpop.f32.mrb[87].mxu1  ;;  %11829 = vmatprep.subr.bf16.mxu0 %v12931_v55 }
 0xd06   :  { %v15277_v20 = vadd.f32 %v11821_v31, %v11820_v32  ;;  %v12970_v31 = vld [vmem:[#allocation5 + $0x50] ss:$8 sps:$4 sm:$0xff]  }
 0xd08   :  { %11830 = vmatpush3.bf16.msra.mxu0 %v12932_v15 }
 0xd09   :  { %11831 = vmatprep.subr.bf16.mxu0 %v12933_v34  ;;  %v12969_v34 = vld [vmem:[#allocation5 + $0x40] ss:$8 sps:$4 sm:$0xff]  }
 0xd0c   :  { %11832 = vmatpush3.bf16.msra.mxu0 %v12934_v40  ;;  %v8206_v40 = vpack.c.bf16 %v12970_v31, %v12969_v34 }
 0xd0d   :  { %11833 = vmatprep.subr.bf16.mxu0 %v12935_v3  ;;  %v12971_v3 = vld [vmem:[%s15680_s0 + $0x40] sm:$0xff]  }
 0xd10   :  { %11834 = vmatpush3.bf16.msra.mxu0 %v12936_v63  ;;  %v12972_v63 = vld [vmem:[%s15680_s0] sm:$0xff]  }
 0xd11   :  { %11835 = vmatprep.subr.bf16.mxu0 %v12937_v38  ;;  %v12973_v38 = vld [vmem:[%s15680_s0 + $0xc0] sm:$0xff]  }
 0xd12   :  { %11945 = vmatprep.subr.bf16.mxu1 %v12973_v38 }
 0xd14   :  { %11836 = vmatpush3.bf16.msra.mxu0 %v12938_v36  ;;  %v12974_v36 = vld [vmem:[%s15680_s0 + $0x80] sm:$0xff]  }
 0xd15   :  { %11837 = vmatprep.subr.bf16.mxu0 %v12939_v12  ;;  %v12975_v12 = vld [vmem:[%s15680_s0 + $0x48] sm:$0xff]   ;;  %11946 = vmatpush3.bf16.msra.mxu1 %v12974_v36 }
 0xd18   :  { %11838 = vmatpush3.bf16.msra.mxu0 %v12940_v27  ;;  %v12977_v27 = vld [vmem:[%s15680_s0 + $0xc8] sm:$0xff]  }
 0xd19   :  { %11879 = vmatprep.subr.bf16.mxu0 %v12943_v29  ;;  %v12978_v29 = vld [vmem:[%s15680_s0 + $0x88] sm:$0xff]   ;;  %11947 = vmatprep.subr.bf16.mxu1 %v12977_v27 }
 0xd1a   :  { %v11867_v60 = vpop.f32.mrb[88].mxu1  ;;  %11948 = vmatpush3.bf16.msra.mxu1 %v12978_v29 }
 0xd1b   :  { %8874 = vmatmul.mubr.bf16.vlgmr.msra.gmra.mrb[84].mxu0 %v8193_v6  ;;  %v11868_v8 = vpop.f32.mrb[89].mxu1  ;;  %11949 = vmatprep.subr.bf16.mxu1 %v12981_v35  ;;  %v12983_v6 = vld [vmem:[%s15680_s0 + $0x58] sm:$0xff]  }
 0xd1c   :  { %8881 = vmatprep.mubr.bf16.mxu0 %v8203_v47  ;;  %v15289_v45 = vadd.f32 %v11868_v8, %v11867_v60  ;;  %11880 = vmatpush3.bf16.msra.mxu0 %v12946_v39  ;;  %v11870_v9 = vpop.f32.mrb[90].mxu1  ;;  %v12982_v39 = vld [vmem:[%s15680_s0 + $0x90] sm:$0xff]   ;;  %v12985_v60 = vld [vmem:[%s15680_s0 + $0xd8] sm:$0xff]   ;;  %v12987_v47 = vld [vmem:[%s15680_s0 + $0x60] sm:$0xff]  }
 0xd1d   :  { %v11871_v17 = vpop.f32.mrb[91].mxu1  ;;  %11881 = vmatprep.subr.bf16.mxu0 %v12947_v4  ;;  %v12984_v4 = vld [vmem:[%s15680_s0 + $0x18] sm:$0xff]  }
 0xd1e   :  { %v15293_v44 = vadd.f32 %v11871_v17, %v11870_v9  ;;  %11950 = vmatpush3.bf16.msra.mxu1 %v12982_v39  ;;  %v12986_v8 = vld [vmem:[%s15680_s0 + $0x98] sm:$0xff]   ;;  %v12988_v9 = vld [vmem:[%s15680_s0 + $0x20] sm:$0xff]  }
 0xd1f   :  { %11951 = vmatprep.subr.bf16.mxu1 %v12985_v60  ;;  %v12990_v17 = vld [vmem:[%s15680_s0 + $0xa0] sm:$0xff]  }
 0xd20   :  { %11882 = vmatpush3.bf16.msra.mxu0 %v12948_v41  ;;  %v12989_v41 = vld [vmem:[%s15680_s0 + $0xe0] sm:$0xff]  }
 0xd21   :  { %11883 = vmatprep.subr.bf16.mxu0 %v12951_v43  ;;  %v12992_v43 = vld [vmem:[%s15680_s0 + $0x28] sm:$0xff]  }
 0xd22   :  { %v11873_v14 = vpop.f32.mrb[92].mxu1  ;;  %11952 = vmatpush3.bf16.msra.mxu1 %v12986_v8 }
 0xd23   :  { %8882 = vmatmul.mubr.bf16.gmra.mrb[88].mxu0 %v8202_v24  ;;  %v11874_v21 = vpop.f32.mrb[93].mxu1  ;;  %11953 = vmatprep.subr.bf16.mxu1 %v12989_v41  ;;  %v12996_v24 = vld [vmem:[%s15680_s0 + $0x30] sm:$0xff]  }
 0xd24   :  { %v15297_v10 = vadd.f32 %v11874_v21, %v11873_v14  ;;  %11884 = vmatpush3.bf16.msra.mxu0 %v12952_v49  ;;  %8971 = vmatprep.mubr.bf16.mxu0 %v8198_v56  ;;  %v11876_v58 = vpop.f32.mrb[94].mxu1  ;;  %v12994_v49 = vld [vmem:[%s15680_s0 + $0xa8] sm:$0xff]   ;;  %v12998_v14 = vld [vmem:[%s15680_s0 + $0xb0] sm:$0xff]   ;;  %v13001_v56 = vld [vmem:[%s15680_s0 + $0xf8] sm:$0xff]  }
 0xd25   :  { %v11877_v46 = vpop.f32.mrb[95].mxu1  ;;  %11885 = vmatprep.subr.bf16.mxu0 %v12955_v28  ;;  %v12999_v28 = vld [vmem:[%s15680_s0 + $0x78] sm:$0xff]  }
 0xd26   :  { %v15301_v5 = vadd.f32 %v11877_v46, %v11876_v58  ;;  %11954 = vmatpush3.bf16.msra.mxu1 %v12990_v17  ;;  %v13000_v21 = vld [vmem:[%s15680_s0 + $0x38] sm:$0xff]   ;;  %v13005_v58 = vld [vmem:[%s15680_s0 + $0x140] sm:$0xff]  }
 0xd27   :  { %11955 = vmatprep.subr.bf16.mxu1 %v12993_v11  ;;  %v13011_v46 = vld [vmem:[%s15680_s0 + $0x1c0] sm:$0xff]  }
 0xd28   :  { %11886 = vmatpush3.bf16.msra.mxu0 %v12956_v25  ;;  %v13002_v25 = vld [vmem:[%s15680_s0 + $0xb8] sm:$0xff]  }
 0xd29   :  { %11887 = vmatprep.subr.bf16.mxu0 %v12957_v13  ;;  %v11139_v13 = vld [vmem:[%s15681_s27] ss:$0 sm:$0xff] }
 0xd2a   :  { %11956 = vmatpush3.bf16.msra.mxu1 %v12994_v49 }
 0xd2b   :  { %11957 = vmatprep.subr.bf16.mxu1 %v12997_v16 }
 0xd2c   :  { %11888 = vmatpush3.bf16.msra.mxu0 %v12958_v7 }
 0xd2d   :  { %11889 = vmatprep.subr.bf16.mxu0 %v12959_v19 }
 0xd2e   :  { %11958 = vmatpush3.bf16.msra.mxu1 %v12998_v14 }
 0xd2f   :  { %11959 = vmatprep.subr.bf16.mxu1 %v13001_v56 }
 0xd30   :  { %11890 = vmatpush3.bf16.msra.mxu0 %v12960_v48 }
 0xd31   :  { %11891 = vmatprep.subr.bf16.mxu0 %v12961_v2 }
 0xd32   :  { %11960 = vmatpush3.bf16.msra.mxu1 %v13002_v25 }
 0xd33   :  { %12001 = vmatprep.subr.bf16.mxu1 %v13011_v46 }
 0xd34   :  { %11892 = vmatpush3.bf16.msra.mxu0 %v12962_v22 }
 0xd35   :  { %11893 = vmatprep.subr.bf16.mxu0 %v12963_v52  ;;  %v11180_v52 = vld [vmem:[%s15682_s26] ss:$0 sm:$0xff] }
 0xd36   :  { %v8827_v37 = vadd.f32 %v15265_v54, %v11180_v52  ;;  %v8838_v54 = vadd.f32 %v15277_v20, %v11180_v52 }
 0xd38   :  { %11894 = vmatpush3.bf16.msra.mxu0 %v12964_v50 }
 0xd39   :  { %11917 = vmatprep.subr.bf16.mxu0 %v12971_v3 }
 0xd3a   :  { %v15310_v55 = vpop.f32.mrb[96].mxu1 }
 0xd3b   :  { %8972 = vmatmul.mubr.bf16.vlgmr.msra.gmra.mrb[92].mxu0 %v8197_v59  ;;  %v15312_v18 = vpop.f32.mrb[97].mxu1 }
 0xd3c   :  { %8979 = vmatprep.mubr.bf16.mxu0 %v8207_v26  ;;  %v15314_v32 = vpop.f32.mrb[98].mxu1  ;;  %11918 = vmatpush3.bf16.msra.mxu0 %v12972_v63  ;;  %v8830_v26 = vadd.f32 %v15269_v0, %v11180_v52 }
 0xd3d   :  { %v15316_v15 = vpop.f32.mrb[99].mxu1  ;;  %11919 = vmatprep.subr.bf16.mxu0 %v12975_v12  ;;  %v8835_v12 = vadd.f32 %v15273_v61, %v11180_v52 }
 0xd40   :  { %11920 = vmatpush3.bf16.msra.mxu0 %v12976_v53 }
 0xd41   :  { %11921 = vmatprep.subr.bf16.mxu0 %v12979_v62 }
 0xd43   :  { %8980 = vmatmul.mubr.bf16.gmra.mrb[96].mxu0 %v8206_v40 }
 0xd44   :  { %11922 = vmatpush3.bf16.msra.mxu0 %v12980_v30 }
 0xd45   :  { %11923 = vmatprep.subr.bf16.mxu0 %v12983_v6 }
 0xd48   :  { %11924 = vmatpush3.bf16.msra.mxu0 %v12984_v4 }
 0xd49   :  { %11925 = vmatprep.subr.bf16.mxu0 %v12987_v47 }
 0xd4c   :  { %11926 = vmatpush3.bf16.msra.mxu0 %v12988_v9 }
 0xd4d   :  { %11927 = vmatprep.subr.bf16.mxu0 %v12991_v42 }
 0xd50   :  { %11928 = vmatpush3.bf16.msra.mxu0 %v12992_v43 }
 0xd51   :  { %11929 = vmatprep.subr.bf16.mxu0 %v12995_v23 }
 0xd54   :  { %11930 = vmatpush3.bf16.msra.mxu0 %v12996_v24 }
 0xd55   :  { %11931 = vmatprep.subr.bf16.mxu0 %v12999_v28 }
 0xd58   :  { %11932 = vmatpush3.bf16.msra.mxu0 %v13000_v21 }
 0xd59   :  { %11973 = vmatprep.subr.bf16.mxu0 %v13005_v58 }
 0xdce   :  { %v7935_v7 = vpop.f32.mrb[80].mxu0 }
 0xdcf   :  { %v7936_v19 = vadd.f32 %v11139_v13, %v7935_v7  ;;  %v12165_v48 = vpop.f32.mrb[81].mxu0  ;;  %v13008_v13 = vld [vmem:[%s15680_s0 + $0x100] sm:$0xff]  }
 0xdd0   :  { %v7938_v2 = vpop.f32.mrb[82].mxu0 }
 0xdd1   :  { %v12166_v22 = vpop.f32.mrb[83].mxu0  ;;  %7942 = vst.msk [vmem:[#allocation18] sm:$0x3] %vm7941_vm5, %v7936_v19 }
 0xdee   :  { %v11839_v50 = vpop.f32.mrb[84].mxu0 }
 0xdef   :  { %v11840_v57 = vpop.f32.mrb[85].mxu0 }
 0xdf0   :  { %v11841_v51 = vadd.f32 %v11840_v57, %v11839_v50  ;;  %v11842_v33 = vpop.f32.mrb[86].mxu0  ;;  %v13014_v50 = vld [vmem:[%s15680_s0 + $0x180] sm:$0xff]   ;;  %v13016_v57 = vld [vmem:[%s15680_s0 + $0x108] sm:$0xff]  }
 0xdf1   :  { %v11843_v59 = vpop.f32.mrb[87].mxu0 }
 0xdf2   :  { %v8876_v31 = vadd.f32 %v11841_v51, %v8827_v37  ;;  %v11844_v34 = vadd.f32 %v11843_v59, %v11842_v33  ;;  %v13017_v33 = vld [vmem:[%s15680_s0 + $0x1c8] sm:$0xff]   ;;  %v13021_v59 = vld [vmem:[%s15680_s0 + $0x150] sm:$0xff]  }
 0xdf4   :  { %v8879_v40 = vadd.f32 %v11844_v34, %v8830_v26  ;;  %v8925_v3 = vadd.f32 %v15289_v45, %v8876_v31 }
 0xdf6   :  { %v11845_v63 = vpop.f32.mrb[88].mxu0  ;;  %v8928_v38 = vadd.f32 %v15293_v44, %v8879_v40  ;;  %v13018_v40 = vld [vmem:[%s15680_s0 + $0x188] sm:$0xff]  }
 0xdf7   :  { %v11846_v36 = vpop.f32.mrb[89].mxu0 }
 0xdf8   :  { %v11847_v27 = vadd.f32 %v11846_v36, %v11845_v63  ;;  %v11848_v53 = vpop.f32.mrb[90].mxu0  ;;  %v13024_v63 = vld [vmem:[%s15680_s0 + $0x110] sm:$0xff]  }
 0xdf9   :  { %v11849_v29 = vpop.f32.mrb[91].mxu0  ;;  %v13029_v36 = vld [vmem:[%s15680_s0 + $0x1d0] sm:$0xff]  }
 0xdfa   :  { %v8884_v62 = vadd.f32 %v11847_v27, %v8835_v12  ;;  %v11850_v30 = vadd.f32 %v11849_v29, %v11848_v53  ;;  %v13033_v27 = vld [vmem:[%s15680_s0 + $0x158] sm:$0xff]  }
 0xdfc   :  { %v8887_v35 = vadd.f32 %v11850_v30, %v8838_v54  ;;  %v8933_v0 = vadd.f32 %v15297_v10, %v8884_v62 }
 0xdfe   :  { %v8936_v39 = vadd.f32 %v15301_v5, %v8887_v35  ;;  %v13036_v35 = vld [vmem:[%s15680_s0 + $0x118] sm:$0xff]  }
 0xe0e   :  { %v11895_v6 = vpop.f32.mrb[92].mxu0 }
 0xe0f   :  { %v11896_v45 = vpop.f32.mrb[93].mxu0 }
 0xe10   :  { %v11897_v4 = vadd.f32 %v11896_v45, %v11895_v6  ;;  %v11898_v60 = vpop.f32.mrb[94].mxu0  ;;  %v13032_v6 = vld [vmem:[%s15680_s0 + $0x190] sm:$0xff]  }
 0xe11   :  { %v11899_v44 = vpop.f32.mrb[95].mxu0 }
 0xe12   :  { %v8974_v47 = vadd.f32 %v11897_v4, %v8925_v3  ;;  %v11900_v8 = vadd.f32 %v11899_v44, %v11898_v60  ;;  %v13037_v60 = vld [vmem:[%s15680_s0 + $0x1d8] sm:$0xff]   ;;  %v13039_v44 = vld [vmem:[%s15680_s0 + $0x160] sm:$0xff]  }
 0xe14   :  { %v9023_v61 = vadd.f32 %v15312_v18, %v8974_v47  ;;  %v8977_v9 = vadd.f32 %v11900_v8, %v8928_v38 }
 0xe16   :  { %v9037_v41 = vmax.f32 %v9023_v61, 0.0  ;;  %v9026_v20 = vadd.f32 %v15316_v15, %v8977_v9  ;;  %v11901_v17 = vpop.f32.mrb[96].mxu0 }
 0xe17   :  { %v11902_v42 = vpop.f32.mrb[97].mxu0 }
 0xe18   :  { %v9045_v43 = vcombine.high %v9037_v41, %v9037_v41  ;;  %9054 = vst [vmem:[#allocation7 + $0x9] sm:$0xf] %v9037_v41  ;;  %v9038_v10 = vmax.f32 %v9026_v20, 0.0  ;;  %v11903_v11 = vadd.f32 %v11902_v42, %v11901_v17  ;;  %v11904_v5 = vpop.f32.mrb[98].mxu0  ;;  %v13038_v41 = vld [vmem:[%s15680_s0 + $0x198] sm:$0xff]   ;;  %v13040_v20 = vld [vmem:[%s15680_s0 + $0x120] sm:$0xff]  }
 0xe19   :  { %v11905_v23 = vpop.f32.mrb[99].mxu0  ;;  %v13041_v17 = vld [vmem:[%s15680_s0 + $0x1e0] sm:$0xff]   ;;  %v13043_v42 = vld [vmem:[%s15680_s0 + $0x168] sm:$0xff]  }
 0xe1a   :  { %9055 = vst [vmem:[#allocation7 + $0x11] sm:$0xf] %v9045_v43  ;;  %v9046_v49 = vcombine.high %v9038_v10, %v9038_v10  ;;  %9056 = vst [vmem:[#allocation7 + $0x19] sm:$0xf] %v9038_v10  ;;  %v8982_v16 = vadd.f32 %v11903_v11, %v8933_v0  ;;  %v11906_v24 = vadd.f32 %v11905_v23, %v11904_v5  ;;  %v13042_v43 = vld [vmem:[%s15680_s0 + $0x1a0] sm:$0xff]   ;;  %v13044_v10 = vld [vmem:[%s15680_s0 + $0x128] sm:$0xff]  }
 0xe1b   :  { %v13047_v11 = vld [vmem:[%s15680_s0 + $0x170] sm:$0xff]   ;;  %v13045_v5 = vld [vmem:[%s15680_s0 + $0x1e8] sm:$0xff]  }
 0xe1c   :  { %9057 = vst [vmem:[#allocation7 + $0x21] sm:$0xf] %v9046_v49  ;;  %v9031_v18 = vadd.f32 %v15310_v55, %v8982_v16  ;;  %v8985_v28 = vadd.f32 %v11906_v24, %v8936_v39  ;;  %v13015_v55 = vld [vmem:[%s15680_s0 + $0x148] sm:$0xff]   ;;  %v13048_v49 = vld [vmem:[%s15680_s0 + $0x130] sm:$0xff]   ;;  %v13051_v16 = vld [vmem:[%s15680_s0 + $0x178] sm:$0xff]  }
 0xe1d   :  { %v13046_v23 = vld [vmem:[%s15680_s0 + $0x1a8] sm:$0xff]   ;;  %v13049_v24 = vld [vmem:[%s15680_s0 + $0x1f0] sm:$0xff]  }
 0xe1e   :  { %v9039_v15 = vmax.f32 %v9031_v18, 0.0  ;;  %v9034_v14 = vadd.f32 %v15314_v32, %v8985_v28  ;;  %v13052_v18 = vld [vmem:[%s15680_s0 + $0x138] sm:$0xff]   ;;  %v13050_v28 = vld [vmem:[%s15680_s0 + $0x1b0] sm:$0xff]  }
 0xe1f   :  { %v13003_v56 = vld [vmem:[#allocation7 + $0x1] ss:$8 sps:$4 sm:$0xff]  }
 0xe20   :  { %v9047_v21 = vcombine.high %v9039_v15, %v9039_v15  ;;  %9058 = vst [vmem:[#allocation7 + $0x39] sm:$0xf] %v9039_v15  ;;  %v9040_v58 = vmax.f32 %v9034_v14, 0.0  ;;  %v13006_v25 = vld [vmem:[#allocation7] ss:$8 sps:$4 sm:$0xff]  }
 0xe21   :  { %v13004_v46 = vld [vmem:[#allocation7 + $0x11] ss:$8 sps:$4 sm:$0xff]   ;;  %v13012_v52 = vld [vmem:[#allocation7 + $0x2] ss:$8 sps:$4 sm:$0xff]  }
 0xe22   :  { %9059 = vst [vmem:[#allocation7 + $0x41] sm:$0xf] %v9047_v21  ;;  %v9048_v7 = vcombine.high %v9040_v58, %v9040_v58  ;;  %9060 = vst [vmem:[#allocation7 + $0x49] sm:$0xf] %v9040_v58  ;;  %v13007_v19 = vld [vmem:[#allocation7 + $0x10] ss:$8 sps:$4 sm:$0xff]   ;;  %v9312_v48 = vpack.c.bf16 %v13004_v46, %v13003_v56 }
 0xe23   :  { %v9311_v2 = vpack.c.bf16 %v13007_v19, %v13006_v25  ;;  %v13009_v32 = vld [vmem:[#allocation7 + $0x8] ss:$8 sps:$4 sm:$0xff]   ;;  %v13010_v22 = vld [vmem:[#allocation7 + $0x18] ss:$8 sps:$4 sm:$0xff]  }
 0xe24   :  { %9061 = vst [vmem:[#allocation7 + $0x51] sm:$0xf] %v9048_v7  ;;  %9944 = vmatprep.mubr.bf16.mxu0 %v9312_v48  ;;  %v9314_v37 = vpack.c.bf16 %v13010_v22, %v13009_v32  ;;  %v13013_v51 = vld [vmem:[#allocation7 + $0x12] ss:$8 sps:$4 sm:$0xff]   ;;  %v13035_v8 = vld [vmem:[#allocation7 + $0x21] ss:$8 sps:$4 sm:$0xff]  }
 0xe25   :  { %9945 = vmatmul.mubr.bf16.vlgmr.msra.gmra.mrb[100].mxu0 %v9311_v2  ;;  %v9313_v31 = vpack.c.bf16 %v13013_v51, %v13012_v52  ;;  %v13027_v62 = vld [vmem:[#allocation7 + $0xa] ss:$8 sps:$4 sm:$0xff]   ;;  %v13028_v30 = vld [vmem:[#allocation7 + $0x1a] ss:$8 sps:$4 sm:$0xff]  }
 0xe26   :  { %11974 = vmatpush3.bf16.msra.mxu0 %v13008_v13  ;;  %9993 = vmatprep.mubr.bf16.mxu1 %v9314_v37  ;;  %v9316_v45 = vpack.c.bf16 %v13028_v30, %v13027_v62  ;;  %v13034_v47 = vld [vmem:[#allocation7 + $0x11] ss:$8 sps:$4 sm:$0xff]   ;;  %v13057_v14 = vld [vmem:[%s15680_s0 + $0x200] sm:$0xff]   ;;  %v13064_v7 = vld [vmem:[%s15680_s0 + $0x208] sm:$0xff]  }
 0xe27   :  { %v13019_v26 = vld [vmem:[#allocation7 + $0x31] ss:$8 sps:$4 sm:$0xff]   ;;  %11975 = vmatprep.subr.bf16.mxu0 %v13015_v55  ;;  %9994 = vmatmul.mubr.bf16.vlgmr.msra.gmra.mrb[100].mxu1 %v9313_v31  ;;  %v9318_v9 = vpack.c.bf16 %v13035_v8, %v13034_v47  ;;  %v13061_v55 = vld [vmem:[#allocation7 + $0x20] ss:$8 sps:$4 sm:$0xff]  }
 0xe28   :  { %v13022_v34 = vld [vmem:[#allocation7 + $0x30] ss:$8 sps:$4 sm:$0xff]   ;;  %12002 = vmatpush3.bf16.msra.mxu1 %v13014_v50  ;;  %v10242_v62 = vld [vmem:[#allocation8 + $0x29] sm:$0xf] }
 0xe29   :  { %v13020_v3 = vld [vmem:[#allocation7 + $0x41] ss:$8 sps:$4 sm:$0xff]   ;;  %12003 = vmatprep.subr.bf16.mxu1 %v13017_v33  ;;  %v13030_v39 = vld [vmem:[#allocation7 + $0x32] ss:$8 sps:$4 sm:$0xff]   ;;  %10365 = vrot.lane.b32.xlu1 %v10242_v62, %s13235_s1 }
 0xe2a   :  { %v13023_v38 = vld [vmem:[#allocation7 + $0x40] ss:$8 sps:$4 sm:$0xff]   ;;  %11976 = vmatpush3.bf16.msra.mxu0 %v13016_v57  ;;  %v9321_v12 = vpack.c.bf16 %v13020_v3, %v13019_v26  ;;  %v13053_v56 = vld [vmem:[%s15680_s0 + $0x1f8] sm:$0xff]   ;;  %v13067_v52 = vld [vmem:[%s15680_s0 + $0x210] sm:$0xff]  }
 0xe2b   :  { %11977 = vmatprep.subr.bf16.mxu0 %v13021_v59  ;;  %v9320_v53 = vpack.c.bf16 %v13023_v38, %v13022_v34  ;;  %v13025_v29 = vld [vmem:[#allocation7 + $0x38] ss:$8 sps:$4 sm:$0xff]   ;;  %v13026_v54 = vld [vmem:[#allocation7 + $0x48] ss:$8 sps:$4 sm:$0xff]  }
 0xe2c   :  { %9952 = vmatprep.mubr.bf16.mxu0 %v9321_v12  ;;  %v9323_v0 = vpack.c.bf16 %v13026_v54, %v13025_v29  ;;  %12004 = vmatpush3.bf16.msra.mxu1 %v13018_v40  ;;  %v13031_v4 = vld [vmem:[#allocation7 + $0x42] ss:$8 sps:$4 sm:$0xff]   ;;  %v13054_v46 = vld [vmem:[%s15680_s0 + $0x1b8] sm:$0xff]   ;;  %v10194_v30 = vld [vmem:[#allocation8 + $0x31] sm:$0xf] }
 0xe2d   :  { %9953 = vmatmul.mubr.bf16.gmra.mrb[104].mxu0 %v9320_v53  ;;  %12005 = vmatprep.subr.bf16.mxu1 %v13029_v36  ;;  %v9322_v61 = vpack.c.bf16 %v13031_v4, %v13030_v39  ;;  %v13056_v15 = vld [vmem:[#allocation7 + $0x19] ss:$8 sps:$4 sm:$0xff]   ;;  %v13059_v21 = vld [vmem:[#allocation7 + $0x4a] ss:$8 sps:$4 sm:$0xff]  }
 0xe2e   :  { %11978 = vmatpush3.bf16.msra.mxu0 %v13024_v63  ;;  %10001 = vmatprep.mubr.bf16.mxu1 %v9323_v0  ;;  %v13055_v58 = vld [vmem:[#allocation7 + $0x9] ss:$8 sps:$4 sm:$0xff]   ;;  %v13058_v25 = vld [vmem:[#allocation7 + $0x3a] ss:$8 sps:$4 sm:$0xff]   ;;  %v11285_v0 = vld [vmem:[%s15683_s20] ss:$0 sm:$0xff] }
 0xe2f   :  { %10042 = vmatprep.mubr.bf16.mxu0 %v9316_v45  ;;  %11979 = vmatprep.subr.bf16.mxu0 %v13033_v27  ;;  %v9315_v13 = vpack.c.bf16 %v13056_v15, %v13055_v58  ;;  %v9325_v19 = vpack.c.bf16 %v13059_v21, %v13058_v25  ;;  %v13063_v48 = vld [vmem:[#allocation7 + $0x51] ss:$8 sps:$4 sm:$0xff]   ;;  %v13062_v32 = vld [vmem:[#allocation7 + $0x41] ss:$8 sps:$4 sm:$0xff]  }
 0xe30   :  { %10002 = vmatmul.mubr.bf16.gmra.mrb[104].mxu1 %v9322_v61  ;;  %v13060_v2 = vld [vmem:[#allocation7 + $0x10] ss:$8 sps:$4 sm:$0xff]   ;;  %v13069_v57 = vld [vmem:[#allocation7 + $0x22] ss:$8 sps:$4 sm:$0xff]   ;;  %v9327_v37 = vpack.c.bf16 %v13063_v48, %v13062_v32 }
 0xe31   :  { %12006 = vmatpush3.bf16.msra.mxu1 %v13032_v6  ;;  %10091 = vmatprep.mubr.bf16.mxu1 %v9318_v9  ;;  %v13066_v22 = vld [vmem:[#allocation7 + $0x49] ss:$8 sps:$4 sm:$0xff]   ;;  %v9317_v50 = vpack.c.bf16 %v13061_v55, %v13060_v2  ;;  %v13065_v51 = vld [vmem:[#allocation7 + $0x39] ss:$8 sps:$4 sm:$0xff]  }
 0xe32   :  { %11980 = vmatpush3.bf16.msra.mxu0 %v13036_v35  ;;  %12007 = vmatprep.subr.bf16.mxu1 %v13037_v60  ;;  %v13068_v33 = vld [vmem:[#allocation7 + $0x12] ss:$8 sps:$4 sm:$0xff]   ;;  %v9324_v59 = vpack.c.bf16 %v13066_v22, %v13065_v51  ;;  %v13070_v40 = vld [vmem:[#allocation7 + $0x40] ss:$8 sps:$4 sm:$0xff]  }
 0xe33   :  { %11981 = vmatprep.subr.bf16.mxu0 %v13039_v44  ;;  %v13072_v26 = vld [vmem:[%s15680_s0 + $0x218] sm:$0xff]   ;;  %v9319_v31 = vpack.c.bf16 %v13069_v57, %v13068_v33  ;;  %v13073_v3 = vld [vmem:[%s15680_s0 + $0x220] sm:$0xff]   ;;  %v13074_v38 = vld [vmem:[%s15680_s0 + $0x228] sm:$0xff]  }
 0xe34   :  { %v13071_v34 = vld [vmem:[#allocation7 + $0x50] ss:$8 sps:$4 sm:$0xff]   ;;  %v13077_v53 = vld [vmem:[#allocation7 + $0x42] ss:$8 sps:$4 sm:$0xff]  }
 0xe35   :  { %12008 = vmatpush3.bf16.msra.mxu1 %v13038_v41  ;;  %v9326_v63 = vpack.c.bf16 %v13071_v34, %v13070_v40  ;;  %v13075_v36 = vld [vmem:[%s15680_s0 + $0x230] sm:$0xff]   ;;  %v13076_v12 = vld [vmem:[%s15680_s0 + $0x238] sm:$0xff]   ;;  %v10190_v54 = vld [vmem:[#allocation8 + $0x1] sm:$0xf] }
 0xe36   :  { %11982 = vmatpush3.bf16.msra.mxu0 %v13040_v20  ;;  %12009 = vmatprep.subr.bf16.mxu1 %v13041_v17  ;;  %v13078_v27 = vld [vmem:[#allocation7 + $0x52] ss:$8 sps:$4 sm:$0xff]  }
 0xe37   :  { %11983 = vmatprep.subr.bf16.mxu0 %v13043_v42  ;;  %v9328_v29 = vpack.c.bf16 %v13078_v27, %v13077_v53  ;;  %10263 = vrot.lane.b32.xlu0 %v10190_v54, %s13235_s1 }
 0xe39   :  { %12010 = vmatpush3.bf16.msra.mxu1 %v13042_v43 }
 0xe3a   :  { %11984 = vmatpush3.bf16.msra.mxu0 %v13044_v10  ;;  %12011 = vmatprep.subr.bf16.mxu1 %v13045_v5 }
 0xe3b   :  { %11985 = vmatprep.subr.bf16.mxu0 %v13047_v11  ;;  %10271 = vrot.lane.b32.xlu0 %v10194_v30, %s13235_s1 }
 0xe3d   :  { %12012 = vmatpush3.bf16.msra.mxu1 %v13046_v23 }
 0xe3e   :  { %11986 = vmatpush3.bf16.msra.mxu0 %v13048_v49  ;;  %12013 = vmatprep.subr.bf16.mxu1 %v13049_v24 }
 0xe3f   :  { %11987 = vmatprep.subr.bf16.mxu0 %v13051_v16 }
 0xe41   :  { %12014 = vmatpush3.bf16.msra.mxu1 %v13050_v28 }
 0xe42   :  { %11988 = vmatpush3.bf16.msra.mxu0 %v13052_v18  ;;  %12015 = vmatprep.subr.bf16.mxu1 %v13053_v56 }
 0xe43   :  { %12187 = vmatprep.subr.bf16.mxu0 %v13057_v14 }
 0xe45   :  { %10043 = vmatmul.mubr.bf16.vlgmr.msra.gmra.mrb[108].mxu0 %v9315_v13  ;;  %12016 = vmatpush3.bf16.msra.mxu1 %v13054_v46 }
 0xe46   :  { %10050 = vmatprep.mubr.bf16.mxu0 %v9325_v19  ;;  %12188 = vmatpush3.bf16.msra.mxu0 %v13057_v14 }
 0xe47   :  { %12189 = vmatprep.subr.bf16.mxu0 %v13064_v7 }
 0xe48   :  { %10092 = vmatmul.mubr.bf16.vlgmr.msra.gmra.mrb[108].mxu1 %v9317_v50 }
 0xe49   :  { %10099 = vmatprep.mubr.bf16.mxu1 %v9327_v37 }
 0xe4a   :  { %12190 = vmatpush3.bf16.msra.mxu0 %v13064_v7 }
 0xe4b   :  { %12191 = vmatprep.subr.bf16.mxu0 %v13067_v52 }
 0xe4d   :  { %10051 = vmatmul.mubr.bf16.gmra.mrb[112].mxu0 %v9324_v59 }
 0xe4e   :  { %12192 = vmatpush3.bf16.msra.mxu0 %v13067_v52  ;;  %12203 = vmatprep.mubr.bf16.mxu0 %v9319_v31 }
 0xe4f   :  { %12193 = vmatprep.subr.bf16.mxu0 %v13072_v26 }
 0xe50   :  { %10100 = vmatmul.mubr.bf16.gmra.mrb[112].mxu1 %v9326_v63 }
 0xe52   :  { %12194 = vmatpush3.bf16.msra.mxu0 %v13072_v26 }
 0xe53   :  { %12195 = vmatprep.subr.bf16.mxu0 %v13073_v3 }
 0xe56   :  { %12196 = vmatpush3.bf16.msra.mxu0 %v13073_v3 }
 0xe57   :  { %12197 = vmatprep.subr.bf16.mxu0 %v13074_v38 }
 0xe5a   :  { %12198 = vmatpush3.bf16.msra.mxu0 %v13074_v38 }
 0xe5b   :  { %12199 = vmatprep.subr.bf16.mxu0 %v13075_v36 }
 0xe5e   :  { %12200 = vmatpush3.bf16.msra.mxu0 %v13075_v36 }
 0xe5f   :  { %12201 = vmatprep.subr.bf16.mxu0 %v13076_v12 }
 0xe62   :  { %12202 = vmatpush3.bf16.msra.mxu0 %v13076_v12 }
 0xe65   :  { %12204 = vmatmul.mubr.bf16.vlgmr.msra.gmra.mrb[116].mxu0 %v9328_v29 }
 0xef8   :  { %v11933_v35 = vpop.f32.mrb[100].mxu0 }
 0xef9   :  { %v11934_v39 = vpop.f32.mrb[101].mxu0 }
 0xefa   :  { %v11935_v6 = vadd.f32 %v11934_v39, %v11933_v35  ;;  %v11936_v45 = vpop.f32.mrb[102].mxu0  ;;  %v11961_v44 = vpop.f32.mrb[100].mxu1 }
 0xefb   :  { %v11937_v4 = vpop.f32.mrb[103].mxu0  ;;  %v11962_v8 = vpop.f32.mrb[101].mxu1 }
 0xefc   :  { %v9947_v60 = vadd.f32 %v11935_v6, %v11285_v0  ;;  %v11938_v47 = vadd.f32 %v11937_v4, %v11936_v45  ;;  %v11963_v9 = vadd.f32 %v11962_v8, %v11961_v44  ;;  %v11964_v41 = vpop.f32.mrb[102].mxu1 }
 0xefd   :  { %v11965_v20 = vpop.f32.mrb[103].mxu1 }
 0xefe   :  { %v9950_v61 = vadd.f32 %v11938_v47, %v11285_v0  ;;  %v9996_v17 = vadd.f32 %v11963_v9, %v9947_v60  ;;  %v11966_v42 = vadd.f32 %v11965_v20, %v11964_v41 }
 0xf00   :  { %v11939_v43 = vpop.f32.mrb[104].mxu0  ;;  %v9999_v11 = vadd.f32 %v11966_v42, %v9950_v61 }
 0xf01   :  { %v11940_v10 = vpop.f32.mrb[105].mxu0 }
 0xf02   :  { %v11941_v5 = vadd.f32 %v11940_v10, %v11939_v43  ;;  %v11942_v23 = vpop.f32.mrb[106].mxu0 }
 0xf03   :  { %v11943_v49 = vpop.f32.mrb[107].mxu0  ;;  %v11967_v18 = vpop.f32.mrb[104].mxu1 }
 0xf04   :  { %v11944_v16 = vadd.f32 %v11943_v49, %v11942_v23  ;;  %v9955_v24 = vadd.f32 %v11941_v5, %v11285_v0  ;;  %v11968_v28 = vpop.f32.mrb[105].mxu1 }
 0xf05   :  { %v11969_v14 = vadd.f32 %v11968_v28, %v11967_v18  ;;  %v11970_v56 = vpop.f32.mrb[106].mxu1 }
 0xf06   :  { %v9958_v15 = vadd.f32 %v11944_v16, %v11285_v0  ;;  %v11971_v21 = vpop.f32.mrb[107].mxu1 }
 0xf07   :  { %v10004_v58 = vadd.f32 %v11969_v14, %v9955_v24  ;;  %v11972_v25 = vadd.f32 %v11971_v21, %v11970_v56 }
 0xf09   :  { %v10007_v46 = vadd.f32 %v11972_v25, %v9958_v15 }
 0xf18   :  { %v11989_v13 = vpop.f32.mrb[108].mxu0 }
 0xf19   :  { %v11990_v7 = vpop.f32.mrb[109].mxu0 }
 0xf1a   :  { %v11991_v19 = vadd.f32 %v11990_v7, %v11989_v13  ;;  %v11992_v55 = vpop.f32.mrb[110].mxu0 }
 0xf1b   :  { %v11993_v48 = vpop.f32.mrb[111].mxu0  ;;  %v12017_v22 = vpop.f32.mrb[108].mxu1 }
 0xf1c   :  { %v10045_v2 = vadd.f32 %v11991_v19, %v9996_v17  ;;  %v11994_v32 = vadd.f32 %v11993_v48, %v11992_v55  ;;  %v12018_v50 = vpop.f32.mrb[109].mxu1 }
 0xf1d   :  { %v12019_v57 = vadd.f32 %v12018_v50, %v12017_v22  ;;  %v12020_v37 = vpop.f32.mrb[110].mxu1 }
 0xf1e   :  { %v10048_v52 = vadd.f32 %v11994_v32, %v9999_v11  ;;  %v12021_v51 = vpop.f32.mrb[111].mxu1 }
 0xf1f   :  { %v12022_v59 = vadd.f32 %v12021_v51, %v12020_v37  ;;  %v10094_v31 = vadd.f32 %v12019_v57, %v10045_v2 }
 0xf20   :  { %v11995_v33 = vpop.f32.mrb[112].mxu0 }
 0xf21   :  { %v11996_v26 = vpop.f32.mrb[113].mxu0  ;;  %v10097_v63 = vadd.f32 %v12022_v59, %v10048_v52  ;;  %v10264_v59 = vpop.permute.xlu0 %10263 }
 0xf22   :  { %v11997_v34 = vadd.f32 %v11996_v26, %v11995_v33  ;;  %v11998_v40 = vpop.f32.mrb[114].mxu0  ;;  %v10246_v33 = vld [vmem:[#allocation8 + $0x59] sm:$0xf]  ;;  %v10366_v26 = vpop.permute.xlu1 %10365 }
 0xf23   :  { %v11999_v3 = vpop.f32.mrb[115].mxu0  ;;  %v12023_v12 = vpop.f32.mrb[112].mxu1 }
 0xf24   :  { %v10053_v38 = vadd.f32 %v11997_v34, %v10004_v58  ;;  %v12000_v36 = vadd.f32 %v11999_v3, %v11998_v40  ;;  %v12024_v53 = vpop.f32.mrb[113].mxu1 }
 0xf25   :  { %v12025_v29 = vadd.f32 %v12024_v53, %v12023_v12  ;;  %v12026_v54 = vpop.f32.mrb[114].mxu1  ;;  %v10423_v53 = vsub.s32 1, %v14855_v1 }
 0xf26   :  { %v10056_v27 = vadd.f32 %v12000_v36, %v10007_v46  ;;  %v12027_v62 = vpop.f32.mrb[115].mxu1 }
 0xf27   :  { %v12028_v30 = vadd.f32 %v12027_v62, %v12026_v54  ;;  %v10102_v35 = vadd.f32 %v12025_v29, %v10053_v38  ;;  %v10202_v29 = vld [vmem:[#allocation8 + $0x32] sm:$0xf]  ;;  %v10427_v54 = vsub.s32 2, %v14855_v1 }
 0xf29   :  { %v10105_v0 = vadd.f32 %v12028_v30, %v10056_v27 }
 0xf38   :  { %v12205_v39 = vpop.f32.mrb[116].mxu0 }
 0xf39   :  { %v10151_v6 = vadd.f32 %v12205_v39, %v10102_v35  ;;  %v10142_v45 = vpop.f32.mrb[117].mxu0  ;;  %v10415_v35 = vld [vmem:[#allocation16] sm:$0x1f]  ;;  %v10431_v39 = vsub.s32 3, %v14855_v1 }
 0xf3a   :  { %v10143_v4 = vadd.f32 %v10142_v45, %v10094_v31  ;;  %v12206_v60 = vpop.f32.mrb[118].mxu0  ;;  %v10272_v31 = vpop.permute.xlu0 %10271  ;;  %v15463_v45 = vrot.slane %v10415_v35, %v10423_v53 }
 0xf3b   :  { %v10159_v44 = vmax.f32 %v10151_v6, 0.0  ;;  %v10154_v47 = vadd.f32 %v12206_v60, %v10105_v0  ;;  %v10145_v8 = vpop.f32.mrb[119].mxu0  ;;  %v10419_v0 = vsub.s32 0, %v14855_v1  ;;  %v10186_v6 = vld [vmem:[#allocation8 + $0x30] sm:$0xf]  ;;  %v10435_v60 = vsub.s32 4, %v14855_v1 }
 0xf3c   :  { %v10157_v61 = vmax.f32 %v10143_v4, 0.0  ;;  %v10146_v9 = vadd.f32 %v10145_v8, %v10097_v63 }
 0xf3d   :  { %v10167_v41 = vcombine.high %v10159_v44, %v10159_v44  ;;  %10178 = vst.msk [vmem:[#allocation8 + $0x39] sm:$0xf] %vm3499_vm1, %v10159_v44  ;;  %v10160_v20 = vmax.f32 %v10154_v47, 0.0  ;;  %v10182_v44 = vld [vmem:[#allocation8] sm:$0xf] }
 0xf3e   :  { %v10165_v17 = vcombine.high %v10157_v61, %v10157_v61  ;;  %10174 = vst.msk [vmem:[#allocation8 + $0x9] sm:$0xf] %vm3499_vm1, %v10157_v61  ;;  %v10158_v42 = vmax.f32 %v10146_v9, 0.0  ;;  %v10234_v47 = vld [vmem:[#allocation8 + $0x28] sm:$0xf]  ;;  %v15467_v61 = vrot.slane %v10415_v35, %v10427_v54  ;;  %v10383_v1 = vsel %vm1258_vm8, %v10182_v44, %v10264_v59 }
 0xf3f   :  { %10179 = vst.msk [vmem:[#allocation8 + $0x41] sm:$0xf] %vm3499_vm1, %v10167_v41  ;;  %v10168_v43 = vcombine.high %v10160_v20, %v10160_v20  ;;  %10180 = vst.msk [vmem:[#allocation8 + $0x49] sm:$0xf] %vm3499_vm1, %v10160_v20  ;;  %v10387_v20 = vsel %vm1258_vm8, %v10186_v6, %v10272_v31 }
 0xf40   :  { %10175 = vst.msk [vmem:[#allocation8 + $0x11] sm:$0xf] %vm3499_vm1, %v10165_v17  ;;  %v10166_v10 = vcombine.high %v10158_v42, %v10158_v42  ;;  %10176 = vst.msk [vmem:[#allocation8 + $0x19] sm:$0xf] %vm3499_vm1, %v10158_v42  ;;  %v15475_v42 = vrot.slane %v10415_v35, %v10419_v0 }
 0xf41   :  { %10181 = vst.msk [vmem:[#allocation8 + $0x51] sm:$0xf] %vm3499_vm1, %v10168_v43  ;;  %v15477_v43 = vrot.slane %v10415_v35, %v10431_v39 }
 0xf42   :  { %10177 = vst.msk [vmem:[#allocation8 + $0x21] sm:$0xf] %vm3499_vm1, %v10166_v10 }
 0xf44   :  { %v10210_v11 = vld [vmem:[#allocation8 + $0x38] sm:$0xf] }
 0xf45   :  { %v10195_v5 = vld [vmem:[#allocation8 + $0x39] sm:$0xf]  ;;  %10303 = vrot.lane.b32.xlu0 %v10210_v11, %s13235_s1  ;;  %v10191_v49 = vld [vmem:[#allocation8 + $0x9] sm:$0xf]  ;;  %v10410_v11 = vsel %vm1258_vm8, %v10234_v47, %v10366_v26 }
 0xf46   :  { %10273 = vrot.lane.b32.xlu1 %v10195_v5, %s13235_s1  ;;  %v10226_v23 = vld [vmem:[#allocation8 + $0x3a] sm:$0xf]  ;;  %v10206_v16 = vld [vmem:[#allocation8 + $0x8] sm:$0xf]  ;;  %v10211_v28 = vld [vmem:[#allocation8 + $0x40] sm:$0xf]  ;;  %v10462_v5 = vmul.f32 %v15475_v42, %v10387_v20 }
 0xf47   :  { %v10197_v24 = vld [vmem:[#allocation8 + $0x49] sm:$0xf]  ;;  %v10196_v15 = vld [vmem:[#allocation8 + $0x41] sm:$0xf]  ;;  %v10193_v25 = vld [vmem:[#allocation8 + $0x19] sm:$0xf] }
 0xf48   :  { %v10222_v18 = vld [vmem:[#allocation8 + $0xa] sm:$0xf]  ;;  %v10227_v14 = vld [vmem:[#allocation8 + $0x42] sm:$0xf]  ;;  %v10207_v13 = vld [vmem:[#allocation8 + $0x10] sm:$0xf] }
 0xf49   :  { %10335 = vrot.lane.b32.xlu0 %v10226_v23, %s13235_s1  ;;  %v10212_v56 = vld [vmem:[#allocation8 + $0x48] sm:$0xf]  ;;  %v10243_v46 = vld [vmem:[#allocation8 + $0x41] sm:$0xf]  ;;  %v10223_v7 = vld [vmem:[#allocation8 + $0x12] sm:$0xf] }
 0xf4a   :  { %10265 = vrot.lane.b32.xlu1 %v10191_v49, %s13235_s1  ;;  %v10244_v21 = vld [vmem:[#allocation8 + $0x49] sm:$0xf]  ;;  %v10192_v19 = vld [vmem:[#allocation8 + $0x11] sm:$0xf]  ;;  %v10240_v55 = vld [vmem:[#allocation8 + $0x19] sm:$0xf] }
 0xf4b   :  { %v10228_v58 = vld [vmem:[#allocation8 + $0x4a] sm:$0xf]  ;;  %v10208_v48 = vld [vmem:[#allocation8 + $0x18] sm:$0xf]  ;;  %v10213_v2 = vld [vmem:[#allocation8 + $0x50] sm:$0xf] }
 0xf4c   :  { %v10224_v32 = vld [vmem:[#allocation8 + $0x1a] sm:$0xf]  ;;  %v10229_v22 = vld [vmem:[#allocation8 + $0x52] sm:$0xf]  ;;  %v10209_v50 = vld [vmem:[#allocation8 + $0x20] sm:$0xf] }
 0xf4d   :  { %10295 = vrot.lane.b32.xlu0 %v10206_v16, %s13235_s1  ;;  %v10239_v52 = vld [vmem:[#allocation8 + $0x11] sm:$0xf]  ;;  %v10241_v57 = vld [vmem:[#allocation8 + $0x21] sm:$0xf]  ;;  %v10218_v8 = vld [vmem:[#allocation8 + $0x39] sm:$0xf] }
 0xf4e   :  { %10277 = vrot.lane.b32.xlu1 %v10197_v24, %s13235_s1  ;;  %v10225_v37 = vld [vmem:[#allocation8 + $0x22] sm:$0xf]  ;;  %v10245_v51 = vld [vmem:[#allocation8 + $0x51] sm:$0xf]  ;;  %v15488_v24 = vrot.slane %v10415_v35, %v10435_v60  ;;  %v10187_v26 = vld [vmem:[#allocation8 + $0x38] sm:$0xf] }
 0xf4f   :  { %v10247_v59 = vld [vmem:[#allocation8 + $0x12] sm:$0xf]  ;;  %v10249_v39 = vld [vmem:[#allocation8 + $0x22] sm:$0xf]  ;;  %v10203_v20 = vld [vmem:[#allocation8 + $0x3a] sm:$0xf] }
 0xf50   :  { %v10446_v44 = vmul.f32 %v15488_v24, %v10247_v59  ;;  %v10253_v47 = vld [vmem:[#allocation8 + $0x52] sm:$0xf]  ;;  %v10189_v59 = vld [vmem:[#allocation8 + $0x48] sm:$0xf] }
 0xf51   :  { %10327 = vrot.lane.b32.xlu0 %v10222_v18, %s13235_s1  ;;  %v10251_v18 = vld [vmem:[#allocation8 + $0x42] sm:$0xf] }
 0xf52   :  { %10305 = vrot.lane.b32.xlu1 %v10211_v28, %s13235_s1  ;;  %v10248_v28 = vld [vmem:[#allocation8 + $0x1a] sm:$0xf] }
 0xf55   :  { %10275 = vrot.lane.b32.xlu0 %v10196_v15, %s13235_s1  ;;  %v10442_v15 = vmul.f32 %v15475_v42, %v10383_v1 }
 0xf56   :  { %10337 = vrot.lane.b32.xlu1 %v10227_v14, %s13235_s1  ;;  %v10460_v14 = vmul.f32 %v15477_v43, %v10410_v11 }
 0xf59   :  { %10307 = vrot.lane.b32.xlu0 %v10212_v56, %s13235_s1 }
 0xf5a   :  { %10369 = vrot.lane.b32.xlu1 %v10244_v21, %s13235_s1  ;;  %v10183_v21 = vld [vmem:[#allocation8 + $0x8] sm:$0xf] }
 0xf5d   :  { %10339 = vrot.lane.b32.xlu0 %v10228_v58, %s13235_s1  ;;  %v10526_v58 = vsel %vm7795_vm3, %v10462_v5, 0.0 }
 0xf5e   :  { %10269 = vrot.lane.b32.xlu1 %v10193_v25, %s13235_s1 }
 0xf61   :  { %10367 = vrot.lane.b32.xlu0 %v10243_v46, %s13235_s1  ;;  %v10199_v46 = vld [vmem:[#allocation8 + $0xa] sm:$0xf] }
 0xf62   :  { %10297 = vrot.lane.b32.xlu1 %v10207_v13, %s13235_s1 }
 0xf65   :  { %10267 = vrot.lane.b32.xlu0 %v10192_v19, %s13235_s1 }
 0xf66   :  { %10329 = vrot.lane.b32.xlu1 %v10223_v7, %s13235_s1  ;;  %v10235_v7 = vld [vmem:[#allocation8 + $0x40] sm:$0xf] }
 0xf69   :  { %10299 = vrot.lane.b32.xlu0 %v10208_v48, %s13235_s1  ;;  %v10451_v48 = vmul.f32 %v15488_v24, %v10248_v28 }
 0xf6a   :  { %10361 = vrot.lane.b32.xlu1 %v10240_v55, %s13235_s1  ;;  %v10466_v55 = vmul.f32 %v15488_v24, %v10251_v18  ;;  %v15530_v18 = vmul.f32 %v15488_v24, %v10249_v39 }
 0xf6b   :  { %v15514_v0 = vsel %vm3499_vm1, %v10451_v48, 0.0  ;;  %v10236_v48 = vld [vmem:[#allocation8 + $0x48] sm:$0xf] }
 0xf6c   :  { %v10533_v35 = vsel %vm3499_vm1, %v10466_v55, 0.0  ;;  %v10188_v55 = vld [vmem:[#allocation8 + $0x40] sm:$0xf] }
 0xf6d   :  { %10331 = vrot.lane.b32.xlu0 %v10224_v32, %s13235_s1 }
 0xf6e   :  { %10309 = vrot.lane.b32.xlu1 %v10213_v2, %s13235_s1 }
 0xf71   :  { %10359 = vrot.lane.b32.xlu0 %v10239_v52, %s13235_s1 }
 0xf72   :  { %10341 = vrot.lane.b32.xlu1 %v10229_v22, %s13235_s1 }
 0xf75   :  { %10363 = vrot.lane.b32.xlu0 %v10241_v57, %s13235_s1  ;;  %v15504_v57 = vsel %vm7795_vm3, %v10460_v14, 0.0 }
 0xf76   :  { %10301 = vrot.lane.b32.xlu1 %v10209_v50, %s13235_s1  ;;  %v15501_v50 = vsel %vm7795_vm3, %v10442_v15, 0.0  ;;  %v10219_v15 = vld [vmem:[#allocation8 + $0x41] sm:$0xf] }
 0xf79   :  { %10371 = vrot.lane.b32.xlu0 %v10245_v51, %s13235_s1 }
 0xf7a   :  { %10333 = vrot.lane.b32.xlu1 %v10225_v37, %s13235_s1  ;;  %v10198_v37 = vld [vmem:[#allocation8 + $0x2] sm:$0xf] }
 0xf7e   :  { %10373 = vrot.lane.b32.xlu1 %v10246_v33, %s13235_s1  ;;  %s13250_s1 = smov [#allocation18]  }
 0xf7f   :  { %s10608_s28 = sshll.u32 %s13250_s1, 4  ;;  %s10609_s28 = int_to_ptr.vmem [resolvable:$true] %s10608_s28 }
 0xf80   :  { %s13173_s2 = scalar_lea.vmem %s10609_s28, 32  ;;  %p13178_p5 = scmp.lt.s32.totalorder %s10609_s28, %s10609_s28 }
 0xf81   :  { %p13174_p4 = scmp.ne.s32.totalorder %s10609_s28, %s13173_s2  ;;  %p13179_p6 = scmp.lt.s32.totalorder %s13173_s2, %s13173_s2 }
 0xf83   :  { %p13180_p7 = por %p13179_p6, %p13178_p5 }
 0xf85   :  { %p13181_p8 = pnand %p13180_p7, %p13174_p4 }
 0xfb7   :  { %v10304_v40 = vpop.permute.xlu0 %10303 }
 0xfb8   :  { %v15445_v34 = vpop.permute.xlu1 %10273  ;;  %v10395_v4 = vsel %vm1258_vm8, %v10202_v29, %v10304_v40  ;;  %v10215_v40 = vld [vmem:[#allocation8 + $0x11] sm:$0xf] }
 0xfb9   :  { %v10463_v10 = vmul.f32 %v15463_v45, %v10395_v4  ;;  %v10388_v6 = vsel %vm1258_vm8, %v10187_v26, %v15445_v34 }
 0xfbb   :  { %v10336_v63 = vpop.permute.xlu0 %10335  ;;  %v10527_v56 = vsel %vm7795_vm3, %v10463_v10, 0.0 }
 0xfbc   :  { %v10266_v3 = vpop.permute.xlu1 %10265  ;;  %v10403_v17 = vsel %vm1258_vm8, %v10218_v8, %v10336_v63  ;;  %v10528_v2 = vadd.f32 %v10527_v56, %v10526_v58  ;;  %v10232_v56 = vld [vmem:[#allocation8 + $0x18] sm:$0xf] }
 0xfbd   :  { %v10464_v23 = vmul.f32 %v15467_v61, %v10403_v17  ;;  %v10384_v32 = vsel %vm1258_vm8, %v10183_v21, %v10266_v3  ;;  %v10252_v3 = vld [vmem:[#allocation8 + $0x4a] sm:$0xf] }
 0xfbe   :  { %v10447_v63 = vmul.f32 %v15475_v42, %v10384_v32  ;;  %v10214_v17 = vld [vmem:[#allocation8 + $0x9] sm:$0xf]  ;;  %v10471_v11 = vmul.f32 %v15488_v24, %v10252_v3  ;;  %v15546_v32 = vsel %vm3499_vm1, %v10446_v44, 0.0  ;;  %v10200_v3 = vld [vmem:[#allocation8 + $0x12] sm:$0xf] }
 0xfbf   :  { %v15449_v36 = vpop.permute.xlu0 %10295  ;;  %v10529_v25 = vsel %vm7795_vm3, %v10464_v23, 0.0  ;;  %v10216_v44 = vld [vmem:[#allocation8 + $0x19] sm:$0xf] }
 0xfc0   :  { %v15447_v38 = vpop.permute.xlu1 %10277  ;;  %v10530_v31 = vadd.f32 %v10529_v25, %v10528_v2  ;;  %v10391_v8 = vsel %vm1258_vm8, %v10198_v37, %v15449_v36  ;;  %v10467_v36 = vmul.f32 %v15475_v42, %v10388_v6  ;;  %v10493_v28 = vsel %vm7795_vm3, %v10447_v63, 0.0 }
 0xfc1   :  { %v15536_v25 = vmul.f32 %v15488_v24, %v10253_v47 }
 0xfc3   :  { %v15453_v27 = vpop.permute.xlu0 %10327 }
 0xfc4   :  { %v15451_v12 = vpop.permute.xlu1 %10305  ;;  %v10399_v5 = vsel %vm1258_vm8, %v10214_v17, %v15453_v27 }
 0xfc5   :  { %v10396_v34 = vsel %vm1258_vm8, %v10203_v20, %v15451_v12  ;;  %v10443_v12 = vmul.f32 %v15463_v45, %v10391_v8  ;;  %v10185_v8 = vld [vmem:[#allocation8 + $0x18] sm:$0xf] }
 0xfc7   :  { %v15459_v30 = vpop.permute.xlu0 %10275 }
 0xfc8   :  { %v15457_v62 = vpop.permute.xlu1 %10337 }
 0xfc9   :  { %v10404_v27 = vsel %vm1258_vm8, %v10219_v15, %v15457_v62 }
 0xfca   :  { %v10469_v26 = vmul.f32 %v15467_v61, %v10404_v27 }
 0xfcb   :  { %v15471_v41 = vpop.permute.xlu0 %10307 }
 0xfcc   :  { %v15469_v9 = vpop.permute.xlu1 %10369 }
 0xfcd   :  { %v10412_v62 = vsel %vm1258_vm8, %v10236_v48, %v15469_v9  ;;  %v10390_v9 = vsel %vm1258_vm8, %v10189_v59, %v15447_v38  ;;  %v10201_v48 = vld [vmem:[#allocation8 + $0x1a] sm:$0xf] }
 0xfcf   :  { %v15486_v16 = vpop.permute.xlu0 %10339 }
 0xfd0   :  { %v15484_v49 = vpop.permute.xlu1 %10269 }
 0xfd3   :  { %v10368_v19 = vpop.permute.xlu0 %10367 }
 0xfd4   :  { %v10298_v13 = vpop.permute.xlu1 %10297  ;;  %v10411_v52 = vsel %vm1258_vm8, %v10235_v7, %v10368_v19  ;;  %v10468_v7 = vmul.f32 %v15463_v45, %v10396_v34  ;;  %v10444_v19 = vmul.f32 %v15467_v61, %v10399_v5  ;;  %v10220_v34 = vld [vmem:[#allocation8 + $0x49] sm:$0xf] }
 0xfd5   :  { %v10392_v22 = vsel %vm1258_vm8, %v10199_v46, %v10298_v13  ;;  %v10465_v33 = vmul.f32 %v15477_v43, %v10411_v52  ;;  %v10204_v52 = vld [vmem:[#allocation8 + $0x42] sm:$0xf] }
 0xfd6   :  { %v10448_v51 = vmul.f32 %v15463_v45, %v10392_v22  ;;  %v10389_v22 = vsel %vm1258_vm8, %v10188_v55, %v15459_v30  ;;  %v10538_v39 = vsel %vm7795_vm3, %v10468_v7, 0.0  ;;  %v10485_v6 = vsel %vm7795_vm3, %v10444_v19, 0.0 }
 0xfd7   :  { %v10531_v53 = vsel %vm7795_vm3, %v10465_v33, 0.0  ;;  %v15510_v54 = vpop.permute.xlu0 %10267  ;;  %v10537_v33 = vsel %vm7795_vm3, %v10467_v36, 0.0  ;;  %v10231_v36 = vld [vmem:[#allocation8 + $0x10] sm:$0xf] }
 0xfd8   :  { %v10330_v29 = vpop.permute.xlu1 %10329  ;;  %v10532_v4 = vadd.f32 %v10531_v53, %v10530_v31  ;;  %v10494_v10 = vsel %vm7795_vm3, %v10448_v51, 0.0  ;;  %v15553_v51 = vsel %vm3499_vm1, %v10471_v11, 0.0  ;;  %v10397_v31 = vsel %vm1258_vm8, %v10204_v52, %v15471_v41 }
 0xfd9   :  { %v10400_v60 = vsel %vm1258_vm8, %v10215_v40, %v10330_v29  ;;  %v10495_v46 = vadd.f32 %v10494_v10, %v10493_v28  ;;  %v10483_v53 = vsel %vm7795_vm3, %v10443_v12, 0.0  ;;  %v10470_v41 = vmul.f32 %v15477_v43, %v10412_v62 }
 0xfda   :  { %v10449_v1 = vmul.f32 %v15467_v61, %v10400_v60  ;;  %v10534_v23 = vadd.f32 %v10533_v35, %v10532_v4  ;;  %v10472_v4 = vmul.f32 %v15475_v42, %v10389_v22  ;;  %v10184_v60 = vld [vmem:[#allocation8 + $0x10] sm:$0xf]  ;;  %v10473_v47 = vmul.f32 %v15463_v45, %v10397_v31  ;;  %v10233_v22 = vld [vmem:[#allocation8 + $0x20] sm:$0xf] }
 0xfdb   :  { %v10300_v58 = vpop.permute.xlu0 %10299  ;;  %v10385_v38 = vsel %vm1258_vm8, %v10184_v60, %v15510_v54  ;;  %v15574_v10 = vmul.f32 %v15475_v42, %v10390_v9  ;;  %v10540_v11 = vsel %vm7795_vm3, %v10469_v26, 0.0  ;;  %v10539_v15 = vadd.f32 %v10538_v39, %v10537_v33  ;;  %v10221_v31 = vld [vmem:[#allocation8 + $0x51] sm:$0xf] }
 0xfdc   :  { %v10496_v14 = vsel %vm7795_vm3, %v10449_v1, 0.0  ;;  %v10362_v21 = vpop.permute.xlu1 %10361  ;;  %10535 = vadd.xlane.f32.xlu1 %v10534_v23  ;;  %v10393_v35 = vsel %vm1258_vm8, %v10200_v3, %v10300_v58  ;;  %v10484_v1 = vadd.f32 %v10483_v53, %v15501_v50  ;;  %v10386_v54 = vsel %vm1258_vm8, %v10185_v8, %v15484_v49  ;;  %v10237_v60 = vld [vmem:[#allocation8 + $0x50] sm:$0xf] }
 0xfdd   :  { %v10408_v13 = vsel %vm1258_vm8, %v10232_v56, %v10362_v21  ;;  %v10497_v37 = vadd.f32 %v10496_v14, %v10495_v46  ;;  %v10453_v5 = vmul.f32 %v15463_v45, %v10393_v35  ;;  %v10452_v50 = vmul.f32 %v15475_v42, %v10385_v38 }
 0xfde   :  { %v10450_v2 = vmul.f32 %v15477_v43, %v10408_v13  ;;  %v10486_v56 = vadd.f32 %v10485_v6, %v10484_v1  ;;  %v10541_v12 = vadd.f32 %v10540_v11, %v10539_v15  ;;  %v10548_v27 = vsel %vm7795_vm3, %v10472_v4, 0.0  ;;  %v10205_v13 = vld [vmem:[#allocation8 + $0x4a] sm:$0xf] }
 0xfdf   :  { %v10332_v63 = vpop.permute.xlu0 %10331  ;;  %v10542_v46 = vsel %vm7795_vm3, %v10470_v41, 0.0  ;;  %v10549_v49 = vsel %vm7795_vm3, %v10473_v47, 0.0  ;;  %v10505_v19 = vsel %vm7795_vm3, %v10453_v5, 0.0  ;;  %v10504_v26 = vsel %vm7795_vm3, %v10452_v50, 0.0 }
 0xfe0   :  { %v10498_v40 = vsel %vm7795_vm3, %v10450_v2, 0.0  ;;  %v10310_v30 = vpop.permute.xlu1 %10309  ;;  %v10401_v20 = vsel %vm1258_vm8, %v10216_v44, %v10332_v63  ;;  %v10543_v63 = vadd.f32 %v10542_v46, %v10541_v12  ;;  %v10506_v9 = vadd.f32 %v10505_v19, %v10504_v26  ;;  %v10254_v12 = vld [vmem:[#allocation8 + $0x5a] sm:$0xf] }
 0xfe1   :  { %v10499_v29 = vadd.f32 %v10498_v40, %v10497_v37  ;;  %v10454_v21 = vmul.f32 %v15467_v61, %v10401_v20  ;;  %v10398_v52 = vsel %vm1258_vm8, %v10205_v13, %v10310_v30  ;;  %v10550_v47 = vadd.f32 %v10549_v49, %v10548_v27 }
 0xfe2   :  { %v10478_v39 = vmul.f32 %v15463_v45, %v10398_v52  ;;  %v10555_v49 = vsel %vm3499_vm1, %v15536_v25, 0.0 }
 0xfe3   :  { %v10501_v17 = vadd.f32 %v15514_v0, %v10499_v29  ;;  %v10360_v28 = vpop.permute.xlu0 %10359  ;;  %v10405_v0 = vsel %vm1258_vm8, %v10220_v34, %v15486_v16  ;;  %v10457_v16 = vmul.f32 %v15475_v42, %v10386_v54  ;;  %v10507_v42 = vsel %vm7795_vm3, %v10454_v21, 0.0  ;;  %v10217_v29 = vld [vmem:[#allocation8 + $0x21] sm:$0xf]  ;;  %v10238_v34 = vld [vmem:[#allocation8 + $0x58] sm:$0xf] }
 0xfe4   :  { %v10342_v23 = vpop.permute.xlu1 %10341  ;;  %v10407_v14 = vsel %vm1258_vm8, %v10231_v36, %v10360_v28  ;;  %v10474_v7 = vmul.f32 %v15467_v61, %v10405_v0  ;;  %v10508_v8 = vadd.f32 %v10507_v42, %v10506_v9  ;;  %v10545_v28 = vadd.f32 %v15553_v51, %v10543_v63 }
 0xfe5   :  { %10502 = vadd.xlane.f32.xlu1 %v10501_v17  ;;  %v10445_v58 = vmul.f32 %v15477_v43, %v10407_v14  ;;  %v10406_v53 = vsel %vm1258_vm8, %v10221_v31, %v10342_v23  ;;  %v10250_v17 = vld [vmem:[#allocation8 + $0x2a] sm:$0xf]  ;;  %v10560_v15 = vsel %vm7795_vm3, %v10478_v39, 0.0  ;;  %v10559_v51 = vsel %vm7795_vm3, %v15574_v10, 0.0 }
 0xfe6   :  { %v10551_v35 = vsel %vm7795_vm3, %v10474_v7, 0.0  ;;  %v10479_v1 = vmul.f32 %v15467_v61, %v10406_v53  ;;  %v10561_v13 = vadd.f32 %v10560_v15, %v10559_v51 }
 0xfe7   :  { %v10487_v55 = vsel %vm7795_vm3, %v10445_v58, 0.0  ;;  %v10364_v62 = vpop.permute.xlu0 %10363  ;;  %v10552_v5 = vadd.f32 %v10551_v35, %v10550_v47  ;;  %v10511_v58 = vsel %vm3499_vm1, %v15530_v18, 0.0 }
 0xfe8   :  { %v10302_v2 = vpop.permute.xlu1 %10301  ;;  %v10488_v37 = vadd.f32 %v10487_v55, %v10486_v56  ;;  %v10409_v59 = vsel %vm1258_vm8, %v10233_v22, %v10364_v62  ;;  %v10461_v56 = vmul.f32 %v15488_v24, %v10250_v17  ;;  %v10562_v27 = vsel %vm7795_vm3, %v10479_v1, 0.0 }
 0xfe9   :  { %v10394_v33 = vsel %vm1258_vm8, %v10201_v48, %v10302_v2  ;;  %v10455_v3 = vmul.f32 %v15477_v43, %v10409_v59  ;;  %v10481_v48 = vmul.f32 %v15488_v24, %v10254_v12  ;;  %v10563_v2 = vadd.f32 %v10562_v27, %v10561_v13 }
 0xfea   :  { %v10458_v40 = vmul.f32 %v15463_v45, %v10394_v33  ;;  %v10490_v30 = vadd.f32 %v15546_v32, %v10488_v37  ;;  %v10515_v32 = vsel %vm7795_vm3, %v10457_v16, 0.0  ;;  %v10522_v18 = vsel %vm3499_vm1, %v10461_v56, 0.0 }
 0xfeb   :  { %v10509_v4 = vsel %vm7795_vm3, %v10455_v3, 0.0  ;;  %v10372_v44 = vpop.permute.xlu0 %10371 }
 0xfec   :  { %v10516_v6 = vsel %vm7795_vm3, %v10458_v40, 0.0  ;;  %v10334_v41 = vpop.permute.xlu1 %10333  ;;  %v10413_v20 = vsel %vm1258_vm8, %v10237_v60, %v10372_v44  ;;  %10491 = vadd.xlane.f32.xlu0 %v10490_v30  ;;  %v10510_v36 = vadd.f32 %v10509_v4, %v10508_v8 }
 0xfed   :  { %v10402_v38 = vsel %vm1258_vm8, %v10217_v29, %v10334_v41  ;;  %v10475_v11 = vmul.f32 %v15477_v43, %v10413_v20  ;;  %v10517_v23 = vadd.f32 %v10516_v6, %v10515_v32 }
 0xfee   :  { %v10459_v45 = vmul.f32 %v15467_v61, %v10402_v38  ;;  %v10512_v16 = vadd.f32 %v10511_v58, %v10510_v36 }
 0xfef   :  { %v10553_v0 = vsel %vm7795_vm3, %v10475_v11, 0.0 }
 0xff0   :  { %v10518_v54 = vsel %vm7795_vm3, %v10459_v45, 0.0  ;;  %v10374_v14 = vpop.permute.xlu1 %10373  ;;  %v10554_v21 = vadd.f32 %v10553_v0, %v10552_v5  ;;  %10546 = vadd.xlane.f32.xlu0 %v10545_v28 }
 0xff1   :  { %v10519_v50 = vadd.f32 %v10518_v54, %v10517_v23  ;;  %v10414_v61 = vsel %vm1258_vm8, %v10238_v34, %v10374_v14 }
 0xff2   :  { %v10480_v46 = vmul.f32 %v15477_v43, %v10414_v61  ;;  %v10556_v7 = vadd.f32 %v10555_v49, %v10554_v21  ;;  %v10566_v43 = vsel %vm3499_vm1, %v10481_v48, 0.0 }
 0xff3   :  { %v10521_v19 = vadd.f32 %v15504_v57, %v10519_v50 }
 0xff4   :  { %v10564_v55 = vsel %vm7795_vm3, %v10480_v46, 0.0  ;;  %10513 = vadd.xlane.f32.xlu0 %v10512_v16  ;;  %10557 = vadd.xlane.f32.xlu1 %v10556_v7 }
 0xff5   :  { %v10565_v10 = vadd.f32 %v10564_v55, %v10563_v2  ;;  %v10523_v22 = vadd.f32 %v10522_v18, %v10521_v19 }
 0xff7   :  { %v10567_v25 = vadd.f32 %v10566_v43, %v10565_v10 }
 0xff8   :  { %10524 = vadd.xlane.f32.xlu0 %v10523_v22 }
 0xffc   :  { %10568 = vadd.xlane.f32.xlu0 %v10567_v25 }
 0xffd   :  { %13184 = shalt.err (!%p13181_p8)
}
 0xffe   :  { %s13185_s10 = scalar_lea.hbm %s13402_s6, 32 }
 0xfff   :  { %p13186_p9 = scmp.ne.s32.totalorder %s13402_s6, %s13185_s10  ;;  %p13189_p10 = scmp.lt.u32.totalorder %s13185_s10, %s13402_s6 }
0x1001   :  { %p13191_p11 = pnand %p13189_p10, %p13186_p9 }
0x1003   :  { %13194 = shalt.err (!%p13191_p11)
}
0x1004   :  { %10611 = dma.vmem_to_hbm [thread:$0]  %s10609_s28, 32, %s13402_s6, [#allocation12]   ;;  %v11358_v24 = vld [vmem:[#allocation9] ss:$0 sm:$0xff]  ;;  %vm10593_vm6 = vcmask 3072  }
0x1069   :  { %v10536_v57 = vpop.xlane.xlu1 %10535 }
0x106a   :  { %v10581_v62 = vadd.f32 %v11358_v24, %v10536_v57 }
0x106c   :  { %v10589_v52 = vmax.f32 %v10581_v62, 0.0 }
0x106e   :  { %10598 = vst.msk [vmem:[%s13407_s12 + $0x10] sm:$0xf] %vm10593_vm6, %v10589_v52 }
0x1072   :  { %v10503_v37 = vpop.xlane.xlu1 %10502 }
0x1073   :  { %v10578_v33 = vadd.f32 %v11358_v24, %v10503_v37 }
0x1075   :  { %v10586_v59 = vmax.f32 %v10578_v33, 0.0 }
0x1077   :  { %10595 = vst.msk [vmem:[%s13407_s12 + $0x4] sm:$0xf] %vm10593_vm6, %v10586_v59 }
0x1079   :  { %v10492_v26 = vpop.xlane.xlu0 %10491 }
0x107a   :  { %v10577_v42 = vadd.f32 %v11358_v24, %v10492_v26 }
0x107c   :  { %v10585_v31 = vmax.f32 %v10577_v42, 0.0 }
0x107d   :  { %v10547_v40 = vpop.xlane.xlu0 %10546 }
0x107e   :  { %10594 = vst.msk [vmem:[%s13407_s12] sm:$0xf] %vm10593_vm6, %v10585_v31  ;;  %v10582_v3 = vadd.f32 %v11358_v24, %v10547_v40 }
0x1080   :  { %v10590_v63 = vmax.f32 %v10582_v3, 0.0 }
0x1081   :  { %v10558_v9 = vpop.xlane.xlu1 %10557  ;;  %v10514_v53 = vpop.xlane.xlu0 %10513 }
0x1082   :  { %10599 = vst.msk [vmem:[%s13407_s12 + $0x14] sm:$0xf] %vm10593_vm6, %v10590_v63  ;;  %v10583_v29 = vadd.f32 %v11358_v24, %v10558_v9  ;;  %v10579_v30 = vadd.f32 %v11358_v24, %v10514_v53 }
0x1084   :  { %v10591_v35 = vmax.f32 %v10583_v29, 0.0  ;;  %v10587_v39 = vmax.f32 %v10579_v30, 0.0 }
0x1085   :  { %v10525_v6 = vpop.xlane.xlu0 %10524 }
0x1086   :  { %10600 = vst.msk [vmem:[%s13407_s12 + $0x18] sm:$0xf] %vm10593_vm6, %v10591_v35  ;;  %10596 = vst.msk [vmem:[%s13407_s12 + $0x8] sm:$0xf] %vm10593_vm6, %v10587_v39  ;;  %v10580_v4 = vadd.f32 %v11358_v24, %v10525_v6 }
0x1088   :  { %v10588_v41 = vmax.f32 %v10580_v4, 0.0 }
0x1089   :  { %v10569_v60 = vpop.xlane.xlu0 %10568 }
0x108a   :  { %10597 = vst.msk [vmem:[%s13407_s12 + $0xc] sm:$0xf] %vm10593_vm6, %v10588_v41  ;;  %v10584_v44 = vadd.f32 %v11358_v24, %v10569_v60 }
0x108c   :  { %v10592_v47 = vmax.f32 %v10584_v44, 0.0 }
0x108e   :  { %10601 = vst.msk [vmem:[%s13407_s12 + $0x1c] sm:$0xf] %vm10593_vm6, %v10592_v47 }
0x108f   :  { %13201 = dma.done.wait [#allocation12], 32  }
0x1090   :  { %13202 = vsyncadd [#allocation12], 4294967264 }
0x1091   :  { %10619 = vsyncpa [#allocation11], 1 }
0x1092   :  { %10620 = vsyncpa [#allocation14], 1 }
0x1093   :  { %10621 = vsyncpa [#allocation17], 1 }
0x1094   :  { %10622 = vsyncpa [#allocation12], 1 }

</bundles_post_ra>
